<compile_context>
chip_gen: v7x
topology: tpu7x:2x2x1
jax: 0.10.0
libtpu: 0.0.40
codegen_flags: <defaults>
</compile_context>

<pallas_src>
import math
from functools import partial

import jax
import jax.numpy as jnp
from jax.experimental import pallas as pl
from jax.experimental.pallas import tpu as pltpu

EPS_LN = 1e-5            # PyTorch nn.LayerNorm default eps
NEG_INF = -1.0e9         # masked_fill value used by the reference module


# ----------------------------------------------------------------------------
# In-kernel helpers
# ----------------------------------------------------------------------------
def _layernorm(z):
    mu = jnp.mean(z, axis=-1, keepdims=True)
    var = jnp.mean((z - mu) ** 2, axis=-1, keepdims=True)
    return (z - mu) * jax.lax.rsqrt(var + EPS_LN)


def _erf(x):
    # Abramowitz & Stegun 7.1.26 rational approximation (|err| < 1.5e-7).
    # TODO(synk): Mosaic has no direct erf lowering; exact-GELU uses this fp32 approx.
    a1, a2, a3, a4, a5 = 0.254829592, -0.284496736, 1.421413741, -1.453152027, 1.061405429
    p = 0.3275911
    sgn = jnp.where(x >= 0.0, 1.0, -1.0)
    ax = jnp.abs(x)
    t = 1.0 / (1.0 + p * ax)
    poly = ((((a5 * t + a4) * t + a3) * t + a2) * t + a1) * t
    return sgn * (1.0 - poly * jnp.exp(-ax * ax))


def _gelu(x):
    # PyTorch nn.GELU() default (exact, erf-based)
    return 0.5 * x * (1.0 + _erf(x * (1.0 / math.sqrt(2.0))))


def _bdot(a, b):
    # bf16 MXU operands, f32 accumulation.
    return jnp.dot(a.astype(jnp.bfloat16), b.astype(jnp.bfloat16),
                   preferred_element_type=jnp.float32)


def _mha(q, k, v, key_keep, num_heads):
    """Per-head attention (static Python loop over heads).

    q: (Lq, Dh) already scaled by 1/sqrt(hd); k, v: (Lk, Dh); key_keep: (1, Lk) bool.
    Returns (Lq, Dh) context with heads merged back along the feature axis.
    """
    Dh = q.shape[1]
    hd = Dh // num_heads
    qb = q.astype(jnp.bfloat16)
    kb = k.astype(jnp.bfloat16)
    vb = v.astype(jnp.bfloat16)

    outs = []
    for h in range(num_heads):
        sl = slice(h * hd, (h + 1) * hd)
        # NT matmul: contract last dims of both operands — no explicit transpose.
        s = jax.lax.dot_general(qb[:, sl], kb[:, sl], (((1,), (1,)), ((), ())),
                                preferred_element_type=jnp.float32)        # (Lq, Lk)
        s = jnp.where(key_keep, s, NEG_INF)            # same -1e9 as torch masked_fill
        s = s - jnp.max(s, axis=-1, keepdims=True)     # stable softmax
        p = jnp.exp(s)
        p = p * pl.reciprocal(jnp.sum(p, axis=-1, keepdims=True), approx=True)
        outs.append(jnp.dot(p.astype(jnp.bfloat16), vb[:, sl],
                            preferred_element_type=jnp.float32))           # (Lq, hd)
    return jnp.concatenate(outs, axis=1)               # (Lq, Dh)


def _compressor_block(x, key_keep, refs, num_heads):
    """SimpleCompressor forward on one batch element; x: (Lv, D)."""
    (qs_ref, query_ref, wkv_ref, bkv_ref, wo_ref, bo_ref, ng_ref, nb_ref,
     w1_ref, b1_ref, w2_ref, b2_ref, fg_ref, fb_ref) = refs
    D = wo_ref.shape[1]

    kv = _bdot(x, wkv_ref[...]) + bkv_ref[...]          # (Lv, 2D) — one lane-dense matmul
    k = kv[:, :D]
    v = kv[:, D:]

    q = qs_ref[0]                                       # (L, D) pre-projected & pre-scaled
    ctx = _mha(q, k, v, key_keep, num_heads)            # (L, D)
    attn = _bdot(ctx, wo_ref[...]) + bo_ref[...]

    xx = _layernorm(query_ref[0] + attn) * ng_ref[...] + nb_ref[...]
    h = jnp.maximum(_bdot(xx, w1_ref[...]) + b1_ref[...], 0.0)
    ff = _bdot(h, w2_ref[...]) + b2_ref[...]
    return _layernorm(xx + ff) * fg_ref[...] + fb_ref[...]


# ----------------------------------------------------------------------------
# Fully-fused kernel: TGVA + direct compressor + enhanced compressor + gates + norm
# ----------------------------------------------------------------------------
def _fused_kernel(fv_ref, ft_ref, tmask_ref, vmc_ref, vmr_ref, *rest, num_heads):
    o_ref = rest[-1]
    w = rest[:-1]
    (tg_wq, tg_bq, tg_wkv, tg_bkv, tg_wo, tg_bo, tg_ng, tg_nb,
     tg_w1, tg_b1, tg_w2, tg_b2, tg_fg, tg_fb) = w[0:14]
    dc = w[14:28]
    ec = w[28:42]
    (dg_w1, dg_b1, dg_w2, dg_b2, eg_w1, eg_b1, eg_w2, eg_b2) = w[42:50]

    fv = fv_ref[0]                     # (Lv, v_dim)
    ft = ft_ref[0]                     # (Lt, t_dim)
    tkeep = tmask_ref[0] > 0.5         # (1, Lt) text key mask
    vkeep = vmr_ref[0] > 0.5           # (1, Lv) video key mask
    hidden = tg_wq.shape[1]

    # ---- TextGuidedVideoAttention (1/sqrt(hd) folded into Wq/bq at prep time) ----
    q = _bdot(fv, tg_wq[...]) + tg_bq[...]
    kv = _bdot(ft, tg_wkv[...]) + tg_bkv[...]
    k = kv[:, :hidden]
    v = kv[:, hidden:]
    ctx = _mha(q, k, v, tkeep, num_heads)                       # (Lv, hidden)
    attn = _bdot(ctx, tg_wo[...]) + tg_bo[...]
    x = _layernorm(fv + attn) * tg_ng[...] + tg_nb[...]
    h = jnp.maximum(_bdot(x, tg_w1[...]) + tg_b1[...], 0.0)
    ff = _bdot(h, tg_w2[...]) + tg_b2[...]
    fv_enh = (_layernorm(x + ff) * tg_fg[...] + tg_fb[...]) * vmc_ref[0]   # (Lv, v_dim)

    # ---- the two SimpleCompressors (intermediates never leave VMEM) ----
    comp_d = _compressor_block(fv, vkeep, dc, num_heads)        # (L, D)
    comp_e = _compressor_block(fv_enh, vkeep, ec, num_heads)    # (L, D)

    # ---- gates + final affine-free LayerNorm ----
    def gate(xc, w1, b1, w2row, b2):
        xm = jnp.mean(xc, axis=0, keepdims=True)                             # (1, D)
        hh = _gelu(_bdot(xm, w1[...]) + b1[...])                             # (1, 2H)
        g = jnp.sum(hh * w2row[...], axis=-1, keepdims=True) + b2[...]       # (1, 1)
        return _gelu(jnp.tanh(g))                                            # (1, 1)

    gd = gate(comp_d, dg_w1, dg_b1, dg_w2, dg_b2)
    gt = gate(comp_e, eg_w1, eg_b1, eg_w2, eg_b2)
    o_ref[0] = _layernorm(gd * comp_d + gt * comp_e)


# ----------------------------------------------------------------------------
# One-time weight preprocessing (run OUTSIDE jit): scale-fold, KV concat, bf16 cast,
# hoisted batch-invariant compressor Q projection.
# ----------------------------------------------------------------------------
def prepare_weights(params, num_heads):
    bf16 = jnp.bfloat16

    def row(x):
        return x.reshape(1, -1)

    p = params["tgva"]
    hidden = p["v_proj_w"].shape[1]
    tg_scale = 1.0 / math.sqrt(hidden // num_heads)
    tgva = [
        (p["v_proj_w"] * tg_scale).astype(bf16), row(p["v_proj_b"] * tg_scale),
        jnp.concatenate([p["t_key_w"], p["t_val_w"]], axis=1).astype(bf16),
        row(jnp.concatenate([p["t_key_b"], p["t_val_b"]])),
        p["out_w"].astype(bf16), row(p["out_b"]),
        row(p["norm_g"]), row(p["norm_b"]),
        p["ff1_w"].astype(bf16), row(p["ff1_b"]),
        p["ff2_w"].astype(bf16), row(p["ff2_b"]),
        row(p["fnorm_g"]), row(p["fnorm_b"]),
    ]

    def comp(cp):
        D = cp["q_w"].shape[0]
        c_scale = 1.0 / math.sqrt(D // num_heads)
        q_scaled = (jnp.dot(cp["query"][0], cp["q_w"]) + cp["q_b"]) * c_scale   # (L, D)
        return [
            q_scaled[None],                       # pre-projected, pre-scaled query
            cp["query"],                          # raw query for the residual
            jnp.concatenate([cp["k_w"], cp["v_w"]], axis=1).astype(bf16),
            row(jnp.concatenate([cp["k_b"], cp["v_b"]])),
            cp["out_w"].astype(bf16), row(cp["out_b"]),
            row(cp["norm_g"]), row(cp["norm_b"]),
            cp["ff1_w"].astype(bf16), row(cp["ff1_b"]),
            cp["ff2_w"].astype(bf16), row(cp["ff2_b"]),
            row(cp["fnorm_g"]), row(cp["fnorm_b"]),
        ]

    gates = [
        params["dgate_w1"].astype(bf16), row(params["dgate_b1"]),
        row(params["dgate_w2"]), params["dgate_b2"].reshape(1, 1),
        params["tgate_w1"].astype(bf16), row(params["tgate_b1"]),
        row(params["tgate_w2"]), params["tgate_b2"].reshape(1, 1),
    ]
    return tuple(tgva + comp(params["dir_comp"]) + comp(params["enh_comp"]) + gates)


# ----------------------------------------------------------------------------
# pallas_call wrapper (grid over batch, "parallel" for megacore)
# ----------------------------------------------------------------------------
def _bcast_spec(shape):
    n = len(shape)
    return pl.BlockSpec(shape, lambda b: (0,) * n)      # grid-invariant: DMA'd once


def text_guided_compressor(prep_weights, Ft, Fv, vid_mask=None, text_mask=None, num_heads=8):
    f32 = jnp.float32
    Fv = Fv.astype(f32)
    Ft = Ft.astype(f32)
    B, Lv, v_dim = Fv.shape
    _, Lt, t_dim = Ft.shape
    L = prep_weights[14].shape[1]     # dir_comp pre-projected query (1, L, D)
    D = v_dim

    tmask = (jnp.ones((B, Lt), f32) if text_mask is None
             else text_mask.astype(f32)).reshape(B, 1, Lt)
    vmask_flat = jnp.ones((B, Lv), f32) if vid_mask is None else vid_mask.astype(f32)
    vmask_col = vmask_flat.reshape(B, Lv, 1)
    vmask_row = vmask_flat.reshape(B, 1, Lv)

    in_specs = [
        pl.BlockSpec((1, Lv, v_dim), lambda b: (b, 0, 0)),
        pl.BlockSpec((1, Lt, t_dim), lambda b: (b, 0, 0)),
        pl.BlockSpec((1, 1, Lt), lambda b: (b, 0, 0)),
        pl.BlockSpec((1, Lv, 1), lambda b: (b, 0, 0)),
        pl.BlockSpec((1, 1, Lv), lambda b: (b, 0, 0)),
    ] + [_bcast_spec(w.shape) for w in prep_weights]

    feat = pl.pallas_call(
        partial(_fused_kernel, num_heads=num_heads),
        out_shape=jax.ShapeDtypeStruct((B, L, D), f32),
        grid=(B,),
        in_specs=in_specs,
        out_specs=pl.BlockSpec((1, L, D), lambda b: (b, 0, 0)),
        compiler_params=pltpu.CompilerParams(
            dimension_semantics=("parallel",),
            vmem_limit_bytes=32 * 1024 * 1024,
        ),
    )(Fv, Ft, tmask, vmask_col, vmask_row, *prep_weights)

    # Reference semantics: SimpleCompressor's second return is the boolean compress_mask,
    # which TextGuidedCompressor names `combined_weights`.
    combined_weights = jnp.ones((B, L), dtype=jnp.bool_)
    return feat, combined_weights


# ----------------------------------------------------------------------------
# Deterministic parameter initialization (synthetic; no checkpoint)
# ----------------------------------------------------------------------------
def init_params(key, t_dim, v_dim, hidden_dim, compress_len):
    keys = iter(jax.random.split(key, 64))

    def dense(din, dout):
        kw, kb = jax.random.split(next(keys))
        w = jax.random.normal(kw, (din, dout), jnp.float32) * (1.0 / math.sqrt(din))
        b = jax.random.normal(kb, (dout,), jnp.float32) * 0.02
        return w, b

    def ln(d):
        return jnp.ones((d,), jnp.float32), jnp.zeros((d,), jnp.float32)

    def tgva_params():
        p = {}
        p["v_proj_w"], p["v_proj_b"] = dense(v_dim, hidden_dim)
        p["t_key_w"], p["t_key_b"] = dense(t_dim, hidden_dim)
        p["t_val_w"], p["t_val_b"] = dense(t_dim, hidden_dim)
        p["out_w"], p["out_b"] = dense(hidden_dim, v_dim)
        p["norm_g"], p["norm_b"] = ln(v_dim)
        p["ff1_w"], p["ff1_b"] = dense(v_dim, 4 * v_dim)
        p["ff2_w"], p["ff2_b"] = dense(4 * v_dim, v_dim)
        p["fnorm_g"], p["fnorm_b"] = ln(v_dim)
        return p

    def compressor_params():
        p = {}
        bound = math.sqrt(6.0 / (compress_len + v_dim))   # xavier_uniform-ish for query
        p["query"] = jax.random.uniform(
            next(keys), (1, compress_len, v_dim), jnp.float32, -bound, bound)
        p["q_w"], p["q_b"] = dense(v_dim, v_dim)
        p["k_w"], p["k_b"] = dense(v_dim, v_dim)
        p["v_w"], p["v_b"] = dense(v_dim, v_dim)
        p["out_w"], p["out_b"] = dense(v_dim, v_dim)
        p["norm_g"], p["norm_b"] = ln(v_dim)
        p["ff1_w"], p["ff1_b"] = dense(v_dim, 4 * v_dim)
        p["ff2_w"], p["ff2_b"] = dense(4 * v_dim, v_dim)
        p["fnorm_g"], p["fnorm_b"] = ln(v_dim)
        return p

    params = {
        "tgva": tgva_params(),
        "enh_comp": compressor_params(),
        "dir_comp": compressor_params(),
    }
    params["dgate_w1"], params["dgate_b1"] = dense(v_dim, hidden_dim << 1)
    params["dgate_w2"], params["dgate_b2"] = dense(hidden_dim << 1, 1)
    params["tgate_w1"], params["tgate_b1"] = dense(v_dim, hidden_dim << 1)
    params["tgate_w2"], params["tgate_b2"] = dense(hidden_dim << 1, 1)
    return params


# ----------------------------------------------------------------------------
if __name__ == "__main__":
    key = jax.random.PRNGKey(0)
    kp, kf, kv = jax.random.split(key, 3)

    B, num_token, vid_len = 2, 8, 16
    t_dim, v_dim, hidden_dim = 32, 64, 64
    compress_len, num_heads = 8, 8

    params = init_params(kp, t_dim, v_dim, hidden_dim, compress_len)
    prep = prepare_weights(params, num_heads)           # one-time, outside jit

    Ft = jax.random.normal(kf, (B, num_token, t_dim), jnp.float32)
    Fv = jax.random.normal(kv, (B, vid_len, v_dim), jnp.float32)

    vid_valid = jnp.array([vid_len, vid_len - 5])
    text_valid = jnp.array([num_token, num_token - 3])
    vid_mask = (jnp.arange(vid_len)[None, :] < vid_valid[:, None]).astype(jnp.float32)
    text_mask = (jnp.arange(num_token)[None, :] < text_valid[:, None]).astype(jnp.float32)

    fwd = jax.jit(partial(text_guided_compressor, num_heads=num_heads))
    feat, combined_weights = fwd(prep, Ft, Fv, vid_mask, text_mask)
    jax.block_until_ready((feat, combined_weights))

    assert feat.shape == (B, compress_len, v_dim) and feat.dtype == jnp.float32
    assert combined_weights.shape == (B, compress_len) and combined_weights.dtype == jnp.bool_
    assert bool(jnp.all(jnp.isfinite(feat)))
    print("KERNEL_OK")
</pallas_src>

<mosaic_0001>
module attributes {stable_mosaic.version = 11 : i64} {
  func.func @_fused_kernel(%arg0: i32, %arg1: memref<1x16x64xf32, #tpu.memory_space<vmem>>, %arg2: memref<1x8x32xf32, #tpu.memory_space<vmem>>, %arg3: memref<1x1x8xf32, #tpu.memory_space<vmem>>, %arg4: memref<1x16x1xf32, #tpu.memory_space<vmem>>, %arg5: memref<1x1x16xf32, #tpu.memory_space<vmem>>, %arg6: memref<64x64xbf16, #tpu.memory_space<vmem>>, %arg7: memref<1x64xf32, #tpu.memory_space<vmem>>, %arg8: memref<32x128xbf16, #tpu.memory_space<vmem>>, %arg9: memref<1x128xf32, #tpu.memory_space<vmem>>, %arg10: memref<64x64xbf16, #tpu.memory_space<vmem>>, %arg11: memref<1x64xf32, #tpu.memory_space<vmem>>, %arg12: memref<1x64xf32, #tpu.memory_space<vmem>>, %arg13: memref<1x64xf32, #tpu.memory_space<vmem>>, %arg14: memref<64x256xbf16, #tpu.memory_space<vmem>>, %arg15: memref<1x256xf32, #tpu.memory_space<vmem>>, %arg16: memref<256x64xbf16, #tpu.memory_space<vmem>>, %arg17: memref<1x64xf32, #tpu.memory_space<vmem>>, %arg18: memref<1x64xf32, #tpu.memory_space<vmem>>, %arg19: memref<1x64xf32, #tpu.memory_space<vmem>>, %arg20: memref<1x8x64xf32, #tpu.memory_space<vmem>>, %arg21: memref<1x8x64xf32, #tpu.memory_space<vmem>>, %arg22: memref<64x128xbf16, #tpu.memory_space<vmem>>, %arg23: memref<1x128xf32, #tpu.memory_space<vmem>>, %arg24: memref<64x64xbf16, #tpu.memory_space<vmem>>, %arg25: memref<1x64xf32, #tpu.memory_space<vmem>>, %arg26: memref<1x64xf32, #tpu.memory_space<vmem>>, %arg27: memref<1x64xf32, #tpu.memory_space<vmem>>, %arg28: memref<64x256xbf16, #tpu.memory_space<vmem>>, %arg29: memref<1x256xf32, #tpu.memory_space<vmem>>, %arg30: memref<256x64xbf16, #tpu.memory_space<vmem>>, %arg31: memref<1x64xf32, #tpu.memory_space<vmem>>, %arg32: memref<1x64xf32, #tpu.memory_space<vmem>>, %arg33: memref<1x64xf32, #tpu.memory_space<vmem>>, %arg34: memref<1x8x64xf32, #tpu.memory_space<vmem>>, %arg35: memref<1x8x64xf32, #tpu.memory_space<vmem>>, %arg36: memref<64x128xbf16, #tpu.memory_space<vmem>>, %arg37: memref<1x128xf32, #tpu.memory_space<vmem>>, %arg38: memref<64x64xbf16, #tpu.memory_space<vmem>>, %arg39: memref<1x64xf32, #tpu.memory_space<vmem>>, %arg40: memref<1x64xf32, #tpu.memory_space<vmem>>, %arg41: memref<1x64xf32, #tpu.memory_space<vmem>>, %arg42: memref<64x256xbf16, #tpu.memory_space<vmem>>, %arg43: memref<1x256xf32, #tpu.memory_space<vmem>>, %arg44: memref<256x64xbf16, #tpu.memory_space<vmem>>, %arg45: memref<1x64xf32, #tpu.memory_space<vmem>>, %arg46: memref<1x64xf32, #tpu.memory_space<vmem>>, %arg47: memref<1x64xf32, #tpu.memory_space<vmem>>, %arg48: memref<64x128xbf16, #tpu.memory_space<vmem>>, %arg49: memref<1x128xf32, #tpu.memory_space<vmem>>, %arg50: memref<1x128xf32, #tpu.memory_space<vmem>>, %arg51: memref<1x1xf32, #tpu.memory_space<vmem>>, %arg52: memref<64x128xbf16, #tpu.memory_space<vmem>>, %arg53: memref<1x128xf32, #tpu.memory_space<vmem>>, %arg54: memref<1x128xf32, #tpu.memory_space<vmem>>, %arg55: memref<1x1xf32, #tpu.memory_space<vmem>>, %arg56: memref<1x8x64xf32, #tpu.memory_space<vmem>>) attributes {dimension_semantics = [#tpu.dimension_semantics<parallel>], iteration_bounds = array<i64: 2>, scalar_prefetch = 0 : i64, scratch_operands = 0 : i64, tpu.core_type = #tpu.core_type<tc>, window_params = [{transform_indices = @transform_0, window_bounds = array<i64: 1, 16, 64>}, {transform_indices = @transform_1, window_bounds = array<i64: 1, 8, 32>}, {transform_indices = @transform_2, window_bounds = array<i64: 1, 1, 8>}, {transform_indices = @transform_3, window_bounds = array<i64: 1, 16, 1>}, {transform_indices = @transform_4, window_bounds = array<i64: 1, 1, 16>}, {pipeline_mode = #tpu.pipeline_mode<synchronous>, transform_indices = @transform_5, window_bounds = array<i64: 64, 64>}, {pipeline_mode = #tpu.pipeline_mode<synchronous>, transform_indices = @transform_6, window_bounds = array<i64: 1, 64>}, {pipeline_mode = #tpu.pipeline_mode<synchronous>, transform_indices = @transform_7, window_bounds = array<i64: 32, 128>}, {pipeline_mode = #tpu.pipeline_mode<synchronous>, transform_indices = @transform_8, window_bounds = array<i64: 1, 128>}, {pipeline_mode = #tpu.pipeline_mode<synchronous>, transform_indices = @transform_9, window_bounds = array<i64: 64, 64>}, {pipeline_mode = #tpu.pipeline_mode<synchronous>, transform_indices = @transform_10, window_bounds = array<i64: 1, 64>}, {pipeline_mode = #tpu.pipeline_mode<synchronous>, transform_indices = @transform_11, window_bounds = array<i64: 1, 64>}, {pipeline_mode = #tpu.pipeline_mode<synchronous>, transform_indices = @transform_12, window_bounds = array<i64: 1, 64>}, {pipeline_mode = #tpu.pipeline_mode<synchronous>, transform_indices = @transform_13, window_bounds = array<i64: 64, 256>}, {pipeline_mode = #tpu.pipeline_mode<synchronous>, transform_indices = @transform_14, window_bounds = array<i64: 1, 256>}, {pipeline_mode = #tpu.pipeline_mode<synchronous>, transform_indices = @transform_15, window_bounds = array<i64: 256, 64>}, {pipeline_mode = #tpu.pipeline_mode<synchronous>, transform_indices = @transform_16, window_bounds = array<i64: 1, 64>}, {pipeline_mode = #tpu.pipeline_mode<synchronous>, transform_indices = @transform_17, window_bounds = array<i64: 1, 64>}, {pipeline_mode = #tpu.pipeline_mode<synchronous>, transform_indices = @transform_18, window_bounds = array<i64: 1, 64>}, {pipeline_mode = #tpu.pipeline_mode<synchronous>, transform_indices = @transform_19, window_bounds = array<i64: 1, 8, 64>}, {pipeline_mode = #tpu.pipeline_mode<synchronous>, transform_indices = @transform_20, window_bounds = array<i64: 1, 8, 64>}, {pipeline_mode = #tpu.pipeline_mode<synchronous>, transform_indices = @transform_21, window_bounds = array<i64: 64, 128>}, {pipeline_mode = #tpu.pipeline_mode<synchronous>, transform_indices = @transform_22, window_bounds = array<i64: 1, 128>}, {pipeline_mode = #tpu.pipeline_mode<synchronous>, transform_indices = @transform_23, window_bounds = array<i64: 64, 64>}, {pipeline_mode = #tpu.pipeline_mode<synchronous>, transform_indices = @transform_24, window_bounds = array<i64: 1, 64>}, {pipeline_mode = #tpu.pipeline_mode<synchronous>, transform_indices = @transform_25, window_bounds = array<i64: 1, 64>}, {pipeline_mode = #tpu.pipeline_mode<synchronous>, transform_indices = @transform_26, window_bounds = array<i64: 1, 64>}, {pipeline_mode = #tpu.pipeline_mode<synchronous>, transform_indices = @transform_27, window_bounds = array<i64: 64, 256>}, {pipeline_mode = #tpu.pipeline_mode<synchronous>, transform_indices = @transform_28, window_bounds = array<i64: 1, 256>}, {pipeline_mode = #tpu.pipeline_mode<synchronous>, transform_indices = @transform_29, window_bounds = array<i64: 256, 64>}, {pipeline_mode = #tpu.pipeline_mode<synchronous>, transform_indices = @transform_30, window_bounds = array<i64: 1, 64>}, {pipeline_mode = #tpu.pipeline_mode<synchronous>, transform_indices = @transform_31, window_bounds = array<i64: 1, 64>}, {pipeline_mode = #tpu.pipeline_mode<synchronous>, transform_indices = @transform_32, window_bounds = array<i64: 1, 64>}, {pipeline_mode = #tpu.pipeline_mode<synchronous>, transform_indices = @transform_33, window_bounds = array<i64: 1, 8, 64>}, {pipeline_mode = #tpu.pipeline_mode<synchronous>, transform_indices = @transform_34, window_bounds = array<i64: 1, 8, 64>}, {pipeline_mode = #tpu.pipeline_mode<synchronous>, transform_indices = @transform_35, window_bounds = array<i64: 64, 128>}, {pipeline_mode = #tpu.pipeline_mode<synchronous>, transform_indices = @transform_36, window_bounds = array<i64: 1, 128>}, {pipeline_mode = #tpu.pipeline_mode<synchronous>, transform_indices = @transform_37, window_bounds = array<i64: 64, 64>}, {pipeline_mode = #tpu.pipeline_mode<synchronous>, transform_indices = @transform_38, window_bounds = array<i64: 1, 64>}, {pipeline_mode = #tpu.pipeline_mode<synchronous>, transform_indices = @transform_39, window_bounds = array<i64: 1, 64>}, {pipeline_mode = #tpu.pipeline_mode<synchronous>, transform_indices = @transform_40, window_bounds = array<i64: 1, 64>}, {pipeline_mode = #tpu.pipeline_mode<synchronous>, transform_indices = @transform_41, window_bounds = array<i64: 64, 256>}, {pipeline_mode = #tpu.pipeline_mode<synchronous>, transform_indices = @transform_42, window_bounds = array<i64: 1, 256>}, {pipeline_mode = #tpu.pipeline_mode<synchronous>, transform_indices = @transform_43, window_bounds = array<i64: 256, 64>}, {pipeline_mode = #tpu.pipeline_mode<synchronous>, transform_indices = @transform_44, window_bounds = array<i64: 1, 64>}, {pipeline_mode = #tpu.pipeline_mode<synchronous>, transform_indices = @transform_45, window_bounds = array<i64: 1, 64>}, {pipeline_mode = #tpu.pipeline_mode<synchronous>, transform_indices = @transform_46, window_bounds = array<i64: 1, 64>}, {pipeline_mode = #tpu.pipeline_mode<synchronous>, transform_indices = @transform_47, window_bounds = array<i64: 64, 128>}, {pipeline_mode = #tpu.pipeline_mode<synchronous>, transform_indices = @transform_48, window_bounds = array<i64: 1, 128>}, {pipeline_mode = #tpu.pipeline_mode<synchronous>, transform_indices = @transform_49, window_bounds = array<i64: 1, 128>}, {pipeline_mode = #tpu.pipeline_mode<synchronous>, transform_indices = @transform_50, window_bounds = array<i64: 1, 1>}, {pipeline_mode = #tpu.pipeline_mode<synchronous>, transform_indices = @transform_51, window_bounds = array<i64: 64, 128>}, {pipeline_mode = #tpu.pipeline_mode<synchronous>, transform_indices = @transform_52, window_bounds = array<i64: 1, 128>}, {pipeline_mode = #tpu.pipeline_mode<synchronous>, transform_indices = @transform_53, window_bounds = array<i64: 1, 128>}, {pipeline_mode = #tpu.pipeline_mode<synchronous>, transform_indices = @transform_54, window_bounds = array<i64: 1, 1>}, {transform_indices = @transform_55, window_bounds = array<i64: 1, 8, 64>}]} {
    %c0 = arith.constant 0 : index
    %c0_0 = arith.constant 0 : index
    %c0_1 = arith.constant 0 : index
    %0 = vector.load %arg1[%c0, %c0_0, %c0_1] : memref<1x16x64xf32, #tpu.memory_space<vmem>>, vector<1x16x64xf32>
    %1 = vector.shape_cast %0 : vector<1x16x64xf32> to vector<16x64xf32>
    %c0_2 = arith.constant 0 : index
    %c0_3 = arith.constant 0 : index
    %c0_4 = arith.constant 0 : index
    %2 = vector.load %arg2[%c0_2, %c0_3, %c0_4] : memref<1x8x32xf32, #tpu.memory_space<vmem>>, vector<1x8x32xf32>
    %3 = vector.shape_cast %2 : vector<1x8x32xf32> to vector<8x32xf32>
    %c0_5 = arith.constant 0 : index
    %c0_6 = arith.constant 0 : index
    %c0_7 = arith.constant 0 : index
    %4 = vector.load %arg3[%c0_5, %c0_6, %c0_7] : memref<1x1x8xf32, #tpu.memory_space<vmem>>, vector<1x1x8xf32>
    %5 = vector.shape_cast %4 : vector<1x1x8xf32> to vector<1x8xf32>
    %cst = arith.constant 5.000000e-01 : f32
    %6 = vector.broadcast %cst : f32 to vector<1x8xf32>
    %7 = arith.cmpf ogt, %5, %6 : vector<1x8xf32>
    %c0_8 = arith.constant 0 : index
    %c0_9 = arith.constant 0 : index
    %c0_10 = arith.constant 0 : index
    %8 = vector.load %arg5[%c0_8, %c0_9, %c0_10] : memref<1x1x16xf32, #tpu.memory_space<vmem>>, vector<1x1x16xf32>
    %9 = vector.shape_cast %8 : vector<1x1x16xf32> to vector<1x16xf32>
    %cst_11 = arith.constant 5.000000e-01 : f32
    %10 = vector.broadcast %cst_11 : f32 to vector<1x16xf32>
    %11 = arith.cmpf ogt, %9, %10 : vector<1x16xf32>
    %c0_12 = arith.constant 0 : index
    %c0_13 = arith.constant 0 : index
    %12 = vector.load %arg6[%c0_12, %c0_13] : memref<64x64xbf16, #tpu.memory_space<vmem>>, vector<64x64xbf16>
    %13 = arith.truncf %1 : vector<16x64xf32> to vector<16x64xbf16>
    %cst_14 = arith.constant dense<0.000000e+00> : vector<16x64xf32>
    %14 = tpu.matmul %13, %12, %cst_14 {dimension_numbers = #tpu.dot_dimension_numbers<[1], [0], [0], [1], [0, 0, 1, 1], [], []>} : vector<16x64xbf16>, vector<64x64xbf16>, vector<16x64xf32> -> vector<16x64xf32>
    %c0_15 = arith.constant 0 : index
    %c0_16 = arith.constant 0 : index
    %15 = vector.load %arg7[%c0_15, %c0_16] : memref<1x64xf32, #tpu.memory_space<vmem>>, vector<1x64xf32>
    %16 = vector.broadcast %15 : vector<1x64xf32> to vector<16x64xf32>
    %17 = arith.addf %14, %16 : vector<16x64xf32>
    %c0_17 = arith.constant 0 : index
    %c0_18 = arith.constant 0 : index
    %18 = vector.load %arg8[%c0_17, %c0_18] : memref<32x128xbf16, #tpu.memory_space<vmem>>, vector<32x128xbf16>
    %19 = arith.truncf %3 : vector<8x32xf32> to vector<8x32xbf16>
    %cst_19 = arith.constant dense<0.000000e+00> : vector<8x128xf32>
    %20 = tpu.matmul %19, %18, %cst_19 {dimension_numbers = #tpu.dot_dimension_numbers<[1], [0], [0], [1], [0, 0, 1, 1], [], []>} : vector<8x32xbf16>, vector<32x128xbf16>, vector<8x128xf32> -> vector<8x128xf32>
    %c0_20 = arith.constant 0 : index
    %c0_21 = arith.constant 0 : index
    %21 = vector.load %arg9[%c0_20, %c0_21] : memref<1x128xf32, #tpu.memory_space<vmem>>, vector<1x128xf32>
    %22 = vector.broadcast %21 : vector<1x128xf32> to vector<8x128xf32>
    %23 = arith.addf %20, %22 : vector<8x128xf32>
    %24 = vector.extract_strided_slice %23 {offsets = [0, 0], sizes = [8, 64], strides = [1, 1]} : vector<8x128xf32> to vector<8x64xf32>
    %25 = vector.extract_strided_slice %23 {offsets = [0, 64], sizes = [8, 64], strides = [1, 1]} : vector<8x128xf32> to vector<8x64xf32>
    %26 = arith.truncf %17 : vector<16x64xf32> to vector<16x64xbf16>
    %27 = arith.truncf %24 : vector<8x64xf32> to vector<8x64xbf16>
    %28 = arith.truncf %25 : vector<8x64xf32> to vector<8x64xbf16>
    %29 = vector.extract_strided_slice %26 {offsets = [0, 0], sizes = [16, 8], strides = [1, 1]} : vector<16x64xbf16> to vector<16x8xbf16>
    %30 = vector.extract_strided_slice %27 {offsets = [0, 0], sizes = [8, 8], strides = [1, 1]} : vector<8x64xbf16> to vector<8x8xbf16>
    %cst_22 = arith.constant dense<0.000000e+00> : vector<16x8xf32>
    %31 = tpu.matmul %29, %30, %cst_22 {dimension_numbers = #tpu.dot_dimension_numbers<[1], [1], [0], [0], [0, 0, 1, 0], [], []>} : vector<16x8xbf16>, vector<8x8xbf16>, vector<16x8xf32> -> vector<16x8xf32>
    %cst_23 = arith.constant -1.000000e+09 : f32
    %32 = vector.shape_cast %7 : vector<1x8xi1> to vector<1x8xi1>
    %33 = vector.broadcast %32 : vector<1x8xi1> to vector<16x8xi1>
    %34 = vector.broadcast %cst_23 : f32 to vector<16x8xf32>
    %35 = arith.select %33, %31, %34 : vector<16x8xi1>, vector<16x8xf32>
    %cst_24 = arith.constant dense<0xFF800000> : vector<16xf32>
    %36 = vector.multi_reduction <maximumf>, %35, %cst_24 [1] : vector<16x8xf32> to vector<16xf32>
    %37 = vector.shape_cast %36 : vector<16xf32> to vector<16x1xf32>
    %38 = vector.broadcast %37 : vector<16x1xf32> to vector<16x8xf32>
    %39 = arith.subf %35, %38 : vector<16x8xf32>
    %40 = math.exp %39 : vector<16x8xf32>
    %cst_25 = arith.constant dense<0.000000e+00> : vector<16xf32>
    %41 = vector.multi_reduction <add>, %40, %cst_25 [1] : vector<16x8xf32> to vector<16xf32>
    %42 = vector.shape_cast %41 : vector<16xf32> to vector<16x1xf32>
    %43 = tpu.reciprocal %42 {approx = true} : vector<16x1xf32> -> vector<16x1xf32>
    %44 = vector.broadcast %43 : vector<16x1xf32> to vector<16x8xf32>
    %45 = arith.mulf %40, %44 : vector<16x8xf32>
    %46 = arith.truncf %45 : vector<16x8xf32> to vector<16x8xbf16>
    %47 = vector.extract_strided_slice %28 {offsets = [0, 0], sizes = [8, 8], strides = [1, 1]} : vector<8x64xbf16> to vector<8x8xbf16>
    %cst_26 = arith.constant dense<0.000000e+00> : vector<16x8xf32>
    %48 = tpu.matmul %46, %47, %cst_26 {dimension_numbers = #tpu.dot_dimension_numbers<[1], [0], [0], [1], [0, 0, 1, 1], [], []>} : vector<16x8xbf16>, vector<8x8xbf16>, vector<16x8xf32> -> vector<16x8xf32>
    %49 = vector.extract_strided_slice %26 {offsets = [0, 8], sizes = [16, 8], strides = [1, 1]} : vector<16x64xbf16> to vector<16x8xbf16>
    %50 = vector.extract_strided_slice %27 {offsets = [0, 8], sizes = [8, 8], strides = [1, 1]} : vector<8x64xbf16> to vector<8x8xbf16>
    %cst_27 = arith.constant dense<0.000000e+00> : vector<16x8xf32>
    %51 = tpu.matmul %49, %50, %cst_27 {dimension_numbers = #tpu.dot_dimension_numbers<[1], [1], [0], [0], [0, 0, 1, 0], [], []>} : vector<16x8xbf16>, vector<8x8xbf16>, vector<16x8xf32> -> vector<16x8xf32>
    %cst_28 = arith.constant -1.000000e+09 : f32
    %52 = vector.shape_cast %7 : vector<1x8xi1> to vector<1x8xi1>
    %53 = vector.broadcast %52 : vector<1x8xi1> to vector<16x8xi1>
    %54 = vector.broadcast %cst_28 : f32 to vector<16x8xf32>
    %55 = arith.select %53, %51, %54 : vector<16x8xi1>, vector<16x8xf32>
    %cst_29 = arith.constant dense<0xFF800000> : vector<16xf32>
    %56 = vector.multi_reduction <maximumf>, %55, %cst_29 [1] : vector<16x8xf32> to vector<16xf32>
    %57 = vector.shape_cast %56 : vector<16xf32> to vector<16x1xf32>
    %58 = vector.broadcast %57 : vector<16x1xf32> to vector<16x8xf32>
    %59 = arith.subf %55, %58 : vector<16x8xf32>
    %60 = math.exp %59 : vector<16x8xf32>
    %cst_30 = arith.constant dense<0.000000e+00> : vector<16xf32>
    %61 = vector.multi_reduction <add>, %60, %cst_30 [1] : vector<16x8xf32> to vector<16xf32>
    %62 = vector.shape_cast %61 : vector<16xf32> to vector<16x1xf32>
    %63 = tpu.reciprocal %62 {approx = true} : vector<16x1xf32> -> vector<16x1xf32>
    %64 = vector.broadcast %63 : vector<16x1xf32> to vector<16x8xf32>
    %65 = arith.mulf %60, %64 : vector<16x8xf32>
    %66 = arith.truncf %65 : vector<16x8xf32> to vector<16x8xbf16>
    %67 = vector.extract_strided_slice %28 {offsets = [0, 8], sizes = [8, 8], strides = [1, 1]} : vector<8x64xbf16> to vector<8x8xbf16>
    %cst_31 = arith.constant dense<0.000000e+00> : vector<16x8xf32>
    %68 = tpu.matmul %66, %67, %cst_31 {dimension_numbers = #tpu.dot_dimension_numbers<[1], [0], [0], [1], [0, 0, 1, 1], [], []>} : vector<16x8xbf16>, vector<8x8xbf16>, vector<16x8xf32> -> vector<16x8xf32>
    %69 = vector.extract_strided_slice %26 {offsets = [0, 16], sizes = [16, 8], strides = [1, 1]} : vector<16x64xbf16> to vector<16x8xbf16>
    %70 = vector.extract_strided_slice %27 {offsets = [0, 16], sizes = [8, 8], strides = [1, 1]} : vector<8x64xbf16> to vector<8x8xbf16>
    %cst_32 = arith.constant dense<0.000000e+00> : vector<16x8xf32>
    %71 = tpu.matmul %69, %70, %cst_32 {dimension_numbers = #tpu.dot_dimension_numbers<[1], [1], [0], [0], [0, 0, 1, 0], [], []>} : vector<16x8xbf16>, vector<8x8xbf16>, vector<16x8xf32> -> vector<16x8xf32>
    %cst_33 = arith.constant -1.000000e+09 : f32
    %72 = vector.shape_cast %7 : vector<1x8xi1> to vector<1x8xi1>
    %73 = vector.broadcast %72 : vector<1x8xi1> to vector<16x8xi1>
    %74 = vector.broadcast %cst_33 : f32 to vector<16x8xf32>
    %75 = arith.select %73, %71, %74 : vector<16x8xi1>, vector<16x8xf32>
    %cst_34 = arith.constant dense<0xFF800000> : vector<16xf32>
    %76 = vector.multi_reduction <maximumf>, %75, %cst_34 [1] : vector<16x8xf32> to vector<16xf32>
    %77 = vector.shape_cast %76 : vector<16xf32> to vector<16x1xf32>
    %78 = vector.broadcast %77 : vector<16x1xf32> to vector<16x8xf32>
    %79 = arith.subf %75, %78 : vector<16x8xf32>
    %80 = math.exp %79 : vector<16x8xf32>
    %cst_35 = arith.constant dense<0.000000e+00> : vector<16xf32>
    %81 = vector.multi_reduction <add>, %80, %cst_35 [1] : vector<16x8xf32> to vector<16xf32>
    %82 = vector.shape_cast %81 : vector<16xf32> to vector<16x1xf32>
    %83 = tpu.reciprocal %82 {approx = true} : vector<16x1xf32> -> vector<16x1xf32>
    %84 = vector.broadcast %83 : vector<16x1xf32> to vector<16x8xf32>
    %85 = arith.mulf %80, %84 : vector<16x8xf32>
    %86 = arith.truncf %85 : vector<16x8xf32> to vector<16x8xbf16>
    %87 = vector.extract_strided_slice %28 {offsets = [0, 16], sizes = [8, 8], strides = [1, 1]} : vector<8x64xbf16> to vector<8x8xbf16>
    %cst_36 = arith.constant dense<0.000000e+00> : vector<16x8xf32>
    %88 = tpu.matmul %86, %87, %cst_36 {dimension_numbers = #tpu.dot_dimension_numbers<[1], [0], [0], [1], [0, 0, 1, 1], [], []>} : vector<16x8xbf16>, vector<8x8xbf16>, vector<16x8xf32> -> vector<16x8xf32>
    %89 = vector.extract_strided_slice %26 {offsets = [0, 24], sizes = [16, 8], strides = [1, 1]} : vector<16x64xbf16> to vector<16x8xbf16>
    %90 = vector.extract_strided_slice %27 {offsets = [0, 24], sizes = [8, 8], strides = [1, 1]} : vector<8x64xbf16> to vector<8x8xbf16>
    %cst_37 = arith.constant dense<0.000000e+00> : vector<16x8xf32>
    %91 = tpu.matmul %89, %90, %cst_37 {dimension_numbers = #tpu.dot_dimension_numbers<[1], [1], [0], [0], [0, 0, 1, 0], [], []>} : vector<16x8xbf16>, vector<8x8xbf16>, vector<16x8xf32> -> vector<16x8xf32>
    %cst_38 = arith.constant -1.000000e+09 : f32
    %92 = vector.shape_cast %7 : vector<1x8xi1> to vector<1x8xi1>
    %93 = vector.broadcast %92 : vector<1x8xi1> to vector<16x8xi1>
    %94 = vector.broadcast %cst_38 : f32 to vector<16x8xf32>
    %95 = arith.select %93, %91, %94 : vector<16x8xi1>, vector<16x8xf32>
    %cst_39 = arith.constant dense<0xFF800000> : vector<16xf32>
    %96 = vector.multi_reduction <maximumf>, %95, %cst_39 [1] : vector<16x8xf32> to vector<16xf32>
    %97 = vector.shape_cast %96 : vector<16xf32> to vector<16x1xf32>
    %98 = vector.broadcast %97 : vector<16x1xf32> to vector<16x8xf32>
    %99 = arith.subf %95, %98 : vector<16x8xf32>
    %100 = math.exp %99 : vector<16x8xf32>
    %cst_40 = arith.constant dense<0.000000e+00> : vector<16xf32>
    %101 = vector.multi_reduction <add>, %100, %cst_40 [1] : vector<16x8xf32> to vector<16xf32>
    %102 = vector.shape_cast %101 : vector<16xf32> to vector<16x1xf32>
    %103 = tpu.reciprocal %102 {approx = true} : vector<16x1xf32> -> vector<16x1xf32>
    %104 = vector.broadcast %103 : vector<16x1xf32> to vector<16x8xf32>
    %105 = arith.mulf %100, %104 : vector<16x8xf32>
    %106 = arith.truncf %105 : vector<16x8xf32> to vector<16x8xbf16>
    %107 = vector.extract_strided_slice %28 {offsets = [0, 24], sizes = [8, 8], strides = [1, 1]} : vector<8x64xbf16> to vector<8x8xbf16>
    %cst_41 = arith.constant dense<0.000000e+00> : vector<16x8xf32>
    %108 = tpu.matmul %106, %107, %cst_41 {dimension_numbers = #tpu.dot_dimension_numbers<[1], [0], [0], [1], [0, 0, 1, 1], [], []>} : vector<16x8xbf16>, vector<8x8xbf16>, vector<16x8xf32> -> vector<16x8xf32>
    %109 = vector.extract_strided_slice %26 {offsets = [0, 32], sizes = [16, 8], strides = [1, 1]} : vector<16x64xbf16> to vector<16x8xbf16>
    %110 = vector.extract_strided_slice %27 {offsets = [0, 32], sizes = [8, 8], strides = [1, 1]} : vector<8x64xbf16> to vector<8x8xbf16>
    %cst_42 = arith.constant dense<0.000000e+00> : vector<16x8xf32>
    %111 = tpu.matmul %109, %110, %cst_42 {dimension_numbers = #tpu.dot_dimension_numbers<[1], [1], [0], [0], [0, 0, 1, 0], [], []>} : vector<16x8xbf16>, vector<8x8xbf16>, vector<16x8xf32> -> vector<16x8xf32>
    %cst_43 = arith.constant -1.000000e+09 : f32
    %112 = vector.shape_cast %7 : vector<1x8xi1> to vector<1x8xi1>
    %113 = vector.broadcast %112 : vector<1x8xi1> to vector<16x8xi1>
    %114 = vector.broadcast %cst_43 : f32 to vector<16x8xf32>
    %115 = arith.select %113, %111, %114 : vector<16x8xi1>, vector<16x8xf32>
    %cst_44 = arith.constant dense<0xFF800000> : vector<16xf32>
    %116 = vector.multi_reduction <maximumf>, %115, %cst_44 [1] : vector<16x8xf32> to vector<16xf32>
    %117 = vector.shape_cast %116 : vector<16xf32> to vector<16x1xf32>
    %118 = vector.broadcast %117 : vector<16x1xf32> to vector<16x8xf32>
    %119 = arith.subf %115, %118 : vector<16x8xf32>
    %120 = math.exp %119 : vector<16x8xf32>
    %cst_45 = arith.constant dense<0.000000e+00> : vector<16xf32>
    %121 = vector.multi_reduction <add>, %120, %cst_45 [1] : vector<16x8xf32> to vector<16xf32>
    %122 = vector.shape_cast %121 : vector<16xf32> to vector<16x1xf32>
    %123 = tpu.reciprocal %122 {approx = true} : vector<16x1xf32> -> vector<16x1xf32>
    %124 = vector.broadcast %123 : vector<16x1xf32> to vector<16x8xf32>
    %125 = arith.mulf %120, %124 : vector<16x8xf32>
    %126 = arith.truncf %125 : vector<16x8xf32> to vector<16x8xbf16>
    %127 = vector.extract_strided_slice %28 {offsets = [0, 32], sizes = [8, 8], strides = [1, 1]} : vector<8x64xbf16> to vector<8x8xbf16>
    %cst_46 = arith.constant dense<0.000000e+00> : vector<16x8xf32>
    %128 = tpu.matmul %126, %127, %cst_46 {dimension_numbers = #tpu.dot_dimension_numbers<[1], [0], [0], [1], [0, 0, 1, 1], [], []>} : vector<16x8xbf16>, vector<8x8xbf16>, vector<16x8xf32> -> vector<16x8xf32>
    %129 = vector.extract_strided_slice %26 {offsets = [0, 40], sizes = [16, 8], strides = [1, 1]} : vector<16x64xbf16> to vector<16x8xbf16>
    %130 = vector.extract_strided_slice %27 {offsets = [0, 40], sizes = [8, 8], strides = [1, 1]} : vector<8x64xbf16> to vector<8x8xbf16>
    %cst_47 = arith.constant dense<0.000000e+00> : vector<16x8xf32>
    %131 = tpu.matmul %129, %130, %cst_47 {dimension_numbers = #tpu.dot_dimension_numbers<[1], [1], [0], [0], [0, 0, 1, 0], [], []>} : vector<16x8xbf16>, vector<8x8xbf16>, vector<16x8xf32> -> vector<16x8xf32>
    %cst_48 = arith.constant -1.000000e+09 : f32
    %132 = vector.shape_cast %7 : vector<1x8xi1> to vector<1x8xi1>
    %133 = vector.broadcast %132 : vector<1x8xi1> to vector<16x8xi1>
    %134 = vector.broadcast %cst_48 : f32 to vector<16x8xf32>
    %135 = arith.select %133, %131, %134 : vector<16x8xi1>, vector<16x8xf32>
    %cst_49 = arith.constant dense<0xFF800000> : vector<16xf32>
    %136 = vector.multi_reduction <maximumf>, %135, %cst_49 [1] : vector<16x8xf32> to vector<16xf32>
    %137 = vector.shape_cast %136 : vector<16xf32> to vector<16x1xf32>
    %138 = vector.broadcast %137 : vector<16x1xf32> to vector<16x8xf32>
    %139 = arith.subf %135, %138 : vector<16x8xf32>
    %140 = math.exp %139 : vector<16x8xf32>
    %cst_50 = arith.constant dense<0.000000e+00> : vector<16xf32>
    %141 = vector.multi_reduction <add>, %140, %cst_50 [1] : vector<16x8xf32> to vector<16xf32>
    %142 = vector.shape_cast %141 : vector<16xf32> to vector<16x1xf32>
    %143 = tpu.reciprocal %142 {approx = true} : vector<16x1xf32> -> vector<16x1xf32>
    %144 = vector.broadcast %143 : vector<16x1xf32> to vector<16x8xf32>
    %145 = arith.mulf %140, %144 : vector<16x8xf32>
    %146 = arith.truncf %145 : vector<16x8xf32> to vector<16x8xbf16>
    %147 = vector.extract_strided_slice %28 {offsets = [0, 40], sizes = [8, 8], strides = [1, 1]} : vector<8x64xbf16> to vector<8x8xbf16>
    %cst_51 = arith.constant dense<0.000000e+00> : vector<16x8xf32>
    %148 = tpu.matmul %146, %147, %cst_51 {dimension_numbers = #tpu.dot_dimension_numbers<[1], [0], [0], [1], [0, 0, 1, 1], [], []>} : vector<16x8xbf16>, vector<8x8xbf16>, vector<16x8xf32> -> vector<16x8xf32>
    %149 = vector.extract_strided_slice %26 {offsets = [0, 48], sizes = [16, 8], strides = [1, 1]} : vector<16x64xbf16> to vector<16x8xbf16>
    %150 = vector.extract_strided_slice %27 {offsets = [0, 48], sizes = [8, 8], strides = [1, 1]} : vector<8x64xbf16> to vector<8x8xbf16>
    %cst_52 = arith.constant dense<0.000000e+00> : vector<16x8xf32>
    %151 = tpu.matmul %149, %150, %cst_52 {dimension_numbers = #tpu.dot_dimension_numbers<[1], [1], [0], [0], [0, 0, 1, 0], [], []>} : vector<16x8xbf16>, vector<8x8xbf16>, vector<16x8xf32> -> vector<16x8xf32>
    %cst_53 = arith.constant -1.000000e+09 : f32
    %152 = vector.shape_cast %7 : vector<1x8xi1> to vector<1x8xi1>
    %153 = vector.broadcast %152 : vector<1x8xi1> to vector<16x8xi1>
    %154 = vector.broadcast %cst_53 : f32 to vector<16x8xf32>
    %155 = arith.select %153, %151, %154 : vector<16x8xi1>, vector<16x8xf32>
    %cst_54 = arith.constant dense<0xFF800000> : vector<16xf32>
    %156 = vector.multi_reduction <maximumf>, %155, %cst_54 [1] : vector<16x8xf32> to vector<16xf32>
    %157 = vector.shape_cast %156 : vector<16xf32> to vector<16x1xf32>
    %158 = vector.broadcast %157 : vector<16x1xf32> to vector<16x8xf32>
    %159 = arith.subf %155, %158 : vector<16x8xf32>
    %160 = math.exp %159 : vector<16x8xf32>
    %cst_55 = arith.constant dense<0.000000e+00> : vector<16xf32>
    %161 = vector.multi_reduction <add>, %160, %cst_55 [1] : vector<16x8xf32> to vector<16xf32>
    %162 = vector.shape_cast %161 : vector<16xf32> to vector<16x1xf32>
    %163 = tpu.reciprocal %162 {approx = true} : vector<16x1xf32> -> vector<16x1xf32>
    %164 = vector.broadcast %163 : vector<16x1xf32> to vector<16x8xf32>
    %165 = arith.mulf %160, %164 : vector<16x8xf32>
    %166 = arith.truncf %165 : vector<16x8xf32> to vector<16x8xbf16>
    %167 = vector.extract_strided_slice %28 {offsets = [0, 48], sizes = [8, 8], strides = [1, 1]} : vector<8x64xbf16> to vector<8x8xbf16>
    %cst_56 = arith.constant dense<0.000000e+00> : vector<16x8xf32>
    %168 = tpu.matmul %166, %167, %cst_56 {dimension_numbers = #tpu.dot_dimension_numbers<[1], [0], [0], [1], [0, 0, 1, 1], [], []>} : vector<16x8xbf16>, vector<8x8xbf16>, vector<16x8xf32> -> vector<16x8xf32>
    %169 = vector.extract_strided_slice %26 {offsets = [0, 56], sizes = [16, 8], strides = [1, 1]} : vector<16x64xbf16> to vector<16x8xbf16>
    %170 = vector.extract_strided_slice %27 {offsets = [0, 56], sizes = [8, 8], strides = [1, 1]} : vector<8x64xbf16> to vector<8x8xbf16>
    %cst_57 = arith.constant dense<0.000000e+00> : vector<16x8xf32>
    %171 = tpu.matmul %169, %170, %cst_57 {dimension_numbers = #tpu.dot_dimension_numbers<[1], [1], [0], [0], [0, 0, 1, 0], [], []>} : vector<16x8xbf16>, vector<8x8xbf16>, vector<16x8xf32> -> vector<16x8xf32>
    %cst_58 = arith.constant -1.000000e+09 : f32
    %172 = vector.shape_cast %7 : vector<1x8xi1> to vector<1x8xi1>
    %173 = vector.broadcast %172 : vector<1x8xi1> to vector<16x8xi1>
    %174 = vector.broadcast %cst_58 : f32 to vector<16x8xf32>
    %175 = arith.select %173, %171, %174 : vector<16x8xi1>, vector<16x8xf32>
    %cst_59 = arith.constant dense<0xFF800000> : vector<16xf32>
    %176 = vector.multi_reduction <maximumf>, %175, %cst_59 [1] : vector<16x8xf32> to vector<16xf32>
    %177 = vector.shape_cast %176 : vector<16xf32> to vector<16x1xf32>
    %178 = vector.broadcast %177 : vector<16x1xf32> to vector<16x8xf32>
    %179 = arith.subf %175, %178 : vector<16x8xf32>
    %180 = math.exp %179 : vector<16x8xf32>
    %cst_60 = arith.constant dense<0.000000e+00> : vector<16xf32>
    %181 = vector.multi_reduction <add>, %180, %cst_60 [1] : vector<16x8xf32> to vector<16xf32>
    %182 = vector.shape_cast %181 : vector<16xf32> to vector<16x1xf32>
    %183 = tpu.reciprocal %182 {approx = true} : vector<16x1xf32> -> vector<16x1xf32>
    %184 = vector.broadcast %183 : vector<16x1xf32> to vector<16x8xf32>
    %185 = arith.mulf %180, %184 : vector<16x8xf32>
    %186 = arith.truncf %185 : vector<16x8xf32> to vector<16x8xbf16>
    %187 = vector.extract_strided_slice %28 {offsets = [0, 56], sizes = [8, 8], strides = [1, 1]} : vector<8x64xbf16> to vector<8x8xbf16>
    %cst_61 = arith.constant dense<0.000000e+00> : vector<16x8xf32>
    %188 = tpu.matmul %186, %187, %cst_61 {dimension_numbers = #tpu.dot_dimension_numbers<[1], [0], [0], [1], [0, 0, 1, 1], [], []>} : vector<16x8xbf16>, vector<8x8xbf16>, vector<16x8xf32> -> vector<16x8xf32>
    %189 = tpu.concatenate %48, %68, %88, %108, %128, %148, %168, %188 in 1 : vector<16x8xf32>, vector<16x8xf32>, vector<16x8xf32>, vector<16x8xf32>, vector<16x8xf32>, vector<16x8xf32>, vector<16x8xf32>, vector<16x8xf32> -> vector<16x64xf32>
    %c0_62 = arith.constant 0 : index
    %c0_63 = arith.constant 0 : index
    %190 = vector.load %arg10[%c0_62, %c0_63] : memref<64x64xbf16, #tpu.memory_space<vmem>>, vector<64x64xbf16>
    %191 = arith.truncf %189 : vector<16x64xf32> to vector<16x64xbf16>
    %cst_64 = arith.constant dense<0.000000e+00> : vector<16x64xf32>
    %192 = tpu.matmul %191, %190, %cst_64 {dimension_numbers = #tpu.dot_dimension_numbers<[1], [0], [0], [1], [0, 0, 1, 1], [], []>} : vector<16x64xbf16>, vector<64x64xbf16>, vector<16x64xf32> -> vector<16x64xf32>
    %c0_65 = arith.constant 0 : index
    %c0_66 = arith.constant 0 : index
    %193 = vector.load %arg11[%c0_65, %c0_66] : memref<1x64xf32, #tpu.memory_space<vmem>>, vector<1x64xf32>
    %194 = vector.broadcast %193 : vector<1x64xf32> to vector<16x64xf32>
    %195 = arith.addf %192, %194 : vector<16x64xf32>
    %196 = arith.addf %1, %195 : vector<16x64xf32>
    %cst_67 = arith.constant dense<0.000000e+00> : vector<16xf32>
    %197 = vector.multi_reduction <add>, %196, %cst_67 [1] : vector<16x64xf32> to vector<16xf32>
    %198 = vector.shape_cast %197 : vector<16xf32> to vector<16x1xf32>
    %cst_68 = arith.constant 6.400000e+01 : f32
    %199 = vector.broadcast %cst_68 : f32 to vector<16x1xf32>
    %200 = arith.divf %198, %199 : vector<16x1xf32>
    %201 = vector.broadcast %200 : vector<16x1xf32> to vector<16x64xf32>
    %202 = arith.subf %196, %201 : vector<16x64xf32>
    %203 = arith.mulf %202, %202 : vector<16x64xf32>
    %cst_69 = arith.constant dense<0.000000e+00> : vector<16xf32>
    %204 = vector.multi_reduction <add>, %203, %cst_69 [1] : vector<16x64xf32> to vector<16xf32>
    %205 = vector.shape_cast %204 : vector<16xf32> to vector<16x1xf32>
    %cst_70 = arith.constant 6.400000e+01 : f32
    %206 = vector.broadcast %cst_70 : f32 to vector<16x1xf32>
    %207 = arith.divf %205, %206 : vector<16x1xf32>
    %208 = vector.broadcast %200 : vector<16x1xf32> to vector<16x64xf32>
    %209 = arith.subf %196, %208 : vector<16x64xf32>
    %cst_71 = arith.constant 9.99999974E-6 : f32
    %210 = vector.broadcast %cst_71 : f32 to vector<16x1xf32>
    %211 = arith.addf %207, %210 : vector<16x1xf32>
    %212 = math.rsqrt %211 : vector<16x1xf32>
    %213 = vector.broadcast %212 : vector<16x1xf32> to vector<16x64xf32>
    %214 = arith.mulf %209, %213 : vector<16x64xf32>
    %c0_72 = arith.constant 0 : index
    %c0_73 = arith.constant 0 : index
    %215 = vector.load %arg12[%c0_72, %c0_73] : memref<1x64xf32, #tpu.memory_space<vmem>>, vector<1x64xf32>
    %216 = vector.broadcast %215 : vector<1x64xf32> to vector<16x64xf32>
    %217 = arith.mulf %214, %216 : vector<16x64xf32>
    %c0_74 = arith.constant 0 : index
    %c0_75 = arith.constant 0 : index
    %218 = vector.load %arg13[%c0_74, %c0_75] : memref<1x64xf32, #tpu.memory_space<vmem>>, vector<1x64xf32>
    %219 = vector.broadcast %218 : vector<1x64xf32> to vector<16x64xf32>
    %220 = arith.addf %217, %219 : vector<16x64xf32>
    %c0_76 = arith.constant 0 : index
    %c0_77 = arith.constant 0 : index
    %221 = vector.load %arg14[%c0_76, %c0_77] : memref<64x256xbf16, #tpu.memory_space<vmem>>, vector<64x256xbf16>
    %222 = arith.truncf %220 : vector<16x64xf32> to vector<16x64xbf16>
    %cst_78 = arith.constant dense<0.000000e+00> : vector<16x256xf32>
    %223 = tpu.matmul %222, %221, %cst_78 {dimension_numbers = #tpu.dot_dimension_numbers<[1], [0], [0], [1], [0, 0, 1, 1], [], []>} : vector<16x64xbf16>, vector<64x256xbf16>, vector<16x256xf32> -> vector<16x256xf32>
    %c0_79 = arith.constant 0 : index
    %c0_80 = arith.constant 0 : index
    %224 = vector.load %arg15[%c0_79, %c0_80] : memref<1x256xf32, #tpu.memory_space<vmem>>, vector<1x256xf32>
    %225 = vector.broadcast %224 : vector<1x256xf32> to vector<16x256xf32>
    %226 = arith.addf %223, %225 : vector<16x256xf32>
    %cst_81 = arith.constant 0.000000e+00 : f32
    %227 = vector.broadcast %cst_81 : f32 to vector<16x256xf32>
    %228 = arith.maximumf %226, %227 : vector<16x256xf32>
    %c0_82 = arith.constant 0 : index
    %c0_83 = arith.constant 0 : index
    %229 = vector.load %arg16[%c0_82, %c0_83] : memref<256x64xbf16, #tpu.memory_space<vmem>>, vector<256x64xbf16>
    %230 = arith.truncf %228 : vector<16x256xf32> to vector<16x256xbf16>
    %cst_84 = arith.constant dense<0.000000e+00> : vector<16x64xf32>
    %231 = tpu.matmul %230, %229, %cst_84 {dimension_numbers = #tpu.dot_dimension_numbers<[1], [0], [0], [1], [0, 0, 1, 1], [], []>} : vector<16x256xbf16>, vector<256x64xbf16>, vector<16x64xf32> -> vector<16x64xf32>
    %c0_85 = arith.constant 0 : index
    %c0_86 = arith.constant 0 : index
    %232 = vector.load %arg17[%c0_85, %c0_86] : memref<1x64xf32, #tpu.memory_space<vmem>>, vector<1x64xf32>
    %233 = vector.broadcast %232 : vector<1x64xf32> to vector<16x64xf32>
    %234 = arith.addf %231, %233 : vector<16x64xf32>
    %235 = arith.addf %220, %234 : vector<16x64xf32>
    %cst_87 = arith.constant dense<0.000000e+00> : vector<16xf32>
    %236 = vector.multi_reduction <add>, %235, %cst_87 [1] : vector<16x64xf32> to vector<16xf32>
    %237 = vector.shape_cast %236 : vector<16xf32> to vector<16x1xf32>
    %cst_88 = arith.constant 6.400000e+01 : f32
    %238 = vector.broadcast %cst_88 : f32 to vector<16x1xf32>
    %239 = arith.divf %237, %238 : vector<16x1xf32>
    %240 = vector.broadcast %239 : vector<16x1xf32> to vector<16x64xf32>
    %241 = arith.subf %235, %240 : vector<16x64xf32>
    %242 = arith.mulf %241, %241 : vector<16x64xf32>
    %cst_89 = arith.constant dense<0.000000e+00> : vector<16xf32>
    %243 = vector.multi_reduction <add>, %242, %cst_89 [1] : vector<16x64xf32> to vector<16xf32>
    %244 = vector.shape_cast %243 : vector<16xf32> to vector<16x1xf32>
    %cst_90 = arith.constant 6.400000e+01 : f32
    %245 = vector.broadcast %cst_90 : f32 to vector<16x1xf32>
    %246 = arith.divf %244, %245 : vector<16x1xf32>
    %247 = vector.broadcast %239 : vector<16x1xf32> to vector<16x64xf32>
    %248 = arith.subf %235, %247 : vector<16x64xf32>
    %cst_91 = arith.constant 9.99999974E-6 : f32
    %249 = vector.broadcast %cst_91 : f32 to vector<16x1xf32>
    %250 = arith.addf %246, %249 : vector<16x1xf32>
    %251 = math.rsqrt %250 : vector<16x1xf32>
    %252 = vector.broadcast %251 : vector<16x1xf32> to vector<16x64xf32>
    %253 = arith.mulf %248, %252 : vector<16x64xf32>
    %c0_92 = arith.constant 0 : index
    %c0_93 = arith.constant 0 : index
    %254 = vector.load %arg18[%c0_92, %c0_93] : memref<1x64xf32, #tpu.memory_space<vmem>>, vector<1x64xf32>
    %255 = vector.broadcast %254 : vector<1x64xf32> to vector<16x64xf32>
    %256 = arith.mulf %253, %255 : vector<16x64xf32>
    %c0_94 = arith.constant 0 : index
    %c0_95 = arith.constant 0 : index
    %257 = vector.load %arg19[%c0_94, %c0_95] : memref<1x64xf32, #tpu.memory_space<vmem>>, vector<1x64xf32>
    %258 = vector.broadcast %257 : vector<1x64xf32> to vector<16x64xf32>
    %259 = arith.addf %256, %258 : vector<16x64xf32>
    %c0_96 = arith.constant 0 : index
    %c0_97 = arith.constant 0 : index
    %c0_98 = arith.constant 0 : index
    %260 = vector.load %arg4[%c0_96, %c0_97, %c0_98] : memref<1x16x1xf32, #tpu.memory_space<vmem>>, vector<1x16x1xf32>
    %261 = vector.shape_cast %260 : vector<1x16x1xf32> to vector<16x1xf32>
    %262 = vector.broadcast %261 : vector<16x1xf32> to vector<16x64xf32>
    %263 = arith.mulf %259, %262 : vector<16x64xf32>
    %c0_99 = arith.constant 0 : index
    %c0_100 = arith.constant 0 : index
    %264 = vector.load %arg22[%c0_99, %c0_100] : memref<64x128xbf16, #tpu.memory_space<vmem>>, vector<64x128xbf16>
    %265 = arith.truncf %1 : vector<16x64xf32> to vector<16x64xbf16>
    %cst_101 = arith.constant dense<0.000000e+00> : vector<16x128xf32>
    %266 = tpu.matmul %265, %264, %cst_101 {dimension_numbers = #tpu.dot_dimension_numbers<[1], [0], [0], [1], [0, 0, 1, 1], [], []>} : vector<16x64xbf16>, vector<64x128xbf16>, vector<16x128xf32> -> vector<16x128xf32>
    %c0_102 = arith.constant 0 : index
    %c0_103 = arith.constant 0 : index
    %267 = vector.load %arg23[%c0_102, %c0_103] : memref<1x128xf32, #tpu.memory_space<vmem>>, vector<1x128xf32>
    %268 = vector.broadcast %267 : vector<1x128xf32> to vector<16x128xf32>
    %269 = arith.addf %266, %268 : vector<16x128xf32>
    %270 = vector.extract_strided_slice %269 {offsets = [0, 0], sizes = [16, 64], strides = [1, 1]} : vector<16x128xf32> to vector<16x64xf32>
    %271 = vector.extract_strided_slice %269 {offsets = [0, 64], sizes = [16, 64], strides = [1, 1]} : vector<16x128xf32> to vector<16x64xf32>
    %c0_104 = arith.constant 0 : index
    %c0_105 = arith.constant 0 : index
    %c0_106 = arith.constant 0 : index
    %272 = vector.load %arg20[%c0_104, %c0_105, %c0_106] : memref<1x8x64xf32, #tpu.memory_space<vmem>>, vector<1x8x64xf32>
    %273 = vector.shape_cast %272 : vector<1x8x64xf32> to vector<8x64xf32>
    %274 = arith.truncf %273 : vector<8x64xf32> to vector<8x64xbf16>
    %275 = arith.truncf %270 : vector<16x64xf32> to vector<16x64xbf16>
    %276 = arith.truncf %271 : vector<16x64xf32> to vector<16x64xbf16>
    %277 = vector.extract_strided_slice %274 {offsets = [0, 0], sizes = [8, 8], strides = [1, 1]} : vector<8x64xbf16> to vector<8x8xbf16>
    %278 = vector.extract_strided_slice %275 {offsets = [0, 0], sizes = [16, 8], strides = [1, 1]} : vector<16x64xbf16> to vector<16x8xbf16>
    %cst_107 = arith.constant dense<0.000000e+00> : vector<8x16xf32>
    %279 = tpu.matmul %277, %278, %cst_107 {dimension_numbers = #tpu.dot_dimension_numbers<[1], [1], [0], [0], [0, 0, 1, 0], [], []>} : vector<8x8xbf16>, vector<16x8xbf16>, vector<8x16xf32> -> vector<8x16xf32>
    %cst_108 = arith.constant -1.000000e+09 : f32
    %280 = vector.shape_cast %11 : vector<1x16xi1> to vector<1x16xi1>
    %281 = vector.broadcast %280 : vector<1x16xi1> to vector<8x16xi1>
    %282 = vector.broadcast %cst_108 : f32 to vector<8x16xf32>
    %283 = arith.select %281, %279, %282 : vector<8x16xi1>, vector<8x16xf32>
    %cst_109 = arith.constant dense<0xFF800000> : vector<8xf32>
    %284 = vector.multi_reduction <maximumf>, %283, %cst_109 [1] : vector<8x16xf32> to vector<8xf32>
    %285 = vector.shape_cast %284 : vector<8xf32> to vector<8x1xf32>
    %286 = vector.broadcast %285 : vector<8x1xf32> to vector<8x16xf32>
    %287 = arith.subf %283, %286 : vector<8x16xf32>
    %288 = math.exp %287 : vector<8x16xf32>
    %cst_110 = arith.constant dense<0.000000e+00> : vector<8xf32>
    %289 = vector.multi_reduction <add>, %288, %cst_110 [1] : vector<8x16xf32> to vector<8xf32>
    %290 = vector.shape_cast %289 : vector<8xf32> to vector<8x1xf32>
    %291 = tpu.reciprocal %290 {approx = true} : vector<8x1xf32> -> vector<8x1xf32>
    %292 = vector.broadcast %291 : vector<8x1xf32> to vector<8x16xf32>
    %293 = arith.mulf %288, %292 : vector<8x16xf32>
    %294 = arith.truncf %293 : vector<8x16xf32> to vector<8x16xbf16>
    %295 = vector.extract_strided_slice %276 {offsets = [0, 0], sizes = [16, 8], strides = [1, 1]} : vector<16x64xbf16> to vector<16x8xbf16>
    %cst_111 = arith.constant dense<0.000000e+00> : vector<8x8xf32>
    %296 = tpu.matmul %294, %295, %cst_111 {dimension_numbers = #tpu.dot_dimension_numbers<[1], [0], [0], [1], [0, 0, 1, 1], [], []>} : vector<8x16xbf16>, vector<16x8xbf16>, vector<8x8xf32> -> vector<8x8xf32>
    %297 = vector.extract_strided_slice %274 {offsets = [0, 8], sizes = [8, 8], strides = [1, 1]} : vector<8x64xbf16> to vector<8x8xbf16>
    %298 = vector.extract_strided_slice %275 {offsets = [0, 8], sizes = [16, 8], strides = [1, 1]} : vector<16x64xbf16> to vector<16x8xbf16>
    %cst_112 = arith.constant dense<0.000000e+00> : vector<8x16xf32>
    %299 = tpu.matmul %297, %298, %cst_112 {dimension_numbers = #tpu.dot_dimension_numbers<[1], [1], [0], [0], [0, 0, 1, 0], [], []>} : vector<8x8xbf16>, vector<16x8xbf16>, vector<8x16xf32> -> vector<8x16xf32>
    %cst_113 = arith.constant -1.000000e+09 : f32
    %300 = vector.shape_cast %11 : vector<1x16xi1> to vector<1x16xi1>
    %301 = vector.broadcast %300 : vector<1x16xi1> to vector<8x16xi1>
    %302 = vector.broadcast %cst_113 : f32 to vector<8x16xf32>
    %303 = arith.select %301, %299, %302 : vector<8x16xi1>, vector<8x16xf32>
    %cst_114 = arith.constant dense<0xFF800000> : vector<8xf32>
    %304 = vector.multi_reduction <maximumf>, %303, %cst_114 [1] : vector<8x16xf32> to vector<8xf32>
    %305 = vector.shape_cast %304 : vector<8xf32> to vector<8x1xf32>
    %306 = vector.broadcast %305 : vector<8x1xf32> to vector<8x16xf32>
    %307 = arith.subf %303, %306 : vector<8x16xf32>
    %308 = math.exp %307 : vector<8x16xf32>
    %cst_115 = arith.constant dense<0.000000e+00> : vector<8xf32>
    %309 = vector.multi_reduction <add>, %308, %cst_115 [1] : vector<8x16xf32> to vector<8xf32>
    %310 = vector.shape_cast %309 : vector<8xf32> to vector<8x1xf32>
    %311 = tpu.reciprocal %310 {approx = true} : vector<8x1xf32> -> vector<8x1xf32>
    %312 = vector.broadcast %311 : vector<8x1xf32> to vector<8x16xf32>
    %313 = arith.mulf %308, %312 : vector<8x16xf32>
    %314 = arith.truncf %313 : vector<8x16xf32> to vector<8x16xbf16>
    %315 = vector.extract_strided_slice %276 {offsets = [0, 8], sizes = [16, 8], strides = [1, 1]} : vector<16x64xbf16> to vector<16x8xbf16>
    %cst_116 = arith.constant dense<0.000000e+00> : vector<8x8xf32>
    %316 = tpu.matmul %314, %315, %cst_116 {dimension_numbers = #tpu.dot_dimension_numbers<[1], [0], [0], [1], [0, 0, 1, 1], [], []>} : vector<8x16xbf16>, vector<16x8xbf16>, vector<8x8xf32> -> vector<8x8xf32>
    %317 = vector.extract_strided_slice %274 {offsets = [0, 16], sizes = [8, 8], strides = [1, 1]} : vector<8x64xbf16> to vector<8x8xbf16>
    %318 = vector.extract_strided_slice %275 {offsets = [0, 16], sizes = [16, 8], strides = [1, 1]} : vector<16x64xbf16> to vector<16x8xbf16>
    %cst_117 = arith.constant dense<0.000000e+00> : vector<8x16xf32>
    %319 = tpu.matmul %317, %318, %cst_117 {dimension_numbers = #tpu.dot_dimension_numbers<[1], [1], [0], [0], [0, 0, 1, 0], [], []>} : vector<8x8xbf16>, vector<16x8xbf16>, vector<8x16xf32> -> vector<8x16xf32>
    %cst_118 = arith.constant -1.000000e+09 : f32
    %320 = vector.shape_cast %11 : vector<1x16xi1> to vector<1x16xi1>
    %321 = vector.broadcast %320 : vector<1x16xi1> to vector<8x16xi1>
    %322 = vector.broadcast %cst_118 : f32 to vector<8x16xf32>
    %323 = arith.select %321, %319, %322 : vector<8x16xi1>, vector<8x16xf32>
    %cst_119 = arith.constant dense<0xFF800000> : vector<8xf32>
    %324 = vector.multi_reduction <maximumf>, %323, %cst_119 [1] : vector<8x16xf32> to vector<8xf32>
    %325 = vector.shape_cast %324 : vector<8xf32> to vector<8x1xf32>
    %326 = vector.broadcast %325 : vector<8x1xf32> to vector<8x16xf32>
    %327 = arith.subf %323, %326 : vector<8x16xf32>
    %328 = math.exp %327 : vector<8x16xf32>
    %cst_120 = arith.constant dense<0.000000e+00> : vector<8xf32>
    %329 = vector.multi_reduction <add>, %328, %cst_120 [1] : vector<8x16xf32> to vector<8xf32>
    %330 = vector.shape_cast %329 : vector<8xf32> to vector<8x1xf32>
    %331 = tpu.reciprocal %330 {approx = true} : vector<8x1xf32> -> vector<8x1xf32>
    %332 = vector.broadcast %331 : vector<8x1xf32> to vector<8x16xf32>
    %333 = arith.mulf %328, %332 : vector<8x16xf32>
    %334 = arith.truncf %333 : vector<8x16xf32> to vector<8x16xbf16>
    %335 = vector.extract_strided_slice %276 {offsets = [0, 16], sizes = [16, 8], strides = [1, 1]} : vector<16x64xbf16> to vector<16x8xbf16>
    %cst_121 = arith.constant dense<0.000000e+00> : vector<8x8xf32>
    %336 = tpu.matmul %334, %335, %cst_121 {dimension_numbers = #tpu.dot_dimension_numbers<[1], [0], [0], [1], [0, 0, 1, 1], [], []>} : vector<8x16xbf16>, vector<16x8xbf16>, vector<8x8xf32> -> vector<8x8xf32>
    %337 = vector.extract_strided_slice %274 {offsets = [0, 24], sizes = [8, 8], strides = [1, 1]} : vector<8x64xbf16> to vector<8x8xbf16>
    %338 = vector.extract_strided_slice %275 {offsets = [0, 24], sizes = [16, 8], strides = [1, 1]} : vector<16x64xbf16> to vector<16x8xbf16>
    %cst_122 = arith.constant dense<0.000000e+00> : vector<8x16xf32>
    %339 = tpu.matmul %337, %338, %cst_122 {dimension_numbers = #tpu.dot_dimension_numbers<[1], [1], [0], [0], [0, 0, 1, 0], [], []>} : vector<8x8xbf16>, vector<16x8xbf16>, vector<8x16xf32> -> vector<8x16xf32>
    %cst_123 = arith.constant -1.000000e+09 : f32
    %340 = vector.shape_cast %11 : vector<1x16xi1> to vector<1x16xi1>
    %341 = vector.broadcast %340 : vector<1x16xi1> to vector<8x16xi1>
    %342 = vector.broadcast %cst_123 : f32 to vector<8x16xf32>
    %343 = arith.select %341, %339, %342 : vector<8x16xi1>, vector<8x16xf32>
    %cst_124 = arith.constant dense<0xFF800000> : vector<8xf32>
    %344 = vector.multi_reduction <maximumf>, %343, %cst_124 [1] : vector<8x16xf32> to vector<8xf32>
    %345 = vector.shape_cast %344 : vector<8xf32> to vector<8x1xf32>
    %346 = vector.broadcast %345 : vector<8x1xf32> to vector<8x16xf32>
    %347 = arith.subf %343, %346 : vector<8x16xf32>
    %348 = math.exp %347 : vector<8x16xf32>
    %cst_125 = arith.constant dense<0.000000e+00> : vector<8xf32>
    %349 = vector.multi_reduction <add>, %348, %cst_125 [1] : vector<8x16xf32> to vector<8xf32>
    %350 = vector.shape_cast %349 : vector<8xf32> to vector<8x1xf32>
    %351 = tpu.reciprocal %350 {approx = true} : vector<8x1xf32> -> vector<8x1xf32>
    %352 = vector.broadcast %351 : vector<8x1xf32> to vector<8x16xf32>
    %353 = arith.mulf %348, %352 : vector<8x16xf32>
    %354 = arith.truncf %353 : vector<8x16xf32> to vector<8x16xbf16>
    %355 = vector.extract_strided_slice %276 {offsets = [0, 24], sizes = [16, 8], strides = [1, 1]} : vector<16x64xbf16> to vector<16x8xbf16>
    %cst_126 = arith.constant dense<0.000000e+00> : vector<8x8xf32>
    %356 = tpu.matmul %354, %355, %cst_126 {dimension_numbers = #tpu.dot_dimension_numbers<[1], [0], [0], [1], [0, 0, 1, 1], [], []>} : vector<8x16xbf16>, vector<16x8xbf16>, vector<8x8xf32> -> vector<8x8xf32>
    %357 = vector.extract_strided_slice %274 {offsets = [0, 32], sizes = [8, 8], strides = [1, 1]} : vector<8x64xbf16> to vector<8x8xbf16>
    %358 = vector.extract_strided_slice %275 {offsets = [0, 32], sizes = [16, 8], strides = [1, 1]} : vector<16x64xbf16> to vector<16x8xbf16>
    %cst_127 = arith.constant dense<0.000000e+00> : vector<8x16xf32>
    %359 = tpu.matmul %357, %358, %cst_127 {dimension_numbers = #tpu.dot_dimension_numbers<[1], [1], [0], [0], [0, 0, 1, 0], [], []>} : vector<8x8xbf16>, vector<16x8xbf16>, vector<8x16xf32> -> vector<8x16xf32>
    %cst_128 = arith.constant -1.000000e+09 : f32
    %360 = vector.shape_cast %11 : vector<1x16xi1> to vector<1x16xi1>
    %361 = vector.broadcast %360 : vector<1x16xi1> to vector<8x16xi1>
    %362 = vector.broadcast %cst_128 : f32 to vector<8x16xf32>
    %363 = arith.select %361, %359, %362 : vector<8x16xi1>, vector<8x16xf32>
    %cst_129 = arith.constant dense<0xFF800000> : vector<8xf32>
    %364 = vector.multi_reduction <maximumf>, %363, %cst_129 [1] : vector<8x16xf32> to vector<8xf32>
    %365 = vector.shape_cast %364 : vector<8xf32> to vector<8x1xf32>
    %366 = vector.broadcast %365 : vector<8x1xf32> to vector<8x16xf32>
    %367 = arith.subf %363, %366 : vector<8x16xf32>
    %368 = math.exp %367 : vector<8x16xf32>
    %cst_130 = arith.constant dense<0.000000e+00> : vector<8xf32>
    %369 = vector.multi_reduction <add>, %368, %cst_130 [1] : vector<8x16xf32> to vector<8xf32>
    %370 = vector.shape_cast %369 : vector<8xf32> to vector<8x1xf32>
    %371 = tpu.reciprocal %370 {approx = true} : vector<8x1xf32> -> vector<8x1xf32>
    %372 = vector.broadcast %371 : vector<8x1xf32> to vector<8x16xf32>
    %373 = arith.mulf %368, %372 : vector<8x16xf32>
    %374 = arith.truncf %373 : vector<8x16xf32> to vector<8x16xbf16>
    %375 = vector.extract_strided_slice %276 {offsets = [0, 32], sizes = [16, 8], strides = [1, 1]} : vector<16x64xbf16> to vector<16x8xbf16>
    %cst_131 = arith.constant dense<0.000000e+00> : vector<8x8xf32>
    %376 = tpu.matmul %374, %375, %cst_131 {dimension_numbers = #tpu.dot_dimension_numbers<[1], [0], [0], [1], [0, 0, 1, 1], [], []>} : vector<8x16xbf16>, vector<16x8xbf16>, vector<8x8xf32> -> vector<8x8xf32>
    %377 = vector.extract_strided_slice %274 {offsets = [0, 40], sizes = [8, 8], strides = [1, 1]} : vector<8x64xbf16> to vector<8x8xbf16>
    %378 = vector.extract_strided_slice %275 {offsets = [0, 40], sizes = [16, 8], strides = [1, 1]} : vector<16x64xbf16> to vector<16x8xbf16>
    %cst_132 = arith.constant dense<0.000000e+00> : vector<8x16xf32>
    %379 = tpu.matmul %377, %378, %cst_132 {dimension_numbers = #tpu.dot_dimension_numbers<[1], [1], [0], [0], [0, 0, 1, 0], [], []>} : vector<8x8xbf16>, vector<16x8xbf16>, vector<8x16xf32> -> vector<8x16xf32>
    %cst_133 = arith.constant -1.000000e+09 : f32
    %380 = vector.shape_cast %11 : vector<1x16xi1> to vector<1x16xi1>
    %381 = vector.broadcast %380 : vector<1x16xi1> to vector<8x16xi1>
    %382 = vector.broadcast %cst_133 : f32 to vector<8x16xf32>
    %383 = arith.select %381, %379, %382 : vector<8x16xi1>, vector<8x16xf32>
    %cst_134 = arith.constant dense<0xFF800000> : vector<8xf32>
    %384 = vector.multi_reduction <maximumf>, %383, %cst_134 [1] : vector<8x16xf32> to vector<8xf32>
    %385 = vector.shape_cast %384 : vector<8xf32> to vector<8x1xf32>
    %386 = vector.broadcast %385 : vector<8x1xf32> to vector<8x16xf32>
    %387 = arith.subf %383, %386 : vector<8x16xf32>
    %388 = math.exp %387 : vector<8x16xf32>
    %cst_135 = arith.constant dense<0.000000e+00> : vector<8xf32>
    %389 = vector.multi_reduction <add>, %388, %cst_135 [1] : vector<8x16xf32> to vector<8xf32>
    %390 = vector.shape_cast %389 : vector<8xf32> to vector<8x1xf32>
    %391 = tpu.reciprocal %390 {approx = true} : vector<8x1xf32> -> vector<8x1xf32>
    %392 = vector.broadcast %391 : vector<8x1xf32> to vector<8x16xf32>
    %393 = arith.mulf %388, %392 : vector<8x16xf32>
    %394 = arith.truncf %393 : vector<8x16xf32> to vector<8x16xbf16>
    %395 = vector.extract_strided_slice %276 {offsets = [0, 40], sizes = [16, 8], strides = [1, 1]} : vector<16x64xbf16> to vector<16x8xbf16>
    %cst_136 = arith.constant dense<0.000000e+00> : vector<8x8xf32>
    %396 = tpu.matmul %394, %395, %cst_136 {dimension_numbers = #tpu.dot_dimension_numbers<[1], [0], [0], [1], [0, 0, 1, 1], [], []>} : vector<8x16xbf16>, vector<16x8xbf16>, vector<8x8xf32> -> vector<8x8xf32>
    %397 = vector.extract_strided_slice %274 {offsets = [0, 48], sizes = [8, 8], strides = [1, 1]} : vector<8x64xbf16> to vector<8x8xbf16>
    %398 = vector.extract_strided_slice %275 {offsets = [0, 48], sizes = [16, 8], strides = [1, 1]} : vector<16x64xbf16> to vector<16x8xbf16>
    %cst_137 = arith.constant dense<0.000000e+00> : vector<8x16xf32>
    %399 = tpu.matmul %397, %398, %cst_137 {dimension_numbers = #tpu.dot_dimension_numbers<[1], [1], [0], [0], [0, 0, 1, 0], [], []>} : vector<8x8xbf16>, vector<16x8xbf16>, vector<8x16xf32> -> vector<8x16xf32>
    %cst_138 = arith.constant -1.000000e+09 : f32
    %400 = vector.shape_cast %11 : vector<1x16xi1> to vector<1x16xi1>
    %401 = vector.broadcast %400 : vector<1x16xi1> to vector<8x16xi1>
    %402 = vector.broadcast %cst_138 : f32 to vector<8x16xf32>
    %403 = arith.select %401, %399, %402 : vector<8x16xi1>, vector<8x16xf32>
    %cst_139 = arith.constant dense<0xFF800000> : vector<8xf32>
    %404 = vector.multi_reduction <maximumf>, %403, %cst_139 [1] : vector<8x16xf32> to vector<8xf32>
    %405 = vector.shape_cast %404 : vector<8xf32> to vector<8x1xf32>
    %406 = vector.broadcast %405 : vector<8x1xf32> to vector<8x16xf32>
    %407 = arith.subf %403, %406 : vector<8x16xf32>
    %408 = math.exp %407 : vector<8x16xf32>
    %cst_140 = arith.constant dense<0.000000e+00> : vector<8xf32>
    %409 = vector.multi_reduction <add>, %408, %cst_140 [1] : vector<8x16xf32> to vector<8xf32>
    %410 = vector.shape_cast %409 : vector<8xf32> to vector<8x1xf32>
    %411 = tpu.reciprocal %410 {approx = true} : vector<8x1xf32> -> vector<8x1xf32>
    %412 = vector.broadcast %411 : vector<8x1xf32> to vector<8x16xf32>
    %413 = arith.mulf %408, %412 : vector<8x16xf32>
    %414 = arith.truncf %413 : vector<8x16xf32> to vector<8x16xbf16>
    %415 = vector.extract_strided_slice %276 {offsets = [0, 48], sizes = [16, 8], strides = [1, 1]} : vector<16x64xbf16> to vector<16x8xbf16>
    %cst_141 = arith.constant dense<0.000000e+00> : vector<8x8xf32>
    %416 = tpu.matmul %414, %415, %cst_141 {dimension_numbers = #tpu.dot_dimension_numbers<[1], [0], [0], [1], [0, 0, 1, 1], [], []>} : vector<8x16xbf16>, vector<16x8xbf16>, vector<8x8xf32> -> vector<8x8xf32>
    %417 = vector.extract_strided_slice %274 {offsets = [0, 56], sizes = [8, 8], strides = [1, 1]} : vector<8x64xbf16> to vector<8x8xbf16>
    %418 = vector.extract_strided_slice %275 {offsets = [0, 56], sizes = [16, 8], strides = [1, 1]} : vector<16x64xbf16> to vector<16x8xbf16>
    %cst_142 = arith.constant dense<0.000000e+00> : vector<8x16xf32>
    %419 = tpu.matmul %417, %418, %cst_142 {dimension_numbers = #tpu.dot_dimension_numbers<[1], [1], [0], [0], [0, 0, 1, 0], [], []>} : vector<8x8xbf16>, vector<16x8xbf16>, vector<8x16xf32> -> vector<8x16xf32>
    %cst_143 = arith.constant -1.000000e+09 : f32
    %420 = vector.shape_cast %11 : vector<1x16xi1> to vector<1x16xi1>
    %421 = vector.broadcast %420 : vector<1x16xi1> to vector<8x16xi1>
    %422 = vector.broadcast %cst_143 : f32 to vector<8x16xf32>
    %423 = arith.select %421, %419, %422 : vector<8x16xi1>, vector<8x16xf32>
    %cst_144 = arith.constant dense<0xFF800000> : vector<8xf32>
    %424 = vector.multi_reduction <maximumf>, %423, %cst_144 [1] : vector<8x16xf32> to vector<8xf32>
    %425 = vector.shape_cast %424 : vector<8xf32> to vector<8x1xf32>
    %426 = vector.broadcast %425 : vector<8x1xf32> to vector<8x16xf32>
    %427 = arith.subf %423, %426 : vector<8x16xf32>
    %428 = math.exp %427 : vector<8x16xf32>
    %cst_145 = arith.constant dense<0.000000e+00> : vector<8xf32>
    %429 = vector.multi_reduction <add>, %428, %cst_145 [1] : vector<8x16xf32> to vector<8xf32>
    %430 = vector.shape_cast %429 : vector<8xf32> to vector<8x1xf32>
    %431 = tpu.reciprocal %430 {approx = true} : vector<8x1xf32> -> vector<8x1xf32>
    %432 = vector.broadcast %431 : vector<8x1xf32> to vector<8x16xf32>
    %433 = arith.mulf %428, %432 : vector<8x16xf32>
    %434 = arith.truncf %433 : vector<8x16xf32> to vector<8x16xbf16>
    %435 = vector.extract_strided_slice %276 {offsets = [0, 56], sizes = [16, 8], strides = [1, 1]} : vector<16x64xbf16> to vector<16x8xbf16>
    %cst_146 = arith.constant dense<0.000000e+00> : vector<8x8xf32>
    %436 = tpu.matmul %434, %435, %cst_146 {dimension_numbers = #tpu.dot_dimension_numbers<[1], [0], [0], [1], [0, 0, 1, 1], [], []>} : vector<8x16xbf16>, vector<16x8xbf16>, vector<8x8xf32> -> vector<8x8xf32>
    %437 = tpu.concatenate %296, %316, %336, %356, %376, %396, %416, %436 in 1 : vector<8x8xf32>, vector<8x8xf32>, vector<8x8xf32>, vector<8x8xf32>, vector<8x8xf32>, vector<8x8xf32>, vector<8x8xf32>, vector<8x8xf32> -> vector<8x64xf32>
    %c0_147 = arith.constant 0 : index
    %c0_148 = arith.constant 0 : index
    %438 = vector.load %arg24[%c0_147, %c0_148] : memref<64x64xbf16, #tpu.memory_space<vmem>>, vector<64x64xbf16>
    %439 = arith.truncf %437 : vector<8x64xf32> to vector<8x64xbf16>
    %cst_149 = arith.constant dense<0.000000e+00> : vector<8x64xf32>
    %440 = tpu.matmul %439, %438, %cst_149 {dimension_numbers = #tpu.dot_dimension_numbers<[1], [0], [0], [1], [0, 0, 1, 1], [], []>} : vector<8x64xbf16>, vector<64x64xbf16>, vector<8x64xf32> -> vector<8x64xf32>
    %c0_150 = arith.constant 0 : index
    %c0_151 = arith.constant 0 : index
    %441 = vector.load %arg25[%c0_150, %c0_151] : memref<1x64xf32, #tpu.memory_space<vmem>>, vector<1x64xf32>
    %442 = vector.broadcast %441 : vector<1x64xf32> to vector<8x64xf32>
    %443 = arith.addf %440, %442 : vector<8x64xf32>
    %c0_152 = arith.constant 0 : index
    %c0_153 = arith.constant 0 : index
    %c0_154 = arith.constant 0 : index
    %444 = vector.load %arg21[%c0_152, %c0_153, %c0_154] : memref<1x8x64xf32, #tpu.memory_space<vmem>>, vector<1x8x64xf32>
    %445 = vector.shape_cast %444 : vector<1x8x64xf32> to vector<8x64xf32>
    %446 = arith.addf %445, %443 : vector<8x64xf32>
    %cst_155 = arith.constant dense<0.000000e+00> : vector<8xf32>
    %447 = vector.multi_reduction <add>, %446, %cst_155 [1] : vector<8x64xf32> to vector<8xf32>
    %448 = vector.shape_cast %447 : vector<8xf32> to vector<8x1xf32>
    %cst_156 = arith.constant 6.400000e+01 : f32
    %449 = vector.broadcast %cst_156 : f32 to vector<8x1xf32>
    %450 = arith.divf %448, %449 : vector<8x1xf32>
    %451 = vector.broadcast %450 : vector<8x1xf32> to vector<8x64xf32>
    %452 = arith.subf %446, %451 : vector<8x64xf32>
    %453 = arith.mulf %452, %452 : vector<8x64xf32>
    %cst_157 = arith.constant dense<0.000000e+00> : vector<8xf32>
    %454 = vector.multi_reduction <add>, %453, %cst_157 [1] : vector<8x64xf32> to vector<8xf32>
    %455 = vector.shape_cast %454 : vector<8xf32> to vector<8x1xf32>
    %cst_158 = arith.constant 6.400000e+01 : f32
    %456 = vector.broadcast %cst_158 : f32 to vector<8x1xf32>
    %457 = arith.divf %455, %456 : vector<8x1xf32>
    %458 = vector.broadcast %450 : vector<8x1xf32> to vector<8x64xf32>
    %459 = arith.subf %446, %458 : vector<8x64xf32>
    %cst_159 = arith.constant 9.99999974E-6 : f32
    %460 = vector.broadcast %cst_159 : f32 to vector<8x1xf32>
    %461 = arith.addf %457, %460 : vector<8x1xf32>
    %462 = math.rsqrt %461 : vector<8x1xf32>
    %463 = vector.broadcast %462 : vector<8x1xf32> to vector<8x64xf32>
    %464 = arith.mulf %459, %463 : vector<8x64xf32>
    %c0_160 = arith.constant 0 : index
    %c0_161 = arith.constant 0 : index
    %465 = vector.load %arg26[%c0_160, %c0_161] : memref<1x64xf32, #tpu.memory_space<vmem>>, vector<1x64xf32>
    %466 = vector.broadcast %465 : vector<1x64xf32> to vector<8x64xf32>
    %467 = arith.mulf %464, %466 : vector<8x64xf32>
    %c0_162 = arith.constant 0 : index
    %c0_163 = arith.constant 0 : index
    %468 = vector.load %arg27[%c0_162, %c0_163] : memref<1x64xf32, #tpu.memory_space<vmem>>, vector<1x64xf32>
    %469 = vector.broadcast %468 : vector<1x64xf32> to vector<8x64xf32>
    %470 = arith.addf %467, %469 : vector<8x64xf32>
    %c0_164 = arith.constant 0 : index
    %c0_165 = arith.constant 0 : index
    %471 = vector.load %arg28[%c0_164, %c0_165] : memref<64x256xbf16, #tpu.memory_space<vmem>>, vector<64x256xbf16>
    %472 = arith.truncf %470 : vector<8x64xf32> to vector<8x64xbf16>
    %cst_166 = arith.constant dense<0.000000e+00> : vector<8x256xf32>
    %473 = tpu.matmul %472, %471, %cst_166 {dimension_numbers = #tpu.dot_dimension_numbers<[1], [0], [0], [1], [0, 0, 1, 1], [], []>} : vector<8x64xbf16>, vector<64x256xbf16>, vector<8x256xf32> -> vector<8x256xf32>
    %c0_167 = arith.constant 0 : index
    %c0_168 = arith.constant 0 : index
    %474 = vector.load %arg29[%c0_167, %c0_168] : memref<1x256xf32, #tpu.memory_space<vmem>>, vector<1x256xf32>
    %475 = vector.broadcast %474 : vector<1x256xf32> to vector<8x256xf32>
    %476 = arith.addf %473, %475 : vector<8x256xf32>
    %cst_169 = arith.constant 0.000000e+00 : f32
    %477 = vector.broadcast %cst_169 : f32 to vector<8x256xf32>
    %478 = arith.maximumf %476, %477 : vector<8x256xf32>
    %c0_170 = arith.constant 0 : index
    %c0_171 = arith.constant 0 : index
    %479 = vector.load %arg30[%c0_170, %c0_171] : memref<256x64xbf16, #tpu.memory_space<vmem>>, vector<256x64xbf16>
    %480 = arith.truncf %478 : vector<8x256xf32> to vector<8x256xbf16>
    %cst_172 = arith.constant dense<0.000000e+00> : vector<8x64xf32>
    %481 = tpu.matmul %480, %479, %cst_172 {dimension_numbers = #tpu.dot_dimension_numbers<[1], [0], [0], [1], [0, 0, 1, 1], [], []>} : vector<8x256xbf16>, vector<256x64xbf16>, vector<8x64xf32> -> vector<8x64xf32>
    %c0_173 = arith.constant 0 : index
    %c0_174 = arith.constant 0 : index
    %482 = vector.load %arg31[%c0_173, %c0_174] : memref<1x64xf32, #tpu.memory_space<vmem>>, vector<1x64xf32>
    %483 = vector.broadcast %482 : vector<1x64xf32> to vector<8x64xf32>
    %484 = arith.addf %481, %483 : vector<8x64xf32>
    %485 = arith.addf %470, %484 : vector<8x64xf32>
    %cst_175 = arith.constant dense<0.000000e+00> : vector<8xf32>
    %486 = vector.multi_reduction <add>, %485, %cst_175 [1] : vector<8x64xf32> to vector<8xf32>
    %487 = vector.shape_cast %486 : vector<8xf32> to vector<8x1xf32>
    %cst_176 = arith.constant 6.400000e+01 : f32
    %488 = vector.broadcast %cst_176 : f32 to vector<8x1xf32>
    %489 = arith.divf %487, %488 : vector<8x1xf32>
    %490 = vector.broadcast %489 : vector<8x1xf32> to vector<8x64xf32>
    %491 = arith.subf %485, %490 : vector<8x64xf32>
    %492 = arith.mulf %491, %491 : vector<8x64xf32>
    %cst_177 = arith.constant dense<0.000000e+00> : vector<8xf32>
    %493 = vector.multi_reduction <add>, %492, %cst_177 [1] : vector<8x64xf32> to vector<8xf32>
    %494 = vector.shape_cast %493 : vector<8xf32> to vector<8x1xf32>
    %cst_178 = arith.constant 6.400000e+01 : f32
    %495 = vector.broadcast %cst_178 : f32 to vector<8x1xf32>
    %496 = arith.divf %494, %495 : vector<8x1xf32>
    %497 = vector.broadcast %489 : vector<8x1xf32> to vector<8x64xf32>
    %498 = arith.subf %485, %497 : vector<8x64xf32>
    %cst_179 = arith.constant 9.99999974E-6 : f32
    %499 = vector.broadcast %cst_179 : f32 to vector<8x1xf32>
    %500 = arith.addf %496, %499 : vector<8x1xf32>
    %501 = math.rsqrt %500 : vector<8x1xf32>
    %502 = vector.broadcast %501 : vector<8x1xf32> to vector<8x64xf32>
    %503 = arith.mulf %498, %502 : vector<8x64xf32>
    %c0_180 = arith.constant 0 : index
    %c0_181 = arith.constant 0 : index
    %504 = vector.load %arg32[%c0_180, %c0_181] : memref<1x64xf32, #tpu.memory_space<vmem>>, vector<1x64xf32>
    %505 = vector.broadcast %504 : vector<1x64xf32> to vector<8x64xf32>
    %506 = arith.mulf %503, %505 : vector<8x64xf32>
    %c0_182 = arith.constant 0 : index
    %c0_183 = arith.constant 0 : index
    %507 = vector.load %arg33[%c0_182, %c0_183] : memref<1x64xf32, #tpu.memory_space<vmem>>, vector<1x64xf32>
    %508 = vector.broadcast %507 : vector<1x64xf32> to vector<8x64xf32>
    %509 = arith.addf %506, %508 : vector<8x64xf32>
    %c0_184 = arith.constant 0 : index
    %c0_185 = arith.constant 0 : index
    %510 = vector.load %arg36[%c0_184, %c0_185] : memref<64x128xbf16, #tpu.memory_space<vmem>>, vector<64x128xbf16>
    %511 = arith.truncf %263 : vector<16x64xf32> to vector<16x64xbf16>
    %cst_186 = arith.constant dense<0.000000e+00> : vector<16x128xf32>
    %512 = tpu.matmul %511, %510, %cst_186 {dimension_numbers = #tpu.dot_dimension_numbers<[1], [0], [0], [1], [0, 0, 1, 1], [], []>} : vector<16x64xbf16>, vector<64x128xbf16>, vector<16x128xf32> -> vector<16x128xf32>
    %c0_187 = arith.constant 0 : index
    %c0_188 = arith.constant 0 : index
    %513 = vector.load %arg37[%c0_187, %c0_188] : memref<1x128xf32, #tpu.memory_space<vmem>>, vector<1x128xf32>
    %514 = vector.broadcast %513 : vector<1x128xf32> to vector<16x128xf32>
    %515 = arith.addf %512, %514 : vector<16x128xf32>
    %516 = vector.extract_strided_slice %515 {offsets = [0, 0], sizes = [16, 64], strides = [1, 1]} : vector<16x128xf32> to vector<16x64xf32>
    %517 = vector.extract_strided_slice %515 {offsets = [0, 64], sizes = [16, 64], strides = [1, 1]} : vector<16x128xf32> to vector<16x64xf32>
    %c0_189 = arith.constant 0 : index
    %c0_190 = arith.constant 0 : index
    %c0_191 = arith.constant 0 : index
    %518 = vector.load %arg34[%c0_189, %c0_190, %c0_191] : memref<1x8x64xf32, #tpu.memory_space<vmem>>, vector<1x8x64xf32>
    %519 = vector.shape_cast %518 : vector<1x8x64xf32> to vector<8x64xf32>
    %520 = arith.truncf %519 : vector<8x64xf32> to vector<8x64xbf16>
    %521 = arith.truncf %516 : vector<16x64xf32> to vector<16x64xbf16>
    %522 = arith.truncf %517 : vector<16x64xf32> to vector<16x64xbf16>
    %523 = vector.extract_strided_slice %520 {offsets = [0, 0], sizes = [8, 8], strides = [1, 1]} : vector<8x64xbf16> to vector<8x8xbf16>
    %524 = vector.extract_strided_slice %521 {offsets = [0, 0], sizes = [16, 8], strides = [1, 1]} : vector<16x64xbf16> to vector<16x8xbf16>
    %cst_192 = arith.constant dense<0.000000e+00> : vector<8x16xf32>
    %525 = tpu.matmul %523, %524, %cst_192 {dimension_numbers = #tpu.dot_dimension_numbers<[1], [1], [0], [0], [0, 0, 1, 0], [], []>} : vector<8x8xbf16>, vector<16x8xbf16>, vector<8x16xf32> -> vector<8x16xf32>
    %cst_193 = arith.constant -1.000000e+09 : f32
    %526 = vector.shape_cast %11 : vector<1x16xi1> to vector<1x16xi1>
    %527 = vector.broadcast %526 : vector<1x16xi1> to vector<8x16xi1>
    %528 = vector.broadcast %cst_193 : f32 to vector<8x16xf32>
    %529 = arith.select %527, %525, %528 : vector<8x16xi1>, vector<8x16xf32>
    %cst_194 = arith.constant dense<0xFF800000> : vector<8xf32>
    %530 = vector.multi_reduction <maximumf>, %529, %cst_194 [1] : vector<8x16xf32> to vector<8xf32>
    %531 = vector.shape_cast %530 : vector<8xf32> to vector<8x1xf32>
    %532 = vector.broadcast %531 : vector<8x1xf32> to vector<8x16xf32>
    %533 = arith.subf %529, %532 : vector<8x16xf32>
    %534 = math.exp %533 : vector<8x16xf32>
    %cst_195 = arith.constant dense<0.000000e+00> : vector<8xf32>
    %535 = vector.multi_reduction <add>, %534, %cst_195 [1] : vector<8x16xf32> to vector<8xf32>
    %536 = vector.shape_cast %535 : vector<8xf32> to vector<8x1xf32>
    %537 = tpu.reciprocal %536 {approx = true} : vector<8x1xf32> -> vector<8x1xf32>
    %538 = vector.broadcast %537 : vector<8x1xf32> to vector<8x16xf32>
    %539 = arith.mulf %534, %538 : vector<8x16xf32>
    %540 = arith.truncf %539 : vector<8x16xf32> to vector<8x16xbf16>
    %541 = vector.extract_strided_slice %522 {offsets = [0, 0], sizes = [16, 8], strides = [1, 1]} : vector<16x64xbf16> to vector<16x8xbf16>
    %cst_196 = arith.constant dense<0.000000e+00> : vector<8x8xf32>
    %542 = tpu.matmul %540, %541, %cst_196 {dimension_numbers = #tpu.dot_dimension_numbers<[1], [0], [0], [1], [0, 0, 1, 1], [], []>} : vector<8x16xbf16>, vector<16x8xbf16>, vector<8x8xf32> -> vector<8x8xf32>
    %543 = vector.extract_strided_slice %520 {offsets = [0, 8], sizes = [8, 8], strides = [1, 1]} : vector<8x64xbf16> to vector<8x8xbf16>
    %544 = vector.extract_strided_slice %521 {offsets = [0, 8], sizes = [16, 8], strides = [1, 1]} : vector<16x64xbf16> to vector<16x8xbf16>
    %cst_197 = arith.constant dense<0.000000e+00> : vector<8x16xf32>
    %545 = tpu.matmul %543, %544, %cst_197 {dimension_numbers = #tpu.dot_dimension_numbers<[1], [1], [0], [0], [0, 0, 1, 0], [], []>} : vector<8x8xbf16>, vector<16x8xbf16>, vector<8x16xf32> -> vector<8x16xf32>
    %cst_198 = arith.constant -1.000000e+09 : f32
    %546 = vector.shape_cast %11 : vector<1x16xi1> to vector<1x16xi1>
    %547 = vector.broadcast %546 : vector<1x16xi1> to vector<8x16xi1>
    %548 = vector.broadcast %cst_198 : f32 to vector<8x16xf32>
    %549 = arith.select %547, %545, %548 : vector<8x16xi1>, vector<8x16xf32>
    %cst_199 = arith.constant dense<0xFF800000> : vector<8xf32>
    %550 = vector.multi_reduction <maximumf>, %549, %cst_199 [1] : vector<8x16xf32> to vector<8xf32>
    %551 = vector.shape_cast %550 : vector<8xf32> to vector<8x1xf32>
    %552 = vector.broadcast %551 : vector<8x1xf32> to vector<8x16xf32>
    %553 = arith.subf %549, %552 : vector<8x16xf32>
    %554 = math.exp %553 : vector<8x16xf32>
    %cst_200 = arith.constant dense<0.000000e+00> : vector<8xf32>
    %555 = vector.multi_reduction <add>, %554, %cst_200 [1] : vector<8x16xf32> to vector<8xf32>
    %556 = vector.shape_cast %555 : vector<8xf32> to vector<8x1xf32>
    %557 = tpu.reciprocal %556 {approx = true} : vector<8x1xf32> -> vector<8x1xf32>
    %558 = vector.broadcast %557 : vector<8x1xf32> to vector<8x16xf32>
    %559 = arith.mulf %554, %558 : vector<8x16xf32>
    %560 = arith.truncf %559 : vector<8x16xf32> to vector<8x16xbf16>
    %561 = vector.extract_strided_slice %522 {offsets = [0, 8], sizes = [16, 8], strides = [1, 1]} : vector<16x64xbf16> to vector<16x8xbf16>
    %cst_201 = arith.constant dense<0.000000e+00> : vector<8x8xf32>
    %562 = tpu.matmul %560, %561, %cst_201 {dimension_numbers = #tpu.dot_dimension_numbers<[1], [0], [0], [1], [0, 0, 1, 1], [], []>} : vector<8x16xbf16>, vector<16x8xbf16>, vector<8x8xf32> -> vector<8x8xf32>
    %563 = vector.extract_strided_slice %520 {offsets = [0, 16], sizes = [8, 8], strides = [1, 1]} : vector<8x64xbf16> to vector<8x8xbf16>
    %564 = vector.extract_strided_slice %521 {offsets = [0, 16], sizes = [16, 8], strides = [1, 1]} : vector<16x64xbf16> to vector<16x8xbf16>
    %cst_202 = arith.constant dense<0.000000e+00> : vector<8x16xf32>
    %565 = tpu.matmul %563, %564, %cst_202 {dimension_numbers = #tpu.dot_dimension_numbers<[1], [1], [0], [0], [0, 0, 1, 0], [], []>} : vector<8x8xbf16>, vector<16x8xbf16>, vector<8x16xf32> -> vector<8x16xf32>
    %cst_203 = arith.constant -1.000000e+09 : f32
    %566 = vector.shape_cast %11 : vector<1x16xi1> to vector<1x16xi1>
    %567 = vector.broadcast %566 : vector<1x16xi1> to vector<8x16xi1>
    %568 = vector.broadcast %cst_203 : f32 to vector<8x16xf32>
    %569 = arith.select %567, %565, %568 : vector<8x16xi1>, vector<8x16xf32>
    %cst_204 = arith.constant dense<0xFF800000> : vector<8xf32>
    %570 = vector.multi_reduction <maximumf>, %569, %cst_204 [1] : vector<8x16xf32> to vector<8xf32>
    %571 = vector.shape_cast %570 : vector<8xf32> to vector<8x1xf32>
    %572 = vector.broadcast %571 : vector<8x1xf32> to vector<8x16xf32>
    %573 = arith.subf %569, %572 : vector<8x16xf32>
    %574 = math.exp %573 : vector<8x16xf32>
    %cst_205 = arith.constant dense<0.000000e+00> : vector<8xf32>
    %575 = vector.multi_reduction <add>, %574, %cst_205 [1] : vector<8x16xf32> to vector<8xf32>
    %576 = vector.shape_cast %575 : vector<8xf32> to vector<8x1xf32>
    %577 = tpu.reciprocal %576 {approx = true} : vector<8x1xf32> -> vector<8x1xf32>
    %578 = vector.broadcast %577 : vector<8x1xf32> to vector<8x16xf32>
    %579 = arith.mulf %574, %578 : vector<8x16xf32>
    %580 = arith.truncf %579 : vector<8x16xf32> to vector<8x16xbf16>
    %581 = vector.extract_strided_slice %522 {offsets = [0, 16], sizes = [16, 8], strides = [1, 1]} : vector<16x64xbf16> to vector<16x8xbf16>
    %cst_206 = arith.constant dense<0.000000e+00> : vector<8x8xf32>
    %582 = tpu.matmul %580, %581, %cst_206 {dimension_numbers = #tpu.dot_dimension_numbers<[1], [0], [0], [1], [0, 0, 1, 1], [], []>} : vector<8x16xbf16>, vector<16x8xbf16>, vector<8x8xf32> -> vector<8x8xf32>
    %583 = vector.extract_strided_slice %520 {offsets = [0, 24], sizes = [8, 8], strides = [1, 1]} : vector<8x64xbf16> to vector<8x8xbf16>
    %584 = vector.extract_strided_slice %521 {offsets = [0, 24], sizes = [16, 8], strides = [1, 1]} : vector<16x64xbf16> to vector<16x8xbf16>
    %cst_207 = arith.constant dense<0.000000e+00> : vector<8x16xf32>
    %585 = tpu.matmul %583, %584, %cst_207 {dimension_numbers = #tpu.dot_dimension_numbers<[1], [1], [0], [0], [0, 0, 1, 0], [], []>} : vector<8x8xbf16>, vector<16x8xbf16>, vector<8x16xf32> -> vector<8x16xf32>
    %cst_208 = arith.constant -1.000000e+09 : f32
    %586 = vector.shape_cast %11 : vector<1x16xi1> to vector<1x16xi1>
    %587 = vector.broadcast %586 : vector<1x16xi1> to vector<8x16xi1>
    %588 = vector.broadcast %cst_208 : f32 to vector<8x16xf32>
    %589 = arith.select %587, %585, %588 : vector<8x16xi1>, vector<8x16xf32>
    %cst_209 = arith.constant dense<0xFF800000> : vector<8xf32>
    %590 = vector.multi_reduction <maximumf>, %589, %cst_209 [1] : vector<8x16xf32> to vector<8xf32>
    %591 = vector.shape_cast %590 : vector<8xf32> to vector<8x1xf32>
    %592 = vector.broadcast %591 : vector<8x1xf32> to vector<8x16xf32>
    %593 = arith.subf %589, %592 : vector<8x16xf32>
    %594 = math.exp %593 : vector<8x16xf32>
    %cst_210 = arith.constant dense<0.000000e+00> : vector<8xf32>
    %595 = vector.multi_reduction <add>, %594, %cst_210 [1] : vector<8x16xf32> to vector<8xf32>
    %596 = vector.shape_cast %595 : vector<8xf32> to vector<8x1xf32>
    %597 = tpu.reciprocal %596 {approx = true} : vector<8x1xf32> -> vector<8x1xf32>
    %598 = vector.broadcast %597 : vector<8x1xf32> to vector<8x16xf32>
    %599 = arith.mulf %594, %598 : vector<8x16xf32>
    %600 = arith.truncf %599 : vector<8x16xf32> to vector<8x16xbf16>
    %601 = vector.extract_strided_slice %522 {offsets = [0, 24], sizes = [16, 8], strides = [1, 1]} : vector<16x64xbf16> to vector<16x8xbf16>
    %cst_211 = arith.constant dense<0.000000e+00> : vector<8x8xf32>
    %602 = tpu.matmul %600, %601, %cst_211 {dimension_numbers = #tpu.dot_dimension_numbers<[1], [0], [0], [1], [0, 0, 1, 1], [], []>} : vector<8x16xbf16>, vector<16x8xbf16>, vector<8x8xf32> -> vector<8x8xf32>
    %603 = vector.extract_strided_slice %520 {offsets = [0, 32], sizes = [8, 8], strides = [1, 1]} : vector<8x64xbf16> to vector<8x8xbf16>
    %604 = vector.extract_strided_slice %521 {offsets = [0, 32], sizes = [16, 8], strides = [1, 1]} : vector<16x64xbf16> to vector<16x8xbf16>
    %cst_212 = arith.constant dense<0.000000e+00> : vector<8x16xf32>
    %605 = tpu.matmul %603, %604, %cst_212 {dimension_numbers = #tpu.dot_dimension_numbers<[1], [1], [0], [0], [0, 0, 1, 0], [], []>} : vector<8x8xbf16>, vector<16x8xbf16>, vector<8x16xf32> -> vector<8x16xf32>
    %cst_213 = arith.constant -1.000000e+09 : f32
    %606 = vector.shape_cast %11 : vector<1x16xi1> to vector<1x16xi1>
    %607 = vector.broadcast %606 : vector<1x16xi1> to vector<8x16xi1>
    %608 = vector.broadcast %cst_213 : f32 to vector<8x16xf32>
    %609 = arith.select %607, %605, %608 : vector<8x16xi1>, vector<8x16xf32>
    %cst_214 = arith.constant dense<0xFF800000> : vector<8xf32>
    %610 = vector.multi_reduction <maximumf>, %609, %cst_214 [1] : vector<8x16xf32> to vector<8xf32>
    %611 = vector.shape_cast %610 : vector<8xf32> to vector<8x1xf32>
    %612 = vector.broadcast %611 : vector<8x1xf32> to vector<8x16xf32>
    %613 = arith.subf %609, %612 : vector<8x16xf32>
    %614 = math.exp %613 : vector<8x16xf32>
    %cst_215 = arith.constant dense<0.000000e+00> : vector<8xf32>
    %615 = vector.multi_reduction <add>, %614, %cst_215 [1] : vector<8x16xf32> to vector<8xf32>
    %616 = vector.shape_cast %615 : vector<8xf32> to vector<8x1xf32>
    %617 = tpu.reciprocal %616 {approx = true} : vector<8x1xf32> -> vector<8x1xf32>
    %618 = vector.broadcast %617 : vector<8x1xf32> to vector<8x16xf32>
    %619 = arith.mulf %614, %618 : vector<8x16xf32>
    %620 = arith.truncf %619 : vector<8x16xf32> to vector<8x16xbf16>
    %621 = vector.extract_strided_slice %522 {offsets = [0, 32], sizes = [16, 8], strides = [1, 1]} : vector<16x64xbf16> to vector<16x8xbf16>
    %cst_216 = arith.constant dense<0.000000e+00> : vector<8x8xf32>
    %622 = tpu.matmul %620, %621, %cst_216 {dimension_numbers = #tpu.dot_dimension_numbers<[1], [0], [0], [1], [0, 0, 1, 1], [], []>} : vector<8x16xbf16>, vector<16x8xbf16>, vector<8x8xf32> -> vector<8x8xf32>
    %623 = vector.extract_strided_slice %520 {offsets = [0, 40], sizes = [8, 8], strides = [1, 1]} : vector<8x64xbf16> to vector<8x8xbf16>
    %624 = vector.extract_strided_slice %521 {offsets = [0, 40], sizes = [16, 8], strides = [1, 1]} : vector<16x64xbf16> to vector<16x8xbf16>
    %cst_217 = arith.constant dense<0.000000e+00> : vector<8x16xf32>
    %625 = tpu.matmul %623, %624, %cst_217 {dimension_numbers = #tpu.dot_dimension_numbers<[1], [1], [0], [0], [0, 0, 1, 0], [], []>} : vector<8x8xbf16>, vector<16x8xbf16>, vector<8x16xf32> -> vector<8x16xf32>
    %cst_218 = arith.constant -1.000000e+09 : f32
    %626 = vector.shape_cast %11 : vector<1x16xi1> to vector<1x16xi1>
    %627 = vector.broadcast %626 : vector<1x16xi1> to vector<8x16xi1>
    %628 = vector.broadcast %cst_218 : f32 to vector<8x16xf32>
    %629 = arith.select %627, %625, %628 : vector<8x16xi1>, vector<8x16xf32>
    %cst_219 = arith.constant dense<0xFF800000> : vector<8xf32>
    %630 = vector.multi_reduction <maximumf>, %629, %cst_219 [1] : vector<8x16xf32> to vector<8xf32>
    %631 = vector.shape_cast %630 : vector<8xf32> to vector<8x1xf32>
    %632 = vector.broadcast %631 : vector<8x1xf32> to vector<8x16xf32>
    %633 = arith.subf %629, %632 : vector<8x16xf32>
    %634 = math.exp %633 : vector<8x16xf32>
    %cst_220 = arith.constant dense<0.000000e+00> : vector<8xf32>
    %635 = vector.multi_reduction <add>, %634, %cst_220 [1] : vector<8x16xf32> to vector<8xf32>
    %636 = vector.shape_cast %635 : vector<8xf32> to vector<8x1xf32>
    %637 = tpu.reciprocal %636 {approx = true} : vector<8x1xf32> -> vector<8x1xf32>
    %638 = vector.broadcast %637 : vector<8x1xf32> to vector<8x16xf32>
    %639 = arith.mulf %634, %638 : vector<8x16xf32>
    %640 = arith.truncf %639 : vector<8x16xf32> to vector<8x16xbf16>
    %641 = vector.extract_strided_slice %522 {offsets = [0, 40], sizes = [16, 8], strides = [1, 1]} : vector<16x64xbf16> to vector<16x8xbf16>
    %cst_221 = arith.constant dense<0.000000e+00> : vector<8x8xf32>
    %642 = tpu.matmul %640, %641, %cst_221 {dimension_numbers = #tpu.dot_dimension_numbers<[1], [0], [0], [1], [0, 0, 1, 1], [], []>} : vector<8x16xbf16>, vector<16x8xbf16>, vector<8x8xf32> -> vector<8x8xf32>
    %643 = vector.extract_strided_slice %520 {offsets = [0, 48], sizes = [8, 8], strides = [1, 1]} : vector<8x64xbf16> to vector<8x8xbf16>
    %644 = vector.extract_strided_slice %521 {offsets = [0, 48], sizes = [16, 8], strides = [1, 1]} : vector<16x64xbf16> to vector<16x8xbf16>
    %cst_222 = arith.constant dense<0.000000e+00> : vector<8x16xf32>
    %645 = tpu.matmul %643, %644, %cst_222 {dimension_numbers = #tpu.dot_dimension_numbers<[1], [1], [0], [0], [0, 0, 1, 0], [], []>} : vector<8x8xbf16>, vector<16x8xbf16>, vector<8x16xf32> -> vector<8x16xf32>
    %cst_223 = arith.constant -1.000000e+09 : f32
    %646 = vector.shape_cast %11 : vector<1x16xi1> to vector<1x16xi1>
    %647 = vector.broadcast %646 : vector<1x16xi1> to vector<8x16xi1>
    %648 = vector.broadcast %cst_223 : f32 to vector<8x16xf32>
    %649 = arith.select %647, %645, %648 : vector<8x16xi1>, vector<8x16xf32>
    %cst_224 = arith.constant dense<0xFF800000> : vector<8xf32>
    %650 = vector.multi_reduction <maximumf>, %649, %cst_224 [1] : vector<8x16xf32> to vector<8xf32>
    %651 = vector.shape_cast %650 : vector<8xf32> to vector<8x1xf32>
    %652 = vector.broadcast %651 : vector<8x1xf32> to vector<8x16xf32>
    %653 = arith.subf %649, %652 : vector<8x16xf32>
    %654 = math.exp %653 : vector<8x16xf32>
    %cst_225 = arith.constant dense<0.000000e+00> : vector<8xf32>
    %655 = vector.multi_reduction <add>, %654, %cst_225 [1] : vector<8x16xf32> to vector<8xf32>
    %656 = vector.shape_cast %655 : vector<8xf32> to vector<8x1xf32>
    %657 = tpu.reciprocal %656 {approx = true} : vector<8x1xf32> -> vector<8x1xf32>
    %658 = vector.broadcast %657 : vector<8x1xf32> to vector<8x16xf32>
    %659 = arith.mulf %654, %658 : vector<8x16xf32>
    %660 = arith.truncf %659 : vector<8x16xf32> to vector<8x16xbf16>
    %661 = vector.extract_strided_slice %522 {offsets = [0, 48], sizes = [16, 8], strides = [1, 1]} : vector<16x64xbf16> to vector<16x8xbf16>
    %cst_226 = arith.constant dense<0.000000e+00> : vector<8x8xf32>
    %662 = tpu.matmul %660, %661, %cst_226 {dimension_numbers = #tpu.dot_dimension_numbers<[1], [0], [0], [1], [0, 0, 1, 1], [], []>} : vector<8x16xbf16>, vector<16x8xbf16>, vector<8x8xf32> -> vector<8x8xf32>
    %663 = vector.extract_strided_slice %520 {offsets = [0, 56], sizes = [8, 8], strides = [1, 1]} : vector<8x64xbf16> to vector<8x8xbf16>
    %664 = vector.extract_strided_slice %521 {offsets = [0, 56], sizes = [16, 8], strides = [1, 1]} : vector<16x64xbf16> to vector<16x8xbf16>
    %cst_227 = arith.constant dense<0.000000e+00> : vector<8x16xf32>
    %665 = tpu.matmul %663, %664, %cst_227 {dimension_numbers = #tpu.dot_dimension_numbers<[1], [1], [0], [0], [0, 0, 1, 0], [], []>} : vector<8x8xbf16>, vector<16x8xbf16>, vector<8x16xf32> -> vector<8x16xf32>
    %cst_228 = arith.constant -1.000000e+09 : f32
    %666 = vector.shape_cast %11 : vector<1x16xi1> to vector<1x16xi1>
    %667 = vector.broadcast %666 : vector<1x16xi1> to vector<8x16xi1>
    %668 = vector.broadcast %cst_228 : f32 to vector<8x16xf32>
    %669 = arith.select %667, %665, %668 : vector<8x16xi1>, vector<8x16xf32>
    %cst_229 = arith.constant dense<0xFF800000> : vector<8xf32>
    %670 = vector.multi_reduction <maximumf>, %669, %cst_229 [1] : vector<8x16xf32> to vector<8xf32>
    %671 = vector.shape_cast %670 : vector<8xf32> to vector<8x1xf32>
    %672 = vector.broadcast %671 : vector<8x1xf32> to vector<8x16xf32>
    %673 = arith.subf %669, %672 : vector<8x16xf32>
    %674 = math.exp %673 : vector<8x16xf32>
    %cst_230 = arith.constant dense<0.000000e+00> : vector<8xf32>
    %675 = vector.multi_reduction <add>, %674, %cst_230 [1] : vector<8x16xf32> to vector<8xf32>
    %676 = vector.shape_cast %675 : vector<8xf32> to vector<8x1xf32>
    %677 = tpu.reciprocal %676 {approx = true} : vector<8x1xf32> -> vector<8x1xf32>
    %678 = vector.broadcast %677 : vector<8x1xf32> to vector<8x16xf32>
    %679 = arith.mulf %674, %678 : vector<8x16xf32>
    %680 = arith.truncf %679 : vector<8x16xf32> to vector<8x16xbf16>
    %681 = vector.extract_strided_slice %522 {offsets = [0, 56], sizes = [16, 8], strides = [1, 1]} : vector<16x64xbf16> to vector<16x8xbf16>
    %cst_231 = arith.constant dense<0.000000e+00> : vector<8x8xf32>
    %682 = tpu.matmul %680, %681, %cst_231 {dimension_numbers = #tpu.dot_dimension_numbers<[1], [0], [0], [1], [0, 0, 1, 1], [], []>} : vector<8x16xbf16>, vector<16x8xbf16>, vector<8x8xf32> -> vector<8x8xf32>
    %683 = tpu.concatenate %542, %562, %582, %602, %622, %642, %662, %682 in 1 : vector<8x8xf32>, vector<8x8xf32>, vector<8x8xf32>, vector<8x8xf32>, vector<8x8xf32>, vector<8x8xf32>, vector<8x8xf32>, vector<8x8xf32> -> vector<8x64xf32>
    %c0_232 = arith.constant 0 : index
    %c0_233 = arith.constant 0 : index
    %684 = vector.load %arg38[%c0_232, %c0_233] : memref<64x64xbf16, #tpu.memory_space<vmem>>, vector<64x64xbf16>
    %685 = arith.truncf %683 : vector<8x64xf32> to vector<8x64xbf16>
    %cst_234 = arith.constant dense<0.000000e+00> : vector<8x64xf32>
    %686 = tpu.matmul %685, %684, %cst_234 {dimension_numbers = #tpu.dot_dimension_numbers<[1], [0], [0], [1], [0, 0, 1, 1], [], []>} : vector<8x64xbf16>, vector<64x64xbf16>, vector<8x64xf32> -> vector<8x64xf32>
    %c0_235 = arith.constant 0 : index
    %c0_236 = arith.constant 0 : index
    %687 = vector.load %arg39[%c0_235, %c0_236] : memref<1x64xf32, #tpu.memory_space<vmem>>, vector<1x64xf32>
    %688 = vector.broadcast %687 : vector<1x64xf32> to vector<8x64xf32>
    %689 = arith.addf %686, %688 : vector<8x64xf32>
    %c0_237 = arith.constant 0 : index
    %c0_238 = arith.constant 0 : index
    %c0_239 = arith.constant 0 : index
    %690 = vector.load %arg35[%c0_237, %c0_238, %c0_239] : memref<1x8x64xf32, #tpu.memory_space<vmem>>, vector<1x8x64xf32>
    %691 = vector.shape_cast %690 : vector<1x8x64xf32> to vector<8x64xf32>
    %692 = arith.addf %691, %689 : vector<8x64xf32>
    %cst_240 = arith.constant dense<0.000000e+00> : vector<8xf32>
    %693 = vector.multi_reduction <add>, %692, %cst_240 [1] : vector<8x64xf32> to vector<8xf32>
    %694 = vector.shape_cast %693 : vector<8xf32> to vector<8x1xf32>
    %cst_241 = arith.constant 6.400000e+01 : f32
    %695 = vector.broadcast %cst_241 : f32 to vector<8x1xf32>
    %696 = arith.divf %694, %695 : vector<8x1xf32>
    %697 = vector.broadcast %696 : vector<8x1xf32> to vector<8x64xf32>
    %698 = arith.subf %692, %697 : vector<8x64xf32>
    %699 = arith.mulf %698, %698 : vector<8x64xf32>
    %cst_242 = arith.constant dense<0.000000e+00> : vector<8xf32>
    %700 = vector.multi_reduction <add>, %699, %cst_242 [1] : vector<8x64xf32> to vector<8xf32>
    %701 = vector.shape_cast %700 : vector<8xf32> to vector<8x1xf32>
    %cst_243 = arith.constant 6.400000e+01 : f32
    %702 = vector.broadcast %cst_243 : f32 to vector<8x1xf32>
    %703 = arith.divf %701, %702 : vector<8x1xf32>
    %704 = vector.broadcast %696 : vector<8x1xf32> to vector<8x64xf32>
    %705 = arith.subf %692, %704 : vector<8x64xf32>
    %cst_244 = arith.constant 9.99999974E-6 : f32
    %706 = vector.broadcast %cst_244 : f32 to vector<8x1xf32>
    %707 = arith.addf %703, %706 : vector<8x1xf32>
    %708 = math.rsqrt %707 : vector<8x1xf32>
    %709 = vector.broadcast %708 : vector<8x1xf32> to vector<8x64xf32>
    %710 = arith.mulf %705, %709 : vector<8x64xf32>
    %c0_245 = arith.constant 0 : index
    %c0_246 = arith.constant 0 : index
    %711 = vector.load %arg40[%c0_245, %c0_246] : memref<1x64xf32, #tpu.memory_space<vmem>>, vector<1x64xf32>
    %712 = vector.broadcast %711 : vector<1x64xf32> to vector<8x64xf32>
    %713 = arith.mulf %710, %712 : vector<8x64xf32>
    %c0_247 = arith.constant 0 : index
    %c0_248 = arith.constant 0 : index
    %714 = vector.load %arg41[%c0_247, %c0_248] : memref<1x64xf32, #tpu.memory_space<vmem>>, vector<1x64xf32>
    %715 = vector.broadcast %714 : vector<1x64xf32> to vector<8x64xf32>
    %716 = arith.addf %713, %715 : vector<8x64xf32>
    %c0_249 = arith.constant 0 : index
    %c0_250 = arith.constant 0 : index
    %717 = vector.load %arg42[%c0_249, %c0_250] : memref<64x256xbf16, #tpu.memory_space<vmem>>, vector<64x256xbf16>
    %718 = arith.truncf %716 : vector<8x64xf32> to vector<8x64xbf16>
    %cst_251 = arith.constant dense<0.000000e+00> : vector<8x256xf32>
    %719 = tpu.matmul %718, %717, %cst_251 {dimension_numbers = #tpu.dot_dimension_numbers<[1], [0], [0], [1], [0, 0, 1, 1], [], []>} : vector<8x64xbf16>, vector<64x256xbf16>, vector<8x256xf32> -> vector<8x256xf32>
    %c0_252 = arith.constant 0 : index
    %c0_253 = arith.constant 0 : index
    %720 = vector.load %arg43[%c0_252, %c0_253] : memref<1x256xf32, #tpu.memory_space<vmem>>, vector<1x256xf32>
    %721 = vector.broadcast %720 : vector<1x256xf32> to vector<8x256xf32>
    %722 = arith.addf %719, %721 : vector<8x256xf32>
    %cst_254 = arith.constant 0.000000e+00 : f32
    %723 = vector.broadcast %cst_254 : f32 to vector<8x256xf32>
    %724 = arith.maximumf %722, %723 : vector<8x256xf32>
    %c0_255 = arith.constant 0 : index
    %c0_256 = arith.constant 0 : index
    %725 = vector.load %arg44[%c0_255, %c0_256] : memref<256x64xbf16, #tpu.memory_space<vmem>>, vector<256x64xbf16>
    %726 = arith.truncf %724 : vector<8x256xf32> to vector<8x256xbf16>
    %cst_257 = arith.constant dense<0.000000e+00> : vector<8x64xf32>
    %727 = tpu.matmul %726, %725, %cst_257 {dimension_numbers = #tpu.dot_dimension_numbers<[1], [0], [0], [1], [0, 0, 1, 1], [], []>} : vector<8x256xbf16>, vector<256x64xbf16>, vector<8x64xf32> -> vector<8x64xf32>
    %c0_258 = arith.constant 0 : index
    %c0_259 = arith.constant 0 : index
    %728 = vector.load %arg45[%c0_258, %c0_259] : memref<1x64xf32, #tpu.memory_space<vmem>>, vector<1x64xf32>
    %729 = vector.broadcast %728 : vector<1x64xf32> to vector<8x64xf32>
    %730 = arith.addf %727, %729 : vector<8x64xf32>
    %731 = arith.addf %716, %730 : vector<8x64xf32>
    %cst_260 = arith.constant dense<0.000000e+00> : vector<8xf32>
    %732 = vector.multi_reduction <add>, %731, %cst_260 [1] : vector<8x64xf32> to vector<8xf32>
    %733 = vector.shape_cast %732 : vector<8xf32> to vector<8x1xf32>
    %cst_261 = arith.constant 6.400000e+01 : f32
    %734 = vector.broadcast %cst_261 : f32 to vector<8x1xf32>
    %735 = arith.divf %733, %734 : vector<8x1xf32>
    %736 = vector.broadcast %735 : vector<8x1xf32> to vector<8x64xf32>
    %737 = arith.subf %731, %736 : vector<8x64xf32>
    %738 = arith.mulf %737, %737 : vector<8x64xf32>
    %cst_262 = arith.constant dense<0.000000e+00> : vector<8xf32>
    %739 = vector.multi_reduction <add>, %738, %cst_262 [1] : vector<8x64xf32> to vector<8xf32>
    %740 = vector.shape_cast %739 : vector<8xf32> to vector<8x1xf32>
    %cst_263 = arith.constant 6.400000e+01 : f32
    %741 = vector.broadcast %cst_263 : f32 to vector<8x1xf32>
    %742 = arith.divf %740, %741 : vector<8x1xf32>
    %743 = vector.broadcast %735 : vector<8x1xf32> to vector<8x64xf32>
    %744 = arith.subf %731, %743 : vector<8x64xf32>
    %cst_264 = arith.constant 9.99999974E-6 : f32
    %745 = vector.broadcast %cst_264 : f32 to vector<8x1xf32>
    %746 = arith.addf %742, %745 : vector<8x1xf32>
    %747 = math.rsqrt %746 : vector<8x1xf32>
    %748 = vector.broadcast %747 : vector<8x1xf32> to vector<8x64xf32>
    %749 = arith.mulf %744, %748 : vector<8x64xf32>
    %c0_265 = arith.constant 0 : index
    %c0_266 = arith.constant 0 : index
    %750 = vector.load %arg46[%c0_265, %c0_266] : memref<1x64xf32, #tpu.memory_space<vmem>>, vector<1x64xf32>
    %751 = vector.broadcast %750 : vector<1x64xf32> to vector<8x64xf32>
    %752 = arith.mulf %749, %751 : vector<8x64xf32>
    %c0_267 = arith.constant 0 : index
    %c0_268 = arith.constant 0 : index
    %753 = vector.load %arg47[%c0_267, %c0_268] : memref<1x64xf32, #tpu.memory_space<vmem>>, vector<1x64xf32>
    %754 = vector.broadcast %753 : vector<1x64xf32> to vector<8x64xf32>
    %755 = arith.addf %752, %754 : vector<8x64xf32>
    %cst_269 = arith.constant dense<0.000000e+00> : vector<64xf32>
    %756 = vector.multi_reduction <add>, %509, %cst_269 [0] : vector<8x64xf32> to vector<64xf32>
    %757 = vector.shape_cast %756 : vector<64xf32> to vector<1x64xf32>
    %cst_270 = arith.constant 8.000000e+00 : f32
    %758 = vector.broadcast %cst_270 : f32 to vector<1x64xf32>
    %759 = arith.divf %757, %758 : vector<1x64xf32>
    %c0_271 = arith.constant 0 : index
    %c0_272 = arith.constant 0 : index
    %760 = vector.load %arg48[%c0_271, %c0_272] : memref<64x128xbf16, #tpu.memory_space<vmem>>, vector<64x128xbf16>
    %761 = arith.truncf %759 : vector<1x64xf32> to vector<1x64xbf16>
    %cst_273 = arith.constant dense<0.000000e+00> : vector<1x128xf32>
    %762 = tpu.matmul %761, %760, %cst_273 {dimension_numbers = #tpu.dot_dimension_numbers<[1], [0], [0], [1], [0, 0, 1, 1], [], []>} : vector<1x64xbf16>, vector<64x128xbf16>, vector<1x128xf32> -> vector<1x128xf32>
    %c0_274 = arith.constant 0 : index
    %c0_275 = arith.constant 0 : index
    %763 = vector.load %arg49[%c0_274, %c0_275] : memref<1x128xf32, #tpu.memory_space<vmem>>, vector<1x128xf32>
    %764 = arith.addf %762, %763 : vector<1x128xf32>
    %cst_276 = arith.constant 5.000000e-01 : f32
    %765 = vector.broadcast %cst_276 : f32 to vector<1x128xf32>
    %766 = arith.mulf %765, %764 : vector<1x128xf32>
    %cst_277 = arith.constant 0.707106769 : f32
    %767 = vector.broadcast %cst_277 : f32 to vector<1x128xf32>
    %768 = arith.mulf %764, %767 : vector<1x128xf32>
    %cst_278 = arith.constant 0.000000e+00 : f32
    %769 = vector.broadcast %cst_278 : f32 to vector<1x128xf32>
    %770 = arith.cmpf oge, %768, %769 : vector<1x128xf32>
    %cst_279 = arith.constant 1.000000e+00 : f32
    %cst_280 = arith.constant -1.000000e+00 : f32
    %771 = vector.broadcast %cst_279 : f32 to vector<1x128xf32>
    %772 = vector.broadcast %cst_280 : f32 to vector<1x128xf32>
    %773 = arith.select %770, %771, %772 : vector<1x128xi1>, vector<1x128xf32>
    %774 = math.absf %768 : vector<1x128xf32>
    %cst_281 = arith.constant 0.327591091 : f32
    %775 = vector.broadcast %cst_281 : f32 to vector<1x128xf32>
    %776 = arith.mulf %775, %774 : vector<1x128xf32>
    %cst_282 = arith.constant 1.000000e+00 : f32
    %777 = vector.broadcast %cst_282 : f32 to vector<1x128xf32>
    %778 = arith.addf %777, %776 : vector<1x128xf32>
    %cst_283 = arith.constant 1.000000e+00 : f32
    %779 = vector.broadcast %cst_283 : f32 to vector<1x128xf32>
    %780 = arith.divf %779, %778 : vector<1x128xf32>
    %cst_284 = arith.constant 1.06140542 : f32
    %781 = vector.broadcast %cst_284 : f32 to vector<1x128xf32>
    %782 = arith.mulf %781, %780 : vector<1x128xf32>
    %cst_285 = arith.constant -1.45315206 : f32
    %783 = vector.broadcast %cst_285 : f32 to vector<1x128xf32>
    %784 = arith.addf %782, %783 : vector<1x128xf32>
    %785 = arith.mulf %784, %780 : vector<1x128xf32>
    %cst_286 = arith.constant 1.42141378 : f32
    %786 = vector.broadcast %cst_286 : f32 to vector<1x128xf32>
    %787 = arith.addf %785, %786 : vector<1x128xf32>
    %788 = arith.mulf %787, %780 : vector<1x128xf32>
    %cst_287 = arith.constant -0.284496725 : f32
    %789 = vector.broadcast %cst_287 : f32 to vector<1x128xf32>
    %790 = arith.addf %788, %789 : vector<1x128xf32>
    %791 = arith.mulf %790, %780 : vector<1x128xf32>
    %cst_288 = arith.constant 0.254829586 : f32
    %792 = vector.broadcast %cst_288 : f32 to vector<1x128xf32>
    %793 = arith.addf %791, %792 : vector<1x128xf32>
    %794 = arith.mulf %793, %780 : vector<1x128xf32>
    %cst_289 = arith.constant 0.000000e+00 : f32
    %795 = vector.broadcast %cst_289 : f32 to vector<1x128xf32>
    %796 = arith.subf %795, %774 : vector<1x128xf32>
    %797 = arith.mulf %796, %774 : vector<1x128xf32>
    %798 = math.exp %797 : vector<1x128xf32>
    %799 = arith.mulf %794, %798 : vector<1x128xf32>
    %cst_290 = arith.constant 1.000000e+00 : f32
    %800 = vector.broadcast %cst_290 : f32 to vector<1x128xf32>
    %801 = arith.subf %800, %799 : vector<1x128xf32>
    %802 = arith.mulf %773, %801 : vector<1x128xf32>
    %cst_291 = arith.constant 1.000000e+00 : f32
    %803 = vector.broadcast %cst_291 : f32 to vector<1x128xf32>
    %804 = arith.addf %803, %802 : vector<1x128xf32>
    %805 = arith.mulf %766, %804 : vector<1x128xf32>
    %c0_292 = arith.constant 0 : index
    %c0_293 = arith.constant 0 : index
    %806 = vector.load %arg50[%c0_292, %c0_293] : memref<1x128xf32, #tpu.memory_space<vmem>>, vector<1x128xf32>
    %807 = arith.mulf %805, %806 : vector<1x128xf32>
    %cst_294 = arith.constant dense<0.000000e+00> : vector<1xf32>
    %808 = vector.multi_reduction <add>, %807, %cst_294 [1] : vector<1x128xf32> to vector<1xf32>
    %809 = vector.shape_cast %808 : vector<1xf32> to vector<1x1xf32>
    %c0_295 = arith.constant 0 : index
    %c0_296 = arith.constant 0 : index
    %810 = vector.load %arg51[%c0_295, %c0_296] : memref<1x1xf32, #tpu.memory_space<vmem>>, vector<1x1xf32>
    %811 = arith.addf %809, %810 : vector<1x1xf32>
    %812 = math.tanh %811 : vector<1x1xf32>
    %cst_297 = arith.constant 5.000000e-01 : f32
    %813 = vector.broadcast %cst_297 : f32 to vector<1x1xf32>
    %814 = arith.mulf %813, %812 : vector<1x1xf32>
    %cst_298 = arith.constant 0.707106769 : f32
    %815 = vector.broadcast %cst_298 : f32 to vector<1x1xf32>
    %816 = arith.mulf %812, %815 : vector<1x1xf32>
    %cst_299 = arith.constant 0.000000e+00 : f32
    %817 = vector.broadcast %cst_299 : f32 to vector<1x1xf32>
    %818 = arith.cmpf oge, %816, %817 : vector<1x1xf32>
    %cst_300 = arith.constant 1.000000e+00 : f32
    %cst_301 = arith.constant -1.000000e+00 : f32
    %819 = vector.broadcast %cst_300 : f32 to vector<1x1xf32>
    %820 = vector.broadcast %cst_301 : f32 to vector<1x1xf32>
    %821 = arith.select %818, %819, %820 : vector<1x1xi1>, vector<1x1xf32>
    %822 = math.absf %816 : vector<1x1xf32>
    %cst_302 = arith.constant 0.327591091 : f32
    %823 = vector.broadcast %cst_302 : f32 to vector<1x1xf32>
    %824 = arith.mulf %823, %822 : vector<1x1xf32>
    %cst_303 = arith.constant 1.000000e+00 : f32
    %825 = vector.broadcast %cst_303 : f32 to vector<1x1xf32>
    %826 = arith.addf %825, %824 : vector<1x1xf32>
    %cst_304 = arith.constant 1.000000e+00 : f32
    %827 = vector.broadcast %cst_304 : f32 to vector<1x1xf32>
    %828 = arith.divf %827, %826 : vector<1x1xf32>
    %cst_305 = arith.constant 1.06140542 : f32
    %829 = vector.broadcast %cst_305 : f32 to vector<1x1xf32>
    %830 = arith.mulf %829, %828 : vector<1x1xf32>
    %cst_306 = arith.constant -1.45315206 : f32
    %831 = vector.broadcast %cst_306 : f32 to vector<1x1xf32>
    %832 = arith.addf %830, %831 : vector<1x1xf32>
    %833 = arith.mulf %832, %828 : vector<1x1xf32>
    %cst_307 = arith.constant 1.42141378 : f32
    %834 = vector.broadcast %cst_307 : f32 to vector<1x1xf32>
    %835 = arith.addf %833, %834 : vector<1x1xf32>
    %836 = arith.mulf %835, %828 : vector<1x1xf32>
    %cst_308 = arith.constant -0.284496725 : f32
    %837 = vector.broadcast %cst_308 : f32 to vector<1x1xf32>
    %838 = arith.addf %836, %837 : vector<1x1xf32>
    %839 = arith.mulf %838, %828 : vector<1x1xf32>
    %cst_309 = arith.constant 0.254829586 : f32
    %840 = vector.broadcast %cst_309 : f32 to vector<1x1xf32>
    %841 = arith.addf %839, %840 : vector<1x1xf32>
    %842 = arith.mulf %841, %828 : vector<1x1xf32>
    %cst_310 = arith.constant 0.000000e+00 : f32
    %843 = vector.broadcast %cst_310 : f32 to vector<1x1xf32>
    %844 = arith.subf %843, %822 : vector<1x1xf32>
    %845 = arith.mulf %844, %822 : vector<1x1xf32>
    %846 = math.exp %845 : vector<1x1xf32>
    %847 = arith.mulf %842, %846 : vector<1x1xf32>
    %cst_311 = arith.constant 1.000000e+00 : f32
    %848 = vector.broadcast %cst_311 : f32 to vector<1x1xf32>
    %849 = arith.subf %848, %847 : vector<1x1xf32>
    %850 = arith.mulf %821, %849 : vector<1x1xf32>
    %cst_312 = arith.constant 1.000000e+00 : f32
    %851 = vector.broadcast %cst_312 : f32 to vector<1x1xf32>
    %852 = arith.addf %851, %850 : vector<1x1xf32>
    %853 = arith.mulf %814, %852 : vector<1x1xf32>
    %cst_313 = arith.constant dense<0.000000e+00> : vector<64xf32>
    %854 = vector.multi_reduction <add>, %755, %cst_313 [0] : vector<8x64xf32> to vector<64xf32>
    %855 = vector.shape_cast %854 : vector<64xf32> to vector<1x64xf32>
    %cst_314 = arith.constant 8.000000e+00 : f32
    %856 = vector.broadcast %cst_314 : f32 to vector<1x64xf32>
    %857 = arith.divf %855, %856 : vector<1x64xf32>
    %c0_315 = arith.constant 0 : index
    %c0_316 = arith.constant 0 : index
    %858 = vector.load %arg52[%c0_315, %c0_316] : memref<64x128xbf16, #tpu.memory_space<vmem>>, vector<64x128xbf16>
    %859 = arith.truncf %857 : vector<1x64xf32> to vector<1x64xbf16>
    %cst_317 = arith.constant dense<0.000000e+00> : vector<1x128xf32>
    %860 = tpu.matmul %859, %858, %cst_317 {dimension_numbers = #tpu.dot_dimension_numbers<[1], [0], [0], [1], [0, 0, 1, 1], [], []>} : vector<1x64xbf16>, vector<64x128xbf16>, vector<1x128xf32> -> vector<1x128xf32>
    %c0_318 = arith.constant 0 : index
    %c0_319 = arith.constant 0 : index
    %861 = vector.load %arg53[%c0_318, %c0_319] : memref<1x128xf32, #tpu.memory_space<vmem>>, vector<1x128xf32>
    %862 = arith.addf %860, %861 : vector<1x128xf32>
    %cst_320 = arith.constant 5.000000e-01 : f32
    %863 = vector.broadcast %cst_320 : f32 to vector<1x128xf32>
    %864 = arith.mulf %863, %862 : vector<1x128xf32>
    %cst_321 = arith.constant 0.707106769 : f32
    %865 = vector.broadcast %cst_321 : f32 to vector<1x128xf32>
    %866 = arith.mulf %862, %865 : vector<1x128xf32>
    %cst_322 = arith.constant 0.000000e+00 : f32
    %867 = vector.broadcast %cst_322 : f32 to vector<1x128xf32>
    %868 = arith.cmpf oge, %866, %867 : vector<1x128xf32>
    %cst_323 = arith.constant 1.000000e+00 : f32
    %cst_324 = arith.constant -1.000000e+00 : f32
    %869 = vector.broadcast %cst_323 : f32 to vector<1x128xf32>
    %870 = vector.broadcast %cst_324 : f32 to vector<1x128xf32>
    %871 = arith.select %868, %869, %870 : vector<1x128xi1>, vector<1x128xf32>
    %872 = math.absf %866 : vector<1x128xf32>
    %cst_325 = arith.constant 0.327591091 : f32
    %873 = vector.broadcast %cst_325 : f32 to vector<1x128xf32>
    %874 = arith.mulf %873, %872 : vector<1x128xf32>
    %cst_326 = arith.constant 1.000000e+00 : f32
    %875 = vector.broadcast %cst_326 : f32 to vector<1x128xf32>
    %876 = arith.addf %875, %874 : vector<1x128xf32>
    %cst_327 = arith.constant 1.000000e+00 : f32
    %877 = vector.broadcast %cst_327 : f32 to vector<1x128xf32>
    %878 = arith.divf %877, %876 : vector<1x128xf32>
    %cst_328 = arith.constant 1.06140542 : f32
    %879 = vector.broadcast %cst_328 : f32 to vector<1x128xf32>
    %880 = arith.mulf %879, %878 : vector<1x128xf32>
    %cst_329 = arith.constant -1.45315206 : f32
    %881 = vector.broadcast %cst_329 : f32 to vector<1x128xf32>
    %882 = arith.addf %880, %881 : vector<1x128xf32>
    %883 = arith.mulf %882, %878 : vector<1x128xf32>
    %cst_330 = arith.constant 1.42141378 : f32
    %884 = vector.broadcast %cst_330 : f32 to vector<1x128xf32>
    %885 = arith.addf %883, %884 : vector<1x128xf32>
    %886 = arith.mulf %885, %878 : vector<1x128xf32>
    %cst_331 = arith.constant -0.284496725 : f32
    %887 = vector.broadcast %cst_331 : f32 to vector<1x128xf32>
    %888 = arith.addf %886, %887 : vector<1x128xf32>
    %889 = arith.mulf %888, %878 : vector<1x128xf32>
    %cst_332 = arith.constant 0.254829586 : f32
    %890 = vector.broadcast %cst_332 : f32 to vector<1x128xf32>
    %891 = arith.addf %889, %890 : vector<1x128xf32>
    %892 = arith.mulf %891, %878 : vector<1x128xf32>
    %cst_333 = arith.constant 0.000000e+00 : f32
    %893 = vector.broadcast %cst_333 : f32 to vector<1x128xf32>
    %894 = arith.subf %893, %872 : vector<1x128xf32>
    %895 = arith.mulf %894, %872 : vector<1x128xf32>
    %896 = math.exp %895 : vector<1x128xf32>
    %897 = arith.mulf %892, %896 : vector<1x128xf32>
    %cst_334 = arith.constant 1.000000e+00 : f32
    %898 = vector.broadcast %cst_334 : f32 to vector<1x128xf32>
    %899 = arith.subf %898, %897 : vector<1x128xf32>
    %900 = arith.mulf %871, %899 : vector<1x128xf32>
    %cst_335 = arith.constant 1.000000e+00 : f32
    %901 = vector.broadcast %cst_335 : f32 to vector<1x128xf32>
    %902 = arith.addf %901, %900 : vector<1x128xf32>
    %903 = arith.mulf %864, %902 : vector<1x128xf32>
    %c0_336 = arith.constant 0 : index
    %c0_337 = arith.constant 0 : index
    %904 = vector.load %arg54[%c0_336, %c0_337] : memref<1x128xf32, #tpu.memory_space<vmem>>, vector<1x128xf32>
    %905 = arith.mulf %903, %904 : vector<1x128xf32>
    %cst_338 = arith.constant dense<0.000000e+00> : vector<1xf32>
    %906 = vector.multi_reduction <add>, %905, %cst_338 [1] : vector<1x128xf32> to vector<1xf32>
    %907 = vector.shape_cast %906 : vector<1xf32> to vector<1x1xf32>
    %c0_339 = arith.constant 0 : index
    %c0_340 = arith.constant 0 : index
    %908 = vector.load %arg55[%c0_339, %c0_340] : memref<1x1xf32, #tpu.memory_space<vmem>>, vector<1x1xf32>
    %909 = arith.addf %907, %908 : vector<1x1xf32>
    %910 = math.tanh %909 : vector<1x1xf32>
    %cst_341 = arith.constant 5.000000e-01 : f32
    %911 = vector.broadcast %cst_341 : f32 to vector<1x1xf32>
    %912 = arith.mulf %911, %910 : vector<1x1xf32>
    %cst_342 = arith.constant 0.707106769 : f32
    %913 = vector.broadcast %cst_342 : f32 to vector<1x1xf32>
    %914 = arith.mulf %910, %913 : vector<1x1xf32>
    %cst_343 = arith.constant 0.000000e+00 : f32
    %915 = vector.broadcast %cst_343 : f32 to vector<1x1xf32>
    %916 = arith.cmpf oge, %914, %915 : vector<1x1xf32>
    %cst_344 = arith.constant 1.000000e+00 : f32
    %cst_345 = arith.constant -1.000000e+00 : f32
    %917 = vector.broadcast %cst_344 : f32 to vector<1x1xf32>
    %918 = vector.broadcast %cst_345 : f32 to vector<1x1xf32>
    %919 = arith.select %916, %917, %918 : vector<1x1xi1>, vector<1x1xf32>
    %920 = math.absf %914 : vector<1x1xf32>
    %cst_346 = arith.constant 0.327591091 : f32
    %921 = vector.broadcast %cst_346 : f32 to vector<1x1xf32>
    %922 = arith.mulf %921, %920 : vector<1x1xf32>
    %cst_347 = arith.constant 1.000000e+00 : f32
    %923 = vector.broadcast %cst_347 : f32 to vector<1x1xf32>
    %924 = arith.addf %923, %922 : vector<1x1xf32>
    %cst_348 = arith.constant 1.000000e+00 : f32
    %925 = vector.broadcast %cst_348 : f32 to vector<1x1xf32>
    %926 = arith.divf %925, %924 : vector<1x1xf32>
    %cst_349 = arith.constant 1.06140542 : f32
    %927 = vector.broadcast %cst_349 : f32 to vector<1x1xf32>
    %928 = arith.mulf %927, %926 : vector<1x1xf32>
    %cst_350 = arith.constant -1.45315206 : f32
    %929 = vector.broadcast %cst_350 : f32 to vector<1x1xf32>
    %930 = arith.addf %928, %929 : vector<1x1xf32>
    %931 = arith.mulf %930, %926 : vector<1x1xf32>
    %cst_351 = arith.constant 1.42141378 : f32
    %932 = vector.broadcast %cst_351 : f32 to vector<1x1xf32>
    %933 = arith.addf %931, %932 : vector<1x1xf32>
    %934 = arith.mulf %933, %926 : vector<1x1xf32>
    %cst_352 = arith.constant -0.284496725 : f32
    %935 = vector.broadcast %cst_352 : f32 to vector<1x1xf32>
    %936 = arith.addf %934, %935 : vector<1x1xf32>
    %937 = arith.mulf %936, %926 : vector<1x1xf32>
    %cst_353 = arith.constant 0.254829586 : f32
    %938 = vector.broadcast %cst_353 : f32 to vector<1x1xf32>
    %939 = arith.addf %937, %938 : vector<1x1xf32>
    %940 = arith.mulf %939, %926 : vector<1x1xf32>
    %cst_354 = arith.constant 0.000000e+00 : f32
    %941 = vector.broadcast %cst_354 : f32 to vector<1x1xf32>
    %942 = arith.subf %941, %920 : vector<1x1xf32>
    %943 = arith.mulf %942, %920 : vector<1x1xf32>
    %944 = math.exp %943 : vector<1x1xf32>
    %945 = arith.mulf %940, %944 : vector<1x1xf32>
    %cst_355 = arith.constant 1.000000e+00 : f32
    %946 = vector.broadcast %cst_355 : f32 to vector<1x1xf32>
    %947 = arith.subf %946, %945 : vector<1x1xf32>
    %948 = arith.mulf %919, %947 : vector<1x1xf32>
    %cst_356 = arith.constant 1.000000e+00 : f32
    %949 = vector.broadcast %cst_356 : f32 to vector<1x1xf32>
    %950 = arith.addf %949, %948 : vector<1x1xf32>
    %951 = arith.mulf %912, %950 : vector<1x1xf32>
    %952 = vector.broadcast %853 : vector<1x1xf32> to vector<8x64xf32>
    %953 = arith.mulf %952, %509 : vector<8x64xf32>
    %954 = vector.broadcast %951 : vector<1x1xf32> to vector<8x64xf32>
    %955 = arith.mulf %954, %755 : vector<8x64xf32>
    %956 = arith.addf %953, %955 : vector<8x64xf32>
    %cst_357 = arith.constant dense<0.000000e+00> : vector<8xf32>
    %957 = vector.multi_reduction <add>, %956, %cst_357 [1] : vector<8x64xf32> to vector<8xf32>
    %958 = vector.shape_cast %957 : vector<8xf32> to vector<8x1xf32>
    %cst_358 = arith.constant 6.400000e+01 : f32
    %959 = vector.broadcast %cst_358 : f32 to vector<8x1xf32>
    %960 = arith.divf %958, %959 : vector<8x1xf32>
    %961 = vector.broadcast %960 : vector<8x1xf32> to vector<8x64xf32>
    %962 = arith.subf %956, %961 : vector<8x64xf32>
    %963 = arith.mulf %962, %962 : vector<8x64xf32>
    %cst_359 = arith.constant dense<0.000000e+00> : vector<8xf32>
    %964 = vector.multi_reduction <add>, %963, %cst_359 [1] : vector<8x64xf32> to vector<8xf32>
    %965 = vector.shape_cast %964 : vector<8xf32> to vector<8x1xf32>
    %cst_360 = arith.constant 6.400000e+01 : f32
    %966 = vector.broadcast %cst_360 : f32 to vector<8x1xf32>
    %967 = arith.divf %965, %966 : vector<8x1xf32>
    %968 = vector.broadcast %960 : vector<8x1xf32> to vector<8x64xf32>
    %969 = arith.subf %956, %968 : vector<8x64xf32>
    %cst_361 = arith.constant 9.99999974E-6 : f32
    %970 = vector.broadcast %cst_361 : f32 to vector<8x1xf32>
    %971 = arith.addf %967, %970 : vector<8x1xf32>
    %972 = math.rsqrt %971 : vector<8x1xf32>
    %973 = vector.broadcast %972 : vector<8x1xf32> to vector<8x64xf32>
    %974 = arith.mulf %969, %973 : vector<8x64xf32>
    %c0_362 = arith.constant 0 : index
    %c0_363 = arith.constant 0 : index
    %c0_364 = arith.constant 0 : index
    %975 = vector.load %arg56[%c0_362, %c0_363, %c0_364] : memref<1x8x64xf32, #tpu.memory_space<vmem>>, vector<1x8x64xf32>
    %976 = vector.shape_cast %975 : vector<1x8x64xf32> to vector<8x64xf32>
    %977 = vector.shape_cast %974 : vector<8x64xf32> to vector<1x8x64xf32>
    tpu.vector_store %arg56[%c0_362, %c0_363, %c0_364], %977 {strides = array<i32>} : memref<1x8x64xf32, #tpu.memory_space<vmem>>, vector<1x8x64xf32>,
    return
  }
  func.func @transform_0(%arg0: i32) -> (i32, i32, i32) {
    %c0_i32 = arith.constant 0 : i32
    %c0_i32_0 = arith.constant 0 : i32
    %c0_i32_1 = arith.constant 0 : i32
    return %arg0, %c0_i32, %c0_i32_0 : i32, i32, i32
  }
  func.func @transform_1(%arg0: i32) -> (i32, i32, i32) {
    %c0_i32 = arith.constant 0 : i32
    %c0_i32_0 = arith.constant 0 : i32
    %c0_i32_1 = arith.constant 0 : i32
    return %arg0, %c0_i32, %c0_i32_0 : i32, i32, i32
  }
  func.func @transform_2(%arg0: i32) -> (i32, i32, i32) {
    %c0_i32 = arith.constant 0 : i32
    %c0_i32_0 = arith.constant 0 : i32
    %c0_i32_1 = arith.constant 0 : i32
    return %arg0, %c0_i32, %c0_i32_0 : i32, i32, i32
  }
  func.func @transform_3(%arg0: i32) -> (i32, i32, i32) {
    %c0_i32 = arith.constant 0 : i32
    %c0_i32_0 = arith.constant 0 : i32
    %c0_i32_1 = arith.constant 0 : i32
    return %arg0, %c0_i32, %c0_i32_0 : i32, i32, i32
  }
  func.func @transform_4(%arg0: i32) -> (i32, i32, i32) {
    %c0_i32 = arith.constant 0 : i32
    %c0_i32_0 = arith.constant 0 : i32
    %c0_i32_1 = arith.constant 0 : i32
    return %arg0, %c0_i32, %c0_i32_0 : i32, i32, i32
  }
  func.func @transform_5(%arg0: i32) -> (i32, i32) {
    %c0_i32 = arith.constant 0 : i32
    %c0_i32_0 = arith.constant 0 : i32
    %c0_i32_1 = arith.constant 0 : i32
    return %c0_i32, %c0_i32_0 : i32, i32
  }
  func.func @transform_6(%arg0: i32) -> (i32, i32) {
    %c0_i32 = arith.constant 0 : i32
    %c0_i32_0 = arith.constant 0 : i32
    %c0_i32_1 = arith.constant 0 : i32
    return %c0_i32, %c0_i32_0 : i32, i32
  }
  func.func @transform_7(%arg0: i32) -> (i32, i32) {
    %c0_i32 = arith.constant 0 : i32
    %c0_i32_0 = arith.constant 0 : i32
    %c0_i32_1 = arith.constant 0 : i32
    return %c0_i32, %c0_i32_0 : i32, i32
  }
  func.func @transform_8(%arg0: i32) -> (i32, i32) {
    %c0_i32 = arith.constant 0 : i32
    %c0_i32_0 = arith.constant 0 : i32
    %c0_i32_1 = arith.constant 0 : i32
    return %c0_i32, %c0_i32_0 : i32, i32
  }
  func.func @transform_9(%arg0: i32) -> (i32, i32) {
    %c0_i32 = arith.constant 0 : i32
    %c0_i32_0 = arith.constant 0 : i32
    %c0_i32_1 = arith.constant 0 : i32
    return %c0_i32, %c0_i32_0 : i32, i32
  }
  func.func @transform_10(%arg0: i32) -> (i32, i32) {
    %c0_i32 = arith.constant 0 : i32
    %c0_i32_0 = arith.constant 0 : i32
    %c0_i32_1 = arith.constant 0 : i32
    return %c0_i32, %c0_i32_0 : i32, i32
  }
  func.func @transform_11(%arg0: i32) -> (i32, i32) {
    %c0_i32 = arith.constant 0 : i32
    %c0_i32_0 = arith.constant 0 : i32
    %c0_i32_1 = arith.constant 0 : i32
    return %c0_i32, %c0_i32_0 : i32, i32
  }
  func.func @transform_12(%arg0: i32) -> (i32, i32) {
    %c0_i32 = arith.constant 0 : i32
    %c0_i32_0 = arith.constant 0 : i32
    %c0_i32_1 = arith.constant 0 : i32
    return %c0_i32, %c0_i32_0 : i32, i32
  }
  func.func @transform_13(%arg0: i32) -> (i32, i32) {
    %c0_i32 = arith.constant 0 : i32
    %c0_i32_0 = arith.constant 0 : i32
    %c0_i32_1 = arith.constant 0 : i32
    return %c0_i32, %c0_i32_0 : i32, i32
  }
  func.func @transform_14(%arg0: i32) -> (i32, i32) {
    %c0_i32 = arith.constant 0 : i32
    %c0_i32_0 = arith.constant 0 : i32
    %c0_i32_1 = arith.constant 0 : i32
    return %c0_i32, %c0_i32_0 : i32, i32
  }
  func.func @transform_15(%arg0: i32) -> (i32, i32) {
    %c0_i32 = arith.constant 0 : i32
    %c0_i32_0 = arith.constant 0 : i32
    %c0_i32_1 = arith.constant 0 : i32
    return %c0_i32, %c0_i32_0 : i32, i32
  }
  func.func @transform_16(%arg0: i32) -> (i32, i32) {
    %c0_i32 = arith.constant 0 : i32
    %c0_i32_0 = arith.constant 0 : i32
    %c0_i32_1 = arith.constant 0 : i32
    return %c0_i32, %c0_i32_0 : i32, i32
  }
  func.func @transform_17(%arg0: i32) -> (i32, i32) {
    %c0_i32 = arith.constant 0 : i32
    %c0_i32_0 = arith.constant 0 : i32
    %c0_i32_1 = arith.constant 0 : i32
    return %c0_i32, %c0_i32_0 : i32, i32
  }
  func.func @transform_18(%arg0: i32) -> (i32, i32) {
    %c0_i32 = arith.constant 0 : i32
    %c0_i32_0 = arith.constant 0 : i32
    %c0_i32_1 = arith.constant 0 : i32
    return %c0_i32, %c0_i32_0 : i32, i32
  }
  func.func @transform_19(%arg0: i32) -> (i32, i32, i32) {
    %c0_i32 = arith.constant 0 : i32
    %c0_i32_0 = arith.constant 0 : i32
    %c0_i32_1 = arith.constant 0 : i32
    %c0_i32_2 = arith.constant 0 : i32
    return %c0_i32, %c0_i32_0, %c0_i32_1 : i32, i32, i32
  }
  func.func @transform_20(%arg0: i32) -> (i32, i32, i32) {
    %c0_i32 = arith.constant 0 : i32
    %c0_i32_0 = arith.constant 0 : i32
    %c0_i32_1 = arith.constant 0 : i32
    %c0_i32_2 = arith.constant 0 : i32
    return %c0_i32, %c0_i32_0, %c0_i32_1 : i32, i32, i32
  }
  func.func @transform_21(%arg0: i32) -> (i32, i32) {
    %c0_i32 = arith.constant 0 : i32
    %c0_i32_0 = arith.constant 0 : i32
    %c0_i32_1 = arith.constant 0 : i32
    return %c0_i32, %c0_i32_0 : i32, i32
  }
  func.func @transform_22(%arg0: i32) -> (i32, i32) {
    %c0_i32 = arith.constant 0 : i32
    %c0_i32_0 = arith.constant 0 : i32
    %c0_i32_1 = arith.constant 0 : i32
    return %c0_i32, %c0_i32_0 : i32, i32
  }
  func.func @transform_23(%arg0: i32) -> (i32, i32) {
    %c0_i32 = arith.constant 0 : i32
    %c0_i32_0 = arith.constant 0 : i32
    %c0_i32_1 = arith.constant 0 : i32
    return %c0_i32, %c0_i32_0 : i32, i32
  }
  func.func @transform_24(%arg0: i32) -> (i32, i32) {
    %c0_i32 = arith.constant 0 : i32
    %c0_i32_0 = arith.constant 0 : i32
    %c0_i32_1 = arith.constant 0 : i32
    return %c0_i32, %c0_i32_0 : i32, i32
  }
  func.func @transform_25(%arg0: i32) -> (i32, i32) {
    %c0_i32 = arith.constant 0 : i32
    %c0_i32_0 = arith.constant 0 : i32
    %c0_i32_1 = arith.constant 0 : i32
    return %c0_i32, %c0_i32_0 : i32, i32
  }
  func.func @transform_26(%arg0: i32) -> (i32, i32) {
    %c0_i32 = arith.constant 0 : i32
    %c0_i32_0 = arith.constant 0 : i32
    %c0_i32_1 = arith.constant 0 : i32
    return %c0_i32, %c0_i32_0 : i32, i32
  }
  func.func @transform_27(%arg0: i32) -> (i32, i32) {
    %c0_i32 = arith.constant 0 : i32
    %c0_i32_0 = arith.constant 0 : i32
    %c0_i32_1 = arith.constant 0 : i32
    return %c0_i32, %c0_i32_0 : i32, i32
  }
  func.func @transform_28(%arg0: i32) -> (i32, i32) {
    %c0_i32 = arith.constant 0 : i32
    %c0_i32_0 = arith.constant 0 : i32
    %c0_i32_1 = arith.constant 0 : i32
    return %c0_i32, %c0_i32_0 : i32, i32
  }
  func.func @transform_29(%arg0: i32) -> (i32, i32) {
    %c0_i32 = arith.constant 0 : i32
    %c0_i32_0 = arith.constant 0 : i32
    %c0_i32_1 = arith.constant 0 : i32
    return %c0_i32, %c0_i32_0 : i32, i32
  }
  func.func @transform_30(%arg0: i32) -> (i32, i32) {
    %c0_i32 = arith.constant 0 : i32
    %c0_i32_0 = arith.constant 0 : i32
    %c0_i32_1 = arith.constant 0 : i32
    return %c0_i32, %c0_i32_0 : i32, i32
  }
  func.func @transform_31(%arg0: i32) -> (i32, i32) {
    %c0_i32 = arith.constant 0 : i32
    %c0_i32_0 = arith.constant 0 : i32
    %c0_i32_1 = arith.constant 0 : i32
    return %c0_i32, %c0_i32_0 : i32, i32
  }
  func.func @transform_32(%arg0: i32) -> (i32, i32) {
    %c0_i32 = arith.constant 0 : i32
    %c0_i32_0 = arith.constant 0 : i32
    %c0_i32_1 = arith.constant 0 : i32
    return %c0_i32, %c0_i32_0 : i32, i32
  }
  func.func @transform_33(%arg0: i32) -> (i32, i32, i32) {
    %c0_i32 = arith.constant 0 : i32
    %c0_i32_0 = arith.constant 0 : i32
    %c0_i32_1 = arith.constant 0 : i32
    %c0_i32_2 = arith.constant 0 : i32
    return %c0_i32, %c0_i32_0, %c0_i32_1 : i32, i32, i32
  }
  func.func @transform_34(%arg0: i32) -> (i32, i32, i32) {
    %c0_i32 = arith.constant 0 : i32
    %c0_i32_0 = arith.constant 0 : i32
    %c0_i32_1 = arith.constant 0 : i32
    %c0_i32_2 = arith.constant 0 : i32
    return %c0_i32, %c0_i32_0, %c0_i32_1 : i32, i32, i32
  }
  func.func @transform_35(%arg0: i32) -> (i32, i32) {
    %c0_i32 = arith.constant 0 : i32
    %c0_i32_0 = arith.constant 0 : i32
    %c0_i32_1 = arith.constant 0 : i32
    return %c0_i32, %c0_i32_0 : i32, i32
  }
  func.func @transform_36(%arg0: i32) -> (i32, i32) {
    %c0_i32 = arith.constant 0 : i32
    %c0_i32_0 = arith.constant 0 : i32
    %c0_i32_1 = arith.constant 0 : i32
    return %c0_i32, %c0_i32_0 : i32, i32
  }
  func.func @transform_37(%arg0: i32) -> (i32, i32) {
    %c0_i32 = arith.constant 0 : i32
    %c0_i32_0 = arith.constant 0 : i32
    %c0_i32_1 = arith.constant 0 : i32
    return %c0_i32, %c0_i32_0 : i32, i32
  }
  func.func @transform_38(%arg0: i32) -> (i32, i32) {
    %c0_i32 = arith.constant 0 : i32
    %c0_i32_0 = arith.constant 0 : i32
    %c0_i32_1 = arith.constant 0 : i32
    return %c0_i32, %c0_i32_0 : i32, i32
  }
  func.func @transform_39(%arg0: i32) -> (i32, i32) {
    %c0_i32 = arith.constant 0 : i32
    %c0_i32_0 = arith.constant 0 : i32
    %c0_i32_1 = arith.constant 0 : i32
    return %c0_i32, %c0_i32_0 : i32, i32
  }
  func.func @transform_40(%arg0: i32) -> (i32, i32) {
    %c0_i32 = arith.constant 0 : i32
    %c0_i32_0 = arith.constant 0 : i32
    %c0_i32_1 = arith.constant 0 : i32
    return %c0_i32, %c0_i32_0 : i32, i32
  }
  func.func @transform_41(%arg0: i32) -> (i32, i32) {
    %c0_i32 = arith.constant 0 : i32
    %c0_i32_0 = arith.constant 0 : i32
    %c0_i32_1 = arith.constant 0 : i32
    return %c0_i32, %c0_i32_0 : i32, i32
  }
  func.func @transform_42(%arg0: i32) -> (i32, i32) {
    %c0_i32 = arith.constant 0 : i32
    %c0_i32_0 = arith.constant 0 : i32
    %c0_i32_1 = arith.constant 0 : i32
    return %c0_i32, %c0_i32_0 : i32, i32
  }
  func.func @transform_43(%arg0: i32) -> (i32, i32) {
    %c0_i32 = arith.constant 0 : i32
    %c0_i32_0 = arith.constant 0 : i32
    %c0_i32_1 = arith.constant 0 : i32
    return %c0_i32, %c0_i32_0 : i32, i32
  }
  func.func @transform_44(%arg0: i32) -> (i32, i32) {
    %c0_i32 = arith.constant 0 : i32
    %c0_i32_0 = arith.constant 0 : i32
    %c0_i32_1 = arith.constant 0 : i32
    return %c0_i32, %c0_i32_0 : i32, i32
  }
  func.func @transform_45(%arg0: i32) -> (i32, i32) {
    %c0_i32 = arith.constant 0 : i32
    %c0_i32_0 = arith.constant 0 : i32
    %c0_i32_1 = arith.constant 0 : i32
    return %c0_i32, %c0_i32_0 : i32, i32
  }
  func.func @transform_46(%arg0: i32) -> (i32, i32) {
    %c0_i32 = arith.constant 0 : i32
    %c0_i32_0 = arith.constant 0 : i32
    %c0_i32_1 = arith.constant 0 : i32
    return %c0_i32, %c0_i32_0 : i32, i32
  }
  func.func @transform_47(%arg0: i32) -> (i32, i32) {
    %c0_i32 = arith.constant 0 : i32
    %c0_i32_0 = arith.constant 0 : i32
    %c0_i32_1 = arith.constant 0 : i32
    return %c0_i32, %c0_i32_0 : i32, i32
  }
  func.func @transform_48(%arg0: i32) -> (i32, i32) {
    %c0_i32 = arith.constant 0 : i32
    %c0_i32_0 = arith.constant 0 : i32
    %c0_i32_1 = arith.constant 0 : i32
    return %c0_i32, %c0_i32_0 : i32, i32
  }
  func.func @transform_49(%arg0: i32) -> (i32, i32) {
    %c0_i32 = arith.constant 0 : i32
    %c0_i32_0 = arith.constant 0 : i32
    %c0_i32_1 = arith.constant 0 : i32
    return %c0_i32, %c0_i32_0 : i32, i32
  }
  func.func @transform_50(%arg0: i32) -> (i32, i32) {
    %c0_i32 = arith.constant 0 : i32
    %c0_i32_0 = arith.constant 0 : i32
    %c0_i32_1 = arith.constant 0 : i32
    return %c0_i32, %c0_i32_0 : i32, i32
  }
  func.func @transform_51(%arg0: i32) -> (i32, i32) {
    %c0_i32 = arith.constant 0 : i32
    %c0_i32_0 = arith.constant 0 : i32
    %c0_i32_1 = arith.constant 0 : i32
    return %c0_i32, %c0_i32_0 : i32, i32
  }
  func.func @transform_52(%arg0: i32) -> (i32, i32) {
    %c0_i32 = arith.constant 0 : i32
    %c0_i32_0 = arith.constant 0 : i32
    %c0_i32_1 = arith.constant 0 : i32
    return %c0_i32, %c0_i32_0 : i32, i32
  }
  func.func @transform_53(%arg0: i32) -> (i32, i32) {
    %c0_i32 = arith.constant 0 : i32
    %c0_i32_0 = arith.constant 0 : i32
    %c0_i32_1 = arith.constant 0 : i32
    return %c0_i32, %c0_i32_0 : i32, i32
  }
  func.func @transform_54(%arg0: i32) -> (i32, i32) {
    %c0_i32 = arith.constant 0 : i32
    %c0_i32_0 = arith.constant 0 : i32
    %c0_i32_1 = arith.constant 0 : i32
    return %c0_i32, %c0_i32_0 : i32, i32
  }
  func.func @transform_55(%arg0: i32) -> (i32, i32, i32) {
    %c0_i32 = arith.constant 0 : i32
    %c0_i32_0 = arith.constant 0 : i32
    %c0_i32_1 = arith.constant 0 : i32
    return %arg0, %c0_i32, %c0_i32_0 : i32, i32, i32
  }
}

</mosaic_0001>

<bundles_post_ra>
// kernel: text_guided_compressor.1
= control target key start
LH: loop header
LB: loop body
LE: loop exit
PB: predicated region body
PF: predicated region fallthrough
CT: control target
= control target key end

     0   :  { %s8965_s6 = smov 1   ;;  %s8966_s10 = smov 2   ;;  %s10677_s0 = inlined_call_operand.smem [shape: u32[56], index: -1, kind: input, shape index: {}] }
   0x1   :  { %s9062_s5 = sld [smem:[%s10677_s0]]   ;;  %s8967_s14 = smov 3  }
   0x2   :  { %s9067_s9 = sld [smem:[%s10677_s0 + %s8965_s6]]   ;;  %s8968_s18 = smov 4  }
   0x3   :  { %s9072_s13 = sld [smem:[%s10677_s0 + %s8966_s10]]   ;;  %s8969_s22 = smov 5  }
   0x4   :  { %s9077_s17 = sld [smem:[%s10677_s0 + %s8967_s14]]   ;;  %s8970_s26 = smov 6  }
   0x5   :  { %s9082_s21 = sld [smem:[%s10677_s0 + %s8968_s18]]   ;;  %s8971_s30 = smov 7  }
   0x6   :  { %s9087_s25 = sld [smem:[%s10677_s0 + %s8969_s22]]   ;;  %s8972_s4 = smov 8  }
   0x7   :  { %10748 = sst [smem:[#allocation37_spill]] %s9062_s5  ;;  %s8973_s10 = smov 9  }
   0x8   :  { %10749 = sst [smem:[#allocation38_spill]] %s9067_s9  ;;  %s8974_s15 = smov 10  }
   0x9   :  { %10750 = sst [smem:[#allocation39_spill]] %s9072_s13  ;;  %s8975_s20 = smov 11  }
   0xa   :  { %10751 = sst [smem:[#allocation40_spill]] %s9077_s17  ;;  %s8977_s1 = smov 13  }
   0xb   :  { %10752 = sst [smem:[#allocation41_spill]] %s9082_s21  ;;  %s8978_s7 = smov 14  }
   0xc   :  { %10753 = sst [smem:[#allocation42_spill]] %s9087_s25  ;;  %s8980_s22 = smov 16  }
   0xd   :  { %s9092_s29 = sld [smem:[%s10677_s0 + %s8970_s26]]   ;;  %s8976_s26 = smov 12  }
   0xe   :  { %s9097_s3 = sld [smem:[%s10677_s0 + %s8971_s30]]   ;;  %s8981_s28 = smov 17  }
   0xf   :  { %s9102_s8 = sld [smem:[%s10677_s0 + %s8972_s4]]   ;;  %s9015_s16 = smov 51  }
  0x10   :  { %s9107_s14 = sld [smem:[%s10677_s0 + %s8973_s10]]   ;;  %s9016_s23 = smov 52  }
  0x11   :  { %s9112_s19 = sld [smem:[%s10677_s0 + %s8974_s15]]   ;;  %s8979_s15 = smov 15  }
  0x12   :  { %s9117_s24 = sld [smem:[%s10677_s0 + %s8975_s20]]   ;;  %s9018_s10 = smov 55  }
  0x13   :  { %10754 = sst [smem:[#allocation43_spill]] %s9092_s29 }
  0x14   :  { %10755 = sst [smem:[#allocation44_spill]] %s9097_s3 }
  0x15   :  { %10756 = sst [smem:[#allocation45_spill]] %s9102_s8 }
  0x16   :  { %10757 = sst [smem:[#allocation46_spill]] %s9107_s14 }
  0x17   :  { %10758 = sst [smem:[#allocation47_spill]] %s9112_s19 }
  0x18   :  { %10759 = sst [smem:[#allocation48_spill]] %s9117_s24 }
  0x19   :  { %s9122_s30 = sld [smem:[%s10677_s0 + %s8976_s26]]  }
  0x1a   :  { %s9127_s6 = sld [smem:[%s10677_s0 + %s8977_s1]]   ;;  %s9017_s1 = smov 53  }
  0x1b   :  { %s9132_s12 = sld [smem:[%s10677_s0 + %s8978_s7]]   ;;  %s8982_s7 = smov 18  }
  0x1c   :  { %s9137_s20 = sld [smem:[%s10677_s0 + %s8979_s15]]   ;;  %s8983_s15 = smov 19  }
  0x1d   :  { %s9142_s27 = sld [smem:[%s10677_s0 + %s8980_s22]]   ;;  %s8984_s22 = smov 20  }
  0x1e   :  { %s9147_s4 = sld [smem:[%s10677_s0 + %s8981_s28]]   ;;  %s8985_s28 = smov 21  }
  0x1f   :  { %s9152_s17 = sld [smem:[%s10677_s0 + %s8982_s7]]   ;;  %s8986_s7 = smov 22  }
  0x20   :  { %10760 = sst [smem:[#allocation49_spill]] %s9127_s6 }
  0x21   :  { %10761 = sst [smem:[#allocation50_spill]] %s9132_s12 }
  0x22   :  { %10762 = sst [smem:[#allocation51_spill]] %s9137_s20 }
  0x23   :  { %10763 = sst [smem:[#allocation52_spill]] %s9142_s27 }
  0x24   :  { %10764 = sst [smem:[#allocation53_spill]] %s9147_s4 }
  0x25   :  { %10765 = sst [smem:[#allocation54_spill]] %s9152_s17 }
  0x26   :  { %s9157_s21 = sld [smem:[%s10677_s0 + %s8983_s15]]   ;;  %s8987_s15 = smov 23  }
  0x27   :  { %s9162_s27 = sld [smem:[%s10677_s0 + %s8984_s22]]   ;;  %s8988_s22 = smov 24  }
  0x28   :  { %s9167_s4 = sld [smem:[%s10677_s0 + %s8985_s28]]   ;;  %s8989_s28 = smov 25  }
  0x29   :  { %s9172_s17 = sld [smem:[%s10677_s0 + %s8986_s7]]   ;;  %s8990_s7 = smov 26  }
  0x2a   :  { %s9320_s5 = sld [smem:[%s10677_s0 + %s9016_s23]]  }
  0x2b   :  { %s9325_s9 = sld [smem:[%s10677_s0 + %s9017_s1]]  }
  0x2c   :  { %10766 = sst [smem:[#allocation55_spill]] %s9157_s21 }
  0x2d   :  { %10767 = sst [smem:[#allocation56_spill]] %s9162_s27 }
  0x2e   :  { %10768 = sst [smem:[#allocation57_spill]] %s9167_s4 }
  0x2f   :  { %10769 = sst [smem:[#allocation58_spill]] %s9172_s17 }
  0x30   :  { %s9177_s21 = sld [smem:[%s10677_s0 + %s8987_s15]]   ;;  %s8991_s15 = smov 27  }
  0x31   :  { %s9182_s27 = sld [smem:[%s10677_s0 + %s8988_s22]]   ;;  %s8992_s22 = smov 28  }
  0x32   :  { %s9187_s4 = sld [smem:[%s10677_s0 + %s8989_s28]]   ;;  %s8993_s28 = smov 29  }
  0x33   :  { %s9192_s17 = sld [smem:[%s10677_s0 + %s8990_s7]]   ;;  %s8994_s7 = smov 30  }
  0x34   :  { %10797 = sst [smem:[#allocation86_spill]] %s9320_s5 }
  0x35   :  { %10798 = sst [smem:[#allocation87_spill]] %s9325_s9 }
  0x36   :  { %10770 = sst [smem:[#allocation59_spill]] %s9177_s21 }
  0x37   :  { %10771 = sst [smem:[#allocation60_spill]] %s9182_s27 }
  0x38   :  { %10772 = sst [smem:[#allocation61_spill]] %s9187_s4 }
  0x39   :  { %10773 = sst [smem:[#allocation62_spill]] %s9192_s17 }
  0x3a   :  { %s9197_s21 = sld [smem:[%s10677_s0 + %s8991_s15]]   ;;  %s8995_s15 = smov 31  }
  0x3b   :  { %s9202_s27 = sld [smem:[%s10677_s0 + %s8992_s22]]   ;;  %s8996_s22 = smov 32  }
  0x3c   :  { %s9207_s4 = sld [smem:[%s10677_s0 + %s8993_s28]]   ;;  %s8997_s28 = smov 33  }
  0x3d   :  { %s9212_s17 = sld [smem:[%s10677_s0 + %s8994_s7]]   ;;  %s8998_s7 = smov 34  }
  0x3e   :  { %s9330_s3 = sld [smem:[%s10677_s0 + %s9018_s10]]  }
  0x40   :  { %10774 = sst [smem:[#allocation63_spill]] %s9197_s21 }
  0x41   :  { %10775 = sst [smem:[#allocation64_spill]] %s9202_s27 }
  0x42   :  { %10776 = sst [smem:[#allocation65_spill]] %s9207_s4 }
  0x43   :  { %10777 = sst [smem:[#allocation66_spill]] %s9212_s17 }
  0x44   :  { %s9217_s21 = sld [smem:[%s10677_s0 + %s8995_s15]]   ;;  %s8999_s15 = smov 35  }
  0x45   :  { %s9222_s27 = sld [smem:[%s10677_s0 + %s8996_s22]]   ;;  %s9000_s22 = smov 36  }
  0x46   :  { %s9227_s4 = sld [smem:[%s10677_s0 + %s8997_s28]]   ;;  %s9001_s28 = smov 37  }
  0x47   :  { %s9232_s17 = sld [smem:[%s10677_s0 + %s8998_s7]]   ;;  %s9002_s7 = smov 38  }
  0x4a   :  { %10778 = sst [smem:[#allocation67_spill]] %s9217_s21 }
  0x4b   :  { %10779 = sst [smem:[#allocation68_spill]] %s9222_s27 }
  0x4c   :  { %10780 = sst [smem:[#allocation69_spill]] %s9227_s4 }
  0x4d   :  { %10781 = sst [smem:[#allocation70_spill]] %s9232_s17 }
  0x4e   :  { %s9237_s21 = sld [smem:[%s10677_s0 + %s8999_s15]]   ;;  %s9003_s15 = smov 39  }
  0x4f   :  { %s9242_s27 = sld [smem:[%s10677_s0 + %s9000_s22]]   ;;  %s9004_s22 = smov 40  }
  0x50   :  { %s9247_s4 = sld [smem:[%s10677_s0 + %s9001_s28]]   ;;  %s9005_s28 = smov 41  }
  0x51   :  { %s9252_s17 = sld [smem:[%s10677_s0 + %s9002_s7]]   ;;  %s9006_s7 = smov 42  }
  0x52   :  { %s9272_s20 = sld [smem:[%s10677_s0 + %s9006_s7]]   ;;  %s9010_s7 = smov 46  }
  0x54   :  { %10782 = sst [smem:[#allocation71_spill]] %s9237_s21 }
  0x55   :  { %10783 = sst [smem:[#allocation72_spill]] %s9242_s27 }
  0x56   :  { %10784 = sst [smem:[#allocation73_spill]] %s9247_s4 }
  0x57   :  { %10785 = sst [smem:[#allocation74_spill]] %s9252_s17 }
  0x58   :  { %s9257_s21 = sld [smem:[%s10677_s0 + %s9003_s15]]   ;;  %s9007_s15 = smov 43  }
  0x59   :  { %s9262_s27 = sld [smem:[%s10677_s0 + %s9004_s22]]   ;;  %s9008_s22 = smov 44  }
  0x5a   :  { %s9267_s4 = sld [smem:[%s10677_s0 + %s9005_s28]]   ;;  %s9009_s28 = smov 45  }
  0x5b   :  { %10789 = sst [smem:[#allocation78_spill]] %s9272_s20 }
  0x5c   :  { %s9277_s6 = sld [smem:[%s10677_s0 + %s9007_s15]]   ;;  %s9011_s15 = smov 47  }
  0x5d   :  { %s9282_s14 = sld [smem:[%s10677_s0 + %s9008_s22]]   ;;  %s9012_s22 = smov 48  }
  0x5e   :  { %10786 = sst [smem:[#allocation75_spill]] %s9257_s21 }
  0x5f   :  { %10787 = sst [smem:[#allocation76_spill]] %s9262_s27 }
  0x60   :  { %10788 = sst [smem:[#allocation77_spill]] %s9267_s4 }
  0x61   :  { %s9287_s4 = sld [smem:[%s10677_s0 + %s9009_s28]]   ;;  %s9013_s28 = smov 49  }
  0x62   :  { %10790 = sst [smem:[#allocation79_spill]] %s9277_s6 }
  0x63   :  { %10791 = sst [smem:[#allocation80_spill]] %s9282_s14 }
  0x64   :  { %s9292_s20 = sld [smem:[%s10677_s0 + %s9010_s7]]   ;;  %s9014_s7 = smov 50  }
  0x65   :  { %s9297_s6 = sld [smem:[%s10677_s0 + %s9011_s15]]  }
  0x66   :  { %s9302_s13 = sld [smem:[%s10677_s0 + %s9012_s22]]  }
  0x67   :  { %10792 = sst [smem:[#allocation81_spill]] %s9287_s4 }
  0x68   :  { %s9307_s29 = sld [smem:[%s10677_s0 + %s9013_s28]]  }
  0x69   :  { %s7060_s8 = sld [smem:[%s10677_s0 + %s9014_s7]]  }
  0x6a   :  { %10793 = sst [smem:[#allocation82_spill]] %s9292_s20 }
  0x6b   :  { %10794 = sst [smem:[#allocation83_spill]] %s9297_s6 }
  0x6c   :  { %10795 = sst [smem:[#allocation84_spill]] %s9302_s13 }
  0x6d   :  { %s9315_s6 = sld [smem:[%s10677_s0 + %s9015_s16]]   ;;  %s9019_s16 = smov 54  }
  0x6f   :  { %v116_v0 = vstv %s7060_s8 }
  0x70   :  { %117 = vst [vmem:[#allocation2] sm:$0x1] %v116_v0 }
  0x73   :  { %10796 = sst [smem:[#allocation85_spill]] %s9315_s6 }
  0x74   :  { %s7064_s6 = sld [smem:[%s10677_s0 + %s9019_s16]]  }
  0x7a   :  { %v118_v1 = vstv %s7064_s6 }
  0x7b   :  { %119 = vst [vmem:[#allocation3] sm:$0x1] %v118_v1 }
  0x7c   :  { %120 = vsyncpa [#allocation5], 0 }
  0x7d   :  { %121 = vsyncpa [#allocation8], 0 }
  0x7e   :  { %122 = vsyncpa [#allocation11], 0 }
  0x7f   :  { %123 = vsyncpa [#allocation14], 0 }
  0x80   :  { %124 = vsyncpa [#allocation17], 0 }
  0x81   :  { %125 = vsyncpa [#allocation20], 0 }
  0x82   :  { %126 = vsyncpa [#allocation23], 0 }
  0x83   :  { %127 = vsyncpa [#allocation26], 0 }
  0x84   :  { %128 = vsyncpa [#allocation6], 0 }
  0x85   :  { %130 = vsyncpa [#allocation6 + $0x1], 0  ;;  %s9335_s23 = smov 0   ;;  %s9337_s22 = smov 0  }
  0x86   :  { %s9339_s26 = smov 0   ;;  %s9341_s0 = smov 0  }
  0x87 LB: > { %s10799_s27 = sld [smem:[#allocation76_spill]]  ;;  %s10800_s25 = sld [smem:[#allocation42_spill]]  ;;  %s8951_s23 = sphi %s9335_s23, %s10901_s23   ;;  %s8963_s0 = sphi %s9341_s0, %s10898_s0   ;;  %s8959_s26 = sphi %s9339_s26, %s10900_s26   ;;  %s8955_s22 = sphi %s9337_s22, %s10902_s22  }
  0x88   : > { %s10801_s21 = sld [smem:[#allocation75_spill]]  ;;  %s10802_s20 = sld [smem:[#allocation82_spill]] }
  0x89   : > { %s10803_s19 = sld [smem:[#allocation47_spill]]  ;;  %s10804_s17 = sld [smem:[#allocation74_spill]] }
  0x8a   : > { %s10805_s14 = sld [smem:[#allocation80_spill]]  ;;  %s10806_s13 = sld [smem:[#allocation84_spill]] }
  0x8b   : > { %s10807_s9 = sld [smem:[#allocation87_spill]]  ;;  %s10808_s5 = sld [smem:[#allocation86_spill]] }
  0x8c   : > { %s10809_s4 = sld [smem:[#allocation81_spill]]  ;;  %s10810_s24 = sld [smem:[#allocation48_spill]] }
  0x8d   : > { %s10811_s12 = sld [smem:[#allocation50_spill]]  ;;  %10812 = sst [smem:[#allocation88_spill]] %s8959_s26 }
  0x8e   : > { %s9356_s8 = sadd.s32 4294967295, %s8963_s0   ;;  %s7067_s6 = sadd.s32 4294967294, %s8963_s0  }
  0x8f   : > { %s9360_s1 = sadd.s32 1, %s8963_s0   ;;  %s1323_s28 = sadd.s32 1, %s8959_s26 }
  0x90   : > { %10813 = sst [smem:[#allocation89_spill]] %s9360_s1  ;;  %s1320_s2 = ssub.s32 %s8963_s0, %s9360_s1 }
  0x91   : > { %p1333_p0 = scmp.ne.s32.totalorder %s8959_s26, %s8955_s22  ;;  %p1321_p1 = scmp.eq.s32.totalorder %s1320_s2, 0 }
  0x92   : > { %p1334_p2 = scmp.eq.s32.totalorder %s9356_s8, 1  ;;  %p1339_p3 = scmp.ne.s32.totalorder %s8955_s22, %s8951_s23 }
  0x93   : > { %p1340_p4 = scmp.eq.s32.totalorder %s7067_s6, 1  ;;  %p7068_p7 = scmp.ge.s32.totalorder %s8963_s0, 1 }
  0x94   : > { %s9371_s10 = scalar_select %p1321_p1, %s8959_s26, %s1323_s28  }
  0x95   : > { %p9373_p5 = por %p1334_p2, %p1333_p0  ;;  %p9377_p6 = por %p1340_p4, %p1339_p3 }
  0x96   : > { %10814 = sst [smem:[#allocation90_spill]] %s9371_s10  ;;  %p1347_p8 = scmp.lt.s32.totalorder %s8963_s0, 3 }
  0x97   : > { %s10815_s7 = scalar_select %p9373_p5, 1, 0 }
  0x98   : > { %s10816_s11 = scalar_select %p9377_p6, 1, 0 }
  0x99   : > { %p10695_p9 = scmp.eq.s32.totalorder %s9356_s8, 0  ;;  %p9384_p10 = pnand %p7068_p7, %p1347_p8 }
  0x9a   : > { %s9020_s15 = smov [#allocation7]   ;;  %s9021_s6 = smov [#allocation10]  }
  0x9b   : > { %s10817_s16 = scalar_select %p9384_p10, 1, 0 }
  0x9c   : > { %s1386_s18 = sshll.u32 %s9020_s15, 4  ;;  %p7958_p11 = pneg %p9384_p10  ;;  %s1387_s18 = int_to_ptr.vmem [resolvable:$true] %s1386_s18 }
  0x9d   : > { %s1411_s28 = sshll.u32 %s9021_s6, 4  ;;  %s9022_s10 = smov [#allocation13]   ;;  %s9396_s28 = int_to_ptr.vmem [resolvable:$true] %s1411_s28 }
  0x9e   : > { %p9392_p12 = pnand %p10695_p9, %p7958_p11  ;;  %s1502_s26 = sshll.u32 %s9022_s10, 4  ;;  %s9398_s26 = int_to_ptr.vmem [resolvable:$true] %s1502_s26 }
  0x9f   : > { %s8477_s1 = scalar_lea.hbm %s10810_s24, 16 }
  0xa0   : > { %p8478_p13 = scmp.ne.s32.totalorder %s10810_s24, %s8477_s1  ;;  %p9404_p0 = pneg %p9392_p12 }
  0xa1   : > { %p8484_p3 = scmp.lt.u32.totalorder %s8477_s1, %s10810_s24 }
  0xa2   : > { %p8480_p1 = pnand %p9404_p0, %p8478_p13 }
  0xa4   : > { %p8481_p2 = pneg %p8480_p1 }
  0xa6   : > { %p8486_p4 = pnand %p8484_p3, %p8481_p2 }
  0xa8   : > { %8489 = shalt.err (!%p8486_p4)
}
  0xa9   : > { %s8490_s6 = scalar_lea.vmem %s1387_s18, 16  ;;  %s8497_s10 = scalar_lea.vmem %s1387_s18, 32 }
  0xaa   : > { %p8491_p7 = scmp.ne.s32.totalorder %s1387_s18, %s8490_s6  ;;  %p8498_p9 = scmp.lt.s32.totalorder %s1387_s18, %s1387_s18 }
  0xab   : > { %p8499_p6 = scmp.lt.s32.totalorder %s8497_s10, %s8490_s6 }
  0xac   : > { %p8493_p8 = pnand %p8491_p7, %p9404_p0 }
  0xad   : > { %p8500_p5 = por %p8499_p6, %p8498_p9 }
  0xae   : > { %p8494_p11 = pneg %p8493_p8 }
  0xb0   : > { %p8501_p10 = pnand %p8500_p5, %p8494_p11 }
  0xb2   : > { %8504 = shalt.err (!%p8501_p10)
}
  0xb3   : > { %7964 = dma.hbm_to_vmem [thread:$0]  (!%p9392_p12), %s10810_s24, 16, %s1387_s18, [#allocation8]  }
  0xb4   : > { %s8505_s1 = scalar_lea.hbm %s10811_s12, 32 }
  0xb5   : > { %p8506_p13 = scmp.ne.s32.totalorder %s10811_s12, %s8505_s1  ;;  %p8512_p3 = scmp.lt.u32.totalorder %s8505_s1, %s10811_s12 }
  0xb7   : > { %p8508_p1 = pnand %p8506_p13, %p9404_p0 }
  0xb9   : > { %p8509_p2 = pneg %p8508_p1 }
  0xbb   : > { %p8514_p4 = pnand %p8512_p3, %p8509_p2 }
  0xbd   : > { %8517 = shalt.err (!%p8514_p4)
}
  0xbe   : > { %s8518_s6 = scalar_lea.vmem %s9396_s28, 32  ;;  %p8526_p10 = scmp.lt.s32.totalorder %s9396_s28, %s9396_s28 }
  0xbf   : > { %p8519_p5 = scmp.ne.s32.totalorder %s9396_s28, %s8518_s6  ;;  %p8527_p7 = scmp.lt.s32.totalorder %s8518_s6, %s8518_s6 }
  0xc1   : > { %p8521_p6 = pnand %p8519_p5, %p9404_p0  ;;  %p8528_p8 = por %p8527_p7, %p8526_p10 }
  0xc3   : > { %p8522_p9 = pneg %p8521_p6 }
  0xc5   : > { %p8529_p11 = pnand %p8528_p8, %p8522_p9 }
  0xc7   : > { %8532 = shalt.err (!%p8529_p11)
}
  0xc8   : > { %7970 = dma.hbm_to_vmem [thread:$0]  (!%p9392_p12), %s10811_s12, 32, %s9396_s28, [#allocation11]  }
  0xc9   : > { %s8533_s18 = scalar_lea.hbm %s10801_s21, 16 }
  0xca   : > { %p8534_p13 = scmp.ne.s32.totalorder %s10801_s21, %s8533_s18  ;;  %p8540_p3 = scmp.lt.u32.totalorder %s8533_s18, %s10801_s21 }
  0xcc   : > { %p8536_p1 = pnand %p8534_p13, %p9404_p0 }
  0xce   : > { %p8537_p2 = pneg %p8536_p1 }
  0xd0   : > { %p8542_p4 = pnand %p8540_p3, %p8537_p2 }
  0xd2   : > { %8545 = shalt.err (!%p8542_p4)
}
  0xd3   : > { %s8546_s10 = scalar_lea.vmem %s9398_s26, 16  ;;  %s8553_s1 = scalar_lea.vmem %s9398_s26, 32 }
  0xd4   : > { %p8547_p5 = scmp.ne.s32.totalorder %s9398_s26, %s8546_s10  ;;  %p8554_p10 = scmp.lt.s32.totalorder %s9398_s26, %s9398_s26 }
  0xd5   : > { %p8555_p7 = scmp.lt.s32.totalorder %s8553_s1, %s8546_s10 }
  0xd6   : > { %p8549_p6 = pnand %p8547_p5, %p9404_p0 }
  0xd7   : > { %p8556_p8 = por %p8555_p7, %p8554_p10 }
  0xd8   : > { %p8550_p9 = pneg %p8549_p6 }
  0xda   : > { %p8557_p11 = pnand %p8556_p8, %p8550_p9 }
  0xdc   : > { %8560 = shalt.err (!%p8557_p11)
}
  0xdd   : > { %7976 = dma.hbm_to_vmem [thread:$0]  (!%p9392_p12), %s10801_s21, 16, %s9398_s26, [#allocation14]  }
  0xde   : > { %s9023_s28 = smov [#allocation16]   ;;  %s9024_s18 = smov [#allocation19]  }
  0xdf   : > { %s1533_s6 = sshll.u32 %s9023_s28, 4  ;;  %s1555_s12 = sshll.u32 %s9024_s18, 4  ;;  %s1534_s6 = int_to_ptr.vmem [resolvable:$true] %s1533_s6  ;;  %s1556_s12 = int_to_ptr.vmem [resolvable:$true] %s1555_s12 }
  0xe0   : > { %s8561_s24 = scalar_lea.hbm %s10805_s14, 16 }
  0xe1   : > { %p8562_p13 = scmp.ne.s32.totalorder %s10805_s14, %s8561_s24  ;;  %p8568_p3 = scmp.lt.u32.totalorder %s8561_s24, %s10805_s14 }
  0xe3   : > { %p8564_p1 = pnand %p8562_p13, %p9404_p0 }
  0xe5   : > { %p8565_p2 = pneg %p8564_p1 }
  0xe7   : > { %p8570_p4 = pnand %p8568_p3, %p8565_p2 }
  0xe9   : > { %8573 = shalt.err (!%p8570_p4)
}
  0xea   : > { %s8574_s10 = scalar_lea.vmem %s1534_s6, 16  ;;  %s8581_s26 = scalar_lea.vmem %s1534_s6, 32 }
  0xeb   : > { %p8575_p5 = scmp.ne.s32.totalorder %s1534_s6, %s8574_s10  ;;  %p8582_p10 = scmp.lt.s32.totalorder %s1534_s6, %s1534_s6 }
  0xec   : > { %p8583_p7 = scmp.lt.s32.totalorder %s8581_s26, %s8574_s10 }
  0xed   : > { %p8577_p6 = pnand %p8575_p5, %p9404_p0 }
  0xee   : > { %p8584_p8 = por %p8583_p7, %p8582_p10 }
  0xef   : > { %p8578_p9 = pneg %p8577_p6 }
  0xf1   : > { %p8585_p11 = pnand %p8584_p8, %p8578_p9 }
  0xf3   : > { %8588 = shalt.err (!%p8585_p11)
}
  0xf4   : > { %7982 = dma.hbm_to_vmem [thread:$0]  (!%p9392_p12), %s10805_s14, 16, %s1534_s6, [#allocation17]  }
  0xf5   : > { %s8589_s24 = scalar_lea.hbm %s10802_s20, 16 }
  0xf6   : > { %p8590_p13 = scmp.ne.s32.totalorder %s10802_s20, %s8589_s24  ;;  %p8596_p3 = scmp.lt.u32.totalorder %s8589_s24, %s10802_s20 }
  0xf8   : > { %p8592_p1 = pnand %p8590_p13, %p9404_p0 }
  0xfa   : > { %p8593_p2 = pneg %p8592_p1 }
  0xfc   : > { %p8598_p4 = pnand %p8596_p3, %p8593_p2 }
  0xfe   : > { %8601 = shalt.err (!%p8598_p4)
}
  0xff   : > { %s8602_s1 = scalar_lea.vmem %s1556_s12, 16  ;;  %s8609_s28 = scalar_lea.vmem %s1556_s12, 32 }
 0x100   : > { %p8603_p5 = scmp.ne.s32.totalorder %s1556_s12, %s8602_s1  ;;  %p8610_p10 = scmp.lt.s32.totalorder %s1556_s12, %s1556_s12 }
 0x101   : > { %p8611_p7 = scmp.lt.s32.totalorder %s8609_s28, %s8602_s1 }
 0x102   : > { %p8605_p6 = pnand %p8603_p5, %p9404_p0 }
 0x103   : > { %p8612_p8 = por %p8611_p7, %p8610_p10 }
 0x104   : > { %p8606_p9 = pneg %p8605_p6 }
 0x106   : > { %p8613_p11 = pnand %p8612_p8, %p8606_p9 }
 0x108   : > { %8616 = shalt.err (!%p8613_p11)
}
 0x109   : > { %7988 = dma.hbm_to_vmem [thread:$0]  (!%p9392_p12), %s10802_s20, 16, %s1556_s12, [#allocation20]  }
 0x10a   : > { %s9025_s6 = smov [#allocation22]   ;;  %s9026_s10 = smov [#allocation4]  }
 0x10b   : > { %s1580_s18 = sshll.u32 %s9025_s6, 4  ;;  %s1375_s26 = sshll.u32 %s9026_s10, 4  ;;  %s1581_s18 = int_to_ptr.vmem [resolvable:$true] %s1580_s18  ;;  %s1376_s26 = int_to_ptr.vmem [resolvable:$true] %s1375_s26 }
 0x10c   : > { %s8617_s24 = scalar_lea.hbm %s9307_s29, 16 }
 0x10d   : > { %p8618_p13 = scmp.ne.s32.totalorder %s9307_s29, %s8617_s24  ;;  %p8624_p3 = scmp.lt.u32.totalorder %s8617_s24, %s9307_s29 }
 0x10f   : > { %p8620_p1 = pnand %p8618_p13, %p9404_p0 }
 0x111   : > { %p8621_p2 = pneg %p8620_p1 }
 0x113   : > { %p8626_p4 = pnand %p8624_p3, %p8621_p2 }
 0x115   : > { %8629 = shalt.err (!%p8626_p4)
}
 0x116   : > { %s8630_s1 = scalar_lea.vmem %s1581_s18, 16  ;;  %s8637_s12 = scalar_lea.vmem %s1581_s18, 32 }
 0x117   : > { %p8631_p5 = scmp.ne.s32.totalorder %s1581_s18, %s8630_s1  ;;  %p8638_p10 = scmp.lt.s32.totalorder %s1581_s18, %s1581_s18 }
 0x118   : > { %p8639_p7 = scmp.lt.s32.totalorder %s8637_s12, %s8630_s1 }
 0x119   : > { %p8633_p6 = pnand %p8631_p5, %p9404_p0 }
 0x11a   : > { %p8640_p8 = por %p8639_p7, %p8638_p10 }
 0x11b   : > { %p8634_p9 = pneg %p8633_p6 }
 0x11d   : > { %p8641_p11 = pnand %p8640_p8, %p8634_p9 }
 0x11f   : > { %8644 = shalt.err (!%p8641_p11)
}
 0x120   : > { %7994 = dma.hbm_to_vmem [thread:$0]  (!%p9392_p12), %s9307_s29, 16, %s1581_s18, [#allocation23]  }
 0x121   : > { %s8645_s28 = scalar_lea.hbm %s10803_s19, 16 }
 0x122   : > { %p8646_p13 = scmp.ne.s32.totalorder %s10803_s19, %s8645_s28  ;;  %p8652_p3 = scmp.lt.u32.totalorder %s8645_s28, %s10803_s19 }
 0x124   : > { %p8648_p1 = pnand %p8646_p13, %p9404_p0 }
 0x126   : > { %p8649_p2 = pneg %p8648_p1 }
 0x128   : > { %p8654_p4 = pnand %p8652_p3, %p8649_p2 }
 0x12a   : > { %8657 = shalt.err (!%p8654_p4)
}
 0x12b   : > { %s8658_s6 = scalar_lea.vmem %s1376_s26, 16  ;;  %s8665_s10 = scalar_lea.vmem %s1376_s26, 32 }
 0x12c   : > { %p8659_p5 = scmp.ne.s32.totalorder %s1376_s26, %s8658_s6  ;;  %p8666_p10 = scmp.lt.s32.totalorder %s1376_s26, %s1376_s26 }
 0x12d   : > { %p8667_p7 = scmp.lt.s32.totalorder %s8665_s10, %s8658_s6 }
 0x12e   : > { %p8661_p6 = pnand %p8659_p5, %p9404_p0 }
 0x12f   : > { %p8668_p8 = por %p8667_p7, %p8666_p10 }
 0x130   : > { %p8662_p9 = pneg %p8661_p6 }
 0x132   : > { %p8669_p11 = pnand %p8668_p8, %p8662_p9 }
 0x134   : > { %8672 = shalt.err (!%p8669_p11)
}
 0x135   : > { %7961 = dma.hbm_to_vmem [thread:$0]  (!%p9392_p12), %s10803_s19, 16, %s1376_s26, [#allocation5]  }
 0x136   : > { %s9027_s18 = smov [#allocation9]   ;;  %s9028_s1 = smov [#allocation12]  }
 0x137   : > { %s1397_s24 = sshll.u32 %s9027_s18, 4  ;;  %s1491_s12 = sshll.u32 %s9028_s1, 4  ;;  %s1398_s24 = int_to_ptr.vmem [resolvable:$true] %s1397_s24  ;;  %s1492_s12 = int_to_ptr.vmem [resolvable:$true] %s1491_s12 }
 0x138   : > { %s8673_s28 = scalar_lea.hbm %s9122_s30, 16 }
 0x139   : > { %p8674_p13 = scmp.ne.s32.totalorder %s9122_s30, %s8673_s28  ;;  %p8680_p3 = scmp.lt.u32.totalorder %s8673_s28, %s9122_s30 }
 0x13b   : > { %p8676_p1 = pnand %p8674_p13, %p9404_p0 }
 0x13d   : > { %p8677_p2 = pneg %p8676_p1 }
 0x13f   : > { %p8682_p4 = pnand %p8680_p3, %p8677_p2 }
 0x141   : > { %8685 = shalt.err (!%p8682_p4)
}
 0x142   : > { %s8686_s6 = scalar_lea.vmem %s1398_s24, 16  ;;  %s8693_s26 = scalar_lea.vmem %s1398_s24, 32 }
 0x143   : > { %p8687_p5 = scmp.ne.s32.totalorder %s1398_s24, %s8686_s6  ;;  %p8694_p10 = scmp.lt.s32.totalorder %s1398_s24, %s1398_s24 }
 0x144   : > { %p8695_p7 = scmp.lt.s32.totalorder %s8693_s26, %s8686_s6 }
 0x145   : > { %p8689_p6 = pnand %p8687_p5, %p9404_p0 }
 0x146   : > { %p8696_p8 = por %p8695_p7, %p8694_p10 }
 0x147   : > { %p8690_p9 = pneg %p8689_p6 }
 0x149   : > { %p8697_p11 = pnand %p8696_p8, %p8690_p9 }
 0x14b   : > { %8700 = shalt.err (!%p8697_p11)
}
 0x14c   : > { %7967 = dma.hbm_to_vmem [thread:$0]  (!%p9392_p12), %s9122_s30, 16, %s1398_s24, [#allocation8]  }
 0x14d   : > { %s8701_s10 = scalar_lea.hbm %s10804_s17, 16 }
 0x14e   : > { %p8702_p13 = scmp.ne.s32.totalorder %s10804_s17, %s8701_s10  ;;  %p8708_p3 = scmp.lt.u32.totalorder %s8701_s10, %s10804_s17 }
 0x150   : > { %p8704_p1 = pnand %p8702_p13, %p9404_p0 }
 0x152   : > { %p8705_p2 = pneg %p8704_p1 }
 0x154   : > { %p8710_p4 = pnand %p8708_p3, %p8705_p2 }
 0x156   : > { %8713 = shalt.err (!%p8710_p4)
}
 0x157   : > { %s8714_s18 = scalar_lea.vmem %s1492_s12, 16  ;;  %s8721_s1 = scalar_lea.vmem %s1492_s12, 32 }
 0x158   : > { %p8715_p5 = scmp.ne.s32.totalorder %s1492_s12, %s8714_s18  ;;  %p8722_p10 = scmp.lt.s32.totalorder %s1492_s12, %s1492_s12 }
 0x159   : > { %p8723_p7 = scmp.lt.s32.totalorder %s8721_s1, %s8714_s18 }
 0x15a   : > { %p8717_p6 = pnand %p8715_p5, %p9404_p0 }
 0x15b   : > { %p8724_p8 = por %p8723_p7, %p8722_p10 }
 0x15c   : > { %p8718_p9 = pneg %p8717_p6 }
 0x15e   : > { %p8725_p11 = pnand %p8724_p8, %p8718_p9 }
 0x160   : > { %8728 = shalt.err (!%p8725_p11)
}
 0x161   : > { %7973 = dma.hbm_to_vmem [thread:$0]  (!%p9392_p12), %s10804_s17, 16, %s1492_s12, [#allocation11]  }
 0x162   : > { %s9029_s24 = smov [#allocation15]   ;;  %s9030_s6 = smov [#allocation18]  }
 0x163   : > { %s1513_s28 = sshll.u32 %s9029_s24, 4  ;;  %s1544_s26 = sshll.u32 %s9030_s6, 4  ;;  %s1514_s28 = int_to_ptr.vmem [resolvable:$true] %s1513_s28  ;;  %s1545_s26 = int_to_ptr.vmem [resolvable:$true] %s1544_s26 }
 0x164   : > { %s8729_s10 = scalar_lea.hbm %s10799_s27, 16 }
 0x165   : > { %p8730_p13 = scmp.ne.s32.totalorder %s10799_s27, %s8729_s10  ;;  %p8736_p3 = scmp.lt.u32.totalorder %s8729_s10, %s10799_s27 }
 0x167   : > { %p8732_p1 = pnand %p8730_p13, %p9404_p0 }
 0x169   : > { %p8733_p2 = pneg %p8732_p1 }
 0x16b   : > { %p8738_p4 = pnand %p8736_p3, %p8733_p2 }
 0x16d   : > { %8741 = shalt.err (!%p8738_p4)
}
 0x16e   : > { %s8742_s18 = scalar_lea.vmem %s1514_s28, 16  ;;  %s8749_s12 = scalar_lea.vmem %s1514_s28, 32 }
 0x16f   : > { %p8743_p5 = scmp.ne.s32.totalorder %s1514_s28, %s8742_s18  ;;  %p8750_p10 = scmp.lt.s32.totalorder %s1514_s28, %s1514_s28 }
 0x170   : > { %p8751_p7 = scmp.lt.s32.totalorder %s8749_s12, %s8742_s18 }
 0x171   : > { %p8745_p6 = pnand %p8743_p5, %p9404_p0 }
 0x172   : > { %p8752_p8 = por %p8751_p7, %p8750_p10 }
 0x173   : > { %p8746_p9 = pneg %p8745_p6 }
 0x175   : > { %p8753_p11 = pnand %p8752_p8, %p8746_p9 }
 0x177   : > { %8756 = shalt.err (!%p8753_p11)
}
 0x178   : > { %7979 = dma.hbm_to_vmem [thread:$0]  (!%p9392_p12), %s10799_s27, 16, %s1514_s28, [#allocation14]  }
 0x179   : > { %s8757_s1 = scalar_lea.hbm %s10809_s4, 16 }
 0x17a   : > { %p8758_p13 = scmp.ne.s32.totalorder %s10809_s4, %s8757_s1  ;;  %p8764_p3 = scmp.lt.u32.totalorder %s8757_s1, %s10809_s4 }
 0x17c   : > { %p8760_p1 = pnand %p8758_p13, %p9404_p0 }
 0x17e   : > { %p8761_p2 = pneg %p8760_p1 }
 0x180   : > { %p8766_p4 = pnand %p8764_p3, %p8761_p2 }
 0x182   : > { %8769 = shalt.err (!%p8766_p4)
}
 0x183   : > { %s8770_s24 = scalar_lea.vmem %s1545_s26, 16  ;;  %s8777_s6 = scalar_lea.vmem %s1545_s26, 32 }
 0x184   : > { %p8771_p5 = scmp.ne.s32.totalorder %s1545_s26, %s8770_s24  ;;  %p8778_p10 = scmp.lt.s32.totalorder %s1545_s26, %s1545_s26 }
 0x185   : > { %p8779_p7 = scmp.lt.s32.totalorder %s8777_s6, %s8770_s24 }
 0x186   : > { %p8773_p6 = pnand %p8771_p5, %p9404_p0 }
 0x187   : > { %p8780_p8 = por %p8779_p7, %p8778_p10 }
 0x188   : > { %p8774_p9 = pneg %p8773_p6 }
 0x18a   : > { %p8781_p11 = pnand %p8780_p8, %p8774_p9 }
 0x18c   : > { %8784 = shalt.err (!%p8781_p11)
}
 0x18d   : > { %7985 = dma.hbm_to_vmem [thread:$0]  (!%p9392_p12), %s10809_s4, 16, %s1545_s26, [#allocation17]  }
 0x18e   : > { %s9031_s28 = smov [#allocation21]   ;;  %s9032_s18 = smov [#allocation24]  }
 0x18f   : > { %s1569_s10 = sshll.u32 %s9031_s28, 4  ;;  %s1597_s12 = sshll.u32 %s9032_s18, 4  ;;  %s1570_s10 = int_to_ptr.vmem [resolvable:$true] %s1569_s10  ;;  %s1598_s12 = int_to_ptr.vmem [resolvable:$true] %s1597_s12 }
 0x190   : > { %s8785_s1 = scalar_lea.hbm %s10806_s13, 16 }
 0x191   : > { %p8786_p13 = scmp.ne.s32.totalorder %s10806_s13, %s8785_s1  ;;  %p8792_p3 = scmp.lt.u32.totalorder %s8785_s1, %s10806_s13 }
 0x193   : > { %p8788_p1 = pnand %p8786_p13, %p9404_p0 }
 0x195   : > { %p8789_p2 = pneg %p8788_p1 }
 0x197   : > { %p8794_p4 = pnand %p8792_p3, %p8789_p2 }
 0x199   : > { %8797 = shalt.err (!%p8794_p4)
}
 0x19a   : > { %s8798_s24 = scalar_lea.vmem %s1570_s10, 16  ;;  %s8805_s26 = scalar_lea.vmem %s1570_s10, 32 }
 0x19b   : > { %p8799_p5 = scmp.ne.s32.totalorder %s1570_s10, %s8798_s24  ;;  %p8806_p10 = scmp.lt.s32.totalorder %s1570_s10, %s1570_s10 }
 0x19c   : > { %p8807_p7 = scmp.lt.s32.totalorder %s8805_s26, %s8798_s24 }
 0x19d   : > { %p8801_p6 = pnand %p8799_p5, %p9404_p0 }
 0x19e   : > { %p8808_p8 = por %p8807_p7, %p8806_p10 }
 0x19f   : > { %p8802_p9 = pneg %p8801_p6 }
 0x1a1   : > { %p8809_p11 = pnand %p8808_p8, %p8802_p9 }
 0x1a3   : > { %8812 = shalt.err (!%p8809_p11)
}
 0x1a4   : > { %7991 = dma.hbm_to_vmem [thread:$0]  (!%p9392_p12), %s10806_s13, 16, %s1570_s10, [#allocation20]  }
 0x1a5   : > { %s8813_s6 = scalar_lea.hbm %s10808_s5, 16 }
 0x1a6   : > { %p8814_p13 = scmp.ne.s32.totalorder %s10808_s5, %s8813_s6  ;;  %p8820_p3 = scmp.lt.u32.totalorder %s8813_s6, %s10808_s5 }
 0x1a8   : > { %p8816_p1 = pnand %p8814_p13, %p9404_p0 }
 0x1aa   : > { %p8817_p2 = pneg %p8816_p1 }
 0x1ac   : > { %p8822_p4 = pnand %p8820_p3, %p8817_p2 }
 0x1ae   : > { %8825 = shalt.err (!%p8822_p4)
}
 0x1af   : > { %s8826_s28 = scalar_lea.vmem %s1598_s12, 16  ;;  %s8833_s18 = scalar_lea.vmem %s1598_s12, 32 }
 0x1b0   : > { %p8827_p5 = scmp.ne.s32.totalorder %s1598_s12, %s8826_s28  ;;  %p8834_p10 = scmp.lt.s32.totalorder %s1598_s12, %s1598_s12 }
 0x1b1   : > { %p8835_p7 = scmp.lt.s32.totalorder %s8833_s18, %s8826_s28 }
 0x1b2   : > { %p8829_p6 = pnand %p8827_p5, %p9404_p0 }
 0x1b3   : > { %p8836_p8 = por %p8835_p7, %p8834_p10 }
 0x1b4   : > { %p8830_p9 = pneg %p8829_p6 }
 0x1b6   : > { %p8837_p11 = pnand %p8836_p8, %p8830_p9 }
 0x1b8   : > { %8840 = shalt.err (!%p8837_p11)
}
 0x1b9   : > { %7997 = dma.hbm_to_vmem [thread:$0]  (!%p9392_p12), %s10808_s5, 16, %s1598_s12, [#allocation23]  }
 0x1ba   : > { %s9033_s10 = smov [#allocation25]   ;;  %s8841_s24 = scalar_lea.hbm %s10807_s9, 16 }
 0x1bb   : > { %s1608_s1 = sshll.u32 %s9033_s10, 4  ;;  %p8842_p13 = scmp.ne.s32.totalorder %s10807_s9, %s8841_s24  ;;  %s1609_s1 = int_to_ptr.vmem [resolvable:$true] %s1608_s1 }
 0x1bc   : > { %p8848_p3 = scmp.lt.u32.totalorder %s8841_s24, %s10807_s9 }
 0x1bd   : > { %p8844_p1 = pnand %p8842_p13, %p9404_p0 }
 0x1bf   : > { %p8845_p2 = pneg %p8844_p1 }
 0x1c1   : > { %p8850_p4 = pnand %p8848_p3, %p8845_p2 }
 0x1c3   : > { %8853 = shalt.err (!%p8850_p4)
}
 0x1c4   : > { %s8854_s26 = scalar_lea.vmem %s1609_s1, 16  ;;  %s8861_s6 = scalar_lea.vmem %s1609_s1, 32 }
 0x1c5   : > { %p8855_p5 = scmp.ne.s32.totalorder %s1609_s1, %s8854_s26  ;;  %p8862_p10 = scmp.lt.s32.totalorder %s1609_s1, %s1609_s1 }
 0x1c6   : > { %p8863_p7 = scmp.lt.s32.totalorder %s8861_s6, %s8854_s26 }
 0x1c7   : > { %p8857_p6 = pnand %p8855_p5, %p9404_p0 }
 0x1c8   : > { %p8864_p8 = por %p8863_p7, %p8862_p10 }
 0x1c9   : > { %p8858_p9 = pneg %p8857_p6 }
 0x1cb   : > { %p8865_p11 = pnand %p8864_p8, %p8858_p9 }
 0x1cd   : > { %8868 = shalt.err (!%p8865_p11)
}
 0x1ce   : > { %8000 = dma.hbm_to_vmem [thread:$0]  (!%p9392_p12), %s10807_s9, 16, %s1609_s1, [#allocation26]  }
 0x1cf   : > { %p10820_p13 = scmp.ne.s32.totalorder %s10817_s16, 0 }
 0x1d0   : > { %p10821_p1 = scmp.eq.s32.totalorder (!%p10820_p13), %s9356_s8, 0 }
 0x1d1   : > { %1659 = sbr.rel (%p10820_p13) target bundleno = 7641 (0x1dd9), region = 240 }
 0x1d8   : > { %8914 = dma.done.wait (%p10821_p1), [#allocation5], 16   ;;  %p10822_p2 = pmov %p10821_p1 }
 0x1d9   : > { %p10823_p0 = pmov %p10821_p1 }
 0x1da   : > { %8916 = vsyncadd (%p10822_p2), [#allocation5], 4294967280 }
 0x1db   : > { %8918 = dma.done.wait (%p10823_p0), [#allocation8], 32   ;;  %p10824_p3 = pmov %p10823_p0 }
 0x1dc   : > { %p10825_p4 = pmov %p10823_p0 }
 0x1dd   : > { %8920 = vsyncadd (%p10824_p3), [#allocation8], 4294967264 }
 0x1de   : > { %8922 = dma.done.wait (%p10825_p4), [#allocation11], 48   ;;  %p10826_p12 = pmov %p10823_p0 }
 0x1df   : > { %p10827_p5 = pmov %p10823_p0 }
 0x1e0   : > { %8924 = vsyncadd (%p10826_p12), [#allocation11], 4294967248 }
 0x1e1   : > { %8926 = dma.done.wait (%p10827_p5), [#allocation14], 32   ;;  %p10828_p6 = pmov %p10823_p0 }
 0x1e2   : > { %p10829_p9 = pmov %p10823_p0 }
 0x1e3   : > { %8928 = vsyncadd (%p10828_p6), [#allocation14], 4294967264 }
 0x1e4   : > { %8930 = dma.done.wait (%p10829_p9), [#allocation17], 32   ;;  %p10830_p10 = pmov %p10823_p0 }
 0x1e5   : > { %p10831_p7 = pmov %p10823_p0 }
 0x1e6   : > { %8932 = vsyncadd (%p10830_p10), [#allocation17], 4294967264 }
 0x1e7   : > { %8934 = dma.done.wait (%p10831_p7), [#allocation20], 32   ;;  %p10832_p8 = pmov %p10823_p0 }
 0x1e8   : > { %p10833_p11 = pmov %p10823_p0 }
 0x1e9   : > { %8936 = vsyncadd (%p10832_p8), [#allocation20], 4294967264 }
 0x1ea   : > { %8938 = dma.done.wait (%p10833_p11), [#allocation23], 32   ;;  %p10834_p13 = pmov %p10823_p0 }
 0x1eb   : > { %p10835_p1 = pmov %p10823_p0 }
 0x1ec   : > { %8940 = vsyncadd (%p10834_p13), [#allocation23], 4294967264 }
 0x1ed   : > { %8942 = dma.done.wait (%p10835_p1), [#allocation26], 16   ;;  %p10836_p2 = pmov %p10823_p0 }
 0x1ee   : > { %s10837_s16 = sld [smem:[#allocation44_spill]]  ;;  %s10838_s2 = sld [smem:[#allocation38_spill]]  ;;  %v9034_v2 = vmov 0.0   ;;  %vm9035_vm0 = vmmov 0   ;;  %v9036_v3 = vmov 0   ;;  %v8191_v4 = vld [vmem:[%s10800_s25] sm:$0xff]   ;;  %v2086_v54 = vlaneseq }
 0x1ef   : > { %8944 = vsyncadd (%p10836_p2), [#allocation26], 4294967280  ;;  %p1854_p0 = scmp.lt.s32.totalorder %s9356_s8, 1  ;;  %7504 = vmatprep.subr.bf16.mxu0 %v9034_v2  ;;  %7516 = vmatprep.subr.bf16.mxu1 %v9034_v2  ;;  %s10839_s12 = sld [smem:[#allocation37_spill]]  ;;  %v8193_v6 = vld [vmem:[%s10800_s25 + $0x8] sm:$0xff]   ;;  %v8195_v10 = vld [vmem:[%s10800_s25 + $0x10] sm:$0xff]  }
 0x1f0   : > { %7520 = vmatprep.mubr.msk.bf16.mxu1 %vm9035_vm0, %v9034_v2  ;;  %7512 = vmatprep.mubr.msk.bf16.mxu0 %vm9035_vm0, %v9034_v2  ;;  %s10840_s24 = sld [smem:[#allocation45_spill]]  ;;  %vm1991_vm1 = vcmask 261120   ;;  %v8196_v11 = vld [vmem:[%s10800_s25 + $0x18] sm:$0xff]   ;;  %vm1922_vm2 = vcmask 523264   ;;  %s10841_s26 = sld [smem:[#allocation43_spill]]  ;;  %vm2037_vm3 = vcmask 64512  }
 0x1f1   : > { %s9597_s15 = scalar_select %p1854_p0, %s9356_s8, 1  ;;  %8189 = vset.pattern.permute.xlu0 %v9036_v3  ;;  %8190 = vset.pattern.permute.xlu1 %v9036_v3  ;;  %vm2122_vm4 = vcmask 1043456   ;;  %v9706_v56 = vshrl.u32 %v2086_v54, 7  ;;  %vm3101_vm7 = vcmask 130048   ;;  %vm3104_vm8 = vcmask 195584  }
 0x1f2   : > { %7505 = vmatpush3.bf16.msra.mxu0 %v8191_v4  ;;  %s10715_s6 = smov 120   ;;  %vm3109_vm9 = vcmask 326656   ;;  %vm3112_vm10 = vcmask 392192   ;;  %vm3115_vm11 = vcmask 457728   ;;  %s10857_s4 = smov 72   ;;  %vm6555_vm15 = vcmask 1040384  }
 0x1f3   : > { %s7102_s28 = sshll.u32 %s9597_s15, 3  ;;  %s10700_s10 = sshll.u32 %s9597_s15, 4  ;;  %7506 = vmatprep.subr.bf16.mxu0 %v9034_v2  ;;  %v9709_v57 = vsub.s32 0, %v9706_v56 }
 0x1f4   : > { %v8192_v5 = vld [vmem:[%s10837_s16] sm:$0xff]   ;;  %s1862_s18 = scalar_lea.vmem %s10838_s2, %s7102_s28  ;;  %v8194_v7 = vld [vmem:[%s10837_s16 + $0x8] sm:$0xff]   ;;  %s10709_s2 = smov 112  }
 0x1f5   : > { %7517 = vmatpush3.bf16.msra.mxu1 %v8192_v5  ;;  %v1877_v8 = vld [vmem:[%s1862_s18] sm:$0xff]  ;;  %s9615_s1 = scalar_lea.vmem %s10839_s12, %s10700_s10  ;;  %s10713_s12 = smov 104  }
 0x1f6   : > { %7518 = vmatprep.subr.bf16.mxu1 %v9034_v2  ;;  %7507 = vmatpush3.bf16.msra.mxu0 %v8193_v6  ;;  %v1971_v9 = vpack.c.bf16 %v1877_v8, %v1877_v8  ;;  %v1875_v12 = vld [vmem:[%s9615_s1] sm:$0xff]  ;;  %v1876_v13 = vld [vmem:[%s9615_s1 + $0x8] sm:$0xff]  ;;  %s10711_s28 = smov 96   ;;  %s10707_s18 = smov 88  }
 0x1f7   : > { %7508 = vmatprep.subr.bf16.mxu0 %v9034_v2  ;;  %v9627_v14 = vpack.c.bf16 %v1876_v13, %v1875_v12  ;;  %v7111_v15 = vld [vmem:[%s10840_s24] ss:$0 sm:$0xff]  ;;  %s10705_s24 = smov 80   ;;  %s10701_s10 = smov 64  }
 0x1f8   : > { %v7105_v23 = vld [vmem:[%s10841_s26] ss:$0 sm:$0xff]  ;;  %s10703_s26 = smov 72   ;;  %s10858_s5 = sld [smem:[#allocation41_spill]] }
 0x1f9   : > { %7519 = vmatpush3.bf16.msra.mxu1 %v8194_v7  ;;  %s10863_s9 = smov 48   ;;  %s10865_s13 = smov 24  }
 0x1fa   : > { %7524 = vmatprep.subr.bf16.mxu1 %v9034_v2  ;;  %7509 = vmatpush3.bf16.msra.mxu0 %v8195_v10  ;;  %s10866_s14 = smov 16   ;;  %s10867_s16 = smov 8  }
 0x1fb   : > { %7510 = vmatprep.subr.bf16.mxu0 %v9034_v2  ;;  %s10868_s17 = smov 32   ;;  %s10870_s19 = sld [smem:[#allocation52_spill]] }
 0x1fc   : > { %7521 = vmatmul.mubr.msk.bf16.vlgmr.msra.gmra.mrb[0].mxu1 %vm1991_vm1, %v1971_v9  ;;  %s10873_s20 = sld [smem:[#allocation56_spill]]  ;;  %s10874_s21 = sshll.u32 %s9597_s15, 4 }
 0x1fd   : > { %7526 = vmatprep.mubr.msk.bf16.mxu1 %vm9035_vm0, %v9034_v2  ;;  %s10875_s27 = sld [smem:[#allocation63_spill]]  ;;  %p10896_p4 = scmp.ne.s32.totalorder %s10815_s7, 0 }
 0x1fe   : > { %7511 = vmatpush3.bf16.msra.mxu0 %v8196_v11 }
 0x1ff   : > { %7530 = vmatprep.subr.bf16.mxu0 %v9034_v2 }
 0x201   : > { %7513 = vmatmul.mubr.msk.bf16.vlgmr.msra.gmra.mrb[0].mxu0 %vm1922_vm2, %v9627_v14 }
 0x202   : > { %7532 = vmatprep.mubr.msk.bf16.mxu0 %vm9035_vm0, %v9034_v2 }
 0x2cf   : > { %v2029_v16 = vpop.f32.mrb[0].mxu1 }
 0x2d0   : > { %v2030_v17 = vadd.f32 %v7111_v15, %v2029_v16  ;;  %v7522_v18 = vpop.f32.mrb[1].mxu1 }
 0x2d1   : > { %v2032_v19 = vpop.f32.mrb[2].mxu1 }
 0x2d2   : > { %v9635_v20 = vpack.c.bf16 %v2030_v17, %v2030_v17  ;;  %v7523_v21 = vpop.f32.mrb[3].mxu1 }
 0x2d4   : > { %2170 = vrot.lane.b32.xlu0 %v9635_v20, %s10715_s6  ;;  %2295 = vrot.lane.b32.xlu1 %v9635_v20, %s10709_s2  ;;  %v2042_v22 = vsel %vm2037_vm3, %v9635_v20, 0  ;;  %v1960_v24 = vpop.f32.mrb[0].mxu0 }
 0x2d5   : > { %7525 = vmatpush3.bf16.xpose.msra.mxu1 %v2042_v22  ;;  %v7514_v25 = vpop.f32.mrb[1].mxu0  ;;  %v1961_v27 = vadd.f32 %v7105_v23, %v1960_v24 }
 0x2d6   : > { %7536 = vmatprep.subr.bf16.mxu1 %v9034_v2  ;;  %v1963_v26 = vpop.f32.mrb[2].mxu0 }
 0x2d7   : > { %v1964_v28 = vadd.f32 %v7105_v23, %v1963_v26  ;;  %v7515_v29 = vpop.f32.mrb[3].mxu0 }
 0x2d9   : > { %v2035_v30 = vpack.c.bf16 %v1964_v28, %v1961_v27 }
 0x2db   : > { %2293 = vrot.lane.b32.xlu1 %v2035_v30, %s10709_s2  ;;  %2168 = vrot.lane.b32.xlu0 %v2035_v30, %s10715_s6  ;;  %s10723_s2 = smov 24   ;;  %s10845_s6 = sld [smem:[#allocation46_spill]] }
 0x2dc   : > { %7527 = vmatmul.mubr.msk.bf16.vlgmr.msra.gmra.mrb[4].mxu1 %vm2037_vm3, %v2035_v30 }
 0x2dd   : > { %7538 = vmatprep.mubr.msk.bf16.mxu1 %vm9035_vm0, %v9034_v2 }
 0x2df   : > { %2418 = vrot.lane.b32.xlu1 %v2035_v30, %s10713_s12  ;;  %2420 = vrot.lane.b32.xlu0 %v9635_v20, %s10713_s12  ;;  %s10719_s12 = smov 8  }
 0x2e3   : > { %2543 = vrot.lane.b32.xlu1 %v2035_v30, %s10711_s28  ;;  %2545 = vrot.lane.b32.xlu0 %v9635_v20, %s10711_s28  ;;  %s10721_s28 = smov 16  }
 0x2e7   : > { %2668 = vrot.lane.b32.xlu1 %v2035_v30, %s10707_s18  ;;  %2670 = vrot.lane.b32.xlu0 %v9635_v20, %s10707_s18  ;;  %s10717_s18 = smov 32  }
 0x2eb   : > { %2793 = vrot.lane.b32.xlu1 %v2035_v30, %s10705_s24  ;;  %2795 = vrot.lane.b32.xlu0 %v9635_v20, %s10705_s24  ;;  %s10725_s24 = smov 40  }
 0x2ef   : > { %2918 = vrot.lane.b32.xlu1 %v2035_v30, %s10703_s26  ;;  %2920 = vrot.lane.b32.xlu0 %v9635_v20, %s10703_s26 }
 0x2f3   : > { %2117 = vrot.lane.b32.xlu1 %v9635_v20, %s10701_s10  ;;  %s10842_s10 = sld [smem:[#allocation39_spill]] }
 0x2f9   : > { %s1865_s26 = scalar_lea.vmem %s10842_s10, %s9597_s15  ;;  %s10727_s10 = smov 48  }
 0x2fa   : > { %v1878_v55 = vld [vmem:[%s1865_s26] sm:$0x1]  ;;  %s10729_s26 = smov 56  }
 0x2fb   : > { %vm1879_vm5 = vcmp.gt.f32.partialorder %v1878_v55, 0.5 }
 0x2fc   : > { %v2085_v58 = vsel %vm1879_vm5, 1, %v9036_v3 }
 0x2fd   : > { %v2089_v59 = vrot.slane %v2085_v58, %v9709_v57 }
 0x2ff   : > { %vm9713_vm6 = vcmp.eq.s32.totalorder %v2089_v59, 1 }
 0x346   : > { %v2171_v31 = vpop.permute.xlu0 %2170  ;;  %v2296_v33 = vpop.permute.xlu1 %2295 }
 0x347   : > { %v2176_v32 = vsel %vm2037_vm3, %v2171_v31, 0  ;;  %v2301_v36 = vsel %vm2037_vm3, %v2296_v33, 0 }
 0x348   : > { %7537 = vmatpush3.bf16.xpose.msra.mxu1 %v2176_v32 }
 0x349   : > { %7548 = vmatprep.subr.bf16.mxu1 %v9034_v2 }
 0x34d   : > { %v2294_v34 = vpop.permute.xlu1 %2293  ;;  %v2169_v35 = vpop.permute.xlu0 %2168 }
 0x34f   : > { %7539 = vmatmul.mubr.msk.bf16.vlgmr.msra.gmra.mrb[8].mxu1 %vm2037_vm3, %v2169_v35 }
 0x350   : > { %7549 = vmatpush3.bf16.xpose.msra.mxu1 %v2301_v36  ;;  %7550 = vmatprep.mubr.msk.bf16.mxu1 %vm9035_vm0, %v9034_v2 }
 0x351   : > { %7560 = vmatprep.subr.bf16.mxu1 %v9034_v2  ;;  %v2419_v37 = vpop.permute.xlu1 %2418  ;;  %v2421_v38 = vpop.permute.xlu0 %2420 }
 0x352   : > { %v2426_v40 = vsel %vm2037_vm3, %v2421_v38, 0 }
 0x355   : > { %v2544_v39 = vpop.permute.xlu1 %2543  ;;  %v2546_v42 = vpop.permute.xlu0 %2545 }
 0x356   : > { %v2551_v44 = vsel %vm2037_vm3, %v2546_v42, 0 }
 0x357   : > { %7551 = vmatmul.mubr.msk.bf16.vlgmr.msra.gmra.mrb[12].mxu1 %vm2037_vm3, %v2294_v34 }
 0x358   : > { %7561 = vmatpush3.bf16.xpose.msra.mxu1 %v2426_v40  ;;  %7562 = vmatprep.mubr.msk.bf16.mxu1 %vm9035_vm0, %v9034_v2 }
 0x359   : > { %7572 = vmatprep.subr.bf16.mxu1 %v9034_v2  ;;  %v2669_v41 = vpop.permute.xlu1 %2668  ;;  %v2671_v46 = vpop.permute.xlu0 %2670 }
 0x35a   : > { %v2676_v48 = vsel %vm2037_vm3, %v2671_v46, 0 }
 0x35d   : > { %v2794_v43 = vpop.permute.xlu1 %2793  ;;  %v2796_v50 = vpop.permute.xlu0 %2795 }
 0x35e   : > { %v2801_v51 = vsel %vm2037_vm3, %v2796_v50, 0 }
 0x35f   : > { %7563 = vmatmul.mubr.msk.bf16.vlgmr.msra.gmra.mrb[16].mxu1 %vm2037_vm3, %v2419_v37 }
 0x360   : > { %7573 = vmatpush3.bf16.xpose.msra.mxu1 %v2551_v44  ;;  %7574 = vmatprep.mubr.msk.bf16.mxu1 %vm9035_vm0, %v9034_v2 }
 0x361   : > { %7584 = vmatprep.subr.bf16.mxu1 %v9034_v2  ;;  %v2919_v45 = vpop.permute.xlu1 %2918  ;;  %v2921_v52 = vpop.permute.xlu0 %2920 }
 0x362   : > { %v2926_v53 = vsel %vm2037_vm3, %v2921_v52, 0 }
 0x365   : > { %v2118_v47 = vpop.permute.xlu1 %2117 }
 0x366   : > { %v2124_v49 = vsel %vm2122_vm4, %v2118_v47, 0 }
 0x367   : > { %7575 = vmatmul.mubr.msk.bf16.vlgmr.msra.gmra.mrb[20].mxu1 %vm2037_vm3, %v2544_v39  ;;  %7531 = vmatpush3.bf16.msra.mxu0 %v2124_v49 }
 0x368   : > { %7585 = vmatpush3.bf16.xpose.msra.mxu1 %v2676_v48  ;;  %7586 = vmatprep.mubr.msk.bf16.mxu1 %vm9035_vm0, %v9034_v2 }
 0x369   : > { %7596 = vmatprep.subr.bf16.mxu1 %v9034_v2  ;;  %7542 = vmatprep.subr.bf16.mxu0 %v9034_v2 }
 0x36f   : > { %7587 = vmatmul.mubr.msk.bf16.vlgmr.msra.gmra.mrb[24].mxu1 %vm2037_vm3, %v2669_v41 }
 0x370   : > { %7597 = vmatpush3.bf16.xpose.msra.mxu1 %v2801_v51  ;;  %7598 = vmatprep.mubr.msk.bf16.mxu1 %vm9035_vm0, %v9034_v2 }
 0x371   : > { %7608 = vmatprep.subr.bf16.mxu1 %v9034_v2 }
 0x377   : > { %7599 = vmatmul.mubr.msk.bf16.vlgmr.msra.gmra.mrb[28].mxu1 %vm2037_vm3, %v2794_v43 }
 0x378   : > { %7609 = vmatpush3.bf16.xpose.msra.mxu1 %v2926_v53  ;;  %7610 = vmatprep.mubr.msk.bf16.mxu1 %vm9035_vm0, %v9034_v2 }
 0x379   : > { %7620 = vmatprep.subr.bf16.mxu1 %v9034_v2 }
 0x37f   : > { %7611 = vmatmul.mubr.msk.bf16.vlgmr.msra.gmra.mrb[32].mxu1 %vm2037_vm3, %v2919_v45 }
 0x380   : > { %7628 = vmatprep.mubr.msk.bf16.mxu1 %vm9035_vm0, %v9034_v2 }
 0x3af   : > { %v2078_v61 = vpop.f32.mrb[4].mxu1 }
 0x3b0   : > { %v2091_v62 = vsel %vm9713_vm6, %v2078_v61, -1e+09  ;;  %v7528_v63 = vpop.f32.mrb[5].mxu1 }
 0x3b1   : > { %v2081_v0 = vpop.f32.mrb[6].mxu1  ;;  %v2093_v1 = vsel %vm2037_vm3, %v2091_v62, -inf }
 0x3b2   : > { %v2092_v4 = vsel %vm9713_vm6, %v2081_v0, -1e+09  ;;  %2094 = vmax.xlane.f32.xlu0 %v2093_v1  ;;  %v7529_v5 = vpop.f32.mrb[7].mxu1 }
 0x3b3   : > { %v2096_v6 = vsel %vm2037_vm3, %v2092_v4, -inf }
 0x3b4   : > { %2097 = vmax.xlane.f32.xlu1 %v2096_v6 }
 0x422   : > { %v2212_v7 = vpop.f32.mrb[8].mxu1 }
 0x423   : > { %v9725_v8 = vsel %vm9713_vm6, %v2212_v7, -1e+09  ;;  %v7540_v9 = vpop.f32.mrb[9].mxu1 }
 0x424   : > { %v2215_v10 = vpop.f32.mrb[10].mxu1  ;;  %v2221_v11 = vsel %vm2037_vm3, %v9725_v8, -inf }
 0x425   : > { %v9731_v12 = vsel %vm9713_vm6, %v2215_v10, -1e+09  ;;  %2222 = vmax.xlane.f32.xlu0 %v2221_v11  ;;  %v7541_v13 = vpop.f32.mrb[11].mxu1 }
 0x426   : > { %v2224_v15 = vsel %vm2037_vm3, %v9731_v12, -inf }
 0x429   : > { %2225 = vmax.xlane.f32.xlu0 %v2224_v15 }
 0x42a   : > { %v2337_v16 = vpop.f32.mrb[12].mxu1 }
 0x42b   : > { %v9737_v17 = vsel %vm9713_vm6, %v2337_v16, -1e+09  ;;  %v7552_v18 = vpop.f32.mrb[13].mxu1 }
 0x42c   : > { %v2340_v19 = vpop.f32.mrb[14].mxu1  ;;  %v2346_v21 = vsel %vm2037_vm3, %v9737_v17, -inf }
 0x42d   : > { %v9743_v22 = vsel %vm9713_vm6, %v2340_v19, -1e+09  ;;  %2347 = vmax.xlane.f32.xlu1 %v2346_v21  ;;  %v7553_v23 = vpop.f32.mrb[15].mxu1 }
 0x42e   : > { %v2349_v24 = vsel %vm2037_vm3, %v9743_v22, -inf }
 0x42f   : > { %2350 = vmax.xlane.f32.xlu0 %v2349_v24 }
 0x432   : > { %v2462_v25 = vpop.f32.mrb[16].mxu1 }
 0x433   : > { %v9749_v26 = vsel %vm9713_vm6, %v2462_v25, -1e+09  ;;  %v7564_v27 = vpop.f32.mrb[17].mxu1 }
 0x434   : > { %v2465_v28 = vpop.f32.mrb[18].mxu1  ;;  %v2471_v29 = vsel %vm2037_vm3, %v9749_v26, -inf }
 0x435   : > { %v9755_v30 = vsel %vm9713_vm6, %v2465_v28, -1e+09  ;;  %2472 = vmax.xlane.f32.xlu1 %v2471_v29  ;;  %v7565_v31 = vpop.f32.mrb[19].mxu1 }
 0x436   : > { %v2474_v32 = vsel %vm2037_vm3, %v9755_v30, -inf }
 0x437   : > { %2475 = vmax.xlane.f32.xlu0 %v2474_v32 }
 0x43a   : > { %v2587_v33 = vpop.f32.mrb[20].mxu1 }
 0x43b   : > { %v9761_v34 = vsel %vm9713_vm6, %v2587_v33, -1e+09  ;;  %v7576_v35 = vpop.f32.mrb[21].mxu1 }
 0x43c   : > { %v2590_v36 = vpop.f32.mrb[22].mxu1  ;;  %v2596_v37 = vsel %vm2037_vm3, %v9761_v34, -inf }
 0x43d   : > { %v9767_v38 = vsel %vm9713_vm6, %v2590_v36, -1e+09  ;;  %2597 = vmax.xlane.f32.xlu1 %v2596_v37  ;;  %v7577_v39 = vpop.f32.mrb[23].mxu1 }
 0x43e   : > { %v2599_v40 = vsel %vm2037_vm3, %v9767_v38, -inf }
 0x43f   : > { %2600 = vmax.xlane.f32.xlu0 %v2599_v40  ;;  %v2095_v41 = vpop.xlane.xlu0 %2094 }
 0x440   : > { %v2099_v42 = vsub.f32 %v2091_v62, %v2095_v41 }
 0x441   : > { %v2098_v43 = vpop.xlane.xlu1 %2097 }
 0x442   : > { %v2712_v44 = vpop.f32.mrb[24].mxu1  ;;  %v2101_v45 = vmul.f32 1.442695, %v2099_v42  ;;  %v2100_v46 = vsub.f32 %v2092_v4, %v2098_v43 }
 0x443   : > { %v9773_v47 = vsel %vm9713_vm6, %v2712_v44, -1e+09  ;;  %v7588_v48 = vpop.f32.mrb[25].mxu1 }
 0x444   : > { %v2715_v49 = vpop.f32.mrb[26].mxu1  ;;  %v2721_v50 = vsel %vm2037_vm3, %v9773_v47, -inf  ;;  %8309 = vpow2.f32 %v2101_v45  ;;  %v2103_v51 = vmul.f32 1.442695, %v2100_v46 }
 0x445   : > { %v9779_v52 = vsel %vm9713_vm6, %v2715_v49, -1e+09  ;;  %2722 = vmax.xlane.f32.xlu1 %v2721_v50  ;;  %v7589_v53 = vpop.f32.mrb[27].mxu1 }
 0x446   : > { %v2724_v54 = vsel %vm2037_vm3, %v9779_v52, -inf  ;;  %8311 = vpow2.f32 %v2103_v51 }
 0x447   : > { %2725 = vmax.xlane.f32.xlu0 %v2724_v54 }
 0x44a   : > { %v2837_v55 = vpop.f32.mrb[28].mxu1 }
 0x44b   : > { %v9785_v58 = vsel %vm9713_vm6, %v2837_v55, -1e+09  ;;  %v7600_v59 = vpop.f32.mrb[29].mxu1 }
 0x44c   : > { %v2840_v61 = vpop.f32.mrb[30].mxu1  ;;  %v2846_v62 = vsel %vm2037_vm3, %v9785_v58, -inf }
 0x44d   : > { %v9791_v63 = vsel %vm9713_vm6, %v2840_v61, -1e+09  ;;  %2847 = vmax.xlane.f32.xlu1 %v2846_v62  ;;  %v7601_v0 = vpop.f32.mrb[31].mxu1 }
 0x44e   : > { %v2849_v1 = vsel %vm2037_vm3, %v9791_v63, -inf  ;;  %v9795_v4 = vpop.eup %8309 }
 0x44f   : > { %2850 = vmax.xlane.f32.xlu0 %v2849_v1  ;;  %v2105_v5 = vsel %vm2037_vm3, %v9795_v4, 0.0 }
 0x450   : > { %v9799_v6 = vpop.eup %8311 }
 0x451   : > { %2106 = vadd.xlane.f32.xlu1 %v2105_v5  ;;  %v2108_v9 = vsel %vm2037_vm3, %v9799_v6, 0.0 }
 0x452   : > { %v2962_v7 = vpop.f32.mrb[32].mxu1 }
 0x453   : > { %v9805_v10 = vsel %vm9713_vm6, %v2962_v7, -1e+09  ;;  %2109 = vadd.xlane.f32.xlu0 %v2108_v9  ;;  %v7612_v11 = vpop.f32.mrb[33].mxu1 }
 0x454   : > { %v2965_v13 = vpop.f32.mrb[34].mxu1  ;;  %v2971_v15 = vsel %vm2037_vm3, %v9805_v10, -inf }
 0x455   : > { %v9811_v16 = vsel %vm9713_vm6, %v2965_v13, -1e+09  ;;  %2972 = vmax.xlane.f32.xlu1 %v2971_v15  ;;  %v7613_v18 = vpop.f32.mrb[35].mxu1 }
 0x456   : > { %v2974_v19 = vsel %vm2037_vm3, %v9811_v16, -inf }
 0x457   : > { %2975 = vmax.xlane.f32.xlu0 %v2974_v19 }
 0x466   : > { %2369 = vrot.lane.b32.xlu1 %v9635_v20, %s10727_s10 }
 0x46d   : > { %2244 = vrot.lane.b32.xlu0 %v9635_v20, %s10729_s26 }
 0x4b2   : > { %v2223_v21 = vpop.xlane.xlu0 %2222 }
 0x4b3   : > { %v2227_v23 = vsub.f32 %v9725_v8, %v2223_v21 }
 0x4b5   : > { %v2229_v60 = vmul.f32 1.442695, %v2227_v23 }
 0x4b6   : > { %v2226_v24 = vpop.xlane.xlu0 %2225 }
 0x4b7   : > { %8313 = vpow2.f32 %v2229_v60  ;;  %v2228_v25 = vsub.f32 %v9731_v12, %v2226_v24 }
 0x4b9   : > { %v2231_v27 = vmul.f32 1.442695, %v2228_v25 }
 0x4ba   : > { %v2348_v28 = vpop.xlane.xlu1 %2347 }
 0x4bb   : > { %8315 = vpow2.f32 %v2231_v27  ;;  %v2352_v29 = vsub.f32 %v9737_v17, %v2348_v28 }
 0x4bc   : > { %v2351_v31 = vpop.xlane.xlu0 %2350 }
 0x4bd   : > { %v2354_v32 = vmul.f32 1.442695, %v2352_v29  ;;  %v2353_v33 = vsub.f32 %v9743_v22, %v2351_v31 }
 0x4bf   : > { %8317 = vpow2.f32 %v2354_v32  ;;  %v2356_v35 = vmul.f32 1.442695, %v2353_v33 }
 0x4c1   : > { %v9823_v36 = vpop.eup %8313  ;;  %8319 = vpow2.f32 %v2356_v35 }
 0x4c2   : > { %v2473_v8 = vpop.xlane.xlu1 %2472  ;;  %v2233_v37 = vsel %vm2037_vm3, %v9823_v36, 0.0 }
 0x4c3   : > { %v2477_v12 = vsub.f32 %v9749_v26, %v2473_v8  ;;  %2234 = vadd.xlane.f32.xlu1 %v2233_v37 }
 0x4c4   : > { %v2476_v39 = vpop.xlane.xlu0 %2475 }
 0x4c5   : > { %v9828_v40 = vpop.eup %8315  ;;  %v2479_v17 = vmul.f32 1.442695, %v2477_v12  ;;  %v2478_v41 = vsub.f32 %v9755_v30, %v2476_v39 }
 0x4c6   : > { %v2236_v22 = vsel %vm2037_vm3, %v9828_v40, 0.0 }
 0x4c7   : > { %8321 = vpow2.f32 %v2479_v17  ;;  %v2481_v42 = vmul.f32 1.442695, %v2478_v41  ;;  %2237 = vadd.xlane.f32.xlu0 %v2236_v22 }
 0x4c9   : > { %v9833_v43 = vpop.eup %8317  ;;  %8323 = vpow2.f32 %v2481_v42 }
 0x4ca   : > { %v2598_v44 = vpop.xlane.xlu1 %2597  ;;  %v2358_v26 = vsel %vm2037_vm3, %v9833_v43, 0.0 }
 0x4cb   : > { %v9837_v45 = vpop.eup %8319  ;;  %v2602_v46 = vsub.f32 %v9761_v34, %v2598_v44  ;;  %2359 = vadd.xlane.f32.xlu1 %v2358_v26 }
 0x4cc   : > { %v2601_v48 = vpop.xlane.xlu0 %2600  ;;  %v2361_v30 = vsel %vm2037_vm3, %v9837_v45, 0.0 }
 0x4cd   : > { %v2604_v49 = vmul.f32 1.442695, %v2602_v46  ;;  %v2603_v50 = vsub.f32 %v9767_v38, %v2601_v48  ;;  %2362 = vadd.xlane.f32.xlu0 %v2361_v30 }
 0x4cf   : > { %8325 = vpow2.f32 %v2604_v49  ;;  %v2606_v51 = vmul.f32 1.442695, %v2603_v50 }
 0x4d1   : > { %v9843_v53 = vpop.eup %8321  ;;  %8327 = vpow2.f32 %v2606_v51 }
 0x4d2   : > { %v2723_v54 = vpop.xlane.xlu1 %2722  ;;  %v2483_v55 = vsel %vm2037_vm3, %v9843_v53, 0.0 }
 0x4d3   : > { %v9847_v59 = vpop.eup %8323  ;;  %v2727_v34 = vsub.f32 %v9773_v47, %v2723_v54  ;;  %2484 = vadd.xlane.f32.xlu1 %v2483_v55 }
 0x4d4   : > { %v2726_v61 = vpop.xlane.xlu0 %2725  ;;  %v2486_v62 = vsel %vm2037_vm3, %v9847_v59, 0.0 }
 0x4d5   : > { %v2729_v38 = vmul.f32 1.442695, %v2727_v34  ;;  %v2728_v0 = vsub.f32 %v9779_v52, %v2726_v61  ;;  %2487 = vadd.xlane.f32.xlu0 %v2486_v62 }
 0x4d7   : > { %8329 = vpow2.f32 %v2729_v38  ;;  %v2731_v1 = vmul.f32 1.442695, %v2728_v0 }
 0x4d9   : > { %v9853_v5 = vpop.eup %8325  ;;  %8331 = vpow2.f32 %v2731_v1 }
 0x4da   : > { %v2848_v7 = vpop.xlane.xlu1 %2847  ;;  %v2608_v9 = vsel %vm2037_vm3, %v9853_v5, 0.0 }
 0x4db   : > { %v9857_v11 = vpop.eup %8327  ;;  %v2852_v47 = vsub.f32 %v9785_v58, %v2848_v7  ;;  %2609 = vadd.xlane.f32.xlu0 %v2608_v9 }
 0x4dc   : > { %v2851_v13 = vpop.xlane.xlu0 %2850  ;;  %v2611_v19 = vsel %vm2037_vm3, %v9857_v11, 0.0 }
 0x4dd   : > { %v2854_v15 = vmul.f32 1.442695, %v2852_v47  ;;  %v2853_v18 = vsub.f32 %v9791_v63, %v2851_v13 }
 0x4de   : > { %v2107_v52 = vpop.xlane.xlu1 %2106 }
 0x4df   : > { %8333 = vpow2.f32 %v2854_v15  ;;  %v2856_v21 = vmul.f32 1.442695, %v2853_v18  ;;  %2612 = vadd.xlane.f32.xlu0 %v2611_v19 }
 0x4e0   : > { %8335 = vrcp.f32 %v2107_v52  ;;  %v2110_v23 = vpop.xlane.xlu0 %2109 }
 0x4e1   : > { %v9863_v60 = vpop.eup %8329  ;;  %8337 = vpow2.f32 %v2856_v21 }
 0x4e2   : > { %8339 = vrcp.f32 %v2110_v23  ;;  %v2973_v24 = vpop.xlane.xlu1 %2972  ;;  %v2733_v58 = vsel %vm2037_vm3, %v9863_v60, 0.0 }
 0x4e3   : > { %v9867_v25 = vpop.eup %8331  ;;  %v2977_v63 = vsub.f32 %v9805_v10, %v2973_v24  ;;  %2734 = vadd.xlane.f32.xlu1 %v2733_v58 }
 0x4e4   : > { %v2736_v27 = vsel %vm2037_vm3, %v9867_v25, 0.0  ;;  %v2976_v29 = vpop.xlane.xlu0 %2975 }
 0x4e5   : > { %v2979_v28 = vmul.f32 1.442695, %v2977_v63  ;;  %2737 = vadd.xlane.f32.xlu0 %v2736_v27 }
 0x4e6   : > { %v2370_v26 = vpop.permute.xlu1 %2369 }
 0x4e7   : > { %8341 = vpow2.f32 %v2979_v28  ;;  %v2375_v62 = vsel %vm2122_vm4, %v2370_v26, 0 }
 0x4e8   : > { %v2245_v12 = vpop.permute.xlu0 %2244 }
 0x4e9   : > { %v9872_v31 = vpop.eup %8333  ;;  %v2250_v22 = vsel %vm2122_vm4, %v2245_v12, 0 }
 0x4ea   : > { %v8336_v32 = vpop.eup %8335  ;;  %v2858_v33 = vsel %vm2037_vm3, %v9872_v31, 0.0 }
 0x4eb   : > { %v9876_v35 = vpop.eup %8337  ;;  %2859 = vadd.xlane.f32.xlu0 %v2858_v33  ;;  %v2113_v10 = vmul.f32 %v8336_v32, %v9795_v4  ;;  %v2978_v4 = vsub.f32 %v9811_v16, %v2976_v29 }
 0x4ec   : > { %v8340_v8 = vpop.eup %8339  ;;  %v2861_v39 = vsel %vm2037_vm3, %v9876_v35, 0.0 }
 0x4ed   : > { %v2114_v37 = vmul.f32 %v8340_v8, %v9799_v6  ;;  %v2981_v6 = vmul.f32 1.442695, %v2978_v4 }
 0x4ef   : > { %2862 = vadd.xlane.f32.xlu0 %v2861_v39  ;;  %v2115_v17 = vpack.c.bf16 %v2114_v37, %v2113_v10  ;;  %8343 = vpow2.f32 %v2981_v6 }
 0x4f1   : > { %v9882_v41 = vpop.eup %8341  ;;  %7533 = vmatmul.mubr.msk.bf16.vlgmr.msra.gmra.mrb[4].mxu0 %vm2037_vm3, %v2115_v17 }
 0x4f2   : > { %7543 = vmatpush3.bf16.msra.mxu0 %v2250_v22  ;;  %v2983_v42 = vsel %vm2037_vm3, %v9882_v41, 0.0  ;;  %7544 = vmatprep.mubr.msk.bf16.mxu0 %vm9035_vm0, %v9034_v2 }
 0x4f3   : > { %2984 = vadd.xlane.f32.xlu0 %v2983_v42  ;;  %7554 = vmatprep.subr.bf16.mxu0 %v9034_v2 }
 0x4f4   : > { %2494 = vrot.lane.b32.xlu1 %v9635_v20, %s10725_s24 }
 0x4f9   : > { %v9900_v44 = vpop.eup %8343 }
 0x4fa   : > { %v2986_v16 = vsel %vm2037_vm3, %v9900_v44, 0.0 }
 0x509   : > { %2619 = vrot.lane.b32.xlu0 %v9635_v20, %s10717_s18 }
 0x50d   : > { %2744 = vrot.lane.b32.xlu0 %v9635_v20, %s10723_s2 }
 0x511   : > { %2869 = vrot.lane.b32.xlu0 %v9635_v20, %s10721_s28 }
 0x515   : > { %2994 = vrot.lane.b32.xlu0 %v9635_v20, %s10719_s12 }
 0x518   : > { %2987 = vadd.xlane.f32.xlu1 %v2986_v16 }
 0x550   : > { %v2235_v46 = vpop.xlane.xlu1 %2234 }
 0x551   : > { %8345 = vrcp.f32 %v2235_v46 }
 0x554   : > { %v2238_v48 = vpop.xlane.xlu0 %2237 }
 0x555   : > { %8347 = vrcp.f32 %v2238_v48 }
 0x558   : > { %v2360_v30 = vpop.xlane.xlu1 %2359 }
 0x559   : > { %8349 = vrcp.f32 %v2360_v30 }
 0x55a   : > { %v2363_v49 = vpop.xlane.xlu0 %2362 }
 0x55b   : > { %8351 = vrcp.f32 %v2363_v49  ;;  %v8346_v50 = vpop.eup %8345 }
 0x55c   : > { %v2241_v54 = vmul.f32 %v8346_v50, %v9823_v36 }
 0x55f   : > { %v8348_v51 = vpop.eup %8347 }
 0x560   : > { %v2242_v55 = vmul.f32 %v8348_v51, %v9828_v40  ;;  %v2485_v0 = vpop.xlane.xlu1 %2484 }
 0x562   : > { %v2243_v20 = vpack.c.bf16 %v2242_v55, %v2241_v54  ;;  %v2488_v34 = vpop.xlane.xlu0 %2487 }
 0x563   : > { %v8350_v61 = vpop.eup %8349  ;;  %8353 = vrcp.f32 %v2488_v34 }
 0x564   : > { %7545 = vmatmul.mubr.msk.bf16.vlgmr.msra.gmra.mrb[8].mxu0 %vm2037_vm3, %v2243_v20  ;;  %v2366_v36 = vmul.f32 %v8350_v61, %v9833_v43  ;;  %8355 = vrcp.f32 %v2485_v0 }
 0x565   : > { %v8352_v38 = vpop.eup %8351  ;;  %7555 = vmatpush3.bf16.msra.mxu0 %v2375_v62  ;;  %7556 = vmatprep.mubr.msk.bf16.mxu0 %vm9035_vm0, %v9034_v2 }
 0x566   : > { %v2367_v1 = vmul.f32 %v8352_v38, %v9837_v45  ;;  %7566 = vmatprep.subr.bf16.mxu0 %v9034_v2 }
 0x568   : > { %v2610_v40 = vpop.xlane.xlu0 %2609  ;;  %v2368_v7 = vpack.c.bf16 %v2367_v1, %v2366_v36 }
 0x56c   : > { %7557 = vmatmul.mubr.msk.bf16.vlgmr.msra.gmra.mrb[12].mxu0 %vm2037_vm3, %v2368_v7  ;;  %v2613_v47 = vpop.xlane.xlu0 %2612 }
 0x56d   : > { %7568 = vmatprep.mubr.msk.bf16.mxu0 %vm9035_vm0, %v9034_v2  ;;  %v8354_v9 = vpop.eup %8353  ;;  %8357 = vrcp.f32 %v2613_v47 }
 0x56e   : > { %v8356_v15 = vpop.eup %8355  ;;  %v2492_v18 = vmul.f32 %v8354_v9, %v9847_v59  ;;  %8359 = vrcp.f32 %v2610_v40 }
 0x56f   : > { %v2491_v19 = vmul.f32 %v8356_v15, %v9843_v53 }
 0x570   : > { %v2735_v13 = vpop.xlane.xlu1 %2734 }
 0x571   : > { %v2493_v21 = vpack.c.bf16 %v2492_v18, %v2491_v19 }
 0x572   : > { %v2738_v45 = vpop.xlane.xlu0 %2737 }
 0x573   : > { %8361 = vrcp.f32 %v2738_v45 }
 0x574   : > { %v2495_v52 = vpop.permute.xlu1 %2494  ;;  %8363 = vrcp.f32 %v2735_v13 }
 0x575   : > { %v2500_v43 = vsel %vm2122_vm4, %v2495_v52, 0 }
 0x576   : > { %7567 = vmatpush3.bf16.msra.mxu0 %v2500_v43 }
 0x577   : > { %7578 = vmatprep.subr.bf16.mxu0 %v9034_v2  ;;  %v8358_v59 = vpop.eup %8357 }
 0x578   : > { %v2860_v23 = vpop.xlane.xlu0 %2859  ;;  %v8360_v53 = vpop.eup %8359  ;;  %v2617_v63 = vmul.f32 %v8358_v59, %v9857_v11 }
 0x579   : > { %7569 = vmatmul.mubr.msk.bf16.vlgmr.msra.gmra.mrb[16].mxu0 %vm2037_vm3, %v2493_v21  ;;  %v2616_v28 = vmul.f32 %v8360_v53, %v9853_v5 }
 0x57a   : > { %7580 = vmatprep.mubr.msk.bf16.mxu0 %vm9035_vm0, %v9034_v2 }
 0x57b   : > { %v2618_v32 = vpack.c.bf16 %v2617_v63, %v2616_v28  ;;  %v8199_v63 = vld [vmem:[%s10845_s6 + $0x10] sm:$0xff]  }
 0x57c   : > { %v2863_v24 = vpop.xlane.xlu0 %2862 }
 0x57d   : > { %8365 = vrcp.f32 %v2863_v24  ;;  %v8362_v33 = vpop.eup %8361 }
 0x57e   : > { %8367 = vrcp.f32 %v2860_v23  ;;  %v8364_v37 = vpop.eup %8363  ;;  %v2742_v5 = vmul.f32 %v8362_v33, %v9867_v25  ;;  %v8197_v23 = vld [vmem:[%s10845_s6] sm:$0xff]   ;;  %v8200_v33 = vld [vmem:[%s10845_s6 + $0x18] sm:$0xff]  }
 0x57f   : > { %v2741_v11 = vmul.f32 %v8364_v37, %v9863_v60  ;;  %7621 = vmatpush3.bf16.msra.mxu1 %v8197_v23  ;;  %v8475_v23 = vld [vmem:[%s9615_s1] sm:$0xff] }
 0x580   : > { %v2985_v58 = vpop.xlane.xlu0 %2984  ;;  %7622 = vmatprep.subr.bf16.mxu1 %v9034_v2 }
 0x581   : > { %v2743_v39 = vpack.c.bf16 %v2742_v5, %v2741_v11  ;;  %8369 = vrcp.f32 %v2985_v58  ;;  %v8198_v58 = vld [vmem:[%s10845_s6 + $0x8] sm:$0xff]   ;;  %s1873_s6 = scalar_lea.vmem %s10858_s5, %s9597_s15  ;;  %s10861_s5 = smov 56  }
 0x582   : > { %s10879_s15 = sld [smem:[#allocation71_spill]] }
 0x583   : > { %7623 = vmatpush3.bf16.msra.mxu1 %v8198_v58  ;;  %v8476_v58 = vld [vmem:[%s9615_s1 + $0x8] sm:$0xff]  ;;  %s10847_s1 = sld [smem:[#allocation51_spill]] }
 0x584   : > { %v2620_v27 = vpop.permute.xlu0 %2619  ;;  %7624 = vmatprep.subr.bf16.mxu1 %v9034_v2 }
 0x585   : > { %v2625_v29 = vsel %vm2122_vm4, %v2620_v27, 0 }
 0x586   : > { %7579 = vmatpush3.bf16.msra.mxu0 %v2625_v29 }
 0x587   : > { %7590 = vmatprep.subr.bf16.mxu0 %v9034_v2  ;;  %v8366_v17 = vpop.eup %8365  ;;  %7625 = vmatpush3.bf16.msra.mxu1 %v8199_v63 }
 0x588   : > { %v2745_v8 = vpop.permute.xlu0 %2744  ;;  %v8368_v42 = vpop.eup %8367  ;;  %v2867_v4 = vmul.f32 %v8366_v17, %v9876_v35  ;;  %7626 = vmatprep.subr.bf16.mxu1 %v9034_v2 }
 0x589   : > { %v2750_v10 = vsel %vm2122_vm4, %v2745_v8, 0  ;;  %7581 = vmatmul.mubr.msk.bf16.vlgmr.msra.gmra.mrb[20].mxu0 %vm2037_vm3, %v2618_v32  ;;  %v2866_v25 = vmul.f32 %v8368_v42, %v9872_v31 }
 0x58a   : > { %7591 = vmatpush3.bf16.msra.mxu0 %v2750_v10  ;;  %7592 = vmatprep.mubr.msk.bf16.mxu0 %vm9035_vm0, %v9034_v2 }
 0x58b   : > { %7602 = vmatprep.subr.bf16.mxu0 %v9034_v2  ;;  %v2868_v60 = vpack.c.bf16 %v2867_v4, %v2866_v25  ;;  %v8370_v46 = vpop.eup %8369  ;;  %7627 = vmatpush3.bf16.msra.mxu1 %v8200_v33 }
 0x58c   : > { %v2870_v12 = vpop.permute.xlu0 %2869  ;;  %v2991_v35 = vmul.f32 %v8370_v46, %v9882_v41 }
 0x58d   : > { %v2875_v22 = vsel %vm2122_vm4, %v2870_v12, 0 }
 0x590   : > { %v2995_v6 = vpop.permute.xlu0 %2994 }
 0x591   : > { %7593 = vmatmul.mubr.msk.bf16.vlgmr.msra.gmra.mrb[24].mxu0 %vm2037_vm3, %v2743_v39  ;;  %v3000_v16 = vsel %vm2122_vm4, %v2995_v6, 0 }
 0x592   : > { %7603 = vmatpush3.bf16.msra.mxu0 %v2875_v22  ;;  %7604 = vmatprep.mubr.msk.bf16.mxu0 %vm9035_vm0, %v9034_v2 }
 0x593   : > { %7614 = vmatprep.subr.bf16.mxu0 %v9034_v2 }
 0x599   : > { %7605 = vmatmul.mubr.msk.bf16.vlgmr.msra.gmra.mrb[28].mxu0 %vm2037_vm3, %v2868_v60 }
 0x59a   : > { %7615 = vmatpush3.bf16.msra.mxu0 %v3000_v16  ;;  %7616 = vmatprep.mubr.msk.bf16.mxu0 %vm9035_vm0, %v9034_v2 }
 0x5a5   : > { %v2988_v26 = vpop.xlane.xlu1 %2987 }
 0x5a6   : > { %8371 = vrcp.f32 %v2988_v26 }
 0x5b0   : > { %v8372_v48 = vpop.eup %8371 }
 0x5b1   : > { %v2992_v30 = vmul.f32 %v8372_v48, %v9900_v44 }
 0x5b3   : > { %v2993_v31 = vpack.c.bf16 %v2992_v30, %v2991_v35 }
 0x5b5   : > { %7617 = vmatmul.mubr.msk.bf16.vlgmr.msra.gmra.mrb[32].mxu0 %vm2037_vm3, %v2993_v31 }
 0x5b6   : > { %3345 = vmatprep.mubr.bf16.mxu0 %v9036_v3 }
 0x5c4   : > { %v9951_v49 = vpop.f32.mrb[4].mxu0 }
 0x5c5   : > { %v7534_v50 = vpop.f32.mrb[5].mxu0 }
 0x5c6   : > { %v9953_v51 = vpop.f32.mrb[6].mxu0 }
 0x5c7   : > { %v7535_v54 = vpop.f32.mrb[7].mxu0 }
 0x637   : > { %v2286_v55 = vpop.f32.mrb[8].mxu0 }
 0x638   : > { %v7546_v20 = vpop.f32.mrb[9].mxu0 }
 0x639   : > { %v2289_v34 = vpop.f32.mrb[10].mxu0 }
 0x63a   : > { %v8154_v61 = vpack.i.bf16 %v2289_v34, %v2286_v55  ;;  %v7547_v62 = vpop.f32.mrb[11].mxu0 }
 0x63c   : > { %8155 = vrot.lane.b32.xlu0 %v8154_v61, %s10719_s12  ;;  %s10848_s12 = sld [smem:[#allocation57_spill]] }
 0x63f   : > { %v2411_v41 = vpop.f32.mrb[12].mxu0 }
 0x640   : > { %v7558_v44 = vpop.f32.mrb[13].mxu0 }
 0x641   : > { %v2414_v38 = vpop.f32.mrb[14].mxu0 }
 0x642   : > { %v8159_v0 = vpack.i.bf16 %v2414_v38, %v2411_v41  ;;  %v7559_v1 = vpop.f32.mrb[15].mxu0 }
 0x644   : > { %8160 = vrot.lane.b32.xlu1 %v8159_v0, %s10721_s28  ;;  %s10849_s28 = sld [smem:[#allocation55_spill]] }
 0x64c   : > { %v2536_v36 = vpop.f32.mrb[16].mxu0 }
 0x64d   : > { %v7570_v40 = vpop.f32.mrb[17].mxu0 }
 0x64e   : > { %v2539_v7 = vpop.f32.mrb[18].mxu0 }
 0x64f   : > { %v8164_v9 = vpack.i.bf16 %v2539_v7, %v2536_v36  ;;  %v7571_v47 = vpop.f32.mrb[19].mxu0 }
 0x651   : > { %8165 = vrot.lane.b32.xlu0 %v8164_v9, %s10723_s2  ;;  %s10850_s2 = smov 120  }
 0x65c   : > { %v2661_v13 = vpop.f32.mrb[20].mxu0 }
 0x65d   : > { %v7582_v15 = vpop.f32.mrb[21].mxu0 }
 0x65e   : > { %v2664_v18 = vpop.f32.mrb[22].mxu0  ;;  %v7131_v15 = vld [vmem:[#allocation4] ss:$0 sm:$0xff] }
 0x65f   : > { %v8169_v45 = vpack.i.bf16 %v2664_v18, %v2661_v13  ;;  %v7583_v52 = vpop.f32.mrb[23].mxu0 }
 0x661   : > { %8170 = vrot.lane.b32.xlu0 %v8169_v45, %s10717_s18  ;;  %s10846_s18 = sld [smem:[#allocation49_spill]] }
 0x664   : > { %v2786_v19 = vpop.f32.mrb[24].mxu0 }
 0x665   : > { %v7594_v43 = vpop.f32.mrb[25].mxu0 }
 0x666   : > { %v2789_v21 = vpop.f32.mrb[26].mxu0 }
 0x667   : > { %v8174_v24 = vpack.i.bf16 %v2789_v21, %v2786_v19  ;;  %v7595_v59 = vpop.f32.mrb[27].mxu0 }
 0x669   : > { %8175 = vrot.lane.b32.xlu0 %v8174_v24, %s10725_s24  ;;  %s10851_s24 = sld [smem:[#allocation58_spill]] }
 0x66c   : > { %v2911_v53 = vpop.f32.mrb[28].mxu0 }
 0x66d   : > { %v7606_v27 = vpop.f32.mrb[29].mxu0 }
 0x66e   : > { %v2914_v28 = vpop.f32.mrb[30].mxu0 }
 0x66f   : > { %v8179_v29 = vpack.i.bf16 %v2914_v28, %v2911_v53  ;;  %v7607_v32 = vpop.f32.mrb[31].mxu0 }
 0x671   : > { %8180 = vrot.lane.b32.xlu0 %v8179_v29, %s10727_s10  ;;  %s10854_s10 = smov 112  }
 0x688   : > { %v3036_v8 = vpop.f32.mrb[32].mxu0 }
 0x689   : > { %v7618_v10 = vpop.f32.mrb[33].mxu0 }
 0x68a   : > { %v3039_v37 = vpop.f32.mrb[34].mxu0 }
 0x68b   : > { %v8184_v5 = vpack.i.bf16 %v3039_v37, %v3036_v8  ;;  %v7619_v11 = vpop.f32.mrb[35].mxu0 }
 0x68d   : > { %8185 = vrot.lane.b32.xlu1 %v8184_v5, %s10729_s26  ;;  %s10855_s26 = smov 88  }
 0x6ae   : > { %v8156_v12 = vpop.permute.xlu0 %8155 }
 0x6af   : > { %v8158_v4 = vunpack.i.h.bf16 %v8156_v12  ;;  %v8157_v25 = vunpack.i.l.bf16 %v8156_v12  ;;  %v8203_v12 = vld [vmem:[%s10846_s18 + $0x4] ss:$8 sps:$4 sm:$0xff]  }
 0x6b0   : > { %3313 = vmatprep.subr.bf16.mxu0 %v8203_v12 }
 0x6b1   : > { %v3100_v30 = vsel %vm2037_vm3, %v9953_v51, %v8158_v4  ;;  %v3099_v31 = vsel %vm2037_vm3, %v9951_v49, %v8157_v25  ;;  %v8207_v4 = vld [vmem:[%s10846_s18 + $0x20] ss:$8 sps:$4 sm:$0xff]   ;;  %v8210_v25 = vld [vmem:[%s10846_s18 + $0x30] ss:$8 sps:$4 sm:$0xff]  }
 0x6b6   : > { %v8161_v22 = vpop.permute.xlu1 %8160 }
 0x6b7   : > { %v8163_v6 = vunpack.i.h.bf16 %v8161_v22  ;;  %v8162_v60 = vunpack.i.l.bf16 %v8161_v22  ;;  %v8204_v22 = vld [vmem:[%s10846_s18 + $0x10] ss:$8 sps:$4 sm:$0xff]  }
 0x6b9   : > { %v3103_v55 = vsel %vm3101_vm7, %v3100_v30, %v8163_v6  ;;  %v3102_v20 = vsel %vm3101_vm7, %v3099_v31, %v8162_v60  ;;  %v8212_v6 = vld [vmem:[%s10846_s18 + $0x34] ss:$8 sps:$4 sm:$0xff]   ;;  %v8217_v60 = vld [vmem:[%s10847_s1 + $0x40] sm:$0xff]  }
 0x6ba   : > { %7344 = vmatprep.subr.bf16.mxu1 %v8217_v60  ;;  %v8223_v30 = vld [vmem:[%s10847_s1 + $0x58] sm:$0xff]  }
 0x6bb   : > { %v8224_v31 = vld [vmem:[%s10847_s1 + $0x18] sm:$0xff]  }
 0x6c3   : > { %v8166_v39 = vpop.permute.xlu0 %8165 }
 0x6c4   : > { %v8168_v16 = vunpack.i.h.bf16 %v8166_v39  ;;  %v8167_v26 = vunpack.i.l.bf16 %v8166_v39  ;;  %v8201_v39 = vld [vmem:[%s10846_s18] ss:$8 sps:$4 sm:$0xff]  }
 0x6c5   : > { %3314 = vmatpush1.bf16.msra.mxu0 %v8201_v39 }
 0x6c6   : > { %v3106_v62 = vsel %vm3104_vm8, %v3103_v55, %v8168_v16  ;;  %v3105_v41 = vsel %vm3104_vm8, %v3102_v20, %v8167_v26  ;;  %v8218_v16 = vld [vmem:[%s10847_s1] sm:$0xff]   ;;  %v8219_v26 = vld [vmem:[%s10847_s1 + $0x48] sm:$0xff]  }
 0x6c7   : > { %v8227_v55 = vld [vmem:[%s10847_s1 + $0x68] sm:$0xff]  }
 0x6d3   : > { %v8171_v17 = vpop.permute.xlu0 %8170 }
 0x6d4   : > { %v8173_v48 = vunpack.i.h.bf16 %v8171_v17  ;;  %v8172_v35 = vunpack.i.l.bf16 %v8171_v17  ;;  %v8206_v17 = vld [vmem:[%s10846_s18 + $0x14] ss:$8 sps:$4 sm:$0xff]  }
 0x6d5   : > { %3315 = vmatprep.subr.bf16.mxu0 %v8206_v17 }
 0x6d6   : > { %v3108_v44 = vsel %vm1991_vm1, %v3106_v62, %v8173_v48  ;;  %v3107_v51 = vsel %vm1991_vm1, %v3105_v41, %v8172_v35  ;;  %3316 = vmatpush1.bf16.msra.mxu0 %v8204_v22  ;;  %v8221_v48 = vld [vmem:[%s10847_s1 + $0x50] sm:$0xff]  }
 0x6d7   : > { %v8222_v35 = vld [vmem:[%s10847_s1 + $0x10] sm:$0xff]  }
 0x6db   : > { %v8176_v42 = vpop.permute.xlu0 %8175 }
 0x6dc   : > { %v8178_v50 = vunpack.i.h.bf16 %v8176_v42  ;;  %v8177_v54 = vunpack.i.l.bf16 %v8176_v42  ;;  %v8209_v42 = vld [vmem:[%s10846_s18 + $0x24] ss:$8 sps:$4 sm:$0xff]   ;;  %s10869_s18 = sld [smem:[#allocation59_spill]] }
 0x6dd   : > { %3317 = vmatprep.subr.bf16.mxu0 %v8209_v42  ;;  %v7167_v42 = vld [vmem:[%s10851_s24] ss:$0 sm:$0xff]  ;;  %s10853_s24 = smov 96  }
 0x6de   : > { %v3111_v49 = vsel %vm3109_vm9, %v3108_v44, %v8178_v50  ;;  %v3110_v0 = vsel %vm3109_vm9, %v3107_v51, %v8177_v54  ;;  %3318 = vmatpush1.bf16.msra.mxu0 %v8207_v4  ;;  %v8225_v50 = vld [vmem:[%s10847_s1 + $0x60] sm:$0xff]  }
 0x6df   : > { %3319 = vmatprep.subr.bf16.mxu0 %v8212_v6  ;;  %v8226_v54 = vld [vmem:[%s10847_s1 + $0x20] sm:$0xff]  }
 0x6e2   : > { %3320 = vmatpush1.bf16.msra.mxu0 %v8210_v25 }
 0x6e3   : > { %v8181_v46 = vpop.permute.xlu0 %8180  ;;  %7632 = vmatprep.subr.bf16.mxu0 %v9034_v2 }
 0x6e4   : > { %v8183_v34 = vunpack.i.h.bf16 %v8181_v46  ;;  %v8182_v61 = vunpack.i.l.bf16 %v8181_v46  ;;  %v8220_v46 = vld [vmem:[%s10847_s1 + $0x8] sm:$0xff]  }
 0x6e6   : > { %v3114_v40 = vsel %vm3112_vm10, %v3111_v49, %v8183_v34  ;;  %v3113_v7 = vsel %vm3112_vm10, %v3110_v0, %v8182_v61  ;;  %v7137_v49 = vld [vmem:[#allocation7] ss:$0 sm:$0xff] }
 0x6ff   : > { %v8186_v38 = vpop.permute.xlu1 %8185 }
 0x700   : > { %v8188_v1 = vunpack.i.h.bf16 %v8186_v38  ;;  %v8187_v36 = vunpack.i.l.bf16 %v8186_v38 }
 0x702   : > { %v3117_v9 = vsel %vm3115_vm11, %v3114_v40, %v8188_v1  ;;  %v3116_v47 = vsel %vm3115_vm11, %v3113_v7, %v8187_v36  ;;  %v7138_v40 = vld [vmem:[#allocation9] ss:$0 sm:$0xff] }
 0x703   : > { %v3126_v13 = vpack.c.bf16 %v3117_v9, %v3116_v47 }
 0x705   : > { %7629 = vmatmul.mubr.msk.bf16.vlgmr.msra.gmra.mrb[36].mxu1 %vm1922_vm2, %v3126_v13  ;;  %v8213_v13 = vld [vmem:[%s10848_s12] sm:$0xff]  }
 0x706   : > { %7345 = vmatpush3.bf16.msra.mxu1 %v8218_v16 }
 0x707   : > { %7346 = vmatprep.subr.bf16.mxu1 %v8219_v26 }
 0x70a   : > { %7347 = vmatpush3.bf16.msra.mxu1 %v8220_v46 }
 0x70b   : > { %7348 = vmatprep.subr.bf16.mxu1 %v8221_v48 }
 0x70e   : > { %7349 = vmatpush3.bf16.msra.mxu1 %v8222_v35 }
 0x70f   : > { %7350 = vmatprep.subr.bf16.mxu1 %v8223_v30 }
 0x712   : > { %7351 = vmatpush3.bf16.msra.mxu1 %v8224_v31 }
 0x713   : > { %7352 = vmatprep.subr.bf16.mxu1 %v8225_v50 }
 0x716   : > { %7353 = vmatpush3.bf16.msra.mxu1 %v8226_v54 }
 0x717   : > { %7354 = vmatprep.subr.bf16.mxu1 %v8227_v55 }
 0x7d8   : > { %v3195_v18 = vpop.f32.mrb[36].mxu1 }
 0x7d9   : > { %v3196_v45 = vadd.f32 %v7131_v15, %v3195_v18  ;;  %v7630_v52 = vpop.f32.mrb[37].mxu1  ;;  %v8214_v18 = vld [vmem:[%s10848_s12 + $0x8] sm:$0xff]  }
 0x7da   : > { %v3198_v19 = vpop.f32.mrb[38].mxu1  ;;  %v8216_v52 = vld [vmem:[%s10848_s12 + $0x18] sm:$0xff]  }
 0x7db   : > { %v3199_v43 = vadd.f32 %v7131_v15, %v3198_v19  ;;  %v7631_v21 = vpop.f32.mrb[39].mxu1  ;;  %v3202_v24 = vadd.f32 %v8475_v23, %v3196_v45  ;;  %v8215_v45 = vld [vmem:[%s10848_s12 + $0x10] sm:$0xff]   ;;  %v8228_v19 = vld [vmem:[%s10847_s1 + $0x28] sm:$0xff]   ;;  %v8231_v23 = vld [vmem:[%s10847_s1 + $0x78] sm:$0xff]   ;;  %s10864_s12 = smov 40  }
 0x7dc   : > { %7355 = vmatpush3.bf16.msra.mxu1 %v8228_v19  ;;  %v8230_v21 = vld [vmem:[%s10847_s1 + $0x30] sm:$0xff]  }
 0x7dd   : > { %v3204_v59 = vsel %vm1922_vm2, %v3202_v24, 0.0  ;;  %v3203_v53 = vadd.f32 %v8476_v58, %v3199_v43  ;;  %v8229_v43 = vld [vmem:[%s10847_s1 + $0x70] sm:$0xff]  }
 0x7de   : > { %3205 = vadd.xlane.f32.xlu0 %v3204_v59  ;;  %7356 = vmatprep.subr.bf16.mxu1 %v8229_v43  ;;  %v3678_v59 = vld [vmem:[%s10849_s28] sm:$0xff]  ;;  %s10852_s28 = smov 104  }
 0x7df   : > { %v3207_v63 = vsel %vm1922_vm2, %v3203_v53, 0.0  ;;  %v3679_v58 = vpack.c.bf16 %v3678_v59, %v3678_v59 }
 0x7e0   : > { %3208 = vadd.xlane.f32.xlu1 %v3207_v63  ;;  %7357 = vmatpush3.bf16.msra.mxu1 %v8230_v21  ;;  %v1880_v21 = vld [vmem:[%s1873_s6] sm:$0x1]  ;;  %s10862_s6 = smov 64  }
 0x7e1   : > { %7358 = vmatprep.subr.bf16.mxu1 %v8231_v23  ;;  %vm1881_vm12 = vcmp.gt.f32.partialorder %v1880_v21, 0.5 }
 0x7e2   : > { %v3727_v23 = vsel %vm1881_vm12, 1, %v9036_v3 }
 0x86b   : > { %v3206_v27 = vpop.xlane.xlu0 %3205 }
 0x86c   : > { %v3211_v28 = vmul.f32 0.015625, %v3206_v27 }
 0x86d   : > { %v3209_v29 = vpop.xlane.xlu1 %3208 }
 0x86e   : > { %v3213_v32 = vsub.f32 %v3202_v24, %v3211_v28  ;;  %v3212_v33 = vmul.f32 0.015625, %v3209_v29  ;;  %v8232_v24 = vld [vmem:[%s10847_s1 + $0x38] sm:$0xff]   ;;  %s10856_s1 = smov 80  }
 0x86f   : > { %7359 = vmatpush3.bf16.msra.mxu1 %v8232_v24  ;;  %v3731_v24 = vrot.slane %v3727_v23, %v9709_v57 }
 0x870   : > { %v3214_v8 = vsub.f32 %v3203_v53, %v3212_v33  ;;  %v3215_v10 = vmul.f32 %v3213_v32, %v3213_v32  ;;  %7656 = vmatprep.subr.bf16.mxu1 %v9034_v2  ;;  %v10042_v53 = vsub.s32 1, %v9706_v56 }
 0x871   : > { %vm10120_vm13 = vcmp.eq.s32.totalorder %v3731_v24, 1 }
 0x872   : > { %v3217_v37 = vsel %vm1922_vm2, %v3215_v10, 0.0  ;;  %v3216_v5 = vmul.f32 %v3214_v8, %v3214_v8 }
 0x873   : > { %3218 = vadd.xlane.f32.xlu0 %v3217_v37 }
 0x874   : > { %v3220_v11 = vsel %vm1922_vm2, %v3216_v5, 0.0 }
 0x877   : > { %3221 = vadd.xlane.f32.xlu0 %v3220_v11 }
 0x88d   : > { %3794 = vrot.lane.b32.xlu0 %v3679_v58, %s10850_s2 }
 0x900   : > { %v3219_v20 = vpop.xlane.xlu0 %3218 }
 0x901   : > { %v3223_v34 = vmul.f32 0.015625, %v3219_v20 }
 0x903   : > { %v3225_v61 = vadd.f32 1e-05, %v3223_v34 }
 0x904   : > { %v3222_v62 = vpop.xlane.xlu0 %3221 }
 0x905   : > { %8373 = vrsqrt.f32 %v3225_v61  ;;  %v3224_v41 = vmul.f32 0.015625, %v3222_v62 }
 0x907   : > { %v3226_v44 = vadd.f32 1e-05, %v3224_v41 }
 0x908   : > { %v3795_v50 = vpop.permute.xlu0 %3794 }
 0x909   : > { %8375 = vrsqrt.f32 %v3226_v44 }
 0x90f   : > { %v8374_v51 = vpop.eup %8373 }
 0x910   : > { %v3229_v38 = vmul.f32 %v8374_v51, %v3213_v32 }
 0x912   : > { %v3238_v1 = vmul.f32 %v7137_v49, %v3229_v38 }
 0x913   : > { %v8376_v0 = vpop.eup %8375 }
 0x914   : > { %v3230_v36 = vmul.f32 %v8376_v0, %v3214_v8  ;;  %v10012_v9 = vadd.f32 %v7138_v40, %v3238_v1 }
 0x916   : > { %v3239_v7 = vmul.f32 %v7137_v49, %v3230_v36 }
 0x918   : > { %v10014_v47 = vadd.f32 %v7138_v40, %v3239_v7 }
 0x91a   : > { %v3257_v15 = vpack.c.bf16 %v10014_v47, %v10012_v9 }
 0x91c   : > { %7147 = vmatmul.mubr.msk.bf16.vlgmr.msra.gmra.mrb[36].mxu0 %vm1922_vm2, %v3257_v15 }
 0x91d   : > { %7633 = vmatpush3.bf16.msra.mxu0 %v8213_v13  ;;  %7640 = vmatprep.mubr.msk.bf16.mxu0 %vm9035_vm0, %v9034_v2 }
 0x91e   : > { %7634 = vmatprep.subr.bf16.mxu0 %v9034_v2 }
 0x921   : > { %7635 = vmatpush3.bf16.msra.mxu0 %v8214_v18 }
 0x922   : > { %7636 = vmatprep.subr.bf16.mxu0 %v9034_v2 }
 0x925   : > { %7637 = vmatpush3.bf16.msra.mxu0 %v8215_v45 }
 0x926   : > { %7638 = vmatprep.subr.bf16.mxu0 %v9034_v2 }
 0x929   : > { %7639 = vmatpush3.bf16.msra.mxu0 %v8216_v52 }
 0x92a   : > { %7644 = vmatprep.subr.bf16.mxu0 %v9034_v2 }
 0x92c   : > { %7641 = vmatmul.mubr.msk.bf16.vlgmr.msra.gmra.mrb[40].mxu0 %vm1922_vm2, %v9627_v14  ;;  %v3258_v14 = vld [vmem:[#allocation10] sm:$0x3] }
 0x92d   : > { %7646 = vmatprep.mubr.msk.bf16.mxu0 %vm9035_vm0, %v9034_v2  ;;  %v3263_v63 = vrot.slane %v3258_v14, %v9709_v57  ;;  %v3267_v27 = vrot.slane %v3258_v14, %v10042_v53 }
 0x9ef   : > { %v3347_v28 = vpop.f32.mrb[36].mxu0 }
 0x9f0   : > { %v3348_v29 = vadd.f32 %v3347_v28, %v3263_v63  ;;  %v3349_v32 = vpop.f32.mrb[37].mxu0 }
 0x9f1   : > { %v3350_v33 = vadd.f32 %v3349_v32, %v3267_v27  ;;  %v3351_v8 = vpop.f32.mrb[38].mxu0 }
 0x9f2   : > { %v3352_v10 = vadd.f32 %v3351_v8, %v3263_v63  ;;  %v3353_v37 = vpop.f32.mrb[39].mxu0  ;;  %v3356_v11 = vmax.f32 %v3348_v29, 0.0 }
 0x9f3   : > { %v3354_v5 = vadd.f32 %v3353_v37, %v3267_v27  ;;  %v3357_v39 = vmax.f32 %v3350_v33, 0.0 }
 0x9f4   : > { %v3358_v12 = vmax.f32 %v3352_v10, 0.0 }
 0x9f5   : > { %v3359_v17 = vmax.f32 %v3354_v5, 0.0 }
 0x9f6   : > { %v3392_v22 = vpack.c.bf16 %v3358_v12, %v3356_v11 }
 0x9f7   : > { %v3393_v56 = vpack.c.bf16 %v3359_v17, %v3357_v39 }
 0x9f9   : > { %3529 = vmatprep.mubr.bf16.mxu1 %v3393_v56 }
 0x9fa   : > { %3530 = vmatmul.mubr.bf16.vlgmr.msra.gmra.mrb[40].mxu1 %v3392_v22 }
 0x9fb   : > { %7658 = vmatprep.mubr.msk.bf16.mxu1 %vm9035_vm0, %v9034_v2 }
 0x9ff   : > { %v3671_v4 = vpop.f32.mrb[40].mxu0 }
 0xa00   : > { %v7642_v25 = vpop.f32.mrb[41].mxu0  ;;  %v3672_v60 = vadd.f32 %v7167_v42, %v3671_v4 }
 0xa01   : > { %v3674_v6 = vpop.f32.mrb[42].mxu0 }
 0xa02   : > { %v3675_v16 = vadd.f32 %v7167_v42, %v3674_v6  ;;  %v7643_v26 = vpop.f32.mrb[43].mxu0 }
 0xa04   : > { %v10049_v46 = vpack.c.bf16 %v3675_v16, %v3672_v60 }
 0xa06   : > { %4014 = vrot.lane.b32.xlu0 %v10049_v46, %s10852_s28  ;;  %3796 = vrot.lane.b32.xlu1 %v10049_v46, %s10850_s2  ;;  %v3685_v48 = vsel %vm2037_vm3, %v10049_v46, 0 }
 0xa07   : > { %7645 = vmatpush3.bf16.xpose.msra.mxu0 %v3685_v48 }
 0xa08   : > { %7650 = vmatprep.subr.bf16.mxu0 %v9034_v2 }
 0xa0a   : > { %4123 = vrot.lane.b32.xlu0 %v10049_v46, %s10853_s24  ;;  %3905 = vrot.lane.b32.xlu1 %v10049_v46, %s10854_s10 }
 0xa0e   : > { %4232 = vrot.lane.b32.xlu0 %v10049_v46, %s10855_s26  ;;  %7647 = vmatmul.mubr.msk.bf16.vlgmr.msra.gmra.mrb[44].mxu0 %vm2037_vm3, %v3679_v58 }
 0xa0f   : > { %3903 = vrot.lane.b32.xlu1 %v3679_v58, %s10854_s10  ;;  %7652 = vmatprep.mubr.msk.bf16.mxu0 %vm9035_vm0, %v9034_v2 }
 0xa12   : > { %4341 = vrot.lane.b32.xlu0 %v10049_v46, %s10856_s1 }
 0xa13   : > { %4012 = vrot.lane.b32.xlu1 %v3679_v58, %s10852_s28 }
 0xa16   : > { %4450 = vrot.lane.b32.xlu0 %v10049_v46, %s10857_s4 }
 0xa17   : > { %4121 = vrot.lane.b32.xlu1 %v3679_v58, %s10853_s24 }
 0xa1b   : > { %4230 = vrot.lane.b32.xlu1 %v3679_v58, %s10855_s26 }
 0xa1f   : > { %4339 = vrot.lane.b32.xlu1 %v3679_v58, %s10856_s1 }
 0xa23   : > { %4448 = vrot.lane.b32.xlu1 %v3679_v58, %s10857_s4 }
 0xa78   : > { %v3797_v35 = vpop.permute.xlu1 %3796  ;;  %v4015_v55 = vpop.permute.xlu0 %4014 }
 0xa79   : > { %v3802_v30 = vsel %vm2037_vm3, %v3797_v35, 0  ;;  %v4020_v34 = vsel %vm2037_vm3, %v4015_v55, 0 }
 0xa7a   : > { %7657 = vmatpush3.bf16.xpose.msra.mxu1 %v3802_v30 }
 0xa7b   : > { %7668 = vmatprep.subr.bf16.mxu1 %v9034_v2 }
 0xa7c   : > { %v3906_v31 = vpop.permute.xlu1 %3905  ;;  %v4124_v61 = vpop.permute.xlu0 %4123 }
 0xa7d   : > { %v3911_v54 = vsel %vm2037_vm3, %v3906_v31, 0  ;;  %v4129_v41 = vsel %vm2037_vm3, %v4124_v61, 0 }
 0xa80   : > { %v4233_v44 = vpop.permute.xlu0 %4232 }
 0xa81   : > { %7659 = vmatmul.mubr.msk.bf16.vlgmr.msra.gmra.mrb[44].mxu1 %vm2037_vm3, %v3795_v50  ;;  %v3904_v20 = vpop.permute.xlu1 %3903  ;;  %v4238_v38 = vsel %vm2037_vm3, %v4233_v44, 0 }
 0xa82   : > { %7669 = vmatpush3.bf16.xpose.msra.mxu1 %v3911_v54  ;;  %7670 = vmatprep.mubr.msk.bf16.mxu1 %vm9035_vm0, %v9034_v2 }
 0xa83   : > { %7680 = vmatprep.subr.bf16.mxu1 %v9034_v2 }
 0xa84   : > { %v4342_v49 = vpop.permute.xlu0 %4341 }
 0xa85   : > { %v4013_v62 = vpop.permute.xlu1 %4012  ;;  %v4347_v1 = vsel %vm2037_vm3, %v4342_v49, 0 }
 0xa88   : > { %v4451_v36 = vpop.permute.xlu0 %4450 }
 0xa89   : > { %7671 = vmatmul.mubr.msk.bf16.vlgmr.msra.gmra.mrb[48].mxu1 %vm2037_vm3, %v3904_v20  ;;  %v4122_v51 = vpop.permute.xlu1 %4121  ;;  %v4456_v7 = vsel %vm2037_vm3, %v4451_v36, 0 }
 0xa8a   : > { %7681 = vmatpush3.bf16.xpose.msra.mxu1 %v4020_v34  ;;  %7682 = vmatprep.mubr.msk.bf16.mxu1 %vm9035_vm0, %v9034_v2 }
 0xa8b   : > { %7692 = vmatprep.subr.bf16.mxu1 %v9034_v2 }
 0xa8d   : > { %v4231_v0 = vpop.permute.xlu1 %4230 }
 0xa91   : > { %7683 = vmatmul.mubr.msk.bf16.vlgmr.msra.gmra.mrb[52].mxu1 %vm2037_vm3, %v4013_v62  ;;  %v4340_v40 = vpop.permute.xlu1 %4339 }
 0xa92   : > { %7693 = vmatpush3.bf16.xpose.msra.mxu1 %v4129_v41  ;;  %7694 = vmatprep.mubr.msk.bf16.mxu1 %vm9035_vm0, %v9034_v2 }
 0xa93   : > { %7704 = vmatprep.subr.bf16.mxu1 %v9034_v2 }
 0xa95   : > { %v4449_v13 = vpop.permute.xlu1 %4448 }
 0xa99   : > { %7695 = vmatmul.mubr.msk.bf16.vlgmr.msra.gmra.mrb[56].mxu1 %vm2037_vm3, %v4122_v51 }
 0xa9a   : > { %7705 = vmatpush3.bf16.xpose.msra.mxu1 %v4238_v38  ;;  %7706 = vmatprep.mubr.msk.bf16.mxu1 %vm9035_vm0, %v9034_v2 }
 0xa9b   : > { %7716 = vmatprep.subr.bf16.mxu1 %v9034_v2 }
 0xaa1   : > { %7707 = vmatmul.mubr.msk.bf16.vlgmr.msra.gmra.mrb[60].mxu1 %vm2037_vm3, %v4231_v0 }
 0xaa2   : > { %7717 = vmatpush3.bf16.xpose.msra.mxu1 %v4347_v1  ;;  %7718 = vmatprep.mubr.msk.bf16.mxu1 %vm9035_vm0, %v9034_v2 }
 0xaa3   : > { %7728 = vmatprep.subr.bf16.mxu1 %v9034_v2 }
 0xaa9   : > { %7719 = vmatmul.mubr.msk.bf16.vlgmr.msra.gmra.mrb[64].mxu1 %vm2037_vm3, %v4340_v40 }
 0xaaa   : > { %7729 = vmatpush3.bf16.xpose.msra.mxu1 %v4456_v7  ;;  %7730 = vmatprep.mubr.msk.bf16.mxu1 %vm9035_vm0, %v9034_v2 }
 0xaab   : > { %7740 = vmatprep.subr.bf16.mxu1 %v9034_v2 }
 0xab1   : > { %7731 = vmatmul.mubr.msk.bf16.vlgmr.msra.gmra.mrb[68].mxu1 %vm2037_vm3, %v4449_v13 }
 0xab2   : > { %7748 = vmatprep.mubr.msk.bf16.mxu1 %vm9035_vm0, %v9034_v2 }
 0xacd   : > { %v7360_v15 = vpop.f32.mrb[40].mxu1 }
 0xace   : > { %v7361_v18 = vpop.f32.mrb[41].mxu1 }
 0xacf   : > { %v10114_v45 = vadd.f32 %v7361_v18, %v7360_v15  ;;  %v7363_v52 = vpop.f32.mrb[42].mxu1 }
 0xad0   : > { %v7364_v19 = vpop.f32.mrb[43].mxu1 }
 0xad1   : > { %v10116_v43 = vadd.f32 %v7364_v19, %v7363_v52 }
 0xae1   : > { %v3721_v58 = vpop.f32.mrb[44].mxu0 }
 0xae2   : > { %v3733_v14 = vsel %vm10120_vm13, %v3721_v58, -1e+09  ;;  %v7648_v63 = vpop.f32.mrb[45].mxu0 }
 0xae3   : > { %v3734_v27 = vsel %vm3101_vm7, %v3733_v14, -inf  ;;  %v3724_v28 = vpop.f32.mrb[46].mxu0 }
 0xae4   : > { %3735 = vmax.xlane.f32.xlu0 %v3734_v27  ;;  %v7649_v29 = vpop.f32.mrb[47].mxu0 }
 0xb54   : > { %v3838_v32 = vpop.f32.mrb[44].mxu1 }
 0xb55   : > { %v3844_v33 = vsel %vm10120_vm13, %v3838_v32, -1e+09  ;;  %v7660_v8 = vpop.f32.mrb[45].mxu1 }
 0xb56   : > { %v3841_v10 = vpop.f32.mrb[46].mxu1  ;;  %v3845_v37 = vsel %vm3101_vm7, %v3844_v33, -inf }
 0xb57   : > { %3846 = vmax.xlane.f32.xlu1 %v3845_v37  ;;  %v7661_v5 = vpop.f32.mrb[47].mxu1 }
 0xb5c   : > { %v3947_v11 = vpop.f32.mrb[48].mxu1 }
 0xb5d   : > { %v3953_v12 = vsel %vm10120_vm13, %v3947_v11, -1e+09  ;;  %v7672_v39 = vpop.f32.mrb[49].mxu1 }
 0xb5e   : > { %v3950_v17 = vpop.f32.mrb[50].mxu1  ;;  %v3954_v22 = vsel %vm3101_vm7, %v3953_v12, -inf }
 0xb5f   : > { %3955 = vmax.xlane.f32.xlu0 %v3954_v22  ;;  %v7673_v56 = vpop.f32.mrb[51].mxu1 }
 0xb64   : > { %v4056_v42 = vpop.f32.mrb[52].mxu1 }
 0xb65   : > { %v10135_v4 = vsel %vm10120_vm13, %v4056_v42, -1e+09  ;;  %v7684_v25 = vpop.f32.mrb[53].mxu1 }
 0xb66   : > { %v4059_v6 = vpop.f32.mrb[54].mxu1  ;;  %v4063_v60 = vsel %vm3101_vm7, %v10135_v4, -inf }
 0xb67   : > { %4064 = vmax.xlane.f32.xlu0 %v4063_v60  ;;  %v7685_v16 = vpop.f32.mrb[55].mxu1 }
 0xb6c   : > { %v4165_v26 = vpop.f32.mrb[56].mxu1 }
 0xb6d   : > { %v10141_v48 = vsel %vm10120_vm13, %v4165_v26, -1e+09  ;;  %v7696_v35 = vpop.f32.mrb[57].mxu1 }
 0xb6e   : > { %v4168_v30 = vpop.f32.mrb[58].mxu1  ;;  %v4172_v31 = vsel %vm3101_vm7, %v10141_v48, -inf }
 0xb6f   : > { %4173 = vmax.xlane.f32.xlu1 %v4172_v31  ;;  %v7697_v50 = vpop.f32.mrb[59].mxu1 }
 0xb71   : > { %v3736_v13 = vpop.xlane.xlu0 %3735 }
 0xb72   : > { %v3737_v15 = vsub.f32 %v3733_v14, %v3736_v13 }
 0xb74   : > { %v4274_v54 = vpop.f32.mrb[60].mxu1  ;;  %v3738_v18 = vmul.f32 1.442695, %v3737_v15 }
 0xb75   : > { %v4280_v55 = vsel %vm10120_vm13, %v4274_v54, -1e+09  ;;  %v7708_v20 = vpop.f32.mrb[61].mxu1 }
 0xb76   : > { %v4277_v34 = vpop.f32.mrb[62].mxu1  ;;  %v4281_v61 = vsel %vm3101_vm7, %v4280_v55, -inf  ;;  %8377 = vpow2.f32 %v3738_v18 }
 0xb77   : > { %4282 = vmax.xlane.f32.xlu0 %v4281_v61  ;;  %v7709_v62 = vpop.f32.mrb[63].mxu1 }
 0xb7c   : > { %v4383_v41 = vpop.f32.mrb[64].mxu1 }
 0xb7d   : > { %v4389_v44 = vsel %vm10120_vm13, %v4383_v41, -1e+09  ;;  %v7720_v51 = vpop.f32.mrb[65].mxu1 }
 0xb7e   : > { %v4390_v38 = vsel %vm3101_vm7, %v4389_v44, -inf  ;;  %v4386_v49 = vpop.f32.mrb[66].mxu1 }
 0xb7f   : > { %4391 = vmax.xlane.f32.xlu1 %v4390_v38  ;;  %v7721_v0 = vpop.f32.mrb[67].mxu1 }
 0xb80   : > { %v10158_v21 = vpop.eup %8377 }
 0xb81   : > { %v3740_v23 = vsel %vm3101_vm7, %v10158_v21, 0.0 }
 0xb84   : > { %v4492_v1 = vpop.f32.mrb[68].mxu1 }
 0xb85   : > { %v7732_v36 = vpop.f32.mrb[69].mxu1  ;;  %v4498_v52 = vsel %vm10120_vm13, %v4492_v1, -1e+09 }
 0xb86   : > { %v4495_v40 = vpop.f32.mrb[70].mxu1  ;;  %v4499_v19 = vsel %vm3101_vm7, %v4498_v52, -inf }
 0xb87   : > { %v7733_v7 = vpop.f32.mrb[71].mxu1 }
 0xb8d   : > { %3857 = vrot.lane.b32.xlu0 %v10049_v46, %s10861_s5 }
 0xb90   : > { %3747 = vrot.lane.b32.xlu1 %v10049_v46, %s10862_s6 }
 0xbac   : > { %4500 = vmax.xlane.f32.xlu0 %v4499_v19 }
 0xbb4   : > { %3741 = vadd.xlane.f32.xlu1 %v3740_v23 }
 0xbe4   : > { %v3847_v24 = vpop.xlane.xlu1 %3846 }
 0xbe5   : > { %v3848_v58 = vsub.f32 %v3844_v33, %v3847_v24 }
 0xbe7   : > { %v3849_v63 = vmul.f32 1.442695, %v3848_v58 }
 0xbe9   : > { %8379 = vpow2.f32 %v3849_v63 }
 0xbec   : > { %v3956_v27 = vpop.xlane.xlu0 %3955 }
 0xbed   : > { %v3957_v14 = vsub.f32 %v3953_v12, %v3956_v27 }
 0xbef   : > { %v3958_v28 = vmul.f32 1.442695, %v3957_v14 }
 0xbf1   : > { %8381 = vpow2.f32 %v3958_v28 }
 0xbf3   : > { %v10162_v29 = vpop.eup %8379 }
 0xbf4   : > { %v3851_v32 = vsel %vm3101_vm7, %v10162_v29, 0.0  ;;  %v4065_v11 = vpop.xlane.xlu0 %4064 }
 0xbf5   : > { %3852 = vadd.xlane.f32.xlu0 %v3851_v32  ;;  %v4066_v12 = vsub.f32 %v10135_v4, %v4065_v11 }
 0xbf7   : > { %v4067_v39 = vmul.f32 1.442695, %v4066_v12 }
 0xbf9   : > { %8383 = vpow2.f32 %v4067_v39 }
 0xbfb   : > { %v10166_v8 = vpop.eup %8381 }
 0xbfc   : > { %v3960_v10 = vsel %vm3101_vm7, %v10166_v8, 0.0  ;;  %v4174_v37 = vpop.xlane.xlu1 %4173 }
 0xbfd   : > { %3961 = vadd.xlane.f32.xlu1 %v3960_v10  ;;  %v4175_v17 = vsub.f32 %v10141_v48, %v4174_v37 }
 0xbff   : > { %v4176_v42 = vmul.f32 1.442695, %v4175_v17 }
 0xc01   : > { %8385 = vpow2.f32 %v4176_v42 }
 0xc03   : > { %v8384_v16 = vpop.eup %8383 }
 0xc04   : > { %v4283_v22 = vpop.xlane.xlu0 %4282  ;;  %v4069_v26 = vsel %vm3101_vm7, %v8384_v16, 0.0 }
 0xc05   : > { %v4284_v56 = vsub.f32 %v4280_v55, %v4283_v22 }
 0xc07   : > { %v4285_v6 = vmul.f32 1.442695, %v4284_v56 }
 0xc08   : > { %v3858_v54 = vpop.permute.xlu0 %3857 }
 0xc09   : > { %8387 = vpow2.f32 %v4285_v6 }
 0xc0b   : > { %3966 = vrot.lane.b32.xlu0 %v10049_v46, %s10863_s9  ;;  %v10178_v35 = vpop.eup %8385 }
 0xc0c   : > { %v4392_v33 = vpop.xlane.xlu1 %4391  ;;  %v4178_v48 = vsel %vm3101_vm7, %v10178_v35, 0.0 }
 0xc0d   : > { %v4393_v25 = vsub.f32 %v4389_v44, %v4392_v33 }
 0xc0e   : > { %4075 = vrot.lane.b32.xlu1 %v10049_v46, %s10864_s12 }
 0xc0f   : > { %v4394_v60 = vmul.f32 1.442695, %v4393_v25 }
 0xc10   : > { %v3748_v5 = vpop.permute.xlu1 %3747 }
 0xc11   : > { %7651 = vmatpush3.bf16.msra.mxu0 %v3748_v5  ;;  %8389 = vpow2.f32 %v4394_v60 }
 0xc12   : > { %7662 = vmatprep.subr.bf16.mxu0 %v9034_v2 }
 0xc13   : > { %v10180_v4 = vpop.eup %8387 }
 0xc14   : > { %v4287_v31 = vsel %vm3101_vm7, %v10180_v4, 0.0 }
 0xc1b   : > { %v10184_v30 = vpop.eup %8389 }
 0xc1c   : > { %v4396_v50 = vsel %vm3101_vm7, %v10184_v30, 0.0 }
 0xc2a   : > { %4070 = vadd.xlane.f32.xlu0 %v4069_v26 }
 0xc2e   : > { %4179 = vadd.xlane.f32.xlu0 %v4178_v48 }
 0xc32   : > { %4288 = vadd.xlane.f32.xlu1 %v4287_v31  ;;  %4397 = vadd.xlane.f32.xlu0 %v4396_v50 }
 0xc39   : > { %v4501_v55 = vpop.xlane.xlu0 %4500 }
 0xc3a   : > { %v4502_v20 = vsub.f32 %v4498_v52, %v4501_v55 }
 0xc3c   : > { %v4503_v34 = vmul.f32 1.442695, %v4502_v20 }
 0xc3e   : > { %8391 = vpow2.f32 %v4503_v34 }
 0xc41   : > { %v3742_v61 = vpop.xlane.xlu1 %3741 }
 0xc42   : > { %8393 = vrcp.f32 %v3742_v61 }
 0xc43   : > { %4293 = vrot.lane.b32.xlu1 %v10049_v46, %s10865_s13 }
 0xc47   : > { %4402 = vrot.lane.b32.xlu1 %v10049_v46, %s10866_s14 }
 0xc48   : > { %v10194_v62 = vpop.eup %8391 }
 0xc49   : > { %v4505_v41 = vsel %vm3101_vm7, %v10194_v62, 0.0 }
 0xc4a   : > { %4506 = vadd.xlane.f32.xlu0 %v4505_v41 }
 0xc4b   : > { %4511 = vrot.lane.b32.xlu1 %v10049_v46, %s10867_s16 }
 0xc4c   : > { %v8394_v44 = vpop.eup %8393 }
 0xc4d   : > { %v3744_v51 = vmul.f32 %v8394_v44, %v10158_v21 }
 0xc4f   : > { %v3745_v38 = vpack.c.bf16 %v3744_v51, %v3744_v51 }
 0xc51   : > { %7653 = vmatmul.mubr.msk.bf16.vlgmr.msra.gmra.mrb[48].mxu0 %vm3101_vm7, %v3745_v38 }
 0xc52   : > { %7663 = vmatpush3.bf16.msra.mxu0 %v3858_v54  ;;  %7664 = vmatprep.mubr.msk.bf16.mxu0 %vm9035_vm0, %v9034_v2 }
 0xc53   : > { %7674 = vmatprep.subr.bf16.mxu0 %v9034_v2 }
 0xc60   : > { %4184 = vrot.lane.b32.xlu0 %v10049_v46, %s10868_s17 }
 0xc82   : > { %v3853_v49 = vpop.xlane.xlu0 %3852 }
 0xc83   : > { %8395 = vrcp.f32 %v3853_v49  ;;  %v8234_v49 = vld [vmem:[%s10869_s18 + $0x8] sm:$0xff]  }
 0xc86   : > { %v3967_v7 = vpop.permute.xlu0 %3966 }
 0xc8a   : > { %v3962_v0 = vpop.xlane.xlu1 %3961 }
 0xc8b   : > { %8397 = vrcp.f32 %v3962_v0  ;;  %v8235_v0 = vld [vmem:[%s10869_s18 + $0x10] sm:$0xff]  }
 0xc8d   : > { %v8396_v1 = vpop.eup %8395 }
 0xc8e   : > { %v3855_v36 = vmul.f32 %v8396_v1, %v10162_v29  ;;  %v4076_v18 = vpop.permute.xlu1 %4075 }
 0xc90   : > { %v3856_v40 = vpack.c.bf16 %v3855_v36, %v3855_v36 }
 0xc92   : > { %7665 = vmatmul.mubr.msk.bf16.vlgmr.msra.gmra.mrb[52].mxu0 %vm3101_vm7, %v3856_v40 }
 0xc93   : > { %7675 = vmatpush3.bf16.msra.mxu0 %v3967_v7  ;;  %7676 = vmatprep.mubr.msk.bf16.mxu0 %vm9035_vm0, %v9034_v2 }
 0xc94   : > { %7686 = vmatprep.subr.bf16.mxu0 %v9034_v2 }
 0xc95   : > { %v8398_v13 = vpop.eup %8397 }
 0xc96   : > { %v3964_v46 = vmul.f32 %v8398_v13, %v10166_v8  ;;  %v8236_v13 = vld [vmem:[%s10869_s18 + $0x18] sm:$0xff]  }
 0xc98   : > { %v3965_v15 = vpack.c.bf16 %v3964_v46, %v3964_v46 }
 0xc9a   : > { %7677 = vmatmul.mubr.msk.bf16.vlgmr.msra.gmra.mrb[56].mxu0 %vm3101_vm7, %v3965_v15 }
 0xc9b   : > { %7687 = vmatpush3.bf16.msra.mxu0 %v4076_v18  ;;  %7688 = vmatprep.mubr.msk.bf16.mxu0 %vm9035_vm0, %v9034_v2 }
 0xc9c   : > { %7698 = vmatprep.subr.bf16.mxu0 %v9034_v2 }
 0xcb7   : > { %v4071_v52 = vpop.xlane.xlu0 %4070 }
 0xcb8   : > { %8399 = vrcp.f32 %v4071_v52 }
 0xcbb   : > { %v4180_v24 = vpop.xlane.xlu0 %4179 }
 0xcbc   : > { %8401 = vrcp.f32 %v4180_v24 }
 0xcbf   : > { %v4289_v58 = vpop.xlane.xlu1 %4288  ;;  %v4398_v63 = vpop.xlane.xlu0 %4397 }
 0xcc0   : > { %8403 = vrcp.f32 %v4289_v58  ;;  %v7148_v58 = vld [vmem:[%s10870_s19] ss:$0 sm:$0xff]  ;;  %s10871_s19 = sld [smem:[#allocation40_spill]] }
 0xcc1   : > { %8405 = vrcp.f32 %v4398_v63  ;;  %v3532_v63 = vadd.f32 %v10114_v45, %v7148_v58 }
 0xcc2   : > { %v8400_v19 = vpop.eup %8399 }
 0xcc3   : > { %v4073_v21 = vmul.f32 %v8400_v19, %v8384_v16  ;;  %v4294_v10 = vpop.permute.xlu1 %4293 }
 0xcc5   : > { %v4074_v23 = vpack.c.bf16 %v4073_v21, %v4073_v21 }
 0xcc6   : > { %v8402_v27 = vpop.eup %8401  ;;  %s1870_s25 = scalar_lea.vmem %s10871_s19, %s10874_s21  ;;  %s10876_s21 = sld [smem:[#allocation65_spill]] }
 0xcc7   : > { %7689 = vmatmul.mubr.msk.bf16.vlgmr.msra.gmra.mrb[60].mxu0 %vm3101_vm7, %v4074_v23  ;;  %v4182_v28 = vmul.f32 %v8402_v27, %v10178_v35  ;;  %v4403_v11 = vpop.permute.xlu1 %4402  ;;  %v3535_v27 = vadd.f32 %v10116_v43, %v7148_v58  ;;  %s10881_s19 = sld [smem:[#allocation54_spill]] }
 0xcc8   : > { %7700 = vmatprep.mubr.msk.bf16.mxu0 %vm9035_vm0, %v9034_v2 }
 0xcc9   : > { %v4183_v32 = vpack.c.bf16 %v4182_v28, %v4182_v28 }
 0xcca   : > { %v8404_v8 = vpop.eup %8403 }
 0xccb   : > { %v4291_v37 = vmul.f32 %v8404_v8, %v10180_v4  ;;  %v8406_v5 = vpop.eup %8405  ;;  %v4512_v22 = vpop.permute.xlu1 %4511 }
 0xccc   : > { %v4400_v12 = vmul.f32 %v8406_v5, %v10184_v30  ;;  %v8256_v58 = vld [vmem:[%s10876_s21 + $0x8] sm:$0xff]  }
 0xccd   : > { %v4292_v33 = vpack.c.bf16 %v4291_v37, %v4291_v37 }
 0xcce   : > { %v4401_v39 = vpack.c.bf16 %v4400_v12, %v4400_v12 }
 0xcd7   : > { %v4507_v14 = vpop.xlane.xlu0 %4506 }
 0xcd8   : > { %8407 = vrcp.f32 %v4507_v14  ;;  %v3538_v14 = vadd.f32 %v3532_v63, %v10012_v9  ;;  %v8257_v63 = vld [vmem:[%s10876_s21 + $0x50] sm:$0xff]  }
 0xcda   : > { %v3540_v28 = vsel %vm1922_vm2, %v3538_v14, 0.0 }
 0xcdb   : > { %v4185_v29 = vpop.permute.xlu0 %4184 }
 0xcdc   : > { %7699 = vmatpush3.bf16.msra.mxu0 %v4185_v29  ;;  %v3539_v29 = vadd.f32 %v3535_v27, %v10014_v47  ;;  %v8258_v27 = vld [vmem:[%s10876_s21 + $0x10] sm:$0xff]  }
 0xcdd   : > { %7710 = vmatprep.subr.bf16.mxu0 %v9034_v2 }
 0xcdf   : > { %7701 = vmatmul.mubr.msk.bf16.vlgmr.msra.gmra.mrb[64].mxu0 %vm3101_vm7, %v4183_v32  ;;  %v3543_v32 = vsel %vm1922_vm2, %v3539_v29, 0.0 }
 0xce0   : > { %7711 = vmatpush3.bf16.msra.mxu0 %v4294_v10  ;;  %7712 = vmatprep.mubr.msk.bf16.mxu0 %vm9035_vm0, %v9034_v2 }
 0xce1   : > { %7722 = vmatprep.subr.bf16.mxu0 %v9034_v2 }
 0xce2   : > { %v8408_v17 = vpop.eup %8407 }
 0xce3   : > { %v4509_v56 = vmul.f32 %v8408_v17, %v10194_v62  ;;  %v8233_v62 = vld [vmem:[%s10869_s18] sm:$0xff]   ;;  %s10872_s18 = sld [smem:[#allocation60_spill]] }
 0xce4   : > { %7741 = vmatpush3.bf16.msra.mxu1 %v8233_v62 }
 0xce5   : > { %v4510_v42 = vpack.c.bf16 %v4509_v56, %v4509_v56  ;;  %7742 = vmatprep.subr.bf16.mxu1 %v9034_v2 }
 0xce7   : > { %7713 = vmatmul.mubr.msk.bf16.vlgmr.msra.gmra.mrb[68].mxu0 %vm3101_vm7, %v4292_v33 }
 0xce8   : > { %7723 = vmatpush3.bf16.msra.mxu0 %v4403_v11  ;;  %7724 = vmatprep.mubr.msk.bf16.mxu0 %vm9035_vm0, %v9034_v2 }
 0xce9   : > { %7734 = vmatprep.subr.bf16.mxu0 %v9034_v2  ;;  %7743 = vmatpush3.bf16.msra.mxu1 %v8234_v49 }
 0xcea   : > { %7744 = vmatprep.subr.bf16.mxu1 %v9034_v2 }
 0xced   : > { %7745 = vmatpush3.bf16.msra.mxu1 %v8235_v0 }
 0xcee   : > { %7746 = vmatprep.subr.bf16.mxu1 %v9034_v2 }
 0xcef   : > { %7725 = vmatmul.mubr.msk.bf16.vlgmr.msra.gmra.mrb[72].mxu0 %vm3101_vm7, %v4401_v39 }
 0xcf0   : > { %7735 = vmatpush3.bf16.msra.mxu0 %v4512_v22  ;;  %7736 = vmatprep.mubr.msk.bf16.mxu0 %vm9035_vm0, %v9034_v2 }
 0xcf1   : > { %7747 = vmatpush3.bf16.msra.mxu1 %v8236_v13  ;;  %v8242_v13 = vld [vmem:[%s10875_s27 + $0x14] ss:$8 sps:$4 sm:$0xff]  }
 0xcf7   : > { %7737 = vmatmul.mubr.msk.bf16.vlgmr.msra.gmra.mrb[76].mxu0 %vm3101_vm7, %v4510_v42 }
 0xcf8   : > { %4802 = vmatprep.mubr.bf16.mxu0 %v9036_v3 }
 0xd24   : > { %v10238_v25 = vpop.f32.mrb[48].mxu0 }
 0xd25   : > { %v7654_v6 = vpop.f32.mrb[49].mxu0 }
 0xd26   : > { %v3790_v60 = vpop.f32.mrb[50].mxu0 }
 0xd27   : > { %v7655_v16 = vpop.f32.mrb[51].mxu0 }
 0xd65   : > { %v3897_v26 = vpop.f32.mrb[52].mxu0 }
 0xd66   : > { %4558 = vrot.lane.b32.xlu1 %v3897_v26, %s10867_s16  ;;  %v7666_v35 = vpop.f32.mrb[53].mxu0  ;;  %v3584_v26 = vld [vmem:[%s1870_s25] sm:$0xff] }
 0xd67   : > { %v3900_v4 = vpop.f32.mrb[54].mxu0  ;;  %v7189_v35 = vld [vmem:[%s10872_s18] ss:$0 sm:$0xff]  ;;  %s10880_s18 = sld [smem:[#allocation53_spill]] }
 0xd68   : > { %v7667_v48 = vpop.f32.mrb[55].mxu0 }
 0xd69   : > { %v4675_v48 = vld [vmem:[%s10873_s20] sm:$0xff]  ;;  %s10878_s20 = sld [smem:[#allocation62_spill]] }
 0xd6d   : > { %v4006_v30 = vpop.f32.mrb[56].mxu0 }
 0xd6e   : > { %4562 = vrot.lane.b32.xlu1 %v4006_v30, %s10866_s14  ;;  %v7678_v31 = vpop.f32.mrb[57].mxu0 }
 0xd6f   : > { %v4009_v50 = vpop.f32.mrb[58].mxu0 }
 0xd70   : > { %v7679_v54 = vpop.f32.mrb[59].mxu0 }
 0xd9a   : > { %v4115_v55 = vpop.f32.mrb[60].mxu0 }
 0xd9b   : > { %4566 = vrot.lane.b32.xlu0 %v4115_v55, %s10865_s13  ;;  %v7690_v20 = vpop.f32.mrb[61].mxu0 }
 0xd9c   : > { %v4118_v34 = vpop.f32.mrb[62].mxu0 }
 0xd9d   : > { %v7691_v61 = vpop.f32.mrb[63].mxu0 }
 0xdb2   : > { %v4224_v41 = vpop.f32.mrb[64].mxu0 }
 0xdb3   : > { %4570 = vrot.lane.b32.xlu1 %v4224_v41, %s10868_s17  ;;  %v7702_v44 = vpop.f32.mrb[65].mxu0 }
 0xdb4   : > { %v4227_v51 = vpop.f32.mrb[66].mxu0 }
 0xdb5   : > { %v7703_v38 = vpop.f32.mrb[67].mxu0 }
 0xdba   : > { %v4333_v1 = vpop.f32.mrb[68].mxu0 }
 0xdbb   : > { %4574 = vrot.lane.b32.xlu0 %v4333_v1, %s10864_s12  ;;  %v7714_v36 = vpop.f32.mrb[69].mxu0 }
 0xdbc   : > { %v4336_v40 = vpop.f32.mrb[70].mxu0  ;;  %v3585_v36 = vld [vmem:[%s1870_s25 + $0x8] sm:$0xff]  ;;  %s10877_s25 = sld [smem:[#allocation61_spill]] }
 0xdbd   : > { %v7715_v7 = vpop.f32.mrb[71].mxu0  ;;  %v8239_v40 = vld [vmem:[%s10875_s27 + $0x4] ss:$8 sps:$4 sm:$0xff]  }
 0xdbe   : > { %v8237_v7 = vld [vmem:[%s10875_s27] ss:$8 sps:$4 sm:$0xff]   ;;  %4770 = vmatprep.subr.bf16.mxu0 %v8239_v40 }
 0xdbf   : > { %4771 = vmatpush1.bf16.msra.mxu0 %v8237_v7 }
 0xdc0   : > { %4772 = vmatprep.subr.bf16.mxu0 %v8242_v13 }
 0xdc2   : > { %v4442_v46 = vpop.f32.mrb[72].mxu0 }
 0xdc3   : > { %4578 = vrot.lane.b32.xlu1 %v4442_v46, %s10863_s9  ;;  %v7726_v15 = vpop.f32.mrb[73].mxu0  ;;  %v8240_v46 = vld [vmem:[%s10875_s27 + $0x10] ss:$8 sps:$4 sm:$0xff]  }
 0xdc4   : > { %v4445_v18 = vpop.f32.mrb[74].mxu0  ;;  %4773 = vmatpush1.bf16.msra.mxu0 %v8240_v46  ;;  %v8245_v15 = vld [vmem:[%s10875_s27 + $0x24] ss:$8 sps:$4 sm:$0xff]  }
 0xdc5   : > { %v7727_v52 = vpop.f32.mrb[75].mxu0  ;;  %v8243_v18 = vld [vmem:[%s10875_s27 + $0x20] ss:$8 sps:$4 sm:$0xff]   ;;  %4774 = vmatprep.subr.bf16.mxu0 %v8245_v15 }
 0xdc6   : > { %v8246_v52 = vld [vmem:[%s10875_s27 + $0x30] ss:$8 sps:$4 sm:$0xff]  }
 0xdc8   : > { %4775 = vmatpush1.bf16.msra.mxu0 %v8243_v18 }
 0xdca   : > { %v4551_v19 = vpop.f32.mrb[76].mxu0 }
 0xdcb   : > { %4582 = vrot.lane.b32.xlu0 %v4551_v19, %s10861_s5  ;;  %v7738_v21 = vpop.f32.mrb[77].mxu0  ;;  %v8248_v19 = vld [vmem:[%s10875_s27 + $0x34] ss:$8 sps:$4 sm:$0xff]  }
 0xdcc   : > { %v4554_v23 = vpop.f32.mrb[78].mxu0  ;;  %4776 = vmatprep.subr.bf16.mxu0 %v8248_v19  ;;  %v8253_v21 = vld [vmem:[%s10876_s21 + $0x40] sm:$0xff]  }
 0xdcd   : > { %v7739_v24 = vpop.f32.mrb[79].mxu0  ;;  %4777 = vmatpush1.bf16.msra.mxu0 %v8246_v52  ;;  %v8254_v23 = vld [vmem:[%s10876_s21] sm:$0xff]   ;;  %7408 = vmatprep.subr.bf16.mxu1 %v8253_v21 }
 0xdce   : > { %7752 = vmatprep.subr.bf16.mxu0 %v9034_v2  ;;  %v8255_v24 = vld [vmem:[%s10876_s21 + $0x48] sm:$0xff]  }
 0xdd8   : > { %v4559_v8 = vpop.permute.xlu1 %4558 }
 0xdd9   : > { %v4585_v5 = vsel %vm2037_vm3, %v10238_v25, %v4559_v8  ;;  %v8263_v8 = vld [vmem:[%s10876_s21 + $0x68] sm:$0xff]  }
 0xde0   : > { %v4563_v10 = vpop.permute.xlu1 %4562 }
 0xde1   : > { %v4586_v45 = vsel %vm3101_vm7, %v4585_v5, %v4563_v10  ;;  %v8264_v10 = vld [vmem:[%s10876_s21 + $0x28] sm:$0xff]  }
 0xdea   : > { %3541 = vadd.xlane.f32.xlu0 %v3540_v28  ;;  %v8260_v28 = vld [vmem:[%s10876_s21 + $0x18] sm:$0xff]  }
 0xdee   : > { %3544 = vadd.xlane.f32.xlu0 %v3543_v32  ;;  %v8262_v32 = vld [vmem:[%s10876_s21 + $0x20] sm:$0xff]  }
 0xe0d   : > { %v4567_v37 = vpop.permute.xlu0 %4566 }
 0xe0e   : > { %v4587_v9 = vsel %vm3104_vm8, %v4586_v45, %v4567_v37 }
 0xe25   : > { %v4571_v33 = vpop.permute.xlu1 %4570 }
 0xe26   : > { %v4588_v47 = vsel %vm1991_vm1, %v4587_v9, %v4571_v33 }
 0xe2d   : > { %v4575_v43 = vpop.permute.xlu0 %4574 }
 0xe2e   : > { %v4589_v12 = vsel %vm3109_vm9, %v4588_v47, %v4575_v43 }
 0xe35   : > { %v4579_v11 = vpop.permute.xlu1 %4578 }
 0xe36   : > { %v4590_v39 = vsel %vm3112_vm10, %v4589_v12, %v4579_v11 }
 0xe3d   : > { %v4583_v17 = vpop.permute.xlu0 %4582 }
 0xe3e   : > { %v4591_v22 = vsel %vm3115_vm11, %v4590_v39, %v4583_v17  ;;  %v7195_v17 = vld [vmem:[%s10877_s25] ss:$0 sm:$0xff]  ;;  %s10882_s25 = sld [smem:[#allocation69_spill]] }
 0xe3f   : > { %v4600_v56 = vpack.c.bf16 %v4591_v22, %v4591_v22 }
 0xe41   : > { %7749 = vmatmul.mubr.msk.bf16.vlgmr.msra.gmra.mrb[72].mxu1 %vm1922_vm2, %v4600_v56  ;;  %v7196_v56 = vld [vmem:[%s10878_s20] ss:$0 sm:$0xff]  ;;  %s10883_s20 = sld [smem:[#allocation64_spill]] }
 0xe42   : > { %7409 = vmatpush3.bf16.msra.mxu1 %v8254_v23 }
 0xe43   : > { %7410 = vmatprep.subr.bf16.mxu1 %v8255_v24 }
 0xe44   : > { %v5104_v40 = vld [vmem:[%s10882_s25] sm:$0xff] }
 0xe45   : > { %v5105_v7 = vpack.c.bf16 %v5104_v40, %v5104_v40 }
 0xe46   : > { %7411 = vmatpush3.bf16.msra.mxu1 %v8256_v58 }
 0xe47   : > { %7412 = vmatprep.subr.bf16.mxu1 %v8257_v63  ;;  %v4715_v13 = vld [vmem:[%s10883_s20] sm:$0x3] }
 0xe48   : > { %v4720_v46 = vrot.slane %v4715_v13, %v9709_v57  ;;  %v4724_v15 = vrot.slane %v4715_v13, %v10042_v53 }
 0xe4a   : > { %7413 = vmatpush3.bf16.msra.mxu1 %v8258_v27 }
 0xe77   : > { %v3542_v42 = vpop.xlane.xlu0 %3541 }
 0xe78   : > { %v3546_v25 = vmul.f32 0.015625, %v3542_v42 }
 0xe7a   : > { %v10270_v6 = vsub.f32 %v3538_v14, %v3546_v25  ;;  %v8259_v14 = vld [vmem:[%s10876_s21 + $0x58] sm:$0xff]  }
 0xe7b   : > { %v3545_v34 = vpop.xlane.xlu0 %3544  ;;  %7414 = vmatprep.subr.bf16.mxu1 %v8259_v14 }
 0xe7c   : > { %v3550_v60 = vmul.f32 %v10270_v6, %v10270_v6  ;;  %v3547_v61 = vmul.f32 0.015625, %v3545_v34  ;;  %7415 = vmatpush3.bf16.msra.mxu1 %v8260_v28 }
 0xe7e   : > { %v3552_v16 = vsel %vm1922_vm2, %v3550_v60, 0.0  ;;  %v10281_v44 = vsub.f32 %v3539_v29, %v3547_v61  ;;  %v8261_v29 = vld [vmem:[%s10876_s21 + $0x60] sm:$0xff]  }
 0xe7f   : > { %3553 = vadd.xlane.f32.xlu0 %v3552_v16  ;;  %7416 = vmatprep.subr.bf16.mxu1 %v8261_v29 }
 0xe80   : > { %v3551_v0 = vmul.f32 %v10281_v44, %v10281_v44  ;;  %7417 = vmatpush3.bf16.msra.mxu1 %v8262_v32 }
 0xe81   : > { %7418 = vmatprep.subr.bf16.mxu1 %v8263_v8 }
 0xe82   : > { %v3555_v1 = vsel %vm1922_vm2, %v3551_v0, 0.0  ;;  %v8266_v0 = vld [vmem:[%s10876_s21 + $0x30] sm:$0xff]  }
 0xe84   : > { %7419 = vmatpush3.bf16.msra.mxu1 %v8264_v10 }
 0xe95   : > { %3588 = vperm.xlu0 %8189, %v3584_v26   ;;  %v8249_v26 = vld [vmem:[%s10879_s15] sm:$0xff]  }
 0xe99   : > { %5541 = vrot.lane.b32.xlu0 %v5105_v7, %s10853_s24 }
 0xe9d   : > { %5650 = vrot.lane.b32.xlu0 %v5105_v7, %s10855_s26 }
 0xea1   : > { %5759 = vrot.lane.b32.xlu0 %v5105_v7, %s10856_s1 }
 0xea5   : > { %5868 = vrot.lane.b32.xlu0 %v5105_v7, %s10857_s4 }
 0xf0c   : > { %v3554_v37 = vpop.xlane.xlu0 %3553 }
 0xf0d   : > { %v3558_v45 = vmul.f32 0.015625, %v3554_v37 }
 0xf0f   : > { %v3560_v47 = vadd.f32 1e-05, %v3558_v45 }
 0xf14   : > { %v4669_v4 = vpop.f32.mrb[72].mxu1 }
 0xf15   : > { %v4670_v30 = vadd.f32 %v7189_v35, %v4669_v4  ;;  %v7750_v31 = vpop.f32.mrb[73].mxu1 }
 0xf16   : > { %v4672_v50 = vpop.f32.mrb[74].mxu1  ;;  %v8250_v31 = vld [vmem:[%s10879_s15 + $0x8] sm:$0xff]  }
 0xf17   : > { %v4676_v54 = vadd.f32 %v4675_v48, %v4670_v30  ;;  %v7751_v55 = vpop.f32.mrb[75].mxu1  ;;  %v7165_v30 = vld [vmem:[%s10880_s18] ss:$0 sm:$0xff]  ;;  %s10884_s18 = sld [smem:[#allocation72_spill]] }
 0xf18   : > { %v7166_v55 = vld [vmem:[%s10881_s19] ss:$0 sm:$0xff]  ;;  %s7294_s19 = sshll.u32 %s9356_s8, 7  ;;  %s9053_s8 = smov [#allocation27]  }
 0xf19   : > { %v4677_v20 = vsel %vm1922_vm2, %v4676_v54, 0.0 }
 0xf1a   : > { %4678 = vadd.xlane.f32.xlu1 %v4677_v20  ;;  %v8251_v20 = vld [vmem:[%s10879_s15 + $0x10] sm:$0xff]  }
 0xf1d   : > { %v7225_v28 = vld [vmem:[%s10884_s18] ss:$0 sm:$0xff]  ;;  %s10638_s18 = scalar_lea.hbm %s9330_s3, %s7294_s19 }
 0xfa7   : > { %v4679_v62 = vpop.xlane.xlu1 %4678 }
 0xfa8   : > { %v4680_v41 = vmul.f32 0.015625, %v4679_v62  ;;  %v3589_v62 = vpop.permute.xlu0 %3588 }
 0xfaa   : > { %v10283_v51 = vsub.f32 %v4676_v54, %v4680_v41  ;;  %v8252_v41 = vld [vmem:[%s10879_s15 + $0x18] sm:$0xff]  }
 0xfac   : > { %v4682_v38 = vmul.f32 %v10283_v51, %v10283_v51 }
 0xfae   : > { %v4683_v49 = vsel %vm1922_vm2, %v4682_v38, 0.0 }
 0xfaf   : > { %4684 = vadd.xlane.f32.xlu1 %v4683_v49  ;;  %v8265_v49 = vld [vmem:[%s10876_s21 + $0x70] sm:$0xff]  }
 0xfb0   : > { %7420 = vmatprep.subr.bf16.mxu1 %v8265_v49 }
 0xfb1   : > { %7421 = vmatpush3.bf16.msra.mxu1 %v8266_v0 }
 0xfb3   : > { %3556 = vadd.xlane.f32.xlu1 %v3555_v1  ;;  %v8267_v1 = vld [vmem:[%s10876_s21 + $0x78] sm:$0xff]  }
 0xfb4   : > { %7422 = vmatprep.subr.bf16.mxu1 %v8267_v1 }
 0xfc4   : > { %3593 = vperm.xlu1 %8190, %v3585_v36   ;;  %v8268_v36 = vld [vmem:[%s10876_s21 + $0x38] sm:$0xff]  }
 0xfc5   : > { %7423 = vmatpush3.bf16.msra.mxu1 %v8268_v36 }
 0xfc6   : > { %7776 = vmatprep.subr.bf16.mxu1 %v9034_v2 }
0x103c   : > { %v4685_v33 = vpop.xlane.xlu1 %4684 }
0x103d   : > { %v4686_v5 = vmul.f32 0.015625, %v4685_v33 }
0x103f   : > { %v4687_v43 = vadd.f32 1e-05, %v4686_v5 }
0x1040   : > { %v3557_v9 = vpop.xlane.xlu1 %3556 }
0x1041   : > { %8409 = vrsqrt.f32 %v4687_v43  ;;  %v3559_v11 = vmul.f32 0.015625, %v3557_v9 }
0x1043   : > { %v3561_v12 = vadd.f32 1e-05, %v3559_v11 }
0x1045   : > { %8411 = vrsqrt.f32 %v3561_v12 }
0x1046   : > { %8413 = vrsqrt.f32 %v3560_v47 }
0x104b   : > { %v8410_v39 = vpop.eup %8409 }
0x104c   : > { %v4689_v22 = vmul.f32 %v8410_v39, %v10283_v51 }
0x104e   : > { %v4697_v42 = vmul.f32 %v7195_v17, %v4689_v22 }
0x104f   : > { %v8412_v25 = vpop.eup %8411 }
0x1050   : > { %v10315_v60 = vadd.f32 %v7196_v56, %v4697_v42  ;;  %v8414_v16 = vpop.eup %8413  ;;  %v3565_v4 = vmul.f32 %v8412_v25, %v10281_v44 }
0x1051   : > { %v3564_v48 = vmul.f32 %v8414_v16, %v10270_v6  ;;  %v3594_v6 = vpop.permute.xlu1 %3593 }
0x1052   : > { %v4714_v35 = vpack.c.bf16 %v10315_v60, %v10315_v60  ;;  %v3574_v50 = vmul.f32 %v7165_v30, %v3565_v4 }
0x1053   : > { %v3573_v54 = vmul.f32 %v7165_v30, %v3564_v48 }
0x1054   : > { %7205 = vmatmul.mubr.msk.bf16.vlgmr.msra.gmra.mrb[80].mxu0 %vm1922_vm2, %v4714_v35  ;;  %v3583_v34 = vadd.f32 %v7166_v55, %v3574_v50 }
0x1055   : > { %7753 = vmatpush3.bf16.msra.mxu0 %v8249_v26  ;;  %7760 = vmatprep.mubr.msk.bf16.mxu0 %vm9035_vm0, %v9034_v2  ;;  %v3582_v61 = vadd.f32 %v7166_v55, %v3573_v54  ;;  %v5542_v26 = vpop.permute.xlu0 %5541 }
0x1056   : > { %7754 = vmatprep.subr.bf16.mxu0 %v9034_v2  ;;  %v3597_v44 = vmul.f32 %v3594_v6, %v3583_v34 }
0x1057   : > { %v3596_v51 = vmul.f32 %v3589_v62, %v3582_v61 }
0x1059   : > { %7755 = vmatpush3.bf16.msra.mxu0 %v8250_v31  ;;  %v5028_v38 = vpack.c.bf16 %v3597_v44, %v3596_v51  ;;  %v5651_v48 = vpop.permute.xlu0 %5650 }
0x105a   : > { %7756 = vmatprep.subr.bf16.mxu0 %v9034_v2 }
0x105d   : > { %7757 = vmatpush3.bf16.msra.mxu0 %v8251_v20  ;;  %v5760_v50 = vpop.permute.xlu0 %5759 }
0x105e   : > { %7758 = vmatprep.subr.bf16.mxu0 %v9034_v2 }
0x1061   : > { %7759 = vmatpush3.bf16.msra.mxu0 %v8252_v41  ;;  %v5869_v55 = vpop.permute.xlu0 %5868 }
0x1062   : > { %7764 = vmatprep.subr.bf16.mxu0 %v9034_v2 }
0x1064   : > { %7761 = vmatmul.mubr.msk.bf16.vlgmr.msra.gmra.mrb[84].mxu0 %vm1922_vm2, %v5028_v38 }
0x1065   : > { %7766 = vmatprep.mubr.msk.bf16.mxu0 %vm9035_vm0, %v9034_v2 }
0x1127   : > { %v4804_v18 = vpop.f32.mrb[80].mxu0 }
0x1128   : > { %v4805_v52 = vadd.f32 %v4804_v18, %v4720_v46  ;;  %v4806_v19 = vpop.f32.mrb[81].mxu0 }
0x1129   : > { %v4807_v21 = vadd.f32 %v4806_v19, %v4724_v15  ;;  %v4808_v23 = vpop.f32.mrb[82].mxu0 }
0x112a   : > { %v4811_v24 = vmax.f32 %v4805_v52, 0.0  ;;  %v4809_v58 = vpop.f32.mrb[83].mxu0 }
0x112b   : > { %v4812_v63 = vmax.f32 %v4807_v21, 0.0 }
0x112c   : > { %v4845_v14 = vpack.c.bf16 %v4811_v24, %v4811_v24 }
0x112d   : > { %v4846_v27 = vpack.c.bf16 %v4812_v63, %v4812_v63 }
0x112f   : > { %4982 = vmatprep.mubr.bf16.mxu1 %v4846_v27 }
0x1130   : > { %4983 = vmatmul.mubr.bf16.vlgmr.msra.gmra.mrb[76].mxu1 %v4845_v14 }
0x1131   : > { %7778 = vmatprep.mubr.msk.bf16.mxu1 %vm9035_vm0, %v9034_v2 }
0x1137   : > { %v5097_v29 = vpop.f32.mrb[84].mxu0 }
0x1138   : > { %v7762_v32 = vpop.f32.mrb[85].mxu0  ;;  %v5098_v10 = vadd.f32 %v7225_v28, %v5097_v29 }
0x1139   : > { %v5100_v8 = vpop.f32.mrb[86].mxu0 }
0x113a   : > { %v5101_v37 = vadd.f32 %v7225_v28, %v5100_v8  ;;  %v7763_v33 = vpop.f32.mrb[87].mxu0 }
0x113c   : > { %v10353_v5 = vpack.c.bf16 %v5101_v37, %v5098_v10 }
0x113e   : > { %5216 = vrot.lane.b32.xlu1 %v10353_v5, %s10850_s2  ;;  %v5111_v45 = vsel %vm2037_vm3, %v10353_v5, 0 }
0x113f   : > { %7765 = vmatpush3.bf16.xpose.msra.mxu0 %v5111_v45 }
0x1140   : > { %7770 = vmatprep.subr.bf16.mxu0 %v9034_v2 }
0x1142   : > { %5214 = vrot.lane.b32.xlu1 %v5105_v7, %s10850_s2  ;;  %s10891_s2 = sld [smem:[#allocation83_spill]] }
0x1146   : > { %5325 = vrot.lane.b32.xlu1 %v10353_v5, %s10854_s10  ;;  %7767 = vmatmul.mubr.msk.bf16.vlgmr.msra.gmra.mrb[88].mxu0 %vm2037_vm3, %v5105_v7 }
0x1147   : > { %7772 = vmatprep.mubr.msk.bf16.mxu0 %vm9035_vm0, %v9034_v2 }
0x114a   : > { %5323 = vrot.lane.b32.xlu1 %v5105_v7, %s10854_s10  ;;  %s10893_s10 = sld [smem:[#allocation68_spill]] }
0x114e   : > { %5434 = vrot.lane.b32.xlu1 %v10353_v5, %s10852_s28 }
0x1152   : > { %5432 = vrot.lane.b32.xlu1 %v5105_v7, %s10852_s28 }
0x1156   : > { %5543 = vrot.lane.b32.xlu1 %v10353_v5, %s10853_s24 }
0x115a   : > { %5652 = vrot.lane.b32.xlu1 %v10353_v5, %s10855_s26  ;;  %s10894_s26 = sld [smem:[#allocation85_spill]] }
0x115e   : > { %5761 = vrot.lane.b32.xlu1 %v10353_v5, %s10856_s1 }
0x1160   : > { %s10895_s1 = smov %s10894_s26 }
0x1162   : > { %5870 = vrot.lane.b32.xlu1 %v10353_v5, %s10857_s4  ;;  %s10885_s4 = sld [smem:[#allocation73_spill]] }
0x11b0   : > { %v5217_v43 = vpop.permute.xlu1 %5216 }
0x11b1   : > { %v5222_v9 = vsel %vm2037_vm3, %v5217_v43, 0 }
0x11b2   : > { %7777 = vmatpush3.bf16.xpose.msra.mxu1 %v5222_v9 }
0x11b3   : > { %7788 = vmatprep.subr.bf16.mxu1 %v9034_v2 }
0x11b4   : > { %v5215_v11 = vpop.permute.xlu1 %5214 }
0x11b8   : > { %v5326_v47 = vpop.permute.xlu1 %5325 }
0x11b9   : > { %v5331_v12 = vsel %vm2037_vm3, %v5326_v47, 0  ;;  %7779 = vmatmul.mubr.msk.bf16.vlgmr.msra.gmra.mrb[80].mxu1 %vm2037_vm3, %v5215_v11 }
0x11ba   : > { %7789 = vmatpush3.bf16.xpose.msra.mxu1 %v5331_v12  ;;  %7790 = vmatprep.mubr.msk.bf16.mxu1 %vm9035_vm0, %v9034_v2 }
0x11bb   : > { %7800 = vmatprep.subr.bf16.mxu1 %v9034_v2 }
0x11bc   : > { %v5324_v39 = vpop.permute.xlu1 %5323 }
0x11c0   : > { %v5435_v17 = vpop.permute.xlu1 %5434 }
0x11c1   : > { %v5440_v22 = vsel %vm2037_vm3, %v5435_v17, 0  ;;  %7791 = vmatmul.mubr.msk.bf16.vlgmr.msra.gmra.mrb[84].mxu1 %vm2037_vm3, %v5324_v39 }
0x11c2   : > { %7801 = vmatpush3.bf16.xpose.msra.mxu1 %v5440_v22  ;;  %7802 = vmatprep.mubr.msk.bf16.mxu1 %vm9035_vm0, %v9034_v2 }
0x11c3   : > { %7812 = vmatprep.subr.bf16.mxu1 %v9034_v2 }
0x11c4   : > { %v5433_v56 = vpop.permute.xlu1 %5432 }
0x11c8   : > { %v5544_v42 = vpop.permute.xlu1 %5543 }
0x11c9   : > { %v5549_v25 = vsel %vm2037_vm3, %v5544_v42, 0  ;;  %7803 = vmatmul.mubr.msk.bf16.vlgmr.msra.gmra.mrb[88].mxu1 %vm2037_vm3, %v5433_v56 }
0x11ca   : > { %7813 = vmatpush3.bf16.xpose.msra.mxu1 %v5549_v25  ;;  %7814 = vmatprep.mubr.msk.bf16.mxu1 %vm9035_vm0, %v9034_v2 }
0x11cb   : > { %7824 = vmatprep.subr.bf16.mxu1 %v9034_v2 }
0x11cc   : > { %v5653_v16 = vpop.permute.xlu1 %5652 }
0x11cd   : > { %v5658_v35 = vsel %vm2037_vm3, %v5653_v16, 0 }
0x11d0   : > { %v5762_v4 = vpop.permute.xlu1 %5761 }
0x11d1   : > { %7815 = vmatmul.mubr.msk.bf16.vlgmr.msra.gmra.mrb[92].mxu1 %vm2037_vm3, %v5542_v26  ;;  %v5767_v30 = vsel %vm2037_vm3, %v5762_v4, 0 }
0x11d2   : > { %7825 = vmatpush3.bf16.xpose.msra.mxu1 %v5658_v35  ;;  %7826 = vmatprep.mubr.msk.bf16.mxu1 %vm9035_vm0, %v9034_v2 }
0x11d3   : > { %7836 = vmatprep.subr.bf16.mxu1 %v9034_v2 }
0x11d4   : > { %v5871_v31 = vpop.permute.xlu1 %5870 }
0x11d5   : > { %v5876_v54 = vsel %vm2037_vm3, %v5871_v31, 0 }
0x11d9   : > { %7827 = vmatmul.mubr.msk.bf16.vlgmr.msra.gmra.mrb[96].mxu1 %vm2037_vm3, %v5651_v48 }
0x11da   : > { %7837 = vmatpush3.bf16.xpose.msra.mxu1 %v5767_v30  ;;  %7838 = vmatprep.mubr.msk.bf16.mxu1 %vm9035_vm0, %v9034_v2 }
0x11db   : > { %7848 = vmatprep.subr.bf16.mxu1 %v9034_v2 }
0x11e1   : > { %7839 = vmatmul.mubr.msk.bf16.vlgmr.msra.gmra.mrb[100].mxu1 %vm2037_vm3, %v5760_v50 }
0x11e2   : > { %7849 = vmatpush3.bf16.xpose.msra.mxu1 %v5876_v54  ;;  %7850 = vmatprep.mubr.msk.bf16.mxu1 %vm9035_vm0, %v9034_v2 }
0x11e3   : > { %7860 = vmatprep.subr.bf16.mxu1 %v9034_v2 }
0x11e9   : > { %7851 = vmatmul.mubr.msk.bf16.vlgmr.msra.gmra.mrb[104].mxu1 %vm2037_vm3, %v5869_v55 }
0x11ea   : > { %7868 = vmatprep.mubr.msk.bf16.mxu1 %vm9035_vm0, %v9034_v2 }
0x1203   : > { %v7424_v20 = vpop.f32.mrb[76].mxu1 }
0x1204   : > { %v7425_v34 = vpop.f32.mrb[77].mxu1 }
0x1205   : > { %v10413_v6 = vadd.f32 %v7425_v34, %v7424_v20  ;;  %v7427_v61 = vpop.f32.mrb[78].mxu1 }
0x1206   : > { %v7428_v62 = vpop.f32.mrb[79].mxu1 }
0x1219   : > { %v5147_v41 = vpop.f32.mrb[88].mxu0 }
0x121a   : > { %v5153_v44 = vsel %vm10120_vm13, %v5147_v41, -1e+09  ;;  %v7768_v51 = vpop.f32.mrb[89].mxu0 }
0x121b   : > { %v5154_v38 = vsel %vm3101_vm7, %v5153_v44, -inf  ;;  %v5150_v49 = vpop.f32.mrb[90].mxu0 }
0x121c   : > { %5155 = vmax.xlane.f32.xlu1 %v5154_v38  ;;  %v7769_v0 = vpop.f32.mrb[91].mxu0 }
0x128c   : > { %v5258_v1 = vpop.f32.mrb[80].mxu1 }
0x128d   : > { %v5264_v36 = vsel %vm10120_vm13, %v5258_v1, -1e+09  ;;  %v7780_v40 = vpop.f32.mrb[81].mxu1 }
0x128e   : > { %v5265_v7 = vsel %vm3101_vm7, %v5264_v36, -inf  ;;  %v5261_v13 = vpop.f32.mrb[82].mxu1 }
0x128f   : > { %5266 = vmax.xlane.f32.xlu0 %v5265_v7  ;;  %v7781_v46 = vpop.f32.mrb[83].mxu1 }
0x1294   : > { %v5367_v15 = vpop.f32.mrb[84].mxu1 }
0x1295   : > { %v5373_v18 = vsel %vm10120_vm13, %v5367_v15, -1e+09  ;;  %v7792_v52 = vpop.f32.mrb[85].mxu1 }
0x1296   : > { %v5374_v19 = vsel %vm3101_vm7, %v5373_v18, -inf  ;;  %v5370_v21 = vpop.f32.mrb[86].mxu1 }
0x1297   : > { %5375 = vmax.xlane.f32.xlu0 %v5374_v19  ;;  %v7793_v23 = vpop.f32.mrb[87].mxu1 }
0x129c   : > { %v5476_v24 = vpop.f32.mrb[88].mxu1 }
0x129d   : > { %v10426_v58 = vsel %vm10120_vm13, %v5476_v24, -1e+09  ;;  %v7804_v63 = vpop.f32.mrb[89].mxu1 }
0x129e   : > { %v5483_v27 = vsel %vm3101_vm7, %v10426_v58, -inf  ;;  %v5479_v14 = vpop.f32.mrb[90].mxu1 }
0x129f   : > { %5484 = vmax.xlane.f32.xlu0 %v5483_v27  ;;  %v7805_v28 = vpop.f32.mrb[91].mxu1 }
0x12a4   : > { %v5585_v29 = vpop.f32.mrb[92].mxu1 }
0x12a5   : > { %v10432_v32 = vsel %vm10120_vm13, %v5585_v29, -1e+09  ;;  %v7816_v8 = vpop.f32.mrb[93].mxu1 }
0x12a6   : > { %v5592_v10 = vsel %vm3101_vm7, %v10432_v32, -inf  ;;  %v5588_v37 = vpop.f32.mrb[94].mxu1 }
0x12a7   : > { %5593 = vmax.xlane.f32.xlu1 %v5592_v10  ;;  %v7817_v33 = vpop.f32.mrb[95].mxu1 }
0x12a9   : > { %v5156_v48 = vpop.xlane.xlu1 %5155 }
0x12aa   : > { %v5157_v30 = vsub.f32 %v5153_v44, %v5156_v48 }
0x12ac   : > { %v5694_v45 = vpop.f32.mrb[96].mxu1  ;;  %v5158_v31 = vmul.f32 1.442695, %v5157_v30 }
0x12ad   : > { %v5700_v43 = vsel %vm10120_vm13, %v5694_v45, -1e+09  ;;  %v7828_v9 = vpop.f32.mrb[97].mxu1 }
0x12ae   : > { %v5701_v11 = vsel %vm3101_vm7, %v5700_v43, -inf  ;;  %v5697_v47 = vpop.f32.mrb[98].mxu1  ;;  %8415 = vpow2.f32 %v5158_v31 }
0x12af   : > { %5702 = vmax.xlane.f32.xlu0 %v5701_v11  ;;  %v7829_v12 = vpop.f32.mrb[99].mxu1 }
0x12b4   : > { %v5803_v39 = vpop.f32.mrb[100].mxu1 }
0x12b5   : > { %v5809_v17 = vsel %vm10120_vm13, %v5803_v39, -1e+09  ;;  %v7840_v22 = vpop.f32.mrb[101].mxu1 }
0x12b6   : > { %v5810_v56 = vsel %vm3101_vm7, %v5809_v17, -inf  ;;  %v5806_v42 = vpop.f32.mrb[102].mxu1 }
0x12b7   : > { %5811 = vmax.xlane.f32.xlu1 %v5810_v56  ;;  %v7841_v25 = vpop.f32.mrb[103].mxu1 }
0x12b8   : > { %v10449_v55 = vpop.eup %8415 }
0x12b9   : > { %v5160_v20 = vsel %vm3101_vm7, %v10449_v55, 0.0 }
0x12bc   : > { %v5912_v16 = vpop.f32.mrb[104].mxu1 }
0x12bd   : > { %v7852_v26 = vpop.f32.mrb[105].mxu1  ;;  %v5918_v50 = vsel %vm10120_vm13, %v5912_v16, -1e+09 }
0x12be   : > { %v5915_v35 = vpop.f32.mrb[106].mxu1  ;;  %v5919_v54 = vsel %vm3101_vm7, %v5918_v50, -inf }
0x12bf   : > { %v7853_v4 = vpop.f32.mrb[107].mxu1 }
0x12c5   : > { %5277 = vrot.lane.b32.xlu0 %v10353_v5, %s10861_s5 }
0x12c8   : > { %5167 = vrot.lane.b32.xlu1 %v10353_v5, %s10862_s6 }
0x12e4   : > { %5920 = vmax.xlane.f32.xlu0 %v5919_v54 }
0x12ec   : > { %5161 = vadd.xlane.f32.xlu1 %v5160_v20 }
0x131c   : > { %v5267_v34 = vpop.xlane.xlu0 %5266 }
0x131d   : > { %v5268_v61 = vsub.f32 %v5264_v36, %v5267_v34 }
0x131f   : > { %v5269_v62 = vmul.f32 1.442695, %v5268_v61 }
0x1321   : > { %8417 = vpow2.f32 %v5269_v62 }
0x1324   : > { %v5376_v41 = vpop.xlane.xlu0 %5375 }
0x1325   : > { %v5377_v44 = vsub.f32 %v5373_v18, %v5376_v41 }
0x1327   : > { %v5378_v51 = vmul.f32 1.442695, %v5377_v44 }
0x1329   : > { %8419 = vpow2.f32 %v5378_v51 }
0x132b   : > { %v10453_v38 = vpop.eup %8417 }
0x132c   : > { %v5271_v59 = vsel %vm3101_vm7, %v10453_v38, 0.0  ;;  %v5485_v7 = vpop.xlane.xlu0 %5484 }
0x132d   : > { %5272 = vadd.xlane.f32.xlu0 %v5271_v59  ;;  %v5486_v13 = vsub.f32 %v10426_v58, %v5485_v7 }
0x132f   : > { %v5487_v46 = vmul.f32 1.442695, %v5486_v13 }
0x1331   : > { %8421 = vpow2.f32 %v5487_v46 }
0x1333   : > { %v10457_v49 = vpop.eup %8419 }
0x1334   : > { %v5380_v0 = vsel %vm3101_vm7, %v10457_v49, 0.0  ;;  %v5594_v1 = vpop.xlane.xlu1 %5593 }
0x1335   : > { %5381 = vadd.xlane.f32.xlu1 %v5380_v0  ;;  %v5595_v15 = vsub.f32 %v10432_v32, %v5594_v1 }
0x1337   : > { %v5596_v19 = vmul.f32 1.442695, %v5595_v15 }
0x1339   : > { %8423 = vpow2.f32 %v5596_v19 }
0x133b   : > { %v8422_v63 = vpop.eup %8421 }
0x133c   : > { %v5703_v18 = vpop.xlane.xlu0 %5702  ;;  %v5489_v27 = vsel %vm3101_vm7, %v8422_v63, 0.0 }
0x133d   : > { %v5704_v52 = vsub.f32 %v5700_v43, %v5703_v18 }
0x133f   : > { %v5705_v23 = vmul.f32 1.442695, %v5704_v52 }
0x1340   : > { %v5278_v10 = vpop.permute.xlu0 %5277 }
0x1341   : > { %8425 = vpow2.f32 %v5705_v23 }
0x1343   : > { %5386 = vrot.lane.b32.xlu0 %v10353_v5, %s10863_s9  ;;  %v10469_v14 = vpop.eup %8423 }
0x1344   : > { %v5812_v36 = vpop.xlane.xlu1 %5811  ;;  %v5598_v28 = vsel %vm3101_vm7, %v10469_v14, 0.0 }
0x1345   : > { %v5813_v21 = vsub.f32 %v5809_v17, %v5812_v36 }
0x1346   : > { %5495 = vrot.lane.b32.xlu1 %v10353_v5, %s10864_s12 }
0x1347   : > { %v5814_v24 = vmul.f32 1.442695, %v5813_v21 }
0x1348   : > { %v5168_v40 = vpop.permute.xlu1 %5167 }
0x1349   : > { %7771 = vmatpush3.bf16.msra.mxu0 %v5168_v40  ;;  %8427 = vpow2.f32 %v5814_v24 }
0x134a   : > { %7782 = vmatprep.subr.bf16.mxu0 %v9034_v2 }
0x134b   : > { %v10471_v58 = vpop.eup %8425 }
0x134c   : > { %v5707_v8 = vsel %vm3101_vm7, %v10471_v58, 0.0 }
0x1353   : > { %v10475_v29 = vpop.eup %8427 }
0x1354   : > { %v5816_v32 = vsel %vm3101_vm7, %v10475_v29, 0.0 }
0x1362   : > { %5490 = vadd.xlane.f32.xlu0 %v5489_v27 }
0x1366   : > { %5599 = vadd.xlane.f32.xlu0 %v5598_v28 }
0x136a   : > { %5817 = vadd.xlane.f32.xlu0 %v5816_v32  ;;  %5708 = vadd.xlane.f32.xlu1 %v5707_v8 }
0x1371   : > { %v5921_v37 = vpop.xlane.xlu0 %5920 }
0x1372   : > { %v5922_v33 = vsub.f32 %v5918_v50, %v5921_v37  ;;  %v8269_v37 = vld [vmem:[%s10885_s4] sm:$0xff]  }
0x1373   : > { %7861 = vmatpush3.bf16.msra.mxu1 %v8269_v37 }
0x1374   : > { %v5923_v45 = vmul.f32 1.442695, %v5922_v33  ;;  %7862 = vmatprep.subr.bf16.mxu1 %v9034_v2 }
0x1376   : > { %8429 = vpow2.f32 %v5923_v45 }
0x1379   : > { %v5162_v43 = vpop.xlane.xlu1 %5161 }
0x137a   : > { %8431 = vrcp.f32 %v5162_v43 }
0x137b   : > { %5713 = vrot.lane.b32.xlu1 %v10353_v5, %s10865_s13 }
0x137f   : > { %5822 = vrot.lane.b32.xlu1 %v10353_v5, %s10866_s14 }
0x1380   : > { %v10485_v9 = vpop.eup %8429 }
0x1381   : > { %v5925_v11 = vsel %vm3101_vm7, %v10485_v9, 0.0 }
0x1382   : > { %5926 = vadd.xlane.f32.xlu0 %v5925_v11  ;;  %v8270_v11 = vld [vmem:[%s10885_s4 + $0x8] sm:$0xff]  }
0x1383   : > { %5931 = vrot.lane.b32.xlu1 %v10353_v5, %s10867_s16  ;;  %7863 = vmatpush3.bf16.msra.mxu1 %v8270_v11 }
0x1384   : > { %v8432_v47 = vpop.eup %8431  ;;  %7864 = vmatprep.subr.bf16.mxu1 %v9034_v2 }
0x1385   : > { %v5164_v12 = vmul.f32 %v8432_v47, %v10449_v55  ;;  %v8271_v47 = vld [vmem:[%s10885_s4 + $0x10] sm:$0xff]  }
0x1387   : > { %v5165_v39 = vpack.c.bf16 %v5164_v12, %v5164_v12  ;;  %7865 = vmatpush3.bf16.msra.mxu1 %v8271_v47 }
0x1388   : > { %7866 = vmatprep.subr.bf16.mxu1 %v9034_v2 }
0x1389   : > { %7773 = vmatmul.mubr.msk.bf16.vlgmr.msra.gmra.mrb[92].mxu0 %vm3101_vm7, %v5165_v39 }
0x138a   : > { %7783 = vmatpush3.bf16.msra.mxu0 %v5278_v10  ;;  %7784 = vmatprep.mubr.msk.bf16.mxu0 %vm9035_vm0, %v9034_v2 }
0x138b   : > { %7794 = vmatprep.subr.bf16.mxu0 %v9034_v2 }
0x1398   : > { %5604 = vrot.lane.b32.xlu0 %v10353_v5, %s10868_s17 }
0x13ba   : > { %v5273_v17 = vpop.xlane.xlu0 %5272 }
0x13bb   : > { %8433 = vrcp.f32 %v5273_v17 }
0x13be   : > { %v5387_v16 = vpop.permute.xlu0 %5386 }
0x13c2   : > { %v5382_v22 = vpop.xlane.xlu1 %5381 }
0x13c3   : > { %8435 = vrcp.f32 %v5382_v22 }
0x13c5   : > { %v8434_v56 = vpop.eup %8433 }
0x13c6   : > { %v5275_v42 = vmul.f32 %v8434_v56, %v10453_v38  ;;  %v5496_v4 = vpop.permute.xlu1 %5495  ;;  %v8272_v56 = vld [vmem:[%s10885_s4 + $0x18] sm:$0xff]  }
0x13c7   : > { %7867 = vmatpush3.bf16.msra.mxu1 %v8272_v56 }
0x13c8   : > { %v5276_v25 = vpack.c.bf16 %v5275_v42, %v5275_v42 }
0x13ca   : > { %7785 = vmatmul.mubr.msk.bf16.vlgmr.msra.gmra.mrb[96].mxu0 %vm3101_vm7, %v5276_v25 }
0x13cb   : > { %7795 = vmatpush3.bf16.msra.mxu0 %v5387_v16  ;;  %7796 = vmatprep.mubr.msk.bf16.mxu0 %vm9035_vm0, %v9034_v2 }
0x13cc   : > { %7806 = vmatprep.subr.bf16.mxu0 %v9034_v2 }
0x13cd   : > { %v8436_v26 = vpop.eup %8435 }
0x13ce   : > { %v5384_v5 = vmul.f32 %v8436_v26, %v10457_v49 }
0x13d0   : > { %v5385_v35 = vpack.c.bf16 %v5384_v5, %v5384_v5 }
0x13d2   : > { %7797 = vmatmul.mubr.msk.bf16.vlgmr.msra.gmra.mrb[100].mxu0 %vm3101_vm7, %v5385_v35 }
0x13d3   : > { %7807 = vmatpush3.bf16.msra.mxu0 %v5496_v4  ;;  %7808 = vmatprep.mubr.msk.bf16.mxu0 %vm9035_vm0, %v9034_v2 }
0x13d4   : > { %7818 = vmatprep.subr.bf16.mxu0 %v9034_v2 }
0x13ef   : > { %v5491_v48 = vpop.xlane.xlu0 %5490 }
0x13f0   : > { %8437 = vrcp.f32 %v5491_v48 }
0x13f3   : > { %v5600_v54 = vpop.xlane.xlu0 %5599 }
0x13f4   : > { %8439 = vrcp.f32 %v5600_v54 }
0x13f7   : > { %v5709_v55 = vpop.xlane.xlu1 %5708  ;;  %v5818_v20 = vpop.xlane.xlu0 %5817 }
0x13f8   : > { %8441 = vrcp.f32 %v5709_v55 }
0x13f9   : > { %8443 = vrcp.f32 %v5818_v20 }
0x13fa   : > { %v8438_v30 = vpop.eup %8437 }
0x13fb   : > { %v5493_v31 = vmul.f32 %v8438_v30, %v8422_v63  ;;  %v5714_v38 = vpop.permute.xlu1 %5713 }
0x13fd   : > { %v5494_v50 = vpack.c.bf16 %v5493_v31, %v5493_v31 }
0x13fe   : > { %v8440_v34 = vpop.eup %8439 }
0x13ff   : > { %7809 = vmatmul.mubr.msk.bf16.vlgmr.msra.gmra.mrb[104].mxu0 %vm3101_vm7, %v5494_v50  ;;  %v5602_v62 = vmul.f32 %v8440_v34, %v10469_v14  ;;  %v5823_v1 = vpop.permute.xlu1 %5822 }
0x1400   : > { %7820 = vmatprep.mubr.msk.bf16.mxu0 %vm9035_vm0, %v9034_v2 }
0x1401   : > { %v5603_v44 = vpack.c.bf16 %v5602_v62, %v5602_v62 }
0x1402   : > { %v8442_v51 = vpop.eup %8441 }
0x1403   : > { %v5711_v59 = vmul.f32 %v8442_v51, %v10471_v58  ;;  %v8444_v0 = vpop.eup %8443  ;;  %v5932_v13 = vpop.permute.xlu1 %5931 }
0x1404   : > { %v5820_v36 = vmul.f32 %v8444_v0, %v10475_v29 }
0x1405   : > { %v5712_v49 = vpack.c.bf16 %v5711_v59, %v5711_v59 }
0x1406   : > { %v5821_v40 = vpack.c.bf16 %v5820_v36, %v5820_v36 }
0x140f   : > { %v5927_v61 = vpop.xlane.xlu0 %5926 }
0x1410   : > { %8445 = vrcp.f32 %v5927_v61 }
0x1413   : > { %v5605_v41 = vpop.permute.xlu0 %5604 }
0x1414   : > { %7819 = vmatpush3.bf16.msra.mxu0 %v5605_v41 }
0x1415   : > { %7830 = vmatprep.subr.bf16.mxu0 %v9034_v2 }
0x1417   : > { %7821 = vmatmul.mubr.msk.bf16.vlgmr.msra.gmra.mrb[108].mxu0 %vm3101_vm7, %v5603_v44 }
0x1418   : > { %7831 = vmatpush3.bf16.msra.mxu0 %v5714_v38  ;;  %7832 = vmatprep.mubr.msk.bf16.mxu0 %vm9035_vm0, %v9034_v2 }
0x1419   : > { %7842 = vmatprep.subr.bf16.mxu0 %v9034_v2 }
0x141a   : > { %v8446_v7 = vpop.eup %8445 }
0x141b   : > { %v5929_v46 = vmul.f32 %v8446_v7, %v10485_v9 }
0x141d   : > { %v5930_v15 = vpack.c.bf16 %v5929_v46, %v5929_v46 }
0x141f   : > { %7833 = vmatmul.mubr.msk.bf16.vlgmr.msra.gmra.mrb[112].mxu0 %vm3101_vm7, %v5712_v49 }
0x1420   : > { %7843 = vmatpush3.bf16.msra.mxu0 %v5823_v1  ;;  %7844 = vmatprep.mubr.msk.bf16.mxu0 %vm9035_vm0, %v9034_v2  ;;  %v7247_v1 = vld [vmem:[#allocation12] ss:$0 sm:$0xff] }
0x1421   : > { %7854 = vmatprep.subr.bf16.mxu0 %v9034_v2 }
0x1427   : > { %7845 = vmatmul.mubr.msk.bf16.vlgmr.msra.gmra.mrb[116].mxu0 %vm3101_vm7, %v5821_v40 }
0x1428   : > { %7855 = vmatpush3.bf16.msra.mxu0 %v5932_v13  ;;  %7856 = vmatprep.mubr.msk.bf16.mxu0 %vm9035_vm0, %v9034_v2 }
0x142f   : > { %7857 = vmatmul.mubr.msk.bf16.vlgmr.msra.gmra.mrb[120].mxu0 %vm3101_vm7, %v5930_v15 }
0x1430   : > { %6222 = vmatprep.mubr.bf16.mxu0 %v9036_v3 }
0x145c   : > { %v5207_v18 = vpop.f32.mrb[92].mxu0 }
0x145d   : > { %v7774_v52 = vpop.f32.mrb[93].mxu0 }
0x145e   : > { %v5210_v19 = vpop.f32.mrb[94].mxu0 }
0x145f   : > { %v7775_v21 = vpop.f32.mrb[95].mxu0 }
0x149d   : > { %v5317_v23 = vpop.f32.mrb[96].mxu0 }
0x149e   : > { %5978 = vrot.lane.b32.xlu1 %v5317_v23, %s10867_s16  ;;  %v7786_v24 = vpop.f32.mrb[97].mxu0  ;;  %s10890_s16 = sld [smem:[#allocation78_spill]] }
0x149f   : > { %v5320_v63 = vpop.f32.mrb[98].mxu0 }
0x14a0   : > { %v7787_v27 = vpop.f32.mrb[99].mxu0 }
0x14a5   : > { %v5426_v14 = vpop.f32.mrb[100].mxu0 }
0x14a6   : > { %5982 = vrot.lane.b32.xlu1 %v5426_v14, %s10866_s14  ;;  %v7798_v58 = vpop.f32.mrb[101].mxu0  ;;  %s10889_s14 = sld [smem:[#allocation79_spill]] }
0x14a7   : > { %v5429_v28 = vpop.f32.mrb[102].mxu0 }
0x14a8   : > { %v7799_v29 = vpop.f32.mrb[103].mxu0 }
0x14ac   : > { %v8285_v37 = vld [vmem:[%s10889_s14 + $0x40] sm:$0xff]   ;;  %v8290_v11 = vld [vmem:[%s10889_s14 + $0x10] sm:$0xff]   ;;  %v8291_v47 = vld [vmem:[%s10889_s14 + $0x58] sm:$0xff]  }
0x14ad   : > { %7472 = vmatprep.subr.bf16.mxu1 %v8285_v37  ;;  %v8296_v56 = vld [vmem:[%s10889_s14 + $0x28] sm:$0xff]  }
0x14d2   : > { %v5535_v3 = vpop.f32.mrb[104].mxu0 }
0x14d3   : > { %5986 = vrot.lane.b32.xlu1 %v5535_v3, %s10865_s13  ;;  %v7810_v32 = vpop.f32.mrb[105].mxu0  ;;  %s10886_s13 = sld [smem:[#allocation66_spill]] }
0x14d4   : > { %v5538_v8 = vpop.f32.mrb[106].mxu0 }
0x14d5   : > { %v7811_v10 = vpop.f32.mrb[107].mxu0 }
0x14d9   : > { %v7206_v0 = vld [vmem:[%s10886_s13] ss:$0 sm:$0xff] }
0x14da   : > { %v4985_v7 = vadd.f32 %v10413_v6, %v7206_v0 }
0x14dc   : > { %v10556_v21 = vadd.f32 %v4985_v7, %v10315_v60 }
0x14de   : > { %v4991_v23 = vsel %vm1922_vm2, %v10556_v21, 0.0 }
0x14ea   : > { %v5644_v33 = vpop.f32.mrb[108].mxu0 }
0x14eb   : > { %5990 = vrot.lane.b32.xlu0 %v5644_v33, %s10868_s17  ;;  %v7822_v45 = vpop.f32.mrb[109].mxu0  ;;  %s10887_s17 = sld [smem:[#allocation70_spill]]  ;;  %v8286_v33 = vld [vmem:[%s10889_s14] sm:$0xff]  }
0x14ec   : > { %v5647_v43 = vpop.f32.mrb[110].mxu0  ;;  %v8287_v45 = vld [vmem:[%s10889_s14 + $0x48] sm:$0xff]  }
0x14ed   : > { %v7823_v9 = vpop.f32.mrb[111].mxu0  ;;  %v8288_v43 = vld [vmem:[%s10889_s14 + $0x8] sm:$0xff]  }
0x14ee   : > { %v8289_v9 = vld [vmem:[%s10889_s14 + $0x50] sm:$0xff]  }
0x14f1   : > { %v6095_v40 = vld [vmem:[%s10887_s17] sm:$0xff] }
0x14f2   : > { %v5753_v12 = vpop.f32.mrb[112].mxu0 }
0x14f3   : > { %5994 = vrot.lane.b32.xlu1 %v5753_v12, %s10864_s12  ;;  %v7834_v39 = vpop.f32.mrb[113].mxu0  ;;  %v8292_v12 = vld [vmem:[%s10889_s14 + $0x18] sm:$0xff]   ;;  %s10892_s12 = sld [smem:[#allocation67_spill]] }
0x14f4   : > { %v5756_v17 = vpop.f32.mrb[114].mxu0  ;;  %v8293_v39 = vld [vmem:[%s10889_s14 + $0x60] sm:$0xff]  }
0x14f5   : > { %v7835_v22 = vpop.f32.mrb[115].mxu0  ;;  %v8294_v17 = vld [vmem:[%s10889_s14 + $0x20] sm:$0xff]  }
0x14f6   : > { %v8295_v22 = vld [vmem:[%s10889_s14 + $0x68] sm:$0xff]  }
0x14fa   : > { %v5862_v42 = vpop.f32.mrb[116].mxu0 }
0x14fb   : > { %5998 = vrot.lane.b32.xlu0 %v5862_v42, %s10863_s9  ;;  %v7846_v25 = vpop.f32.mrb[117].mxu0  ;;  %s10888_s9 = sld [smem:[#allocation77_spill]] }
0x14fc   : > { %v5865_v16 = vpop.f32.mrb[118].mxu0 }
0x14fd   : > { %v7847_v26 = vpop.f32.mrb[119].mxu0 }
0x1501   : > { %v8275_v58 = vld [vmem:[%s10888_s9 + $0x4] ss:$8 sps:$4 sm:$0xff]   ;;  %v8273_v28 = vld [vmem:[%s10888_s9] ss:$8 sps:$4 sm:$0xff]   ;;  %v8278_v60 = vld [vmem:[%s10888_s9 + $0x14] ss:$8 sps:$4 sm:$0xff]  }
0x1502   : > { %v5971_v5 = vpop.f32.mrb[120].mxu0  ;;  %6190 = vmatprep.subr.bf16.mxu0 %v8275_v58  ;;  %v8276_v29 = vld [vmem:[%s10888_s9 + $0x10] ss:$8 sps:$4 sm:$0xff]   ;;  %v8281_v3 = vld [vmem:[%s10888_s9 + $0x24] ss:$8 sps:$4 sm:$0xff]  }
0x1503   : > { %6002 = vrot.lane.b32.xlu1 %v5971_v5, %s10861_s5  ;;  %v7858_v35 = vpop.f32.mrb[121].mxu0  ;;  %6191 = vmatpush1.bf16.msra.mxu0 %v8273_v28  ;;  %v8279_v32 = vld [vmem:[%s10888_s9 + $0x20] ss:$8 sps:$4 sm:$0xff]   ;;  %v8282_v8 = vld [vmem:[%s10888_s9 + $0x30] ss:$8 sps:$4 sm:$0xff]   ;;  %s1851_s5 = sand.u32 1, %s8955_s22  }
0x1504   : > { %v5974_v4 = vpop.f32.mrb[122].mxu0  ;;  %6192 = vmatprep.subr.bf16.mxu0 %v8278_v60  ;;  %v8284_v10 = vld [vmem:[%s10888_s9 + $0x34] ss:$8 sps:$4 sm:$0xff]   ;;  %v7253_v5 = vld [vmem:[#allocation13] ss:$0 sm:$0xff]  ;;  %s7099_s6 = sshll.u32 %s1851_s5, 3 }
0x1505   : > { %v7859_v48 = vpop.f32.mrb[123].mxu0  ;;  %v7254_v4 = vld [vmem:[#allocation15] ss:$0 sm:$0xff]  ;;  %v8303_v28 = vld [vmem:[%s10891_s2 + $0x10] sm:$0xff]   ;;  %s1853_s25 = scalar_lea.vmem [#allocation27], %s7099_s6  ;;  %s6762_s13 = scalar_lea.sflag [#allocation6], %s1851_s5 }
0x1506   : > { %v8302_v58 = vld [vmem:[%s10891_s2 + $0x8] sm:$0xff]   ;;  %s6775_s20 = sshll.u32 %s1853_s25, 4  ;;  %s10640_s20 = int_to_ptr.vmem [resolvable:$true] %s6775_s20 }
0x1507   : > { %6193 = vmatpush1.bf16.msra.mxu0 %v8276_v29  ;;  %s8869_s17 = scalar_lea.vmem %s10640_s20, 128 }
0x1508   : > { %6194 = vmatprep.subr.bf16.mxu0 %v8281_v3  ;;  %p8870_p3 = scmp.ne.s32.totalorder %s10640_s20, %s8869_s17 }
0x150a   : > { %p8871_p12 = pnand %p8870_p3, %p10896_p4 }
0x150b   : > { %6195 = vmatpush1.bf16.msra.mxu0 %v8279_v32 }
0x150c   : > { %6196 = vmatprep.subr.bf16.mxu0 %v8284_v10  ;;  %p8872_p5 = pneg %p8871_p12 }
0x150f   : > { %6197 = vmatpush1.bf16.msra.mxu0 %v8282_v8 }
0x1510   : > { %v5979_v30 = vpop.permute.xlu1 %5978  ;;  %7872 = vmatprep.subr.bf16.mxu0 %v9034_v2 }
0x1511   : > { %v6005_v55 = vsel %vm2037_vm3, %v5207_v18, %v5979_v30 }
0x1518   : > { %v5983_v31 = vpop.permute.xlu1 %5982 }
0x1519   : > { %v6006_v20 = vsel %vm3101_vm7, %v6005_v55, %v5983_v31  ;;  %v8299_v55 = vld [vmem:[%s10889_s14 + $0x78] sm:$0xff]  }
0x1545   : > { %v5987_v50 = vpop.permute.xlu1 %5986 }
0x1546   : > { %v6007_v61 = vsel %vm3104_vm8, %v6006_v20, %v5987_v50  ;;  %v8297_v50 = vld [vmem:[%s10889_s14 + $0x70] sm:$0xff]   ;;  %v8300_v20 = vld [vmem:[%s10889_s14 + $0x38] sm:$0xff]  }
0x155d   : > { %v5991_v54 = vpop.permute.xlu0 %5990 }
0x155e   : > { %v6008_v41 = vsel %vm1991_vm1, %v6007_v61, %v5991_v54  ;;  %v8298_v54 = vld [vmem:[%s10889_s14 + $0x30] sm:$0xff]  }
0x1565   : > { %v5995_v34 = vpop.permute.xlu1 %5994 }
0x1566   : > { %v6009_v44 = vsel %vm3109_vm9, %v6008_v41, %v5995_v34  ;;  %v6135_v34 = vld [vmem:[%s10890_s16] sm:$0x3]  ;;  %s8873_s16 = sshll.u32 %s9053_s8, 4  ;;  %s8874_s16 = int_to_ptr.vmem [resolvable:$false] %s8873_s16 }
0x1567   : > { %v6140_v61 = vrot.slane %v6135_v34, %v9709_v57  ;;  %v7264_v57 = vld [vmem:[#allocation16] ss:$0 sm:$0xff]  ;;  %p8876_p6 = scmp.lt.s32.totalorder %s10640_s20, %s8874_s16 }
0x156d   : > { %v5999_v62 = vpop.permute.xlu0 %5998 }
0x156e   : > { %v6010_v51 = vsel %vm3112_vm10, %v6009_v44, %v5999_v62  ;;  %v6144_v62 = vrot.slane %v6135_v34, %v10042_v53 }
0x1575   : > { %v6003_v38 = vpop.permute.xlu1 %6002 }
0x1576   : > { %v6011_v59 = vsel %vm3115_vm11, %v6010_v51, %v6003_v38 }
0x1577   : > { %v6020_v49 = vpack.c.bf16 %v6011_v59, %v6011_v59 }
0x1579   : > { %7869 = vmatmul.mubr.msk.bf16.vlgmr.msra.gmra.mrb[108].mxu1 %vm1922_vm2, %v6020_v49 }
0x157a   : > { %7473 = vmatpush3.bf16.msra.mxu1 %v8286_v33 }
0x157b   : > { %7474 = vmatprep.subr.bf16.mxu1 %v8287_v45 }
0x157e   : > { %7475 = vmatpush3.bf16.msra.mxu1 %v8288_v43  ;;  %v7223_v43 = vld [vmem:[%s10892_s12] ss:$0 sm:$0xff]  ;;  %s8875_s12 = scalar_lea.vmem %s8874_s16, 256 }
0x157f   : > { %7476 = vmatprep.subr.bf16.mxu1 %v8289_v9  ;;  %p8877_p9 = scmp.lt.s32.totalorder %s8875_s12, %s8869_s17 }
0x1581   : > { %p8878_p10 = por %p8877_p9, %p8876_p6 }
0x1582   : > { %7477 = vmatpush3.bf16.msra.mxu1 %v8290_v11  ;;  %v7224_v11 = vld [vmem:[%s10893_s10] ss:$0 sm:$0xff] }
0x1583   : > { %7478 = vmatprep.subr.bf16.mxu1 %v8291_v47  ;;  %p8879_p7 = pnand %p8878_p10, %p8872_p5 }
0x1586   : > { %7479 = vmatpush3.bf16.msra.mxu1 %v8292_v12 }
0x1587   : > { %7480 = vmatprep.subr.bf16.mxu1 %v8293_v39 }
0x158a   : > { %7481 = vmatpush3.bf16.msra.mxu1 %v8294_v17 }
0x158b   : > { %7482 = vmatprep.subr.bf16.mxu1 %v8295_v22 }
0x158e   : > { %7483 = vmatpush3.bf16.msra.mxu1 %v8296_v56 }
0x158f   : > { %7484 = vmatprep.subr.bf16.mxu1 %v8297_v50 }
0x1592   : > { %7485 = vmatpush3.bf16.msra.mxu1 %v8298_v54 }
0x1593   : > { %7486 = vmatprep.subr.bf16.mxu1 %v8299_v55 }
0x1596   : > { %7487 = vmatpush3.bf16.msra.mxu1 %v8300_v20  ;;  %v7281_v20 = vld [vmem:[#allocation18] ss:$0 sm:$0xff] }
0x164c   : > { %v6089_v36 = vpop.f32.mrb[108].mxu1 }
0x164d   : > { %v6090_v13 = vadd.f32 %v7247_v1, %v6089_v36  ;;  %v7870_v46 = vpop.f32.mrb[109].mxu1 }
0x164e   : > { %v6092_v15 = vpop.f32.mrb[110].mxu1 }
0x164f   : > { %v6096_v18 = vadd.f32 %v6095_v40, %v6090_v13  ;;  %v7871_v52 = vpop.f32.mrb[111].mxu1 }
0x1651   : > { %v6097_v19 = vsel %vm1922_vm2, %v6096_v18, 0.0 }
0x1652   : > { %6098 = vadd.xlane.f32.xlu0 %v6097_v19 }
0x1656   : > { %4992 = vadd.xlane.f32.xlu0 %v4991_v23 }
0x16df   : > { %v6099_v6 = vpop.xlane.xlu0 %6098 }
0x16e0   : > { %v6100_v24 = vmul.f32 0.015625, %v6099_v6 }
0x16e2   : > { %v6101_v63 = vsub.f32 %v6096_v18, %v6100_v24 }
0x16e3   : > { %v4993_v7 = vpop.xlane.xlu0 %4992 }
0x16e4   : > { %v6102_v27 = vmul.f32 %v6101_v63, %v6101_v63  ;;  %v4994_v13 = vmul.f32 0.015625, %v4993_v7 }
0x16e6   : > { %v6103_v14 = vsel %vm1922_vm2, %v6102_v27, 0.0  ;;  %v4995_v19 = vsub.f32 %v10556_v21, %v4994_v13  ;;  %v8304_v21 = vld [vmem:[%s10891_s2 + $0x18] sm:$0xff]  }
0x16e7   : > { %6104 = vadd.xlane.f32.xlu1 %v6103_v14  ;;  %v8301_v14 = vld [vmem:[%s10891_s2] sm:$0xff]  }
0x1774   : > { %v6105_v42 = vpop.xlane.xlu1 %6104 }
0x1775   : > { %v6106_v25 = vmul.f32 0.015625, %v6105_v42 }
0x1777   : > { %v6107_v16 = vadd.f32 1e-05, %v6106_v25 }
0x1779   : > { %8447 = vrsqrt.f32 %v6107_v16 }
0x1783   : > { %v8448_v26 = vpop.eup %8447 }
0x1784   : > { %v6109_v35 = vmul.f32 %v8448_v26, %v6101_v63  ;;  %v4996_v63 = vmul.f32 %v4995_v19, %v4995_v19 }
0x1786   : > { %v6117_v48 = vmul.f32 %v7253_v5, %v6109_v35  ;;  %v4997_v27 = vsel %vm1922_vm2, %v4996_v63, 0.0  ;;  %v8305_v35 = vld [vmem:[%s10894_s26] sm:$0xff]  }
0x1788   : > { %v6125_v30 = vadd.f32 %v7254_v4, %v6117_v48  ;;  %v8306_v4 = vld [vmem:[%s10895_s1 + $0x8] sm:$0xff]   ;;  %v8307_v48 = vld [vmem:[%s10895_s1 + $0x10] sm:$0xff]  }
0x178a   : > { %v6134_v31 = vpack.c.bf16 %v6125_v30, %v6125_v30 }
0x178c   : > { %7263 = vmatmul.mubr.msk.bf16.vlgmr.msra.gmra.mrb[124].mxu0 %vm1922_vm2, %v6134_v31 }
0x178d   : > { %7880 = vmatprep.mubr.msk.bf16.mxu0 %vm9035_vm0, %v9034_v2  ;;  %7873 = vmatpush3.bf16.msra.mxu0 %v8301_v14 }
0x178e   : > { %7874 = vmatprep.subr.bf16.mxu0 %v9034_v2 }
0x1791   : > { %7875 = vmatpush3.bf16.msra.mxu0 %v8302_v58 }
0x1792   : > { %7876 = vmatprep.subr.bf16.mxu0 %v9034_v2 }
0x1795   : > { %7877 = vmatpush3.bf16.msra.mxu0 %v8303_v28 }
0x1796   : > { %7878 = vmatprep.subr.bf16.mxu0 %v9034_v2 }
0x1799   : > { %7879 = vmatpush3.bf16.msra.mxu0 %v8304_v21 }
0x179a   : > { %7884 = vmatprep.subr.bf16.mxu0 %v9034_v2 }
0x185f   : > { %v6224_v41 = vpop.f32.mrb[124].mxu0 }
0x1860   : > { %v6225_v44 = vadd.f32 %v6224_v41, %v6140_v61  ;;  %v6226_v51 = vpop.f32.mrb[125].mxu0  ;;  %v7282_v61 = vld [vmem:[#allocation19] ss:$0 sm:$0xff] }
0x1861   : > { %v6227_v38 = vadd.f32 %v6226_v51, %v6144_v62  ;;  %v6228_v59 = vpop.f32.mrb[126].mxu0 }
0x1862   : > { %v6231_v49 = vmax.f32 %v6225_v44, 0.0  ;;  %v6229_v0 = vpop.f32.mrb[127].mxu0 }
0x1863   : > { %v6232_v1 = vmax.f32 %v6227_v38, 0.0 }
0x1864   : > { %v6265_v40 = vpack.c.bf16 %v6231_v49, %v6231_v49 }
0x1865   : > { %v6266_v36 = vpack.c.bf16 %v6232_v1, %v6232_v1 }
0x1867   : > { %6402 = vmatprep.mubr.bf16.mxu1 %v6266_v36 }
0x1868   : > { %6403 = vmatmul.mubr.bf16.vlgmr.msra.gmra.mrb[112].mxu1 %v6265_v40  ;;  %v6458_v40 = vld [vmem:[#allocation21] sm:$0x1] }
0x193b   : > { %v7488_v46 = vpop.f32.mrb[112].mxu1 }
0x193c   : > { %v7489_v15 = vpop.f32.mrb[113].mxu1 }
0x193d   : > { %v7490_v53 = vadd.f32 %v7489_v15, %v7488_v46  ;;  %v7491_v18 = vpop.f32.mrb[114].mxu1 }
0x193e   : > { %v7492_v52 = vpop.f32.mrb[115].mxu1 }
0x193f   : > { %v6405_v23 = vadd.f32 %v7490_v53, %v7264_v57 }
0x1941   : > { %v6410_v6 = vadd.f32 %v6405_v23, %v6125_v30  ;;  %v8308_v30 = vld [vmem:[%s10895_s1 + $0x18] sm:$0xff]  }
0x1943   : > { %v6411_v24 = vsel %vm1922_vm2, %v6410_v6, 0.0 }
0x1944   : > { %6412 = vadd.xlane.f32.xlu0 %v6411_v24 }
0x1948   : > { %4998 = vadd.xlane.f32.xlu0 %v4997_v27 }
0x19d1   : > { %v6413_v60 = vpop.xlane.xlu0 %6412 }
0x19d2   : > { %v6414_v29 = vmul.f32 0.015625, %v6413_v60 }
0x19d4   : > { %v6415_v3 = vsub.f32 %v6410_v6, %v6414_v29 }
0x19d5   : > { %v4999_v32 = vpop.xlane.xlu0 %4998 }
0x19d6   : > { %v5000_v8 = vmul.f32 0.015625, %v4999_v32  ;;  %v6416_v10 = vmul.f32 %v6415_v3, %v6415_v3 }
0x19d8   : > { %v5001_v37 = vadd.f32 1e-05, %v5000_v8  ;;  %v6417_v33 = vsel %vm1922_vm2, %v6416_v10, 0.0 }
0x19d9   : > { %6418 = vadd.xlane.f32.xlu1 %v6417_v33  ;;  %v9052_v33 = vmov -1.0  }
0x19da   : > { %8449 = vrsqrt.f32 %v5001_v37 }
0x19e4   : > { %v8450_v45 = vpop.eup %8449 }
0x19e5   : > { %v5003_v9 = vmul.f32 %v8450_v45, %v4995_v19 }
0x19e7   : > { %v5011_v47 = vmul.f32 %v7223_v43, %v5003_v9 }
0x19e9   : > { %v10606_v12 = vadd.f32 %v7224_v11, %v5011_v47  ;;  %v6553_v47 = vld [vmem:[#allocation22] sm:$0x1] }
0x19eb   : > { %v6440_v39 = vsel %vm1922_vm2, %v10606_v12, 0.0 }
0x19ec   : > { %v6441_v17 = vrot.slane %v6440_v39, 4 }
0x19ee   : > { %v6442_v22 = vadd.f32 %v6441_v17, %v6440_v39 }
0x19f0   : > { %v6443_v56 = vrot.slane %v6442_v22, 2 }
0x19f2   : > { %v6444_v42 = vadd.f32 %v6443_v56, %v6442_v22  ;;  %v6606_v56 = vld [vmem:[#allocation24] sm:$0x1] }
0x19f4   : > { %v6445_v25 = vrot.slane %v6444_v42, 1 }
0x19f6   : > { %v6446_v16 = vadd.f32 %v6445_v25, %v6444_v42 }
0x19f8   : > { %v6448_v26 = vmul.f32 0.125, %v6446_v16 }
0x19fa   : > { %v6457_v5 = vpack.c.bf16 %v6448_v26, %v6448_v26 }
0x19fc   : > { %7881 = vmatmul.mubr.msk.bf16.vlgmr.msra.gmra.mrb[128].mxu0 %vm1922_vm2, %v6457_v5 }
0x19fd   : > { %7885 = vmatpush3.bf16.msra.mxu0 %v8305_v35  ;;  %7892 = vmatprep.mubr.msk.bf16.mxu0 %vm9035_vm0, %v9034_v2 }
0x19fe   : > { %7886 = vmatprep.subr.bf16.mxu0 %v9034_v2 }
0x1a01   : > { %7887 = vmatpush3.bf16.msra.mxu0 %v8306_v4 }
0x1a02   : > { %7888 = vmatprep.subr.bf16.mxu0 %v9034_v2 }
0x1a05   : > { %7889 = vmatpush3.bf16.msra.mxu0 %v8307_v48 }
0x1a06   : > { %7890 = vmatprep.subr.bf16.mxu0 %v9034_v2 }
0x1a09   : > { %7891 = vmatpush3.bf16.msra.mxu0 %v8308_v30 }
0x1a66   : > { %v6419_v31 = vpop.xlane.xlu1 %6418 }
0x1a67   : > { %v6420_v50 = vmul.f32 0.015625, %v6419_v31 }
0x1a69   : > { %v6421_v54 = vadd.f32 1e-05, %v6420_v50 }
0x1a6b   : > { %8451 = vrsqrt.f32 %v6421_v54 }
0x1a75   : > { %v8452_v55 = vpop.eup %8451 }
0x1a76   : > { %v6423_v34 = vmul.f32 %v8452_v55, %v6415_v3 }
0x1a78   : > { %v6431_v62 = vmul.f32 %v7281_v20, %v6423_v34 }
0x1a7a   : > { %v10620_v41 = vadd.f32 %v7282_v61, %v6431_v62 }
0x1a7c   : > { %v6589_v44 = vsel %vm1922_vm2, %v10620_v41, 0.0 }
0x1a7d   : > { %v6590_v51 = vrot.slane %v6589_v44, 4 }
0x1a7f   : > { %v6591_v38 = vadd.f32 %v6590_v51, %v6589_v44 }
0x1a81   : > { %v6592_v59 = vrot.slane %v6591_v38, 2 }
0x1a83   : > { %v6593_v49 = vadd.f32 %v6592_v59, %v6591_v38 }
0x1a85   : > { %v6594_v2 = vrot.slane %v6593_v49, 1 }
0x1a87   : > { %v6595_v0 = vadd.f32 %v6594_v2, %v6593_v49 }
0x1a89   : > { %v6596_v1 = vmul.f32 0.125, %v6595_v0 }
0x1a8b   : > { %v6605_v36 = vpack.c.bf16 %v6596_v1, %v6596_v1 }
0x1a8d   : > { %7893 = vmatmul.mubr.msk.bf16.vlgmr.msra.gmra.mrb[132].mxu0 %vm1922_vm2, %v6605_v36 }
0x1acf   : > { %v6520_v7 = vpop.f32.mrb[128].mxu0 }
0x1ad0   : > { %v6521_v13 = vadd.f32 %v6520_v7, %v6458_v40  ;;  %v7882_v46 = vpop.f32.mrb[129].mxu0 }
0x1ad1   : > { %v6523_v57 = vpop.f32.mrb[130].mxu0  ;;  %v6559_v46 = vld [vmem:[#allocation2] sm:$0x1] }
0x1ad2   : > { %v6527_v15 = vmul.f32 0.70710677, %v6521_v13  ;;  %v7883_v53 = vpop.f32.mrb[131].mxu0  ;;  %v6526_v9 = vmul.f32 0.5, %v6521_v13  ;;  %v6701_v57 = vld [vmem:[#allocation25] sm:$0x1] }
0x1ad4   : > { %v6530_v18 = vand.u32 2147483647, %v6527_v15  ;;  %vm6528_vm14 = vcmp.ge.f32.partialorder %v6527_v15, 0.0 }
0x1ad5   : > { %v6529_v45 = vsel %vm6528_vm14, 1.0, %v9052_v33 }
0x1ad6   : > { %v6531_v52 = vmul.f32 0.3275911, %v6530_v18  ;;  %v6544_v23 = vsub.f32 0.0, %v6530_v18 }
0x1ad8   : > { %v6532_v19 = vadd.f32 1.0, %v6531_v52  ;;  %v6545_v24 = vmul.f32 %v6544_v23, %v6530_v18 }
0x1ada   : > { %8453 = vrcp.f32 %v6532_v19  ;;  %v6546_v14 = vmul.f32 1.442695, %v6545_v24 }
0x1adc   : > { %8455 = vpow2.f32 %v6546_v14 }
0x1ae4   : > { %v8454_v6 = vpop.eup %8453 }
0x1ae5   : > { %v6535_v63 = vmul.f32 1.0614054, %v8454_v6 }
0x1ae6   : > { %v8456_v8 = vpop.eup %8455 }
0x1ae7   : > { %v6536_v27 = vadd.f32 -1.4531521, %v6535_v63 }
0x1ae9   : > { %v6537_v58 = vmul.f32 %v8454_v6, %v6536_v27 }
0x1aeb   : > { %v6538_v28 = vadd.f32 1.4214138, %v6537_v58 }
0x1aed   : > { %v6539_v21 = vmul.f32 %v8454_v6, %v6538_v28 }
0x1aef   : > { %v6540_v60 = vadd.f32 -0.28449672, %v6539_v21 }
0x1af1   : > { %v6541_v29 = vmul.f32 %v8454_v6, %v6540_v60 }
0x1af3   : > { %v6542_v3 = vadd.f32 0.2548296, %v6541_v29 }
0x1af5   : > { %v6543_v32 = vmul.f32 %v8454_v6, %v6542_v3 }
0x1af7   : > { %v6548_v10 = vmul.f32 %v8456_v8, %v6543_v32 }
0x1af9   : > { %v6549_v37 = vsub.f32 1.0, %v6548_v10 }
0x1afb   : > { %v6550_v43 = vmul.f32 %v6549_v37, %v6529_v45 }
0x1afd   : > { %v6551_v11 = vadd.f32 1.0, %v6550_v43 }
0x1aff   : > { %v6552_v39 = vmul.f32 %v6551_v11, %v6526_v9 }
0x1b01   : > { %v6554_v17 = vmul.f32 %v6553_v47, %v6552_v39 }
0x1b03   : > { %v6556_v22 = vsel %vm6555_vm15, %v6554_v17, 0.0 }
0x1b04   : > { %6557 = vadd.xlane.f32.xlu0 %v6556_v22 }
0x1b60   : > { %v6668_v42 = vpop.f32.mrb[132].mxu0 }
0x1b61   : > { %v6669_v25 = vadd.f32 %v6668_v42, %v6606_v56  ;;  %v7894_v16 = vpop.f32.mrb[133].mxu0 }
0x1b62   : > { %v6671_v26 = vpop.f32.mrb[134].mxu0 }
0x1b63   : > { %v6675_v5 = vmul.f32 0.70710677, %v6669_v25  ;;  %v7895_v35 = vpop.f32.mrb[135].mxu0  ;;  %v6674_v7 = vmul.f32 0.5, %v6669_v25  ;;  %v6706_v25 = vld [vmem:[#allocation3] sm:$0x1] }
0x1b65   : > { %v6678_v4 = vand.u32 2147483647, %v6675_v5  ;;  %vm6676_vm0 = vcmp.ge.f32.partialorder %v6675_v5, 0.0 }
0x1b66   : > { %v6677_v36 = vsel %vm6676_vm0, 1.0, %v9052_v33 }
0x1b67   : > { %v6679_v48 = vmul.f32 0.3275911, %v6678_v4  ;;  %v6692_v31 = vsub.f32 0.0, %v6678_v4 }
0x1b69   : > { %v6680_v30 = vadd.f32 1.0, %v6679_v48  ;;  %v6693_v54 = vmul.f32 %v6692_v31, %v6678_v4 }
0x1b6b   : > { %8457 = vrcp.f32 %v6680_v30  ;;  %v6694_v34 = vmul.f32 1.442695, %v6693_v54 }
0x1b6d   : > { %8459 = vpow2.f32 %v6694_v34 }
0x1b75   : > { %v8458_v50 = vpop.eup %8457 }
0x1b76   : > { %v6683_v55 = vmul.f32 1.0614054, %v8458_v50 }
0x1b77   : > { %v8460_v2 = vpop.eup %8459 }
0x1b78   : > { %v6684_v20 = vadd.f32 -1.4531521, %v6683_v55 }
0x1b7a   : > { %v6685_v61 = vmul.f32 %v8458_v50, %v6684_v20 }
0x1b7c   : > { %v6686_v62 = vadd.f32 1.4214138, %v6685_v61 }
0x1b7e   : > { %v6687_v44 = vmul.f32 %v8458_v50, %v6686_v62 }
0x1b80   : > { %v6688_v51 = vadd.f32 -0.28449672, %v6687_v44 }
0x1b82   : > { %v6689_v38 = vmul.f32 %v8458_v50, %v6688_v51 }
0x1b84   : > { %v6690_v59 = vadd.f32 0.2548296, %v6689_v38 }
0x1b86   : > { %v6691_v49 = vmul.f32 %v8458_v50, %v6690_v59 }
0x1b88   : > { %v6696_v0 = vmul.f32 %v8460_v2, %v6691_v49 }
0x1b8a   : > { %v6697_v1 = vsub.f32 1.0, %v6696_v0 }
0x1b8c   : > { %v6698_v40 = vmul.f32 %v6697_v1, %v6677_v36 }
0x1b8e   : > { %v6699_v13 = vadd.f32 1.0, %v6698_v40 }
0x1b90   : > { %v6700_v15 = vmul.f32 %v6699_v13, %v6674_v7 }
0x1b91   : > { %v6558_v53 = vpop.xlane.xlu0 %6557 }
0x1b92   : > { %v6560_v18 = vadd.f32 %v6559_v46, %v6558_v53  ;;  %v6702_v52 = vmul.f32 %v6701_v57, %v6700_v15 }
0x1b94   : > { %8461 = vtanh.f32 %v6560_v18  ;;  %v6703_v19 = vsel %vm6555_vm15, %v6702_v52, 0.0 }
0x1b95   : > { %6704 = vadd.xlane.f32.xlu1 %v6703_v19 }
0x1b9e   : > { %v8462_v23 = vpop.eup %8461 }
0x1b9f   : > { %v6563_v6 = vmul.f32 0.70710677, %v8462_v23  ;;  %v6562_v22 = vmul.f32 0.5, %v8462_v23 }
0x1ba1   : > { %v6566_v24 = vand.u32 2147483647, %v6563_v6  ;;  %vm6564_vm1 = vcmp.ge.f32.partialorder %v6563_v6, 0.0 }
0x1ba2   : > { %v6565_v39 = vsel %vm6564_vm1, 1.0, %v9052_v33 }
0x1ba3   : > { %v6567_v63 = vmul.f32 0.3275911, %v6566_v24  ;;  %v6580_v14 = vsub.f32 0.0, %v6566_v24 }
0x1ba5   : > { %v6568_v27 = vadd.f32 1.0, %v6567_v63  ;;  %v6581_v28 = vmul.f32 %v6580_v14, %v6566_v24 }
0x1ba7   : > { %8463 = vrcp.f32 %v6568_v27  ;;  %v6582_v29 = vmul.f32 1.442695, %v6581_v28 }
0x1ba9   : > { %8465 = vpow2.f32 %v6582_v29 }
0x1bb1   : > { %v8464_v58 = vpop.eup %8463 }
0x1bb2   : > { %v6571_v21 = vmul.f32 1.0614054, %v8464_v58 }
0x1bb3   : > { %v8466_v9 = vpop.eup %8465 }
0x1bb4   : > { %v6572_v60 = vadd.f32 -1.4531521, %v6571_v21 }
0x1bb6   : > { %v6573_v3 = vmul.f32 %v8464_v58, %v6572_v60 }
0x1bb8   : > { %v6574_v32 = vadd.f32 1.4214138, %v6573_v3 }
0x1bba   : > { %v6575_v8 = vmul.f32 %v8464_v58, %v6574_v32 }
0x1bbc   : > { %v6576_v10 = vadd.f32 -0.28449672, %v6575_v8 }
0x1bbe   : > { %v6577_v37 = vmul.f32 %v8464_v58, %v6576_v10 }
0x1bc0   : > { %v6578_v45 = vadd.f32 0.2548296, %v6577_v37 }
0x1bc2   : > { %v6579_v43 = vmul.f32 %v8464_v58, %v6578_v45 }
0x1bc4   : > { %v6584_v11 = vmul.f32 %v8466_v9, %v6579_v43 }
0x1bc6   : > { %v6585_v47 = vsub.f32 1.0, %v6584_v11 }
0x1bc8   : > { %v6586_v17 = vmul.f32 %v6585_v47, %v6565_v39 }
0x1bca   : > { %v6587_v56 = vadd.f32 1.0, %v6586_v17 }
0x1bcc   : > { %v6588_v42 = vmul.f32 %v6587_v56, %v6562_v22 }
0x1bce   : > { %7896 = vpush %v6588_v42 }
0x1bff   : > { %s7897_s28 = spop %7896 }
0x1c00   : > { %v6738_v57 = vstv %s7897_s28 }
0x1c01   : > { %v6740_v53 = vmul.f32 %v6738_v57, %v10606_v12 }
0x1c22   : > { %v6705_v16 = vpop.xlane.xlu1 %6704 }
0x1c23   : > { %v6707_v26 = vadd.f32 %v6706_v25, %v6705_v16 }
0x1c25   : > { %8467 = vtanh.f32 %v6707_v26 }
0x1c2f   : > { %v8468_v5 = vpop.eup %8467 }
0x1c30   : > { %v6710_v35 = vmul.f32 0.70710677, %v8468_v5  ;;  %v6709_v7 = vmul.f32 0.5, %v8468_v5 }
0x1c32   : > { %v6713_v4 = vand.u32 2147483647, %v6710_v35  ;;  %vm6711_vm3 = vcmp.ge.f32.partialorder %v6710_v35, 0.0 }
0x1c33   : > { %v6712_v36 = vsel %vm6711_vm3, 1.0, %v9052_v33 }
0x1c34   : > { %v6714_v48 = vmul.f32 0.3275911, %v6713_v4  ;;  %v6727_v31 = vsub.f32 0.0, %v6713_v4 }
0x1c36   : > { %v6715_v30 = vadd.f32 1.0, %v6714_v48  ;;  %v6728_v54 = vmul.f32 %v6727_v31, %v6713_v4 }
0x1c38   : > { %8469 = vrcp.f32 %v6715_v30  ;;  %v6729_v34 = vmul.f32 1.442695, %v6728_v54 }
0x1c3a   : > { %8471 = vpow2.f32 %v6729_v34 }
0x1c42   : > { %v8470_v50 = vpop.eup %8469 }
0x1c43   : > { %v6718_v55 = vmul.f32 1.0614054, %v8470_v50 }
0x1c44   : > { %v8472_v2 = vpop.eup %8471 }
0x1c45   : > { %v6719_v20 = vadd.f32 -1.4531521, %v6718_v55 }
0x1c47   : > { %v6720_v61 = vmul.f32 %v8470_v50, %v6719_v20 }
0x1c49   : > { %v6721_v62 = vadd.f32 1.4214138, %v6720_v61 }
0x1c4b   : > { %v6722_v44 = vmul.f32 %v8470_v50, %v6721_v62 }
0x1c4d   : > { %v6723_v51 = vadd.f32 -0.28449672, %v6722_v44 }
0x1c4f   : > { %v6724_v38 = vmul.f32 %v8470_v50, %v6723_v51 }
0x1c51   : > { %v6725_v59 = vadd.f32 0.2548296, %v6724_v38 }
0x1c53   : > { %v6726_v49 = vmul.f32 %v8470_v50, %v6725_v59 }
0x1c55   : > { %v6731_v0 = vmul.f32 %v8472_v2, %v6726_v49 }
0x1c57   : > { %v6732_v1 = vsub.f32 1.0, %v6731_v0 }
0x1c59   : > { %v6733_v40 = vmul.f32 %v6732_v1, %v6712_v36 }
0x1c5b   : > { %v6734_v13 = vadd.f32 1.0, %v6733_v40 }
0x1c5d   : > { %v6735_v46 = vmul.f32 %v6734_v13, %v6709_v7 }
0x1c5f   : > { %7898 = vpush %v6735_v46 }
0x1c90   : > { %s7899_s24 = spop %7898 }
0x1c91   : > { %v6743_v15 = vstv %s7899_s24 }
0x1c92   : > { %v6745_v18 = vmul.f32 %v6743_v15, %v10620_v41 }
0x1c94   : > { %v6746_v52 = vadd.f32 %v6745_v18, %v6740_v53 }
0x1c96   : > { %v6747_v19 = vsel %vm1922_vm2, %v6746_v52, 0.0 }
0x1c97   : > { %6748 = vadd.xlane.f32.xlu0 %v6747_v19 }
0x1d24   : > { %v6749_v33 = vpop.xlane.xlu0 %6748 }
0x1d25   : > { %v6750_v23 = vmul.f32 0.015625, %v6749_v33 }
0x1d27   : > { %v6751_v6 = vsub.f32 %v6746_v52, %v6750_v23 }
0x1d29   : > { %v6752_v24 = vmul.f32 %v6751_v6, %v6751_v6 }
0x1d2b   : > { %v6753_v63 = vsel %vm1922_vm2, %v6752_v24, 0.0 }
0x1d2c   : > { %6754 = vadd.xlane.f32.xlu1 %v6753_v63 }
0x1db9   : > { %v6755_v27 = vpop.xlane.xlu1 %6754 }
0x1dba   : > { %v6756_v14 = vmul.f32 0.015625, %v6755_v27 }
0x1dbc   : > { %v6757_v58 = vadd.f32 1e-05, %v6756_v14 }
0x1dbe   : > { %8473 = vrsqrt.f32 %v6757_v58 }
0x1dc8   : > { %v8474_v12 = vpop.eup %8473 }
0x1dc9   : > { %v6759_v41 = vmul.f32 %v8474_v12, %v6751_v6 }
0x1dcb   : > { %6760 = vst.msk [vmem:[%s1853_s25] sm:$0xff] %vm1922_vm2, %v6759_v41 }
0x1dcc   : > { %8882 = shalt.err (!%p8879_p7)
}
0x1dcd   : > { %s8883_s10 = scalar_lea.hbm %s10638_s18, 128  ;;  %s8887_s26 = scalar_lea.hbm %s9330_s3, 256 }
0x1dce   : > { %p8884_p8 = scmp.ne.s32.totalorder %s10638_s18, %s8883_s10  ;;  %p8888_p1 = scmp.lt.u32.totalorder %s10638_s18, %s9330_s3 }
0x1dcf   : > { %p8889_p2 = scmp.lt.u32.totalorder %s8887_s26, %s8883_s10  ;;  %p8891_p3 = scmp.lt.u32.totalorder %s8883_s10, %s10638_s18 }
0x1dd0   : > { %p8885_p11 = pnand %p8884_p8, %p10896_p4 }
0x1dd1   : > { %p8890_p0 = por %p8889_p2, %p8888_p1 }
0x1dd2   : > { %p8886_p13 = pneg %p8885_p11 }
0x1dd3   : > { %p8892_p12 = por %p8891_p3, %p8890_p0 }
0x1dd5   : > { %p8893_p5 = pnand %p8892_p12, %p8886_p13 }
0x1dd7   : > { %8896 = shalt.err (!%p8893_p5)
}
0x1dd8   : > { %7956 = dma.vmem_to_hbm [thread:$0]  (%p10896_p4), %s10640_s20, 128, %s10638_s18, %s6762_s13  }
0x1dd9 PF: > { %p8033_p6 = scmp.ge.s32.totalorder %s8963_s0, 2  ;;  %s6787_s28 = sand.u32 1, %s8951_s23  }
0x1dda   : > { %p10897_p9 = scmp.ne.s32.totalorder %s10816_s11, 0  ;;  %s6788_s24 = scalar_lea.sflag [#allocation6], %s6787_s28 }
0x1ddc   : > { %p8002_p10 = pnand %p8033_p6, %p10897_p9 }
0x1dde   : > { %8946 = dma.done.wait (!%p8002_p10), %s6788_s24, 128  }
0x1ddf   : > { %8948 = vsyncadd (!%p8002_p10), %s6788_s24, 4294967168  ;;  %s10898_s0 = sld [smem:[#allocation89_spill]]  ;;  %s10899_s5 = sld [smem:[#allocation88_spill]] }
0x1de0   : > { %s10900_s26 = sld [smem:[#allocation90_spill]]  ;;  %s10901_s23 = smov %s8955_s22 }
0x1de5   : > { %p133_p7 = scmp.ge.s32.totalorder %s10898_s0, 4   ;;  %s10902_s22 = smov %s10899_s5 }
0x1de7   :  { %135 = sbr.rel (!%p133_p7) target bundleno = 135 (0x87), region = 399 }
0x1dee   :  { %6793 = vsyncpa [#allocation5], 1 }
0x1def   :  { %6795 = vsyncpa [#allocation5 + $0x1], 1 }
0x1df0   :  { %6796 = vsyncpa [#allocation8], 1 }
0x1df1   :  { %6797 = vsyncpa [#allocation11], 1 }
0x1df2   :  { %6798 = vsyncpa [#allocation14], 1 }
0x1df3   :  { %6799 = vsyncpa [#allocation17], 1 }
0x1df4   :  { %6800 = vsyncpa [#allocation20], 1 }
0x1df5   :  { %6801 = vsyncpa [#allocation23], 1 }
0x1df6   :  { %6802 = vsyncpa [#allocation26], 1 }
0x1df7   :  { %6803 = vsyncpa [#allocation6], 1 }
0x1df8   :  { %6805 = vsyncpa [#allocation6 + $0x1], 1 }

</bundles_post_ra>
